<compile_context>
chip_gen: v5e
topology: v5e:2x2
jax: 0.10.0
libtpu: 0.0.40
codegen_flags: <defaults>
</compile_context>

<pallas_src>
import functools

import jax
import jax.numpy as jnp
from jax.experimental import pallas as pl
from jax.experimental.pallas import tpu as pltpu

# ----------------------------- model configuration (small) -----------------------------
IMG_SIZE = 32          # image_size_for_features (1024 in real MedSAM, scaled down)
PATCH = 8              # patch size (16 in real model)
VIT_DIM = 32           # ViT embed dim (768)
VIT_DEPTH = 2          # ViT depth (12)
VIT_HEADS = 2
VIT_MLP = 64
EMBED_DIM = 32         # prompt / transformer dim (256)
DEC_DEPTH = 2          # two-way transformer depth (2, matches SAM)
DEC_HEADS = 2
DEC_MLP = 64
DEC_DOWNSAMPLE = 2     # attention downsample rate for cross-attn (matches SAM)
NUM_MASK_TOKENS = 4    # 3 multimask + 1


# --------------------------------- in-kernel helpers ------------------------------------
def _dot(a, b):
    """bf16 x bf16 matmul with f32 accumulation (MXU path)."""
    return jnp.dot(a.astype(jnp.bfloat16), b.astype(jnp.bfloat16),
                   preferred_element_type=jnp.float32)


def _dot_nt(a, b):
    """a @ b.T with bf16 operands, f32 accumulation (avoids an explicit transpose)."""
    return jax.lax.dot_general(
        a.astype(jnp.bfloat16), b.astype(jnp.bfloat16),
        (((1,), (1,)), ((), ())), preferred_element_type=jnp.float32)


def _apply_act(y, act):
    if act == "gelu":
        # TODO(synk): PyTorch nn.GELU default is the exact erf form; tanh approx used here.
        y = jax.nn.gelu(y)
    elif act == "relu":
        y = jnp.maximum(y, 0.0)
    return y


def _layernorm(x, g, b, eps):
    mu = jnp.mean(x, axis=-1, keepdims=True)
    c = x - mu
    var = jnp.mean(c * c, axis=-1, keepdims=True)
    return c * jax.lax.rsqrt(var + eps) * g + b


def _softmax_rows(s):
    m = jnp.max(s, axis=-1, keepdims=True)
    p = jnp.exp(s - m)
    return p * pl.reciprocal(jnp.sum(p, axis=-1, keepdims=True), approx=True)


def _mha_proj(qh, kh, vh, out_w, heads):
    """Multi-head attention + output projection without lane concatenation.

    (concat_h o_h) @ W == sum_h o_h @ W[h*dh:(h+1)*dh, :]
    """
    di = qh.shape[1]
    dh = di // heads
    scale = 1.0 / (dh ** 0.5)
    acc = None
    for h in range(heads):
        q = qh[:, h * dh:(h + 1) * dh]
        k = kh[:, h * dh:(h + 1) * dh]
        v = vh[:, h * dh:(h + 1) * dh]
        s = _dot_nt(q, k) * scale
        p = _softmax_rows(s)
        o_h = _dot(p, v)                                     # (nq, dh)
        contrib = _dot(o_h, out_w[h * dh:(h + 1) * dh, :])   # (nq, D_out)
        acc = contrib if acc is None else acc + contrib
    return acc


def _full2(shape):
    return pl.BlockSpec(shape, lambda i: (0, 0))


def _full3(shape):
    return pl.BlockSpec(shape, lambda i: (0, 0, 0))


def _batch3(shape):
    return pl.BlockSpec(shape, lambda i: (i, 0, 0))


_PARALLEL1 = pltpu.CompilerParams(dimension_semantics=("parallel",))


# ----------------------------------- Pallas kernels -------------------------------------
# ---- patch embedding + positional embedding (grid over batch) ----
def _patch_embed_kernel(x_ref, w_ref, b_ref, pos_ref, o_ref):
    o_ref[0] = _dot(x_ref[0], w_ref[...]) + b_ref[...] + pos_ref[0]


def pallas_patch_embed(x, w, b, pos):
    """(B, N, 3*p*p) -> (B, N, D): patchified conv-embed + bias + pos_embed fused."""
    B, N, K = x.shape
    D = w.shape[1]
    return pl.pallas_call(
        _patch_embed_kernel,
        out_shape=jax.ShapeDtypeStruct((B, N, D), jnp.float32),
        grid=(B,),
        in_specs=[_batch3((1, N, K)), _full2((K, D)), _full2((1, D)),
                  _full3((1, N, D))],
        out_specs=_batch3((1, N, D)),
        compiler_params=_PARALLEL1,
    )(x, w, b, pos)


# ---- y = LayerNorm(x @ w + b)  (neck conv1x1 + LN2d, conv3x3-im2col + LN2d) ----
def _linear_ln_kernel(x_ref, w_ref, b_ref, g_ref, beta_ref, o_ref, *, eps):
    y = _dot(x_ref[...], w_ref[...]) + b_ref[...]
    o_ref[...] = _layernorm(y, g_ref[...], beta_ref[...], eps)


def pallas_linear_ln(x, w, b, g, beta, eps=1e-6):
    M, K = x.shape
    N = w.shape[1]
    return pl.pallas_call(
        functools.partial(_linear_ln_kernel, eps=eps),
        out_shape=jax.ShapeDtypeStruct((M, N), jnp.float32),
        grid=(1,),
        in_specs=[_full2((M, K)), _full2((K, N)), _full2((1, N)),
                  _full2((1, N)), _full2((1, N))],
        out_specs=_full2((M, N)),
    )(x, w, b, g, beta)


# ---- one full ViT block (LN -> QKV -> MHA -> proj -> +res -> LN -> MLP -> +res) ----
def _vit_block_kernel(x_ref, ln1g_ref, ln1b_ref, qkvw_ref, qkvb_ref, projw_ref, projb_ref,
                      ln2g_ref, ln2b_ref, m1w_ref, m1b_ref, m2w_ref, m2b_ref, o_ref,
                      *, heads, eps):
    x = x_ref[0]                                   # (N, D) f32
    D = x.shape[-1]
    h = _layernorm(x, ln1g_ref[...], ln1b_ref[...], eps)
    qkv = _dot(h, qkvw_ref[...]) + qkvb_ref[...]   # (N, 3D)
    attn = _mha_proj(qkv[:, :D], qkv[:, D:2 * D], qkv[:, 2 * D:3 * D],
                     projw_ref[...], heads)
    x = x + attn + projb_ref[...]
    h2 = _layernorm(x, ln2g_ref[...], ln2b_ref[...], eps)
    h2 = _apply_act(_dot(h2, m1w_ref[...]) + m1b_ref[...], "gelu")
    h2 = _dot(h2, m2w_ref[...]) + m2b_ref[...]
    o_ref[0] = x + h2


def pallas_vit_block(p, x):
    B, N, D = x.shape
    H = p["mlp1_w"].shape[1]
    return pl.pallas_call(
        functools.partial(_vit_block_kernel, heads=VIT_HEADS, eps=1e-6),
        out_shape=jax.ShapeDtypeStruct((B, N, D), jnp.float32),
        grid=(B,),
        in_specs=[
            _batch3((1, N, D)),
            _full2((1, D)), _full2((1, D)),                 # ln1
            _full2((D, 3 * D)), _full2((1, 3 * D)),         # qkv
            _full2((D, D)), _full2((1, D)),                 # proj
            _full2((1, D)), _full2((1, D)),                 # ln2
            _full2((D, H)), _full2((1, H)),                 # mlp1
            _full2((H, D)), _full2((1, D)),                 # mlp2
        ],
        out_specs=_batch3((1, N, D)),
        compiler_params=_PARALLEL1,
    )(x, p["ln1_g"], p["ln1_b"], p["qkv_w"], p["qkv_b"], p["proj_w"], p["proj_b"],
      p["ln2_g"], p["ln2_b"], p["mlp1_w"], p["mlp1_b"], p["mlp2_w"], p["mlp2_b"])


# ---- one full SAM TwoWayAttentionBlock fused (grid over batch) ----
def _twoway_block_kernel(q_ref, k_ref, qpe_ref, kpe_ref,
                         sa_qkvw, sa_qkvb, sa_ow, sa_ob, n1g, n1b,
                         ct_qkvw, ct_qkvb, ct_ow, ct_ob, n2g, n2b,
                         m1w, m1b, m2w, m2b, n3g, n3b,
                         ci_qkvw, ci_qkvb, ci_ow, ci_ob, n4g, n4b,
                         qo_ref, ko_ref, *, heads, eps, skip_first_pe):
    queries = q_ref[0]           # (Nq, D)
    keys = k_ref[0]              # (Nk, D)
    qpe = qpe_ref[0]
    kpe = kpe_ref[0]

    # --- self attention (tokens) ---
    q_in = queries if skip_first_pe else queries + qpe
    qh = _dot(q_in, sa_qkvw[0]) + sa_qkvb[0]
    kh = _dot(q_in, sa_qkvw[1]) + sa_qkvb[1]
    vh = _dot(queries, sa_qkvw[2]) + sa_qkvb[2]
    attn = _mha_proj(qh, kh, vh, sa_ow[...], heads) + sa_ob[...]
    if skip_first_pe:
        queries = _layernorm(attn, n1g[...], n1b[...], eps)
    else:
        queries = _layernorm(queries + attn, n1g[...], n1b[...], eps)

    # --- cross attention: tokens -> image ---
    q_in = queries + qpe
    k_in = keys + kpe
    qh = _dot(q_in, ct_qkvw[0]) + ct_qkvb[0]
    kh = _dot(k_in, ct_qkvw[1]) + ct_qkvb[1]
    vh = _dot(keys, ct_qkvw[2]) + ct_qkvb[2]
    attn = _mha_proj(qh, kh, vh, ct_ow[...], heads) + ct_ob[...]
    queries = _layernorm(queries + attn, n2g[...], n2b[...], eps)

    # --- MLP on tokens ---
    h = jnp.maximum(_dot(queries, m1w[...]) + m1b[...], 0.0)
    h = _dot(h, m2w[...]) + m2b[...]
    queries = _layernorm(queries + h, n3g[...], n3b[...], eps)

    # --- cross attention: image -> tokens ---
    q_in = queries + qpe
    k_in = keys + kpe
    qh = _dot(k_in, ci_qkvw[0]) + ci_qkvb[0]
    kh = _dot(q_in, ci_qkvw[1]) + ci_qkvb[1]
    vh = _dot(queries, ci_qkvw[2]) + ci_qkvb[2]
    attn = _mha_proj(qh, kh, vh, ci_ow[...], heads) + ci_ob[...]
    keys = _layernorm(keys + attn, n4g[...], n4b[...], eps)

    qo_ref[0] = queries
    ko_ref[0] = keys


def pallas_twoway_block(p, queries, keys, query_pe, key_pe, skip_first_layer_pe):
    B, Nq, D = queries.shape
    Nk = keys.shape[1]
    Di_s = p["self_attn"]["qkv_w"].shape[2]
    Di_c = p["cross_t2i"]["qkv_w"].shape[2]
    H = p["mlp1_w"].shape[1]
    out_q, out_k = pl.pallas_call(
        functools.partial(_twoway_block_kernel, heads=DEC_HEADS, eps=1e-5,
                          skip_first_pe=skip_first_layer_pe),
        out_shape=(jax.ShapeDtypeStruct((B, Nq, D), jnp.float32),
                   jax.ShapeDtypeStruct((B, Nk, D), jnp.float32)),
        grid=(B,),
        in_specs=[
            _batch3((1, Nq, D)), _batch3((1, Nk, D)),
            _batch3((1, Nq, D)),                              # query_pe (B, Nq, D)
            _full3((1, Nk, D)),                               # key_pe   (1, Nk, D)
            _full3((3, D, Di_s)), _full3((3, 1, Di_s)), _full2((Di_s, D)), _full2((1, D)),
            _full2((1, D)), _full2((1, D)),                   # norm1
            _full3((3, D, Di_c)), _full3((3, 1, Di_c)), _full2((Di_c, D)), _full2((1, D)),
            _full2((1, D)), _full2((1, D)),                   # norm2
            _full2((D, H)), _full2((1, H)), _full2((H, D)), _full2((1, D)),
            _full2((1, D)), _full2((1, D)),                   # norm3
            _full3((3, D, Di_c)), _full3((3, 1, Di_c)), _full2((Di_c, D)), _full2((1, D)),
            _full2((1, D)), _full2((1, D)),                   # norm4
        ],
        out_specs=(_batch3((1, Nq, D)), _batch3((1, Nk, D))),
        compiler_params=_PARALLEL1,
    )(queries, keys, query_pe, key_pe,
      p["self_attn"]["qkv_w"], p["self_attn"]["qkv_b"],
      p["self_attn"]["out_w"], p["self_attn"]["out_b"],
      p["norm1_g"], p["norm1_b"],
      p["cross_t2i"]["qkv_w"], p["cross_t2i"]["qkv_b"],
      p["cross_t2i"]["out_w"], p["cross_t2i"]["out_b"],
      p["norm2_g"], p["norm2_b"],
      p["mlp1_w"], p["mlp1_b"], p["mlp2_w"], p["mlp2_b"],
      p["norm3_g"], p["norm3_b"],
      p["cross_i2t"]["qkv_w"], p["cross_i2t"]["qkv_b"],
      p["cross_i2t"]["out_w"], p["cross_i2t"]["out_b"],
      p["norm4_g"], p["norm4_b"])
    return out_q, out_k


# ---- final token->image attention + final LayerNorm fused (grid over batch) ----
def _final_attn_ln_kernel(q_ref, k_ref, qpe_ref, kpe_ref, qkvw, qkvb, ow, ob, g, b,
                          o_ref, *, heads, eps):
    queries = q_ref[0]
    keys = k_ref[0]
    q_in = queries + qpe_ref[0]
    k_in = keys + kpe_ref[0]
    qh = _dot(q_in, qkvw[0]) + qkvb[0]
    kh = _dot(k_in, qkvw[1]) + qkvb[1]
    vh = _dot(keys, qkvw[2]) + qkvb[2]
    attn = _mha_proj(qh, kh, vh, ow[...], heads) + ob[...]
    o_ref[0] = _layernorm(queries + attn, g[...], b[...], eps)


def pallas_final_attn_ln(attn_p, g, b, queries, keys, query_pe, key_pe, num_heads):
    B, Nq, D = queries.shape
    Nk = keys.shape[1]
    Di = attn_p["qkv_w"].shape[2]
    return pl.pallas_call(
        functools.partial(_final_attn_ln_kernel, heads=num_heads, eps=1e-5),
        out_shape=jax.ShapeDtypeStruct((B, Nq, D), jnp.float32),
        grid=(B,),
        in_specs=[_batch3((1, Nq, D)), _batch3((1, Nk, D)),
                  _batch3((1, Nq, D)), _full3((1, Nk, D)),
                  _full3((3, D, Di)), _full3((3, 1, Di)),
                  _full2((Di, D)), _full2((1, D)),
                  _full2((1, D)), _full2((1, D))],
        out_specs=_batch3((1, Nq, D)),
        compiler_params=_PARALLEL1,
    )(queries, keys, query_pe, key_pe,
      attn_p["qkv_w"], attn_p["qkv_b"], attn_p["out_w"], attn_p["out_b"], g, b)


# ---- output upscaling: ConvT2x2 -> LN2d -> GELU -> ConvT2x2 -> GELU fused ----
def _upscale_kernel(x_ref, w1_ref, b1_ref, g_ref, beta_ref, w2_ref, b2_ref, o_ref,
                    *, c1, eps):
    x = x_ref[...]                                           # (M, C) per low-res pixel
    y1 = _dot(x, w1_ref[...]) + b1_ref[...]                  # (M, 4*c1): col = sp1*c1 + c
    w2 = w2_ref[...]
    b2 = b2_ref[...]
    parts = []
    for sp in range(4):                                      # 4 sub-pixels of first ConvT
        h = _layernorm(y1[:, sp * c1:(sp + 1) * c1], g_ref[...], beta_ref[...], eps)
        h = jax.nn.gelu(h)
        parts.append(jax.nn.gelu(_dot(h, w2) + b2))          # (M, 4*c2)
    o_ref[...] = jnp.concatenate(parts, axis=-1)             # (M, 16*c2)


def pallas_upscale(x, w1, b1, g, beta, w2, b2, eps=1e-6):
    M, C = x.shape
    c1 = w2.shape[0]
    c2x4 = w2.shape[1]
    return pl.pallas_call(
        functools.partial(_upscale_kernel, c1=c1, eps=eps),
        out_shape=jax.ShapeDtypeStruct((M, 4 * c2x4), jnp.float32),
        grid=(1,),
        in_specs=[_full2((M, C)), _full2((C, 4 * c1)), _full2((1, 4 * c1)),
                  _full2((1, c1)), _full2((1, c1)),
                  _full2((c1, c2x4)), _full2((1, c2x4))],
        out_specs=_full2((M, 4 * c2x4)),
    )(x, w1, b1, g, beta, w2, b2)


# ---- hypernetwork MLPs + mask matmul fused (grid over batch) ----
def _hyper_masks_kernel(tok_ref, w1_ref, b1_ref, w2_ref, b2_ref, w3_ref, b3_ref,
                        up_ref, o_ref, *, num_tokens):
    tok = tok_ref[0]                                          # (T, C)
    rows = []
    for t in range(num_tokens):
        x = tok[t:t + 1, :]
        h = jnp.maximum(_dot(x, w1_ref[t]) + b1_ref[t], 0.0)
        h = jnp.maximum(_dot(h, w2_ref[t]) + b2_ref[t], 0.0)
        rows.append(_dot(h, w3_ref[t]) + b3_ref[t])           # (1, Co)
    hyper_in = jnp.concatenate(rows, axis=0)                  # (T, Co)
    o_ref[0] = _dot(hyper_in, up_ref[0])                      # (T, Hm*Wm)


def pallas_hyper_masks(tok, w1, b1, w2, b2, w3, b3, up):
    B, T, C = tok.shape
    Co = w3.shape[2]
    HW = up.shape[2]
    return pl.pallas_call(
        functools.partial(_hyper_masks_kernel, num_tokens=T),
        out_shape=jax.ShapeDtypeStruct((B, T, HW), jnp.float32),
        grid=(B,),
        in_specs=[_batch3((1, T, C)),
                  _full3((T, C, C)), _full3((T, 1, C)),
                  _full3((T, C, C)), _full3((T, 1, C)),
                  _full3((T, C, Co)), _full3((T, 1, Co)),
                  _batch3((1, Co, HW))],
        out_specs=_batch3((1, T, HW)),
        compiler_params=_PARALLEL1,
    )(tok, w1, b1, w2, b2, w3, b3, up)


# -------------------------------- conv glue (im2col + fused matmul+LN) -------------------
def conv3x3_ln(x_tokens, H, W, wmat, b, g, beta, eps=1e-6):
    """3x3 same conv + LayerNorm2d in token layout: (B, H*W, C) -> (B, H*W, Cout).

    wmat: (9*Cin, Cout) bf16 im2col matrix (row index = (di*3+dj)*Cin + cin).
    """
    # TODO(synk): at real SAM scale this im2col slab should be a K-reduction grid axis
    # instead of one materialized (B*H*W, 9*Cin) block.
    B, _, C = x_tokens.shape
    xs = x_tokens.reshape(B, H, W, C)
    xp = jnp.pad(xs, ((0, 0), (1, 1), (1, 1), (0, 0)))
    patches = jnp.stack(
        [xp[:, di:di + H, dj:dj + W, :] for di in range(3) for dj in range(3)], axis=3
    )                                                      # (B, H, W, 9, C)
    patches = patches.reshape(B * H * W, 9 * C)
    y = pallas_linear_ln(patches, wmat, b, g, beta, eps=eps)
    return y.reshape(B, H * W, wmat.shape[1])


# -------------------------------------- image encoder ------------------------------------
def image_encoder(params, image):
    # TODO(synk): real SAM ViT-B uses windowed + relative-position attention; condensed
    # to a plain small ViT here (synthetic init, same dataflow).
    B = image.shape[0]
    p = PATCH
    Hp = Wp = IMG_SIZE // p
    D = VIT_DIM
    # patch embed: Conv2d(3, D, kernel=p, stride=p) == patchify + matmul (+ pos embed, fused)
    x = image.reshape(B, 3, Hp, p, Wp, p).transpose(0, 2, 4, 1, 3, 5).reshape(
        B, Hp * Wp, 3 * p * p)
    x = pallas_patch_embed(x, params["patch_w"], params["patch_b"], params["pos_embed"])
    for blk in params["blocks"]:
        x = pallas_vit_block(blk, x)
    # neck: Conv1x1 + LayerNorm2d (fused) -> Conv3x3 + LayerNorm2d (fused); stays in
    # (B, HW, C) token layout all the way to the decoder (no NCHW round trip).
    n = params["neck"]
    xf = pallas_linear_ln(x.reshape(B * Hp * Wp, D), n["conv1_w"], n["conv1_b"],
                          n["ln1_g"], n["ln1_b"], eps=1e-6).reshape(B, Hp * Wp, EMBED_DIM)
    feats = conv3x3_ln(xf, Hp, Wp, n["conv2_w"], n["conv2_b"], n["ln2_g"], n["ln2_b"],
                       eps=1e-6)
    return feats                                             # (B, Hp*Wp, C)


# ------------------------------------- prompt encoder ------------------------------------
def dense_pe(gauss, Hf, Wf):
    """SAM PositionEmbeddingRandom over the feature grid -> (1, Hf*Wf, C) token layout."""
    ys = (jnp.arange(Hf, dtype=jnp.float32) + 0.5) / Hf
    xs = (jnp.arange(Wf, dtype=jnp.float32) + 0.5) / Wf
    gy, gx = jnp.meshgrid(ys, xs, indexing="ij")
    coords = jnp.stack([gx, gy], axis=-1)            # (Hf, Wf, 2)
    coords = 2.0 * coords - 1.0
    proj = 2.0 * jnp.pi * (coords @ gauss)           # (Hf, Wf, C//2)
    pe = jnp.concatenate([jnp.sin(proj), jnp.cos(proj)], axis=-1)
    return pe.reshape(1, Hf * Wf, pe.shape[-1])


# -------------------------------------- mask decoder -------------------------------------
def mask_decoder(p, feats, image_pe, sparse, dense, Hf, Wf, multimask_output=False):
    """feats: (B, Hf*Wf, C) token layout; image_pe: (1, Hf*Wf, C); dense: (1, 1, C)."""
    B, _, C = feats.shape
    output_tokens = jnp.concatenate([p["iou_token"], p["mask_tokens"]], axis=0)      # (5, C)
    output_tokens = jnp.broadcast_to(output_tokens[None],
                                     (sparse.shape[0], output_tokens.shape[0], C))
    tokens = jnp.concatenate([output_tokens, sparse], axis=1)                        # (B, 5, C)

    queries = tokens
    keys = feats + dense                              # dense (1,1,C) broadcasts over B & HW
    for li, blk in enumerate(p["transformer"]["layers"]):
        queries, keys = pallas_twoway_block(blk, queries, keys, tokens, image_pe,
                                            skip_first_layer_pe=(li == 0))
    queries = pallas_final_attn_ln(p["transformer"]["final_attn"],
                                   p["transformer"]["norm_final_g"],
                                   p["transformer"]["norm_final_b"],
                                   queries, keys, tokens, image_pe, DEC_HEADS)

    mask_tokens_out = queries[:, 1:1 + NUM_MASK_TOKENS, :]                           # (B, T, C)

    # output upscaling fully fused; pixel shuffle happens once on the final slab.
    Co = C // 8
    up_flat = pallas_upscale(keys.reshape(B * Hf * Wf, C), p["up1_w"], p["up1_b"],
                             p["up_ln_g"], p["up_ln_b"], p["up2_w"], p["up2_b"],
                             eps=1e-6)                                               # (B*Hf*Wf, 16*Co)
    up = up_flat.reshape(B, Hf, Wf, 2, 2, 2, 2, Co).transpose(
        0, 7, 1, 3, 5, 2, 4, 6).reshape(B, Co, 4 * Hf * 4 * Wf)                      # (B, Co, Hm*Wm)

    # hypernetwork MLPs + mask matmul in one per-batch kernel
    masks = pallas_hyper_masks(mask_tokens_out, p["hyper_w1"], p["hyper_b1"],
                               p["hyper_w2"], p["hyper_b2"], p["hyper_w3"], p["hyper_b3"],
                               up).reshape(B, NUM_MASK_TOKENS, 4 * Hf, 4 * Wf)
    # TODO(synk): iou_prediction_head omitted — its output is discarded by forward()[0].
    if multimask_output:
        return masks[:, 1:, :, :]
    return masks[:, 0:1, :, :]


# --------------------------------------- full forward ------------------------------------
def bk_medsam_forward(params, image):
    """BKMedSAM.forward(image) -> mask_logits of shape (B, 1, 4*Hf, 4*Wf)."""
    B, Cimg, H, W = image.shape
    if H != IMG_SIZE or W != IMG_SIZE:
        # torch.nn.functional.interpolate default mode is 'nearest'
        image = jax.image.resize(image, (B, Cimg, IMG_SIZE, IMG_SIZE), method="nearest")
    image = image.astype(jnp.float32)

    feats = image_encoder(params, image)                     # (B, Hf*Wf, C)
    Hf = Wf = IMG_SIZE // PATCH

    # prompt encoder with points=None, boxes=None, mask=None
    sparse = jnp.zeros((B, 0, EMBED_DIM), jnp.float32)       # repeat_interleave(B, 0)
    dense = params["no_mask_embed"].reshape(1, 1, EMBED_DIM) # broadcasts over tokens/batch
    image_pe = dense_pe(params["pe_gauss"], Hf, Wf)          # get_dense_pe()

    mask_logits = mask_decoder(params["decoder"], feats, image_pe, sparse, dense,
                               Hf, Wf, multimask_output=False)
    return mask_logits


# ------------------------------------ parameter init -------------------------------------
class _KeyGen:
    def __init__(self, key):
        self.key = key

    def __call__(self):
        self.key, sub = jax.random.split(self.key)
        return sub


def _w(key, shape, std=0.02):
    """Matmul weight: stored in bf16 (cast hoisted out of the forward pass)."""
    return (std * jax.random.normal(key, shape, dtype=jnp.float32)).astype(jnp.bfloat16)


def _b0(n):
    return jnp.zeros((1, n), jnp.float32)


def _ln_g(n):
    return jnp.ones((1, n), jnp.float32)


def _ln_b(n):
    return jnp.zeros((1, n), jnp.float32)


def init_params(key):
    kg = _KeyGen(key)
    D, C, M = VIT_DIM, EMBED_DIM, VIT_MLP
    Hp = IMG_SIZE // PATCH
    P = {
        "patch_w": _w(kg(), (3 * PATCH * PATCH, D)),
        "patch_b": _b0(D),
        "pos_embed": 0.02 * jax.random.normal(kg(), (1, Hp * Hp, D), dtype=jnp.float32),
    }
    P["blocks"] = [{
        "ln1_g": _ln_g(D), "ln1_b": _ln_b(D),
        "qkv_w": _w(kg(), (D, 3 * D)), "qkv_b": _b0(3 * D),
        "proj_w": _w(kg(), (D, D)), "proj_b": _b0(D),
        "ln2_g": _ln_g(D), "ln2_b": _ln_b(D),
        "mlp1_w": _w(kg(), (D, M)), "mlp1_b": _b0(M),
        "mlp2_w": _w(kg(), (M, D)), "mlp2_b": _b0(D),
    } for _ in range(VIT_DEPTH)]
    P["neck"] = {
        "conv1_w": _w(kg(), (D, C)), "conv1_b": _b0(C),
        "ln1_g": _ln_g(C), "ln1_b": _ln_b(C),
        # 3x3 conv stored directly as the (9*Cin, Cout) im2col weight matrix
        "conv2_w": _w(kg(), (9 * C, C)), "conv2_b": _b0(C),
        "ln2_g": _ln_g(C), "ln2_b": _ln_b(C),
    }
    P["pe_gauss"] = jax.random.normal(kg(), (2, C // 2), dtype=jnp.float32)
    P["no_mask_embed"] = 0.02 * jax.random.normal(kg(), (1, C), dtype=jnp.float32)

    def attn_params(downsample):
        Di = C // downsample
        return {
            # q/k/v projection weights stacked along a leading axis -> fewer kernel operands
            "qkv_w": _w(kg(), (3, C, Di)),
            "qkv_b": jnp.zeros((3, 1, Di), jnp.float32),
            "out_w": _w(kg(), (Di, C)), "out_b": _b0(C),
        }

    layers = [{
        "self_attn": attn_params(1),
        "norm1_g": _ln_g(C), "norm1_b": _ln_b(C),
        "cross_t2i": attn_params(DEC_DOWNSAMPLE),
        "norm2_g": _ln_g(C), "norm2_b": _ln_b(C),
        "mlp1_w": _w(kg(), (C, DEC_MLP)), "mlp1_b": _b0(DEC_MLP),
        "mlp2_w": _w(kg(), (DEC_MLP, C)), "mlp2_b": _b0(C),
        "norm3_g": _ln_g(C), "norm3_b": _ln_b(C),
        "cross_i2t": attn_params(DEC_DOWNSAMPLE),
        "norm4_g": _ln_g(C), "norm4_b": _ln_b(C),
    } for _ in range(DEC_DEPTH)]

    C1 = C // 4
    Co = C // 8
    P["decoder"] = {
        "iou_token": 0.02 * jax.random.normal(kg(), (1, C), dtype=jnp.float32),
        "mask_tokens": 0.02 * jax.random.normal(kg(), (NUM_MASK_TOKENS, C), dtype=jnp.float32),
        "transformer": {
            "layers": layers,
            "final_attn": attn_params(DEC_DOWNSAMPLE),
            "norm_final_g": _ln_g(C), "norm_final_b": _ln_b(C),
        },
        # ConvTranspose2d weights stored as (Cin, 4*Cout) matrices; column index is
        # sub-pixel-major: col = (ki*2+kj)*Cout + cout.  Biases expanded to the same layout.
        "up1_w": _w(kg(), (C, 4 * C1)), "up1_b": _b0(4 * C1),
        "up_ln_g": _ln_g(C1), "up_ln_b": _ln_b(C1),
        "up2_w": _w(kg(), (C1, 4 * Co)), "up2_b": _b0(4 * Co),
        # hypernetwork MLP weights stacked over the token axis for one batched kernel
        "hyper_w1": (0.02 * jax.random.normal(kg(), (NUM_MASK_TOKENS, C, C),
                                              dtype=jnp.float32)).astype(jnp.bfloat16),
        "hyper_b1": jnp.zeros((NUM_MASK_TOKENS, 1, C), jnp.float32),
        "hyper_w2": (0.02 * jax.random.normal(kg(), (NUM_MASK_TOKENS, C, C),
                                              dtype=jnp.float32)).astype(jnp.bfloat16),
        "hyper_b2": jnp.zeros((NUM_MASK_TOKENS, 1, C), jnp.float32),
        "hyper_w3": (0.02 * jax.random.normal(kg(), (NUM_MASK_TOKENS, C, Co),
                                              dtype=jnp.float32)).astype(jnp.bfloat16),
        "hyper_b3": jnp.zeros((NUM_MASK_TOKENS, 1, Co), jnp.float32),
    }
    return P


# -------------------------------------------- main ---------------------------------------
if __name__ == "__main__":
    key = jax.random.PRNGKey(0)
    pkey, xkey = jax.random.split(key)
    params = init_params(pkey)
    image = jax.random.normal(xkey, (2, 3, IMG_SIZE, IMG_SIZE), dtype=jnp.float32)

    fwd = jax.jit(bk_medsam_forward)
    mask_logits = fwd(params, image)
    mask_logits = jax.block_until_ready(mask_logits)

    Hf = IMG_SIZE // PATCH
    assert mask_logits.shape == (2, 1, 4 * Hf, 4 * Hf), mask_logits.shape
    assert bool(jnp.all(jnp.isfinite(mask_logits)))
    print("KERNEL_OK")
</pallas_src>

<mosaic_0001>
module attributes {stable_mosaic.version = 11 : i64} {
  func.func @_patch_embed_kernel(%arg0: i32, %arg1: memref<1x16x192xf32, #tpu.memory_space<vmem>>, %arg2: memref<192x32xbf16, #tpu.memory_space<vmem>>, %arg3: memref<1x32xf32, #tpu.memory_space<vmem>>, %arg4: memref<1x16x32xf32, #tpu.memory_space<vmem>>, %arg5: memref<1x16x32xf32, #tpu.memory_space<vmem>>) attributes {dimension_semantics = [#tpu.dimension_semantics<parallel>], iteration_bounds = array<i64: 2>, scalar_prefetch = 0 : i64, scratch_operands = 0 : i64, tpu.core_type = #tpu.core_type<tc>, window_params = [{transform_indices = @transform_0, window_bounds = array<i64: 1, 16, 192>}, {pipeline_mode = #tpu.pipeline_mode<synchronous>, transform_indices = @transform_1, window_bounds = array<i64: 192, 32>}, {pipeline_mode = #tpu.pipeline_mode<synchronous>, transform_indices = @transform_2, window_bounds = array<i64: 1, 32>}, {pipeline_mode = #tpu.pipeline_mode<synchronous>, transform_indices = @transform_3, window_bounds = array<i64: 1, 16, 32>}, {transform_indices = @transform_4, window_bounds = array<i64: 1, 16, 32>}]} {
    %c0 = arith.constant 0 : index
    %c0_0 = arith.constant 0 : index
    %c0_1 = arith.constant 0 : index
    %0 = vector.load %arg1[%c0, %c0_0, %c0_1] : memref<1x16x192xf32, #tpu.memory_space<vmem>>, vector<1x16x192xf32>
    %1 = vector.shape_cast %0 : vector<1x16x192xf32> to vector<16x192xf32>
    %c0_2 = arith.constant 0 : index
    %c0_3 = arith.constant 0 : index
    %2 = vector.load %arg2[%c0_2, %c0_3] : memref<192x32xbf16, #tpu.memory_space<vmem>>, vector<192x32xbf16>
    %3 = arith.truncf %1 : vector<16x192xf32> to vector<16x192xbf16>
    %cst = arith.constant dense<0.000000e+00> : vector<16x32xf32>
    %4 = tpu.matmul %3, %2, %cst {dimension_numbers = #tpu.dot_dimension_numbers<[1], [0], [0], [1], [0, 0, 1, 1], [], []>} : vector<16x192xbf16>, vector<192x32xbf16>, vector<16x32xf32> -> vector<16x32xf32>
    %c0_4 = arith.constant 0 : index
    %c0_5 = arith.constant 0 : index
    %5 = vector.load %arg3[%c0_4, %c0_5] : memref<1x32xf32, #tpu.memory_space<vmem>>, vector<1x32xf32>
    %6 = vector.broadcast %5 : vector<1x32xf32> to vector<16x32xf32>
    %7 = arith.addf %4, %6 : vector<16x32xf32>
    %c0_6 = arith.constant 0 : index
    %c0_7 = arith.constant 0 : index
    %c0_8 = arith.constant 0 : index
    %8 = vector.load %arg4[%c0_6, %c0_7, %c0_8] : memref<1x16x32xf32, #tpu.memory_space<vmem>>, vector<1x16x32xf32>
    %9 = vector.shape_cast %8 : vector<1x16x32xf32> to vector<16x32xf32>
    %10 = arith.addf %7, %9 : vector<16x32xf32>
    %c0_9 = arith.constant 0 : index
    %c0_10 = arith.constant 0 : index
    %c0_11 = arith.constant 0 : index
    %11 = vector.load %arg5[%c0_9, %c0_10, %c0_11] : memref<1x16x32xf32, #tpu.memory_space<vmem>>, vector<1x16x32xf32>
    %12 = vector.shape_cast %11 : vector<1x16x32xf32> to vector<16x32xf32>
    %13 = vector.shape_cast %10 : vector<16x32xf32> to vector<1x16x32xf32>
    tpu.vector_store %arg5[%c0_9, %c0_10, %c0_11], %13 {strides = array<i32>} : memref<1x16x32xf32, #tpu.memory_space<vmem>>, vector<1x16x32xf32>,
    return
  }
  func.func @transform_0(%arg0: i32) -> (i32, i32, i32) {
    %c0_i32 = arith.constant 0 : i32
    %c0_i32_0 = arith.constant 0 : i32
    %c0_i32_1 = arith.constant 0 : i32
    return %arg0, %c0_i32, %c0_i32_0 : i32, i32, i32
  }
  func.func @transform_1(%arg0: i32) -> (i32, i32) {
    %c0_i32 = arith.constant 0 : i32
    %c0_i32_0 = arith.constant 0 : i32
    %c0_i32_1 = arith.constant 0 : i32
    return %c0_i32, %c0_i32_0 : i32, i32
  }
  func.func @transform_2(%arg0: i32) -> (i32, i32) {
    %c0_i32 = arith.constant 0 : i32
    %c0_i32_0 = arith.constant 0 : i32
    %c0_i32_1 = arith.constant 0 : i32
    return %c0_i32, %c0_i32_0 : i32, i32
  }
  func.func @transform_3(%arg0: i32) -> (i32, i32, i32) {
    %c0_i32 = arith.constant 0 : i32
    %c0_i32_0 = arith.constant 0 : i32
    %c0_i32_1 = arith.constant 0 : i32
    %c0_i32_2 = arith.constant 0 : i32
    return %c0_i32, %c0_i32_0, %c0_i32_1 : i32, i32, i32
  }
  func.func @transform_4(%arg0: i32) -> (i32, i32, i32) {
    %c0_i32 = arith.constant 0 : i32
    %c0_i32_0 = arith.constant 0 : i32
    %c0_i32_1 = arith.constant 0 : i32
    return %arg0, %c0_i32, %c0_i32_0 : i32, i32, i32
  }
}

module attributes {stable_mosaic.version = 11 : i64} {
  func.func @_vit_block_kernel(%arg0: i32, %arg1: memref<1x16x32xf32, #tpu.memory_space<vmem>>, %arg2: memref<1x32xf32, #tpu.memory_space<vmem>>, %arg3: memref<1x32xf32, #tpu.memory_space<vmem>>, %arg4: memref<32x96xbf16, #tpu.memory_space<vmem>>, %arg5: memref<1x96xf32, #tpu.memory_space<vmem>>, %arg6: memref<32x32xbf16, #tpu.memory_space<vmem>>, %arg7: memref<1x32xf32, #tpu.memory_space<vmem>>, %arg8: memref<1x32xf32, #tpu.memory_space<vmem>>, %arg9: memref<1x32xf32, #tpu.memory_space<vmem>>, %arg10: memref<32x64xbf16, #tpu.memory_space<vmem>>, %arg11: memref<1x64xf32, #tpu.memory_space<vmem>>, %arg12: memref<64x32xbf16, #tpu.memory_space<vmem>>, %arg13: memref<1x32xf32, #tpu.memory_space<vmem>>, %arg14: memref<1x16x32xf32, #tpu.memory_space<vmem>>) attributes {dimension_semantics = [#tpu.dimension_semantics<parallel>], iteration_bounds = array<i64: 2>, scalar_prefetch = 0 : i64, scratch_operands = 0 : i64, tpu.core_type = #tpu.core_type<tc>, window_params = [{transform_indices = @transform_0, window_bounds = array<i64: 1, 16, 32>}, {pipeline_mode = #tpu.pipeline_mode<synchronous>, transform_indices = @transform_1, window_bounds = array<i64: 1, 32>}, {pipeline_mode = #tpu.pipeline_mode<synchronous>, transform_indices = @transform_2, window_bounds = array<i64: 1, 32>}, {pipeline_mode = #tpu.pipeline_mode<synchronous>, transform_indices = @transform_3, window_bounds = array<i64: 32, 96>}, {pipeline_mode = #tpu.pipeline_mode<synchronous>, transform_indices = @transform_4, window_bounds = array<i64: 1, 96>}, {pipeline_mode = #tpu.pipeline_mode<synchronous>, transform_indices = @transform_5, window_bounds = array<i64: 32, 32>}, {pipeline_mode = #tpu.pipeline_mode<synchronous>, transform_indices = @transform_6, window_bounds = array<i64: 1, 32>}, {pipeline_mode = #tpu.pipeline_mode<synchronous>, transform_indices = @transform_7, window_bounds = array<i64: 1, 32>}, {pipeline_mode = #tpu.pipeline_mode<synchronous>, transform_indices = @transform_8, window_bounds = array<i64: 1, 32>}, {pipeline_mode = #tpu.pipeline_mode<synchronous>, transform_indices = @transform_9, window_bounds = array<i64: 32, 64>}, {pipeline_mode = #tpu.pipeline_mode<synchronous>, transform_indices = @transform_10, window_bounds = array<i64: 1, 64>}, {pipeline_mode = #tpu.pipeline_mode<synchronous>, transform_indices = @transform_11, window_bounds = array<i64: 64, 32>}, {pipeline_mode = #tpu.pipeline_mode<synchronous>, transform_indices = @transform_12, window_bounds = array<i64: 1, 32>}, {transform_indices = @transform_13, window_bounds = array<i64: 1, 16, 32>}]} {
    %c0 = arith.constant 0 : index
    %c0_0 = arith.constant 0 : index
    %c0_1 = arith.constant 0 : index
    %0 = vector.load %arg1[%c0, %c0_0, %c0_1] : memref<1x16x32xf32, #tpu.memory_space<vmem>>, vector<1x16x32xf32>
    %1 = vector.shape_cast %0 : vector<1x16x32xf32> to vector<16x32xf32>
    %c0_2 = arith.constant 0 : index
    %c0_3 = arith.constant 0 : index
    %2 = vector.load %arg2[%c0_2, %c0_3] : memref<1x32xf32, #tpu.memory_space<vmem>>, vector<1x32xf32>
    %c0_4 = arith.constant 0 : index
    %c0_5 = arith.constant 0 : index
    %3 = vector.load %arg3[%c0_4, %c0_5] : memref<1x32xf32, #tpu.memory_space<vmem>>, vector<1x32xf32>
    %cst = arith.constant dense<0.000000e+00> : vector<16xf32>
    %4 = vector.multi_reduction <add>, %1, %cst [1] : vector<16x32xf32> to vector<16xf32>
    %5 = vector.shape_cast %4 : vector<16xf32> to vector<16x1xf32>
    %cst_6 = arith.constant 3.200000e+01 : f32
    %6 = vector.broadcast %cst_6 : f32 to vector<16x1xf32>
    %7 = arith.divf %5, %6 : vector<16x1xf32>
    %8 = vector.broadcast %7 : vector<16x1xf32> to vector<16x32xf32>
    %9 = arith.subf %1, %8 : vector<16x32xf32>
    %10 = arith.mulf %9, %9 : vector<16x32xf32>
    %cst_7 = arith.constant dense<0.000000e+00> : vector<16xf32>
    %11 = vector.multi_reduction <add>, %10, %cst_7 [1] : vector<16x32xf32> to vector<16xf32>
    %12 = vector.shape_cast %11 : vector<16xf32> to vector<16x1xf32>
    %cst_8 = arith.constant 3.200000e+01 : f32
    %13 = vector.broadcast %cst_8 : f32 to vector<16x1xf32>
    %14 = arith.divf %12, %13 : vector<16x1xf32>
    %cst_9 = arith.constant 9.99999997E-7 : f32
    %15 = vector.broadcast %cst_9 : f32 to vector<16x1xf32>
    %16 = arith.addf %14, %15 : vector<16x1xf32>
    %17 = math.rsqrt %16 : vector<16x1xf32>
    %18 = vector.broadcast %17 : vector<16x1xf32> to vector<16x32xf32>
    %19 = arith.mulf %9, %18 : vector<16x32xf32>
    %20 = vector.broadcast %2 : vector<1x32xf32> to vector<16x32xf32>
    %21 = arith.mulf %19, %20 : vector<16x32xf32>
    %22 = vector.broadcast %3 : vector<1x32xf32> to vector<16x32xf32>
    %23 = arith.addf %21, %22 : vector<16x32xf32>
    %c0_10 = arith.constant 0 : index
    %c0_11 = arith.constant 0 : index
    %24 = vector.load %arg4[%c0_10, %c0_11] : memref<32x96xbf16, #tpu.memory_space<vmem>>, vector<32x96xbf16>
    %25 = arith.truncf %23 : vector<16x32xf32> to vector<16x32xbf16>
    %cst_12 = arith.constant dense<0.000000e+00> : vector<16x96xf32>
    %26 = tpu.matmul %25, %24, %cst_12 {dimension_numbers = #tpu.dot_dimension_numbers<[1], [0], [0], [1], [0, 0, 1, 1], [], []>} : vector<16x32xbf16>, vector<32x96xbf16>, vector<16x96xf32> -> vector<16x96xf32>
    %c0_13 = arith.constant 0 : index
    %c0_14 = arith.constant 0 : index
    %27 = vector.load %arg5[%c0_13, %c0_14] : memref<1x96xf32, #tpu.memory_space<vmem>>, vector<1x96xf32>
    %28 = vector.broadcast %27 : vector<1x96xf32> to vector<16x96xf32>
    %29 = arith.addf %26, %28 : vector<16x96xf32>
    %30 = vector.extract_strided_slice %29 {offsets = [0, 0], sizes = [16, 32], strides = [1, 1]} : vector<16x96xf32> to vector<16x32xf32>
    %31 = vector.extract_strided_slice %29 {offsets = [0, 32], sizes = [16, 32], strides = [1, 1]} : vector<16x96xf32> to vector<16x32xf32>
    %32 = vector.extract_strided_slice %29 {offsets = [0, 64], sizes = [16, 32], strides = [1, 1]} : vector<16x96xf32> to vector<16x32xf32>
    %c0_15 = arith.constant 0 : index
    %c0_16 = arith.constant 0 : index
    %33 = vector.load %arg6[%c0_15, %c0_16] : memref<32x32xbf16, #tpu.memory_space<vmem>>, vector<32x32xbf16>
    %34 = vector.extract_strided_slice %30 {offsets = [0, 0], sizes = [16, 16], strides = [1, 1]} : vector<16x32xf32> to vector<16x16xf32>
    %35 = vector.extract_strided_slice %31 {offsets = [0, 0], sizes = [16, 16], strides = [1, 1]} : vector<16x32xf32> to vector<16x16xf32>
    %36 = vector.extract_strided_slice %32 {offsets = [0, 0], sizes = [16, 16], strides = [1, 1]} : vector<16x32xf32> to vector<16x16xf32>
    %37 = arith.truncf %34 : vector<16x16xf32> to vector<16x16xbf16>
    %38 = arith.truncf %35 : vector<16x16xf32> to vector<16x16xbf16>
    %cst_17 = arith.constant dense<0.000000e+00> : vector<16x16xf32>
    %39 = tpu.matmul %37, %38, %cst_17 {dimension_numbers = #tpu.dot_dimension_numbers<[1], [1], [0], [0], [0, 0, 1, 0], [], []>} : vector<16x16xbf16>, vector<16x16xbf16>, vector<16x16xf32> -> vector<16x16xf32>
    %cst_18 = arith.constant 2.500000e-01 : f32
    %40 = vector.broadcast %cst_18 : f32 to vector<16x16xf32>
    %41 = arith.mulf %39, %40 : vector<16x16xf32>
    %cst_19 = arith.constant dense<0xFF800000> : vector<16xf32>
    %42 = vector.multi_reduction <maximumf>, %41, %cst_19 [1] : vector<16x16xf32> to vector<16xf32>
    %43 = vector.shape_cast %42 : vector<16xf32> to vector<16x1xf32>
    %44 = vector.broadcast %43 : vector<16x1xf32> to vector<16x16xf32>
    %45 = arith.subf %41, %44 : vector<16x16xf32>
    %46 = math.exp %45 : vector<16x16xf32>
    %cst_20 = arith.constant dense<0.000000e+00> : vector<16xf32>
    %47 = vector.multi_reduction <add>, %46, %cst_20 [1] : vector<16x16xf32> to vector<16xf32>
    %48 = vector.shape_cast %47 : vector<16xf32> to vector<16x1xf32>
    %49 = tpu.reciprocal %48 {approx = true} : vector<16x1xf32> -> vector<16x1xf32>
    %50 = vector.broadcast %49 : vector<16x1xf32> to vector<16x16xf32>
    %51 = arith.mulf %46, %50 : vector<16x16xf32>
    %52 = arith.truncf %51 : vector<16x16xf32> to vector<16x16xbf16>
    %53 = arith.truncf %36 : vector<16x16xf32> to vector<16x16xbf16>
    %cst_21 = arith.constant dense<0.000000e+00> : vector<16x16xf32>
    %54 = tpu.matmul %52, %53, %cst_21 {dimension_numbers = #tpu.dot_dimension_numbers<[1], [0], [0], [1], [0, 0, 1, 1], [], []>} : vector<16x16xbf16>, vector<16x16xbf16>, vector<16x16xf32> -> vector<16x16xf32>
    %55 = vector.extract_strided_slice %33 {offsets = [0, 0], sizes = [16, 32], strides = [1, 1]} : vector<32x32xbf16> to vector<16x32xbf16>
    %56 = arith.truncf %54 : vector<16x16xf32> to vector<16x16xbf16>
    %cst_22 = arith.constant dense<0.000000e+00> : vector<16x32xf32>
    %57 = tpu.matmul %56, %55, %cst_22 {dimension_numbers = #tpu.dot_dimension_numbers<[1], [0], [0], [1], [0, 0, 1, 1], [], []>} : vector<16x16xbf16>, vector<16x32xbf16>, vector<16x32xf32> -> vector<16x32xf32>
    %58 = vector.extract_strided_slice %30 {offsets = [0, 16], sizes = [16, 16], strides = [1, 1]} : vector<16x32xf32> to vector<16x16xf32>
    %59 = vector.extract_strided_slice %31 {offsets = [0, 16], sizes = [16, 16], strides = [1, 1]} : vector<16x32xf32> to vector<16x16xf32>
    %60 = vector.extract_strided_slice %32 {offsets = [0, 16], sizes = [16, 16], strides = [1, 1]} : vector<16x32xf32> to vector<16x16xf32>
    %61 = arith.truncf %58 : vector<16x16xf32> to vector<16x16xbf16>
    %62 = arith.truncf %59 : vector<16x16xf32> to vector<16x16xbf16>
    %cst_23 = arith.constant dense<0.000000e+00> : vector<16x16xf32>
    %63 = tpu.matmul %61, %62, %cst_23 {dimension_numbers = #tpu.dot_dimension_numbers<[1], [1], [0], [0], [0, 0, 1, 0], [], []>} : vector<16x16xbf16>, vector<16x16xbf16>, vector<16x16xf32> -> vector<16x16xf32>
    %cst_24 = arith.constant 2.500000e-01 : f32
    %64 = vector.broadcast %cst_24 : f32 to vector<16x16xf32>
    %65 = arith.mulf %63, %64 : vector<16x16xf32>
    %cst_25 = arith.constant dense<0xFF800000> : vector<16xf32>
    %66 = vector.multi_reduction <maximumf>, %65, %cst_25 [1] : vector<16x16xf32> to vector<16xf32>
    %67 = vector.shape_cast %66 : vector<16xf32> to vector<16x1xf32>
    %68 = vector.broadcast %67 : vector<16x1xf32> to vector<16x16xf32>
    %69 = arith.subf %65, %68 : vector<16x16xf32>
    %70 = math.exp %69 : vector<16x16xf32>
    %cst_26 = arith.constant dense<0.000000e+00> : vector<16xf32>
    %71 = vector.multi_reduction <add>, %70, %cst_26 [1] : vector<16x16xf32> to vector<16xf32>
    %72 = vector.shape_cast %71 : vector<16xf32> to vector<16x1xf32>
    %73 = tpu.reciprocal %72 {approx = true} : vector<16x1xf32> -> vector<16x1xf32>
    %74 = vector.broadcast %73 : vector<16x1xf32> to vector<16x16xf32>
    %75 = arith.mulf %70, %74 : vector<16x16xf32>
    %76 = arith.truncf %75 : vector<16x16xf32> to vector<16x16xbf16>
    %77 = arith.truncf %60 : vector<16x16xf32> to vector<16x16xbf16>
    %cst_27 = arith.constant dense<0.000000e+00> : vector<16x16xf32>
    %78 = tpu.matmul %76, %77, %cst_27 {dimension_numbers = #tpu.dot_dimension_numbers<[1], [0], [0], [1], [0, 0, 1, 1], [], []>} : vector<16x16xbf16>, vector<16x16xbf16>, vector<16x16xf32> -> vector<16x16xf32>
    %79 = vector.extract_strided_slice %33 {offsets = [16, 0], sizes = [16, 32], strides = [1, 1]} : vector<32x32xbf16> to vector<16x32xbf16>
    %80 = arith.truncf %78 : vector<16x16xf32> to vector<16x16xbf16>
    %cst_28 = arith.constant dense<0.000000e+00> : vector<16x32xf32>
    %81 = tpu.matmul %80, %79, %cst_28 {dimension_numbers = #tpu.dot_dimension_numbers<[1], [0], [0], [1], [0, 0, 1, 1], [], []>} : vector<16x16xbf16>, vector<16x32xbf16>, vector<16x32xf32> -> vector<16x32xf32>
    %82 = arith.addf %57, %81 : vector<16x32xf32>
    %83 = arith.addf %1, %82 : vector<16x32xf32>
    %c0_29 = arith.constant 0 : index
    %c0_30 = arith.constant 0 : index
    %84 = vector.load %arg7[%c0_29, %c0_30] : memref<1x32xf32, #tpu.memory_space<vmem>>, vector<1x32xf32>
    %85 = vector.broadcast %84 : vector<1x32xf32> to vector<16x32xf32>
    %86 = arith.addf %83, %85 : vector<16x32xf32>
    %c0_31 = arith.constant 0 : index
    %c0_32 = arith.constant 0 : index
    %87 = vector.load %arg8[%c0_31, %c0_32] : memref<1x32xf32, #tpu.memory_space<vmem>>, vector<1x32xf32>
    %c0_33 = arith.constant 0 : index
    %c0_34 = arith.constant 0 : index
    %88 = vector.load %arg9[%c0_33, %c0_34] : memref<1x32xf32, #tpu.memory_space<vmem>>, vector<1x32xf32>
    %cst_35 = arith.constant dense<0.000000e+00> : vector<16xf32>
    %89 = vector.multi_reduction <add>, %86, %cst_35 [1] : vector<16x32xf32> to vector<16xf32>
    %90 = vector.shape_cast %89 : vector<16xf32> to vector<16x1xf32>
    %cst_36 = arith.constant 3.200000e+01 : f32
    %91 = vector.broadcast %cst_36 : f32 to vector<16x1xf32>
    %92 = arith.divf %90, %91 : vector<16x1xf32>
    %93 = vector.broadcast %92 : vector<16x1xf32> to vector<16x32xf32>
    %94 = arith.subf %86, %93 : vector<16x32xf32>
    %95 = arith.mulf %94, %94 : vector<16x32xf32>
    %cst_37 = arith.constant dense<0.000000e+00> : vector<16xf32>
    %96 = vector.multi_reduction <add>, %95, %cst_37 [1] : vector<16x32xf32> to vector<16xf32>
    %97 = vector.shape_cast %96 : vector<16xf32> to vector<16x1xf32>
    %cst_38 = arith.constant 3.200000e+01 : f32
    %98 = vector.broadcast %cst_38 : f32 to vector<16x1xf32>
    %99 = arith.divf %97, %98 : vector<16x1xf32>
    %cst_39 = arith.constant 9.99999997E-7 : f32
    %100 = vector.broadcast %cst_39 : f32 to vector<16x1xf32>
    %101 = arith.addf %99, %100 : vector<16x1xf32>
    %102 = math.rsqrt %101 : vector<16x1xf32>
    %103 = vector.broadcast %102 : vector<16x1xf32> to vector<16x32xf32>
    %104 = arith.mulf %94, %103 : vector<16x32xf32>
    %105 = vector.broadcast %87 : vector<1x32xf32> to vector<16x32xf32>
    %106 = arith.mulf %104, %105 : vector<16x32xf32>
    %107 = vector.broadcast %88 : vector<1x32xf32> to vector<16x32xf32>
    %108 = arith.addf %106, %107 : vector<16x32xf32>
    %c0_40 = arith.constant 0 : index
    %c0_41 = arith.constant 0 : index
    %109 = vector.load %arg10[%c0_40, %c0_41] : memref<32x64xbf16, #tpu.memory_space<vmem>>, vector<32x64xbf16>
    %110 = arith.truncf %108 : vector<16x32xf32> to vector<16x32xbf16>
    %cst_42 = arith.constant dense<0.000000e+00> : vector<16x64xf32>
    %111 = tpu.matmul %110, %109, %cst_42 {dimension_numbers = #tpu.dot_dimension_numbers<[1], [0], [0], [1], [0, 0, 1, 1], [], []>} : vector<16x32xbf16>, vector<32x64xbf16>, vector<16x64xf32> -> vector<16x64xf32>
    %c0_43 = arith.constant 0 : index
    %c0_44 = arith.constant 0 : index
    %112 = vector.load %arg11[%c0_43, %c0_44] : memref<1x64xf32, #tpu.memory_space<vmem>>, vector<1x64xf32>
    %113 = vector.broadcast %112 : vector<1x64xf32> to vector<16x64xf32>
    %114 = arith.addf %111, %113 : vector<16x64xf32>
    %115 = arith.mulf %114, %114 : vector<16x64xf32>
    %116 = arith.mulf %114, %115 : vector<16x64xf32>
    %cst_45 = arith.constant 4.471500e-02 : f32
    %117 = vector.broadcast %cst_45 : f32 to vector<16x64xf32>
    %118 = arith.mulf %117, %116 : vector<16x64xf32>
    %119 = arith.addf %114, %118 : vector<16x64xf32>
    %cst_46 = arith.constant 0.797884583 : f32
    %120 = vector.broadcast %cst_46 : f32 to vector<16x64xf32>
    %121 = arith.mulf %120, %119 : vector<16x64xf32>
    %122 = math.tanh %121 : vector<16x64xf32>
    %cst_47 = arith.constant 1.000000e+00 : f32
    %123 = vector.broadcast %cst_47 : f32 to vector<16x64xf32>
    %124 = arith.addf %123, %122 : vector<16x64xf32>
    %cst_48 = arith.constant 5.000000e-01 : f32
    %125 = vector.broadcast %cst_48 : f32 to vector<16x64xf32>
    %126 = arith.mulf %125, %124 : vector<16x64xf32>
    %127 = arith.mulf %114, %126 : vector<16x64xf32>
    %c0_49 = arith.constant 0 : index
    %c0_50 = arith.constant 0 : index
    %128 = vector.load %arg12[%c0_49, %c0_50] : memref<64x32xbf16, #tpu.memory_space<vmem>>, vector<64x32xbf16>
    %129 = arith.truncf %127 : vector<16x64xf32> to vector<16x64xbf16>
    %cst_51 = arith.constant dense<0.000000e+00> : vector<16x32xf32>
    %130 = tpu.matmul %129, %128, %cst_51 {dimension_numbers = #tpu.dot_dimension_numbers<[1], [0], [0], [1], [0, 0, 1, 1], [], []>} : vector<16x64xbf16>, vector<64x32xbf16>, vector<16x32xf32> -> vector<16x32xf32>
    %c0_52 = arith.constant 0 : index
    %c0_53 = arith.constant 0 : index
    %131 = vector.load %arg13[%c0_52, %c0_53] : memref<1x32xf32, #tpu.memory_space<vmem>>, vector<1x32xf32>
    %132 = vector.broadcast %131 : vector<1x32xf32> to vector<16x32xf32>
    %133 = arith.addf %130, %132 : vector<16x32xf32>
    %134 = arith.addf %86, %133 : vector<16x32xf32>
    %c0_54 = arith.constant 0 : index
    %c0_55 = arith.constant 0 : index
    %c0_56 = arith.constant 0 : index
    %135 = vector.load %arg14[%c0_54, %c0_55, %c0_56] : memref<1x16x32xf32, #tpu.memory_space<vmem>>, vector<1x16x32xf32>
    %136 = vector.shape_cast %135 : vector<1x16x32xf32> to vector<16x32xf32>
    %137 = vector.shape_cast %134 : vector<16x32xf32> to vector<1x16x32xf32>
    tpu.vector_store %arg14[%c0_54, %c0_55, %c0_56], %137 {strides = array<i32>} : memref<1x16x32xf32, #tpu.memory_space<vmem>>, vector<1x16x32xf32>,
    return
  }
  func.func @transform_0(%arg0: i32) -> (i32, i32, i32) {
    %c0_i32 = arith.constant 0 : i32
    %c0_i32_0 = arith.constant 0 : i32
    %c0_i32_1 = arith.constant 0 : i32
    return %arg0, %c0_i32, %c0_i32_0 : i32, i32, i32
  }
  func.func @transform_1(%arg0: i32) -> (i32, i32) {
    %c0_i32 = arith.constant 0 : i32
    %c0_i32_0 = arith.constant 0 : i32
    %c0_i32_1 = arith.constant 0 : i32
    return %c0_i32, %c0_i32_0 : i32, i32
  }
  func.func @transform_2(%arg0: i32) -> (i32, i32) {
    %c0_i32 = arith.constant 0 : i32
    %c0_i32_0 = arith.constant 0 : i32
    %c0_i32_1 = arith.constant 0 : i32
    return %c0_i32, %c0_i32_0 : i32, i32
  }
  func.func @transform_3(%arg0: i32) -> (i32, i32) {
    %c0_i32 = arith.constant 0 : i32
    %c0_i32_0 = arith.constant 0 : i32
    %c0_i32_1 = arith.constant 0 : i32
    return %c0_i32, %c0_i32_0 : i32, i32
  }
  func.func @transform_4(%arg0: i32) -> (i32, i32) {
    %c0_i32 = arith.constant 0 : i32
    %c0_i32_0 = arith.constant 0 : i32
    %c0_i32_1 = arith.constant 0 : i32
    return %c0_i32, %c0_i32_0 : i32, i32
  }
  func.func @transform_5(%arg0: i32) -> (i32, i32) {
    %c0_i32 = arith.constant 0 : i32
    %c0_i32_0 = arith.constant 0 : i32
    %c0_i32_1 = arith.constant 0 : i32
    return %c0_i32, %c0_i32_0 : i32, i32
  }
  func.func @transform_6(%arg0: i32) -> (i32, i32) {
    %c0_i32 = arith.constant 0 : i32
    %c0_i32_0 = arith.constant 0 : i32
    %c0_i32_1 = arith.constant 0 : i32
    return %c0_i32, %c0_i32_0 : i32, i32
  }
  func.func @transform_7(%arg0: i32) -> (i32, i32) {
    %c0_i32 = arith.constant 0 : i32
    %c0_i32_0 = arith.constant 0 : i32
    %c0_i32_1 = arith.constant 0 : i32
    return %c0_i32, %c0_i32_0 : i32, i32
  }
  func.func @transform_8(%arg0: i32) -> (i32, i32) {
    %c0_i32 = arith.constant 0 : i32
    %c0_i32_0 = arith.constant 0 : i32
    %c0_i32_1 = arith.constant 0 : i32
    return %c0_i32, %c0_i32_0 : i32, i32
  }
  func.func @transform_9(%arg0: i32) -> (i32, i32) {
    %c0_i32 = arith.constant 0 : i32
    %c0_i32_0 = arith.constant 0 : i32
    %c0_i32_1 = arith.constant 0 : i32
    return %c0_i32, %c0_i32_0 : i32, i32
  }
  func.func @transform_10(%arg0: i32) -> (i32, i32) {
    %c0_i32 = arith.constant 0 : i32
    %c0_i32_0 = arith.constant 0 : i32
    %c0_i32_1 = arith.constant 0 : i32
    return %c0_i32, %c0_i32_0 : i32, i32
  }
  func.func @transform_11(%arg0: i32) -> (i32, i32) {
    %c0_i32 = arith.constant 0 : i32
    %c0_i32_0 = arith.constant 0 : i32
    %c0_i32_1 = arith.constant 0 : i32
    return %c0_i32, %c0_i32_0 : i32, i32
  }
  func.func @transform_12(%arg0: i32) -> (i32, i32) {
    %c0_i32 = arith.constant 0 : i32
    %c0_i32_0 = arith.constant 0 : i32
    %c0_i32_1 = arith.constant 0 : i32
    return %c0_i32, %c0_i32_0 : i32, i32
  }
  func.func @transform_13(%arg0: i32) -> (i32, i32, i32) {
    %c0_i32 = arith.constant 0 : i32
    %c0_i32_0 = arith.constant 0 : i32
    %c0_i32_1 = arith.constant 0 : i32
    return %arg0, %c0_i32, %c0_i32_0 : i32, i32, i32
  }
}

module attributes {stable_mosaic.version = 11 : i64} {
  func.func @_linear_ln_kernel(%arg0: i32, %arg1: memref<32x32xf32, #tpu.memory_space<vmem>>, %arg2: memref<32x32xbf16, #tpu.memory_space<vmem>>, %arg3: memref<1x32xf32, #tpu.memory_space<vmem>>, %arg4: memref<1x32xf32, #tpu.memory_space<vmem>>, %arg5: memref<1x32xf32, #tpu.memory_space<vmem>>, %arg6: memref<32x32xf32, #tpu.memory_space<vmem>>) attributes {dimension_semantics = [#tpu.dimension_semantics<arbitrary>], iteration_bounds = array<i64: 1>, scalar_prefetch = 0 : i64, scratch_operands = 0 : i64, tpu.core_type = #tpu.core_type<tc>, window_params = [{pipeline_mode = #tpu.pipeline_mode<synchronous>, transform_indices = @transform_0, window_bounds = array<i64: 32, 32>}, {pipeline_mode = #tpu.pipeline_mode<synchronous>, transform_indices = @transform_1, window_bounds = array<i64: 32, 32>}, {pipeline_mode = #tpu.pipeline_mode<synchronous>, transform_indices = @transform_2, window_bounds = array<i64: 1, 32>}, {pipeline_mode = #tpu.pipeline_mode<synchronous>, transform_indices = @transform_3, window_bounds = array<i64: 1, 32>}, {pipeline_mode = #tpu.pipeline_mode<synchronous>, transform_indices = @transform_4, window_bounds = array<i64: 1, 32>}, {pipeline_mode = #tpu.pipeline_mode<synchronous>, transform_indices = @transform_5, window_bounds = array<i64: 32, 32>}]} {
    %c0 = arith.constant 0 : index
    %c0_0 = arith.constant 0 : index
    %0 = vector.load %arg1[%c0, %c0_0] : memref<32x32xf32, #tpu.memory_space<vmem>>, vector<32x32xf32>
    %c0_1 = arith.constant 0 : index
    %c0_2 = arith.constant 0 : index
    %1 = vector.load %arg2[%c0_1, %c0_2] : memref<32x32xbf16, #tpu.memory_space<vmem>>, vector<32x32xbf16>
    %2 = arith.truncf %0 : vector<32x32xf32> to vector<32x32xbf16>
    %cst = arith.constant dense<0.000000e+00> : vector<32x32xf32>
    %3 = tpu.matmul %2, %1, %cst {dimension_numbers = #tpu.dot_dimension_numbers<[1], [0], [0], [1], [0, 0, 1, 1], [], []>} : vector<32x32xbf16>, vector<32x32xbf16>, vector<32x32xf32> -> vector<32x32xf32>
    %c0_3 = arith.constant 0 : index
    %c0_4 = arith.constant 0 : index
    %4 = vector.load %arg3[%c0_3, %c0_4] : memref<1x32xf32, #tpu.memory_space<vmem>>, vector<1x32xf32>
    %5 = vector.broadcast %4 : vector<1x32xf32> to vector<32x32xf32>
    %6 = arith.addf %3, %5 : vector<32x32xf32>
    %c0_5 = arith.constant 0 : index
    %c0_6 = arith.constant 0 : index
    %7 = vector.load %arg4[%c0_5, %c0_6] : memref<1x32xf32, #tpu.memory_space<vmem>>, vector<1x32xf32>
    %c0_7 = arith.constant 0 : index
    %c0_8 = arith.constant 0 : index
    %8 = vector.load %arg5[%c0_7, %c0_8] : memref<1x32xf32, #tpu.memory_space<vmem>>, vector<1x32xf32>
    %cst_9 = arith.constant dense<0.000000e+00> : vector<32xf32>
    %9 = vector.multi_reduction <add>, %6, %cst_9 [1] : vector<32x32xf32> to vector<32xf32>
    %10 = vector.shape_cast %9 : vector<32xf32> to vector<32x1xf32>
    %cst_10 = arith.constant 3.200000e+01 : f32
    %11 = vector.broadcast %cst_10 : f32 to vector<32x1xf32>
    %12 = arith.divf %10, %11 : vector<32x1xf32>
    %13 = vector.broadcast %12 : vector<32x1xf32> to vector<32x32xf32>
    %14 = arith.subf %6, %13 : vector<32x32xf32>
    %15 = arith.mulf %14, %14 : vector<32x32xf32>
    %cst_11 = arith.constant dense<0.000000e+00> : vector<32xf32>
    %16 = vector.multi_reduction <add>, %15, %cst_11 [1] : vector<32x32xf32> to vector<32xf32>
    %17 = vector.shape_cast %16 : vector<32xf32> to vector<32x1xf32>
    %cst_12 = arith.constant 3.200000e+01 : f32
    %18 = vector.broadcast %cst_12 : f32 to vector<32x1xf32>
    %19 = arith.divf %17, %18 : vector<32x1xf32>
    %cst_13 = arith.constant 9.99999997E-7 : f32
    %20 = vector.broadcast %cst_13 : f32 to vector<32x1xf32>
    %21 = arith.addf %19, %20 : vector<32x1xf32>
    %22 = math.rsqrt %21 : vector<32x1xf32>
    %23 = vector.broadcast %22 : vector<32x1xf32> to vector<32x32xf32>
    %24 = arith.mulf %14, %23 : vector<32x32xf32>
    %25 = vector.broadcast %7 : vector<1x32xf32> to vector<32x32xf32>
    %26 = arith.mulf %24, %25 : vector<32x32xf32>
    %27 = vector.broadcast %8 : vector<1x32xf32> to vector<32x32xf32>
    %28 = arith.addf %26, %27 : vector<32x32xf32>
    %c0_14 = arith.constant 0 : index
    %c0_15 = arith.constant 0 : index
    %29 = vector.load %arg6[%c0_14, %c0_15] : memref<32x32xf32, #tpu.memory_space<vmem>>, vector<32x32xf32>
    tpu.vector_store %arg6[%c0_14, %c0_15], %28 {strides = array<i32>} : memref<32x32xf32, #tpu.memory_space<vmem>>, vector<32x32xf32>,
    return
  }
  func.func @transform_0(%arg0: i32) -> (i32, i32) {
    %c0_i32 = arith.constant 0 : i32
    %c0_i32_0 = arith.constant 0 : i32
    %c0_i32_1 = arith.constant 0 : i32
    return %c0_i32, %c0_i32_0 : i32, i32
  }
  func.func @transform_1(%arg0: i32) -> (i32, i32) {
    %c0_i32 = arith.constant 0 : i32
    %c0_i32_0 = arith.constant 0 : i32
    %c0_i32_1 = arith.constant 0 : i32
    return %c0_i32, %c0_i32_0 : i32, i32
  }
  func.func @transform_2(%arg0: i32) -> (i32, i32) {
    %c0_i32 = arith.constant 0 : i32
    %c0_i32_0 = arith.constant 0 : i32
    %c0_i32_1 = arith.constant 0 : i32
    return %c0_i32, %c0_i32_0 : i32, i32
  }
  func.func @transform_3(%arg0: i32) -> (i32, i32) {
    %c0_i32 = arith.constant 0 : i32
    %c0_i32_0 = arith.constant 0 : i32
    %c0_i32_1 = arith.constant 0 : i32
    return %c0_i32, %c0_i32_0 : i32, i32
  }
  func.func @transform_4(%arg0: i32) -> (i32, i32) {
    %c0_i32 = arith.constant 0 : i32
    %c0_i32_0 = arith.constant 0 : i32
    %c0_i32_1 = arith.constant 0 : i32
    return %c0_i32, %c0_i32_0 : i32, i32
  }
  func.func @transform_5(%arg0: i32) -> (i32, i32) {
    %c0_i32 = arith.constant 0 : i32
    %c0_i32_0 = arith.constant 0 : i32
    %c0_i32_1 = arith.constant 0 : i32
    return %c0_i32, %c0_i32_0 : i32, i32
  }
}

module attributes {stable_mosaic.version = 11 : i64} {
  func.func @_linear_ln_kernel(%arg0: i32, %arg1: memref<32x288xf32, #tpu.memory_space<vmem>>, %arg2: memref<288x32xbf16, #tpu.memory_space<vmem>>, %arg3: memref<1x32xf32, #tpu.memory_space<vmem>>, %arg4: memref<1x32xf32, #tpu.memory_space<vmem>>, %arg5: memref<1x32xf32, #tpu.memory_space<vmem>>, %arg6: memref<32x32xf32, #tpu.memory_space<vmem>>) attributes {dimension_semantics = [#tpu.dimension_semantics<arbitrary>], iteration_bounds = array<i64: 1>, scalar_prefetch = 0 : i64, scratch_operands = 0 : i64, tpu.core_type = #tpu.core_type<tc>, window_params = [{pipeline_mode = #tpu.pipeline_mode<synchronous>, transform_indices = @transform_0, window_bounds = array<i64: 32, 288>}, {pipeline_mode = #tpu.pipeline_mode<synchronous>, transform_indices = @transform_1, window_bounds = array<i64: 288, 32>}, {pipeline_mode = #tpu.pipeline_mode<synchronous>, transform_indices = @transform_2, window_bounds = array<i64: 1, 32>}, {pipeline_mode = #tpu.pipeline_mode<synchronous>, transform_indices = @transform_3, window_bounds = array<i64: 1, 32>}, {pipeline_mode = #tpu.pipeline_mode<synchronous>, transform_indices = @transform_4, window_bounds = array<i64: 1, 32>}, {pipeline_mode = #tpu.pipeline_mode<synchronous>, transform_indices = @transform_5, window_bounds = array<i64: 32, 32>}]} {
    %c0 = arith.constant 0 : index
    %c0_0 = arith.constant 0 : index
    %0 = vector.load %arg1[%c0, %c0_0] : memref<32x288xf32, #tpu.memory_space<vmem>>, vector<32x288xf32>
    %c0_1 = arith.constant 0 : index
    %c0_2 = arith.constant 0 : index
    %1 = vector.load %arg2[%c0_1, %c0_2] : memref<288x32xbf16, #tpu.memory_space<vmem>>, vector<288x32xbf16>
    %2 = arith.truncf %0 : vector<32x288xf32> to vector<32x288xbf16>
    %cst = arith.constant dense<0.000000e+00> : vector<32x32xf32>
    %3 = tpu.matmul %2, %1, %cst {dimension_numbers = #tpu.dot_dimension_numbers<[1], [0], [0], [1], [0, 0, 1, 1], [], []>} : vector<32x288xbf16>, vector<288x32xbf16>, vector<32x32xf32> -> vector<32x32xf32>
    %c0_3 = arith.constant 0 : index
    %c0_4 = arith.constant 0 : index
    %4 = vector.load %arg3[%c0_3, %c0_4] : memref<1x32xf32, #tpu.memory_space<vmem>>, vector<1x32xf32>
    %5 = vector.broadcast %4 : vector<1x32xf32> to vector<32x32xf32>
    %6 = arith.addf %3, %5 : vector<32x32xf32>
    %c0_5 = arith.constant 0 : index
    %c0_6 = arith.constant 0 : index
    %7 = vector.load %arg4[%c0_5, %c0_6] : memref<1x32xf32, #tpu.memory_space<vmem>>, vector<1x32xf32>
    %c0_7 = arith.constant 0 : index
    %c0_8 = arith.constant 0 : index
    %8 = vector.load %arg5[%c0_7, %c0_8] : memref<1x32xf32, #tpu.memory_space<vmem>>, vector<1x32xf32>
    %cst_9 = arith.constant dense<0.000000e+00> : vector<32xf32>
    %9 = vector.multi_reduction <add>, %6, %cst_9 [1] : vector<32x32xf32> to vector<32xf32>
    %10 = vector.shape_cast %9 : vector<32xf32> to vector<32x1xf32>
    %cst_10 = arith.constant 3.200000e+01 : f32
    %11 = vector.broadcast %cst_10 : f32 to vector<32x1xf32>
    %12 = arith.divf %10, %11 : vector<32x1xf32>
    %13 = vector.broadcast %12 : vector<32x1xf32> to vector<32x32xf32>
    %14 = arith.subf %6, %13 : vector<32x32xf32>
    %15 = arith.mulf %14, %14 : vector<32x32xf32>
    %cst_11 = arith.constant dense<0.000000e+00> : vector<32xf32>
    %16 = vector.multi_reduction <add>, %15, %cst_11 [1] : vector<32x32xf32> to vector<32xf32>
    %17 = vector.shape_cast %16 : vector<32xf32> to vector<32x1xf32>
    %cst_12 = arith.constant 3.200000e+01 : f32
    %18 = vector.broadcast %cst_12 : f32 to vector<32x1xf32>
    %19 = arith.divf %17, %18 : vector<32x1xf32>
    %cst_13 = arith.constant 9.99999997E-7 : f32
    %20 = vector.broadcast %cst_13 : f32 to vector<32x1xf32>
    %21 = arith.addf %19, %20 : vector<32x1xf32>
    %22 = math.rsqrt %21 : vector<32x1xf32>
    %23 = vector.broadcast %22 : vector<32x1xf32> to vector<32x32xf32>
    %24 = arith.mulf %14, %23 : vector<32x32xf32>
    %25 = vector.broadcast %7 : vector<1x32xf32> to vector<32x32xf32>
    %26 = arith.mulf %24, %25 : vector<32x32xf32>
    %27 = vector.broadcast %8 : vector<1x32xf32> to vector<32x32xf32>
    %28 = arith.addf %26, %27 : vector<32x32xf32>
    %c0_14 = arith.constant 0 : index
    %c0_15 = arith.constant 0 : index
    %29 = vector.load %arg6[%c0_14, %c0_15] : memref<32x32xf32, #tpu.memory_space<vmem>>, vector<32x32xf32>
    tpu.vector_store %arg6[%c0_14, %c0_15], %28 {strides = array<i32>} : memref<32x32xf32, #tpu.memory_space<vmem>>, vector<32x32xf32>,
    return
  }
  func.func @transform_0(%arg0: i32) -> (i32, i32) {
    %c0_i32 = arith.constant 0 : i32
    %c0_i32_0 = arith.constant 0 : i32
    %c0_i32_1 = arith.constant 0 : i32
    return %c0_i32, %c0_i32_0 : i32, i32
  }
  func.func @transform_1(%arg0: i32) -> (i32, i32) {
    %c0_i32 = arith.constant 0 : i32
    %c0_i32_0 = arith.constant 0 : i32
    %c0_i32_1 = arith.constant 0 : i32
    return %c0_i32, %c0_i32_0 : i32, i32
  }
  func.func @transform_2(%arg0: i32) -> (i32, i32) {
    %c0_i32 = arith.constant 0 : i32
    %c0_i32_0 = arith.constant 0 : i32
    %c0_i32_1 = arith.constant 0 : i32
    return %c0_i32, %c0_i32_0 : i32, i32
  }
  func.func @transform_3(%arg0: i32) -> (i32, i32) {
    %c0_i32 = arith.constant 0 : i32
    %c0_i32_0 = arith.constant 0 : i32
    %c0_i32_1 = arith.constant 0 : i32
    return %c0_i32, %c0_i32_0 : i32, i32
  }
  func.func @transform_4(%arg0: i32) -> (i32, i32) {
    %c0_i32 = arith.constant 0 : i32
    %c0_i32_0 = arith.constant 0 : i32
    %c0_i32_1 = arith.constant 0 : i32
    return %c0_i32, %c0_i32_0 : i32, i32
  }
  func.func @transform_5(%arg0: i32) -> (i32, i32) {
    %c0_i32 = arith.constant 0 : i32
    %c0_i32_0 = arith.constant 0 : i32
    %c0_i32_1 = arith.constant 0 : i32
    return %c0_i32, %c0_i32_0 : i32, i32
  }
}

module attributes {stable_mosaic.version = 11 : i64} {
  func.func @_twoway_block_kernel(%arg0: i32, %arg1: memref<1x5x32xf32, #tpu.memory_space<vmem>>, %arg2: memref<1x16x32xf32, #tpu.memory_space<vmem>>, %arg3: memref<1x5x32xf32, #tpu.memory_space<vmem>>, %arg4: memref<1x16x32xf32, #tpu.memory_space<vmem>>, %arg5: memref<3x32x32xbf16, #tpu.memory_space<vmem>>, %arg6: memref<3x1x32xf32, #tpu.memory_space<vmem>>, %arg7: memref<32x32xbf16, #tpu.memory_space<vmem>>, %arg8: memref<1x32xf32, #tpu.memory_space<vmem>>, %arg9: memref<1x32xf32, #tpu.memory_space<vmem>>, %arg10: memref<1x32xf32, #tpu.memory_space<vmem>>, %arg11: memref<3x32x16xbf16, #tpu.memory_space<vmem>>, %arg12: memref<3x1x16xf32, #tpu.memory_space<vmem>>, %arg13: memref<16x32xbf16, #tpu.memory_space<vmem>>, %arg14: memref<1x32xf32, #tpu.memory_space<vmem>>, %arg15: memref<1x32xf32, #tpu.memory_space<vmem>>, %arg16: memref<1x32xf32, #tpu.memory_space<vmem>>, %arg17: memref<32x64xbf16, #tpu.memory_space<vmem>>, %arg18: memref<1x64xf32, #tpu.memory_space<vmem>>, %arg19: memref<64x32xbf16, #tpu.memory_space<vmem>>, %arg20: memref<1x32xf32, #tpu.memory_space<vmem>>, %arg21: memref<1x32xf32, #tpu.memory_space<vmem>>, %arg22: memref<1x32xf32, #tpu.memory_space<vmem>>, %arg23: memref<3x32x16xbf16, #tpu.memory_space<vmem>>, %arg24: memref<3x1x16xf32, #tpu.memory_space<vmem>>, %arg25: memref<16x32xbf16, #tpu.memory_space<vmem>>, %arg26: memref<1x32xf32, #tpu.memory_space<vmem>>, %arg27: memref<1x32xf32, #tpu.memory_space<vmem>>, %arg28: memref<1x32xf32, #tpu.memory_space<vmem>>, %arg29: memref<1x5x32xf32, #tpu.memory_space<vmem>>, %arg30: memref<1x16x32xf32, #tpu.memory_space<vmem>>) attributes {dimension_semantics = [#tpu.dimension_semantics<parallel>], iteration_bounds = array<i64: 2>, scalar_prefetch = 0 : i64, scratch_operands = 0 : i64, tpu.core_type = #tpu.core_type<tc>, window_params = [{transform_indices = @transform_0, window_bounds = array<i64: 1, 5, 32>}, {transform_indices = @transform_1, window_bounds = array<i64: 1, 16, 32>}, {transform_indices = @transform_2, window_bounds = array<i64: 1, 5, 32>}, {pipeline_mode = #tpu.pipeline_mode<synchronous>, transform_indices = @transform_3, window_bounds = array<i64: 1, 16, 32>}, {pipeline_mode = #tpu.pipeline_mode<synchronous>, transform_indices = @transform_4, window_bounds = array<i64: 3, 32, 32>}, {pipeline_mode = #tpu.pipeline_mode<synchronous>, transform_indices = @transform_5, window_bounds = array<i64: 3, 1, 32>}, {pipeline_mode = #tpu.pipeline_mode<synchronous>, transform_indices = @transform_6, window_bounds = array<i64: 32, 32>}, {pipeline_mode = #tpu.pipeline_mode<synchronous>, transform_indices = @transform_7, window_bounds = array<i64: 1, 32>}, {pipeline_mode = #tpu.pipeline_mode<synchronous>, transform_indices = @transform_8, window_bounds = array<i64: 1, 32>}, {pipeline_mode = #tpu.pipeline_mode<synchronous>, transform_indices = @transform_9, window_bounds = array<i64: 1, 32>}, {pipeline_mode = #tpu.pipeline_mode<synchronous>, transform_indices = @transform_10, window_bounds = array<i64: 3, 32, 16>}, {pipeline_mode = #tpu.pipeline_mode<synchronous>, transform_indices = @transform_11, window_bounds = array<i64: 3, 1, 16>}, {pipeline_mode = #tpu.pipeline_mode<synchronous>, transform_indices = @transform_12, window_bounds = array<i64: 16, 32>}, {pipeline_mode = #tpu.pipeline_mode<synchronous>, transform_indices = @transform_13, window_bounds = array<i64: 1, 32>}, {pipeline_mode = #tpu.pipeline_mode<synchronous>, transform_indices = @transform_14, window_bounds = array<i64: 1, 32>}, {pipeline_mode = #tpu.pipeline_mode<synchronous>, transform_indices = @transform_15, window_bounds = array<i64: 1, 32>}, {pipeline_mode = #tpu.pipeline_mode<synchronous>, transform_indices = @transform_16, window_bounds = array<i64: 32, 64>}, {pipeline_mode = #tpu.pipeline_mode<synchronous>, transform_indices = @transform_17, window_bounds = array<i64: 1, 64>}, {pipeline_mode = #tpu.pipeline_mode<synchronous>, transform_indices = @transform_18, window_bounds = array<i64: 64, 32>}, {pipeline_mode = #tpu.pipeline_mode<synchronous>, transform_indices = @transform_19, window_bounds = array<i64: 1, 32>}, {pipeline_mode = #tpu.pipeline_mode<synchronous>, transform_indices = @transform_20, window_bounds = array<i64: 1, 32>}, {pipeline_mode = #tpu.pipeline_mode<synchronous>, transform_indices = @transform_21, window_bounds = array<i64: 1, 32>}, {pipeline_mode = #tpu.pipeline_mode<synchronous>, transform_indices = @transform_22, window_bounds = array<i64: 3, 32, 16>}, {pipeline_mode = #tpu.pipeline_mode<synchronous>, transform_indices = @transform_23, window_bounds = array<i64: 3, 1, 16>}, {pipeline_mode = #tpu.pipeline_mode<synchronous>, transform_indices = @transform_24, window_bounds = array<i64: 16, 32>}, {pipeline_mode = #tpu.pipeline_mode<synchronous>, transform_indices = @transform_25, window_bounds = array<i64: 1, 32>}, {pipeline_mode = #tpu.pipeline_mode<synchronous>, transform_indices = @transform_26, window_bounds = array<i64: 1, 32>}, {pipeline_mode = #tpu.pipeline_mode<synchronous>, transform_indices = @transform_27, window_bounds = array<i64: 1, 32>}, {transform_indices = @transform_28, window_bounds = array<i64: 1, 5, 32>}, {transform_indices = @transform_29, window_bounds = array<i64: 1, 16, 32>}]} {
    %c0 = arith.constant 0 : index
    %c0_0 = arith.constant 0 : index
    %c0_1 = arith.constant 0 : index
    %0 = vector.load %arg1[%c0, %c0_0, %c0_1] : memref<1x5x32xf32, #tpu.memory_space<vmem>>, vector<1x5x32xf32>
    %1 = vector.shape_cast %0 : vector<1x5x32xf32> to vector<5x32xf32>
    %c0_2 = arith.constant 0 : index
    %c0_3 = arith.constant 0 : index
    %c0_4 = arith.constant 0 : index
    %2 = vector.load %arg2[%c0_2, %c0_3, %c0_4] : memref<1x16x32xf32, #tpu.memory_space<vmem>>, vector<1x16x32xf32>
    %3 = vector.shape_cast %2 : vector<1x16x32xf32> to vector<16x32xf32>
    %c0_5 = arith.constant 0 : index
    %c0_6 = arith.constant 0 : index
    %c0_7 = arith.constant 0 : index
    %4 = vector.load %arg3[%c0_5, %c0_6, %c0_7] : memref<1x5x32xf32, #tpu.memory_space<vmem>>, vector<1x5x32xf32>
    %5 = vector.shape_cast %4 : vector<1x5x32xf32> to vector<5x32xf32>
    %c0_8 = arith.constant 0 : index
    %c0_9 = arith.constant 0 : index
    %c0_10 = arith.constant 0 : index
    %6 = vector.load %arg4[%c0_8, %c0_9, %c0_10] : memref<1x16x32xf32, #tpu.memory_space<vmem>>, vector<1x16x32xf32>
    %7 = vector.shape_cast %6 : vector<1x16x32xf32> to vector<16x32xf32>
    %c0_11 = arith.constant 0 : index
    %c0_12 = arith.constant 0 : index
    %c0_13 = arith.constant 0 : index
    %8 = vector.load %arg5[%c0_11, %c0_12, %c0_13] : memref<3x32x32xbf16, #tpu.memory_space<vmem>>, vector<1x32x32xbf16>
    %9 = vector.shape_cast %8 : vector<1x32x32xbf16> to vector<32x32xbf16>
    %10 = arith.truncf %1 : vector<5x32xf32> to vector<5x32xbf16>
    %cst = arith.constant dense<0.000000e+00> : vector<5x32xf32>
    %11 = tpu.matmul %10, %9, %cst {dimension_numbers = #tpu.dot_dimension_numbers<[1], [0], [0], [1], [0, 0, 1, 1], [], []>} : vector<5x32xbf16>, vector<32x32xbf16>, vector<5x32xf32> -> vector<5x32xf32>
    %c0_14 = arith.constant 0 : index
    %c0_15 = arith.constant 0 : index
    %c0_16 = arith.constant 0 : index
    %12 = vector.load %arg6[%c0_14, %c0_15, %c0_16] : memref<3x1x32xf32, #tpu.memory_space<vmem>>, vector<1x1x32xf32>
    %13 = vector.shape_cast %12 : vector<1x1x32xf32> to vector<1x32xf32>
    %14 = vector.broadcast %13 : vector<1x32xf32> to vector<5x32xf32>
    %15 = arith.addf %11, %14 : vector<5x32xf32>
    %c1 = arith.constant 1 : index
    %c0_17 = arith.constant 0 : index
    %c0_18 = arith.constant 0 : index
    %16 = vector.load %arg5[%c1, %c0_17, %c0_18] : memref<3x32x32xbf16, #tpu.memory_space<vmem>>, vector<1x32x32xbf16>
    %17 = vector.shape_cast %16 : vector<1x32x32xbf16> to vector<32x32xbf16>
    %18 = arith.truncf %1 : vector<5x32xf32> to vector<5x32xbf16>
    %cst_19 = arith.constant dense<0.000000e+00> : vector<5x32xf32>
    %19 = tpu.matmul %18, %17, %cst_19 {dimension_numbers = #tpu.dot_dimension_numbers<[1], [0], [0], [1], [0, 0, 1, 1], [], []>} : vector<5x32xbf16>, vector<32x32xbf16>, vector<5x32xf32> -> vector<5x32xf32>
    %c1_20 = arith.constant 1 : index
    %c0_21 = arith.constant 0 : index
    %c0_22 = arith.constant 0 : index
    %20 = vector.load %arg6[%c1_20, %c0_21, %c0_22] : memref<3x1x32xf32, #tpu.memory_space<vmem>>, vector<1x1x32xf32>
    %21 = vector.shape_cast %20 : vector<1x1x32xf32> to vector<1x32xf32>
    %22 = vector.broadcast %21 : vector<1x32xf32> to vector<5x32xf32>
    %23 = arith.addf %19, %22 : vector<5x32xf32>
    %c2 = arith.constant 2 : index
    %c0_23 = arith.constant 0 : index
    %c0_24 = arith.constant 0 : index
    %24 = vector.load %arg5[%c2, %c0_23, %c0_24] : memref<3x32x32xbf16, #tpu.memory_space<vmem>>, vector<1x32x32xbf16>
    %25 = vector.shape_cast %24 : vector<1x32x32xbf16> to vector<32x32xbf16>
    %26 = arith.truncf %1 : vector<5x32xf32> to vector<5x32xbf16>
    %cst_25 = arith.constant dense<0.000000e+00> : vector<5x32xf32>
    %27 = tpu.matmul %26, %25, %cst_25 {dimension_numbers = #tpu.dot_dimension_numbers<[1], [0], [0], [1], [0, 0, 1, 1], [], []>} : vector<5x32xbf16>, vector<32x32xbf16>, vector<5x32xf32> -> vector<5x32xf32>
    %c2_26 = arith.constant 2 : index
    %c0_27 = arith.constant 0 : index
    %c0_28 = arith.constant 0 : index
    %28 = vector.load %arg6[%c2_26, %c0_27, %c0_28] : memref<3x1x32xf32, #tpu.memory_space<vmem>>, vector<1x1x32xf32>
    %29 = vector.shape_cast %28 : vector<1x1x32xf32> to vector<1x32xf32>
    %30 = vector.broadcast %29 : vector<1x32xf32> to vector<5x32xf32>
    %31 = arith.addf %27, %30 : vector<5x32xf32>
    %c0_29 = arith.constant 0 : index
    %c0_30 = arith.constant 0 : index
    %32 = vector.load %arg7[%c0_29, %c0_30] : memref<32x32xbf16, #tpu.memory_space<vmem>>, vector<32x32xbf16>
    %33 = vector.extract_strided_slice %15 {offsets = [0, 0], sizes = [5, 16], strides = [1, 1]} : vector<5x32xf32> to vector<5x16xf32>
    %34 = vector.extract_strided_slice %23 {offsets = [0, 0], sizes = [5, 16], strides = [1, 1]} : vector<5x32xf32> to vector<5x16xf32>
    %35 = vector.extract_strided_slice %31 {offsets = [0, 0], sizes = [5, 16], strides = [1, 1]} : vector<5x32xf32> to vector<5x16xf32>
    %36 = arith.truncf %33 : vector<5x16xf32> to vector<5x16xbf16>
    %37 = arith.truncf %34 : vector<5x16xf32> to vector<5x16xbf16>
    %cst_31 = arith.constant dense<0.000000e+00> : vector<5x5xf32>
    %38 = tpu.matmul %36, %37, %cst_31 {dimension_numbers = #tpu.dot_dimension_numbers<[1], [1], [0], [0], [0, 0, 1, 0], [], []>} : vector<5x16xbf16>, vector<5x16xbf16>, vector<5x5xf32> -> vector<5x5xf32>
    %cst_32 = arith.constant 2.500000e-01 : f32
    %39 = vector.broadcast %cst_32 : f32 to vector<5x5xf32>
    %40 = arith.mulf %38, %39 : vector<5x5xf32>
    %cst_33 = arith.constant dense<0xFF800000> : vector<5xf32>
    %41 = vector.multi_reduction <maximumf>, %40, %cst_33 [1] : vector<5x5xf32> to vector<5xf32>
    %42 = vector.shape_cast %41 : vector<5xf32> to vector<5x1xf32>
    %43 = vector.broadcast %42 : vector<5x1xf32> to vector<5x5xf32>
    %44 = arith.subf %40, %43 : vector<5x5xf32>
    %45 = math.exp %44 : vector<5x5xf32>
    %cst_34 = arith.constant dense<0.000000e+00> : vector<5xf32>
    %46 = vector.multi_reduction <add>, %45, %cst_34 [1] : vector<5x5xf32> to vector<5xf32>
    %47 = vector.shape_cast %46 : vector<5xf32> to vector<5x1xf32>
    %48 = tpu.reciprocal %47 {approx = true} : vector<5x1xf32> -> vector<5x1xf32>
    %49 = vector.broadcast %48 : vector<5x1xf32> to vector<5x5xf32>
    %50 = arith.mulf %45, %49 : vector<5x5xf32>
    %51 = arith.truncf %50 : vector<5x5xf32> to vector<5x5xbf16>
    %52 = arith.truncf %35 : vector<5x16xf32> to vector<5x16xbf16>
    %cst_35 = arith.constant dense<0.000000e+00> : vector<5x16xf32>
    %53 = tpu.matmul %51, %52, %cst_35 {dimension_numbers = #tpu.dot_dimension_numbers<[1], [0], [0], [1], [0, 0, 1, 1], [], []>} : vector<5x5xbf16>, vector<5x16xbf16>, vector<5x16xf32> -> vector<5x16xf32>
    %54 = vector.extract_strided_slice %32 {offsets = [0, 0], sizes = [16, 32], strides = [1, 1]} : vector<32x32xbf16> to vector<16x32xbf16>
    %55 = arith.truncf %53 : vector<5x16xf32> to vector<5x16xbf16>
    %cst_36 = arith.constant dense<0.000000e+00> : vector<5x32xf32>
    %56 = tpu.matmul %55, %54, %cst_36 {dimension_numbers = #tpu.dot_dimension_numbers<[1], [0], [0], [1], [0, 0, 1, 1], [], []>} : vector<5x16xbf16>, vector<16x32xbf16>, vector<5x32xf32> -> vector<5x32xf32>
    %57 = vector.extract_strided_slice %15 {offsets = [0, 16], sizes = [5, 16], strides = [1, 1]} : vector<5x32xf32> to vector<5x16xf32>
    %58 = vector.extract_strided_slice %23 {offsets = [0, 16], sizes = [5, 16], strides = [1, 1]} : vector<5x32xf32> to vector<5x16xf32>
    %59 = vector.extract_strided_slice %31 {offsets = [0, 16], sizes = [5, 16], strides = [1, 1]} : vector<5x32xf32> to vector<5x16xf32>
    %60 = arith.truncf %57 : vector<5x16xf32> to vector<5x16xbf16>
    %61 = arith.truncf %58 : vector<5x16xf32> to vector<5x16xbf16>
    %cst_37 = arith.constant dense<0.000000e+00> : vector<5x5xf32>
    %62 = tpu.matmul %60, %61, %cst_37 {dimension_numbers = #tpu.dot_dimension_numbers<[1], [1], [0], [0], [0, 0, 1, 0], [], []>} : vector<5x16xbf16>, vector<5x16xbf16>, vector<5x5xf32> -> vector<5x5xf32>
    %cst_38 = arith.constant 2.500000e-01 : f32
    %63 = vector.broadcast %cst_38 : f32 to vector<5x5xf32>
    %64 = arith.mulf %62, %63 : vector<5x5xf32>
    %cst_39 = arith.constant dense<0xFF800000> : vector<5xf32>
    %65 = vector.multi_reduction <maximumf>, %64, %cst_39 [1] : vector<5x5xf32> to vector<5xf32>
    %66 = vector.shape_cast %65 : vector<5xf32> to vector<5x1xf32>
    %67 = vector.broadcast %66 : vector<5x1xf32> to vector<5x5xf32>
    %68 = arith.subf %64, %67 : vector<5x5xf32>
    %69 = math.exp %68 : vector<5x5xf32>
    %cst_40 = arith.constant dense<0.000000e+00> : vector<5xf32>
    %70 = vector.multi_reduction <add>, %69, %cst_40 [1] : vector<5x5xf32> to vector<5xf32>
    %71 = vector.shape_cast %70 : vector<5xf32> to vector<5x1xf32>
    %72 = tpu.reciprocal %71 {approx = true} : vector<5x1xf32> -> vector<5x1xf32>
    %73 = vector.broadcast %72 : vector<5x1xf32> to vector<5x5xf32>
    %74 = arith.mulf %69, %73 : vector<5x5xf32>
    %75 = arith.truncf %74 : vector<5x5xf32> to vector<5x5xbf16>
    %76 = arith.truncf %59 : vector<5x16xf32> to vector<5x16xbf16>
    %cst_41 = arith.constant dense<0.000000e+00> : vector<5x16xf32>
    %77 = tpu.matmul %75, %76, %cst_41 {dimension_numbers = #tpu.dot_dimension_numbers<[1], [0], [0], [1], [0, 0, 1, 1], [], []>} : vector<5x5xbf16>, vector<5x16xbf16>, vector<5x16xf32> -> vector<5x16xf32>
    %78 = vector.extract_strided_slice %32 {offsets = [16, 0], sizes = [16, 32], strides = [1, 1]} : vector<32x32xbf16> to vector<16x32xbf16>
    %79 = arith.truncf %77 : vector<5x16xf32> to vector<5x16xbf16>
    %cst_42 = arith.constant dense<0.000000e+00> : vector<5x32xf32>
    %80 = tpu.matmul %79, %78, %cst_42 {dimension_numbers = #tpu.dot_dimension_numbers<[1], [0], [0], [1], [0, 0, 1, 1], [], []>} : vector<5x16xbf16>, vector<16x32xbf16>, vector<5x32xf32> -> vector<5x32xf32>
    %81 = arith.addf %56, %80 : vector<5x32xf32>
    %c0_43 = arith.constant 0 : index
    %c0_44 = arith.constant 0 : index
    %82 = vector.load %arg8[%c0_43, %c0_44] : memref<1x32xf32, #tpu.memory_space<vmem>>, vector<1x32xf32>
    %83 = vector.broadcast %82 : vector<1x32xf32> to vector<5x32xf32>
    %84 = arith.addf %81, %83 : vector<5x32xf32>
    %c0_45 = arith.constant 0 : index
    %c0_46 = arith.constant 0 : index
    %85 = vector.load %arg9[%c0_45, %c0_46] : memref<1x32xf32, #tpu.memory_space<vmem>>, vector<1x32xf32>
    %c0_47 = arith.constant 0 : index
    %c0_48 = arith.constant 0 : index
    %86 = vector.load %arg10[%c0_47, %c0_48] : memref<1x32xf32, #tpu.memory_space<vmem>>, vector<1x32xf32>
    %cst_49 = arith.constant dense<0.000000e+00> : vector<5xf32>
    %87 = vector.multi_reduction <add>, %84, %cst_49 [1] : vector<5x32xf32> to vector<5xf32>
    %88 = vector.shape_cast %87 : vector<5xf32> to vector<5x1xf32>
    %cst_50 = arith.constant 3.200000e+01 : f32
    %89 = vector.broadcast %cst_50 : f32 to vector<5x1xf32>
    %90 = arith.divf %88, %89 : vector<5x1xf32>
    %91 = vector.broadcast %90 : vector<5x1xf32> to vector<5x32xf32>
    %92 = arith.subf %84, %91 : vector<5x32xf32>
    %93 = arith.mulf %92, %92 : vector<5x32xf32>
    %cst_51 = arith.constant dense<0.000000e+00> : vector<5xf32>
    %94 = vector.multi_reduction <add>, %93, %cst_51 [1] : vector<5x32xf32> to vector<5xf32>
    %95 = vector.shape_cast %94 : vector<5xf32> to vector<5x1xf32>
    %cst_52 = arith.constant 3.200000e+01 : f32
    %96 = vector.broadcast %cst_52 : f32 to vector<5x1xf32>
    %97 = arith.divf %95, %96 : vector<5x1xf32>
    %cst_53 = arith.constant 9.99999974E-6 : f32
    %98 = vector.broadcast %cst_53 : f32 to vector<5x1xf32>
    %99 = arith.addf %97, %98 : vector<5x1xf32>
    %100 = math.rsqrt %99 : vector<5x1xf32>
    %101 = vector.broadcast %100 : vector<5x1xf32> to vector<5x32xf32>
    %102 = arith.mulf %92, %101 : vector<5x32xf32>
    %103 = vector.broadcast %85 : vector<1x32xf32> to vector<5x32xf32>
    %104 = arith.mulf %102, %103 : vector<5x32xf32>
    %105 = vector.broadcast %86 : vector<1x32xf32> to vector<5x32xf32>
    %106 = arith.addf %104, %105 : vector<5x32xf32>
    %107 = arith.addf %106, %5 : vector<5x32xf32>
    %108 = arith.addf %3, %7 : vector<16x32xf32>
    %c0_54 = arith.constant 0 : index
    %c0_55 = arith.constant 0 : index
    %c0_56 = arith.constant 0 : index
    %109 = vector.load %arg11[%c0_54, %c0_55, %c0_56] : memref<3x32x16xbf16, #tpu.memory_space<vmem>>, vector<1x32x16xbf16>
    %110 = vector.shape_cast %109 : vector<1x32x16xbf16> to vector<32x16xbf16>
    %111 = arith.truncf %107 : vector<5x32xf32> to vector<5x32xbf16>
    %cst_57 = arith.constant dense<0.000000e+00> : vector<5x16xf32>
    %112 = tpu.matmul %111, %110, %cst_57 {dimension_numbers = #tpu.dot_dimension_numbers<[1], [0], [0], [1], [0, 0, 1, 1], [], []>} : vector<5x32xbf16>, vector<32x16xbf16>, vector<5x16xf32> -> vector<5x16xf32>
    %c0_58 = arith.constant 0 : index
    %c0_59 = arith.constant 0 : index
    %c0_60 = arith.constant 0 : index
    %113 = vector.load %arg12[%c0_58, %c0_59, %c0_60] : memref<3x1x16xf32, #tpu.memory_space<vmem>>, vector<1x1x16xf32>
    %114 = vector.shape_cast %113 : vector<1x1x16xf32> to vector<1x16xf32>
    %115 = vector.broadcast %114 : vector<1x16xf32> to vector<5x16xf32>
    %116 = arith.addf %112, %115 : vector<5x16xf32>
    %c1_61 = arith.constant 1 : index
    %c0_62 = arith.constant 0 : index
    %c0_63 = arith.constant 0 : index
    %117 = vector.load %arg11[%c1_61, %c0_62, %c0_63] : memref<3x32x16xbf16, #tpu.memory_space<vmem>>, vector<1x32x16xbf16>
    %118 = vector.shape_cast %117 : vector<1x32x16xbf16> to vector<32x16xbf16>
    %119 = arith.truncf %108 : vector<16x32xf32> to vector<16x32xbf16>
    %cst_64 = arith.constant dense<0.000000e+00> : vector<16x16xf32>
    %120 = tpu.matmul %119, %118, %cst_64 {dimension_numbers = #tpu.dot_dimension_numbers<[1], [0], [0], [1], [0, 0, 1, 1], [], []>} : vector<16x32xbf16>, vector<32x16xbf16>, vector<16x16xf32> -> vector<16x16xf32>
    %c1_65 = arith.constant 1 : index
    %c0_66 = arith.constant 0 : index
    %c0_67 = arith.constant 0 : index
    %121 = vector.load %arg12[%c1_65, %c0_66, %c0_67] : memref<3x1x16xf32, #tpu.memory_space<vmem>>, vector<1x1x16xf32>
    %122 = vector.shape_cast %121 : vector<1x1x16xf32> to vector<1x16xf32>
    %123 = vector.broadcast %122 : vector<1x16xf32> to vector<16x16xf32>
    %124 = arith.addf %120, %123 : vector<16x16xf32>
    %c2_68 = arith.constant 2 : index
    %c0_69 = arith.constant 0 : index
    %c0_70 = arith.constant 0 : index
    %125 = vector.load %arg11[%c2_68, %c0_69, %c0_70] : memref<3x32x16xbf16, #tpu.memory_space<vmem>>, vector<1x32x16xbf16>
    %126 = vector.shape_cast %125 : vector<1x32x16xbf16> to vector<32x16xbf16>
    %127 = arith.truncf %3 : vector<16x32xf32> to vector<16x32xbf16>
    %cst_71 = arith.constant dense<0.000000e+00> : vector<16x16xf32>
    %128 = tpu.matmul %127, %126, %cst_71 {dimension_numbers = #tpu.dot_dimension_numbers<[1], [0], [0], [1], [0, 0, 1, 1], [], []>} : vector<16x32xbf16>, vector<32x16xbf16>, vector<16x16xf32> -> vector<16x16xf32>
    %c2_72 = arith.constant 2 : index
    %c0_73 = arith.constant 0 : index
    %c0_74 = arith.constant 0 : index
    %129 = vector.load %arg12[%c2_72, %c0_73, %c0_74] : memref<3x1x16xf32, #tpu.memory_space<vmem>>, vector<1x1x16xf32>
    %130 = vector.shape_cast %129 : vector<1x1x16xf32> to vector<1x16xf32>
    %131 = vector.broadcast %130 : vector<1x16xf32> to vector<16x16xf32>
    %132 = arith.addf %128, %131 : vector<16x16xf32>
    %c0_75 = arith.constant 0 : index
    %c0_76 = arith.constant 0 : index
    %133 = vector.load %arg13[%c0_75, %c0_76] : memref<16x32xbf16, #tpu.memory_space<vmem>>, vector<16x32xbf16>
    %134 = vector.extract_strided_slice %116 {offsets = [0, 0], sizes = [5, 8], strides = [1, 1]} : vector<5x16xf32> to vector<5x8xf32>
    %135 = vector.extract_strided_slice %124 {offsets = [0, 0], sizes = [16, 8], strides = [1, 1]} : vector<16x16xf32> to vector<16x8xf32>
    %136 = vector.extract_strided_slice %132 {offsets = [0, 0], sizes = [16, 8], strides = [1, 1]} : vector<16x16xf32> to vector<16x8xf32>
    %137 = arith.truncf %134 : vector<5x8xf32> to vector<5x8xbf16>
    %138 = arith.truncf %135 : vector<16x8xf32> to vector<16x8xbf16>
    %cst_77 = arith.constant dense<0.000000e+00> : vector<5x16xf32>
    %139 = tpu.matmul %137, %138, %cst_77 {dimension_numbers = #tpu.dot_dimension_numbers<[1], [1], [0], [0], [0, 0, 1, 0], [], []>} : vector<5x8xbf16>, vector<16x8xbf16>, vector<5x16xf32> -> vector<5x16xf32>
    %cst_78 = arith.constant 0.353553385 : f32
    %140 = vector.broadcast %cst_78 : f32 to vector<5x16xf32>
    %141 = arith.mulf %139, %140 : vector<5x16xf32>
    %cst_79 = arith.constant dense<0xFF800000> : vector<5xf32>
    %142 = vector.multi_reduction <maximumf>, %141, %cst_79 [1] : vector<5x16xf32> to vector<5xf32>
    %143 = vector.shape_cast %142 : vector<5xf32> to vector<5x1xf32>
    %144 = vector.broadcast %143 : vector<5x1xf32> to vector<5x16xf32>
    %145 = arith.subf %141, %144 : vector<5x16xf32>
    %146 = math.exp %145 : vector<5x16xf32>
    %cst_80 = arith.constant dense<0.000000e+00> : vector<5xf32>
    %147 = vector.multi_reduction <add>, %146, %cst_80 [1] : vector<5x16xf32> to vector<5xf32>
    %148 = vector.shape_cast %147 : vector<5xf32> to vector<5x1xf32>
    %149 = tpu.reciprocal %148 {approx = true} : vector<5x1xf32> -> vector<5x1xf32>
    %150 = vector.broadcast %149 : vector<5x1xf32> to vector<5x16xf32>
    %151 = arith.mulf %146, %150 : vector<5x16xf32>
    %152 = arith.truncf %151 : vector<5x16xf32> to vector<5x16xbf16>
    %153 = arith.truncf %136 : vector<16x8xf32> to vector<16x8xbf16>
    %cst_81 = arith.constant dense<0.000000e+00> : vector<5x8xf32>
    %154 = tpu.matmul %152, %153, %cst_81 {dimension_numbers = #tpu.dot_dimension_numbers<[1], [0], [0], [1], [0, 0, 1, 1], [], []>} : vector<5x16xbf16>, vector<16x8xbf16>, vector<5x8xf32> -> vector<5x8xf32>
    %155 = vector.extract_strided_slice %133 {offsets = [0, 0], sizes = [8, 32], strides = [1, 1]} : vector<16x32xbf16> to vector<8x32xbf16>
    %156 = arith.truncf %154 : vector<5x8xf32> to vector<5x8xbf16>
    %cst_82 = arith.constant dense<0.000000e+00> : vector<5x32xf32>
    %157 = tpu.matmul %156, %155, %cst_82 {dimension_numbers = #tpu.dot_dimension_numbers<[1], [0], [0], [1], [0, 0, 1, 1], [], []>} : vector<5x8xbf16>, vector<8x32xbf16>, vector<5x32xf32> -> vector<5x32xf32>
    %158 = vector.extract_strided_slice %116 {offsets = [0, 8], sizes = [5, 8], strides = [1, 1]} : vector<5x16xf32> to vector<5x8xf32>
    %159 = vector.extract_strided_slice %124 {offsets = [0, 8], sizes = [16, 8], strides = [1, 1]} : vector<16x16xf32> to vector<16x8xf32>
    %160 = vector.extract_strided_slice %132 {offsets = [0, 8], sizes = [16, 8], strides = [1, 1]} : vector<16x16xf32> to vector<16x8xf32>
    %161 = arith.truncf %158 : vector<5x8xf32> to vector<5x8xbf16>
    %162 = arith.truncf %159 : vector<16x8xf32> to vector<16x8xbf16>
    %cst_83 = arith.constant dense<0.000000e+00> : vector<5x16xf32>
    %163 = tpu.matmul %161, %162, %cst_83 {dimension_numbers = #tpu.dot_dimension_numbers<[1], [1], [0], [0], [0, 0, 1, 0], [], []>} : vector<5x8xbf16>, vector<16x8xbf16>, vector<5x16xf32> -> vector<5x16xf32>
    %cst_84 = arith.constant 0.353553385 : f32
    %164 = vector.broadcast %cst_84 : f32 to vector<5x16xf32>
    %165 = arith.mulf %163, %164 : vector<5x16xf32>
    %cst_85 = arith.constant dense<0xFF800000> : vector<5xf32>
    %166 = vector.multi_reduction <maximumf>, %165, %cst_85 [1] : vector<5x16xf32> to vector<5xf32>
    %167 = vector.shape_cast %166 : vector<5xf32> to vector<5x1xf32>
    %168 = vector.broadcast %167 : vector<5x1xf32> to vector<5x16xf32>
    %169 = arith.subf %165, %168 : vector<5x16xf32>
    %170 = math.exp %169 : vector<5x16xf32>
    %cst_86 = arith.constant dense<0.000000e+00> : vector<5xf32>
    %171 = vector.multi_reduction <add>, %170, %cst_86 [1] : vector<5x16xf32> to vector<5xf32>
    %172 = vector.shape_cast %171 : vector<5xf32> to vector<5x1xf32>
    %173 = tpu.reciprocal %172 {approx = true} : vector<5x1xf32> -> vector<5x1xf32>
    %174 = vector.broadcast %173 : vector<5x1xf32> to vector<5x16xf32>
    %175 = arith.mulf %170, %174 : vector<5x16xf32>
    %176 = arith.truncf %175 : vector<5x16xf32> to vector<5x16xbf16>
    %177 = arith.truncf %160 : vector<16x8xf32> to vector<16x8xbf16>
    %cst_87 = arith.constant dense<0.000000e+00> : vector<5x8xf32>
    %178 = tpu.matmul %176, %177, %cst_87 {dimension_numbers = #tpu.dot_dimension_numbers<[1], [0], [0], [1], [0, 0, 1, 1], [], []>} : vector<5x16xbf16>, vector<16x8xbf16>, vector<5x8xf32> -> vector<5x8xf32>
    %179 = vector.extract_strided_slice %133 {offsets = [8, 0], sizes = [8, 32], strides = [1, 1]} : vector<16x32xbf16> to vector<8x32xbf16>
    %180 = arith.truncf %178 : vector<5x8xf32> to vector<5x8xbf16>
    %cst_88 = arith.constant dense<0.000000e+00> : vector<5x32xf32>
    %181 = tpu.matmul %180, %179, %cst_88 {dimension_numbers = #tpu.dot_dimension_numbers<[1], [0], [0], [1], [0, 0, 1, 1], [], []>} : vector<5x8xbf16>, vector<8x32xbf16>, vector<5x32xf32> -> vector<5x32xf32>
    %182 = arith.addf %157, %181 : vector<5x32xf32>
    %c0_89 = arith.constant 0 : index
    %c0_90 = arith.constant 0 : index
    %183 = vector.load %arg14[%c0_89, %c0_90] : memref<1x32xf32, #tpu.memory_space<vmem>>, vector<1x32xf32>
    %184 = vector.broadcast %183 : vector<1x32xf32> to vector<5x32xf32>
    %185 = arith.addf %182, %184 : vector<5x32xf32>
    %186 = arith.addf %106, %185 : vector<5x32xf32>
    %c0_91 = arith.constant 0 : index
    %c0_92 = arith.constant 0 : index
    %187 = vector.load %arg15[%c0_91, %c0_92] : memref<1x32xf32, #tpu.memory_space<vmem>>, vector<1x32xf32>
    %c0_93 = arith.constant 0 : index
    %c0_94 = arith.constant 0 : index
    %188 = vector.load %arg16[%c0_93, %c0_94] : memref<1x32xf32, #tpu.memory_space<vmem>>, vector<1x32xf32>
    %cst_95 = arith.constant dense<0.000000e+00> : vector<5xf32>
    %189 = vector.multi_reduction <add>, %186, %cst_95 [1] : vector<5x32xf32> to vector<5xf32>
    %190 = vector.shape_cast %189 : vector<5xf32> to vector<5x1xf32>
    %cst_96 = arith.constant 3.200000e+01 : f32
    %191 = vector.broadcast %cst_96 : f32 to vector<5x1xf32>
    %192 = arith.divf %190, %191 : vector<5x1xf32>
    %193 = vector.broadcast %192 : vector<5x1xf32> to vector<5x32xf32>
    %194 = arith.subf %186, %193 : vector<5x32xf32>
    %195 = arith.mulf %194, %194 : vector<5x32xf32>
    %cst_97 = arith.constant dense<0.000000e+00> : vector<5xf32>
    %196 = vector.multi_reduction <add>, %195, %cst_97 [1] : vector<5x32xf32> to vector<5xf32>
    %197 = vector.shape_cast %196 : vector<5xf32> to vector<5x1xf32>
    %cst_98 = arith.constant 3.200000e+01 : f32
    %198 = vector.broadcast %cst_98 : f32 to vector<5x1xf32>
    %199 = arith.divf %197, %198 : vector<5x1xf32>
    %cst_99 = arith.constant 9.99999974E-6 : f32
    %200 = vector.broadcast %cst_99 : f32 to vector<5x1xf32>
    %201 = arith.addf %199, %200 : vector<5x1xf32>
    %202 = math.rsqrt %201 : vector<5x1xf32>
    %203 = vector.broadcast %202 : vector<5x1xf32> to vector<5x32xf32>
    %204 = arith.mulf %194, %203 : vector<5x32xf32>
    %205 = vector.broadcast %187 : vector<1x32xf32> to vector<5x32xf32>
    %206 = arith.mulf %204, %205 : vector<5x32xf32>
    %207 = vector.broadcast %188 : vector<1x32xf32> to vector<5x32xf32>
    %208 = arith.addf %206, %207 : vector<5x32xf32>
    %c0_100 = arith.constant 0 : index
    %c0_101 = arith.constant 0 : index
    %209 = vector.load %arg17[%c0_100, %c0_101] : memref<32x64xbf16, #tpu.memory_space<vmem>>, vector<32x64xbf16>
    %210 = arith.truncf %208 : vector<5x32xf32> to vector<5x32xbf16>
    %cst_102 = arith.constant dense<0.000000e+00> : vector<5x64xf32>
    %211 = tpu.matmul %210, %209, %cst_102 {dimension_numbers = #tpu.dot_dimension_numbers<[1], [0], [0], [1], [0, 0, 1, 1], [], []>} : vector<5x32xbf16>, vector<32x64xbf16>, vector<5x64xf32> -> vector<5x64xf32>
    %c0_103 = arith.constant 0 : index
    %c0_104 = arith.constant 0 : index
    %212 = vector.load %arg18[%c0_103, %c0_104] : memref<1x64xf32, #tpu.memory_space<vmem>>, vector<1x64xf32>
    %213 = vector.broadcast %212 : vector<1x64xf32> to vector<5x64xf32>
    %214 = arith.addf %211, %213 : vector<5x64xf32>
    %cst_105 = arith.constant 0.000000e+00 : f32
    %215 = vector.broadcast %cst_105 : f32 to vector<5x64xf32>
    %216 = arith.maximumf %214, %215 : vector<5x64xf32>
    %c0_106 = arith.constant 0 : index
    %c0_107 = arith.constant 0 : index
    %217 = vector.load %arg19[%c0_106, %c0_107] : memref<64x32xbf16, #tpu.memory_space<vmem>>, vector<64x32xbf16>
    %218 = arith.truncf %216 : vector<5x64xf32> to vector<5x64xbf16>
    %cst_108 = arith.constant dense<0.000000e+00> : vector<5x32xf32>
    %219 = tpu.matmul %218, %217, %cst_108 {dimension_numbers = #tpu.dot_dimension_numbers<[1], [0], [0], [1], [0, 0, 1, 1], [], []>} : vector<5x64xbf16>, vector<64x32xbf16>, vector<5x32xf32> -> vector<5x32xf32>
    %c0_109 = arith.constant 0 : index
    %c0_110 = arith.constant 0 : index
    %220 = vector.load %arg20[%c0_109, %c0_110] : memref<1x32xf32, #tpu.memory_space<vmem>>, vector<1x32xf32>
    %221 = vector.broadcast %220 : vector<1x32xf32> to vector<5x32xf32>
    %222 = arith.addf %219, %221 : vector<5x32xf32>
    %223 = arith.addf %208, %222 : vector<5x32xf32>
    %c0_111 = arith.constant 0 : index
    %c0_112 = arith.constant 0 : index
    %224 = vector.load %arg21[%c0_111, %c0_112] : memref<1x32xf32, #tpu.memory_space<vmem>>, vector<1x32xf32>
    %c0_113 = arith.constant 0 : index
    %c0_114 = arith.constant 0 : index
    %225 = vector.load %arg22[%c0_113, %c0_114] : memref<1x32xf32, #tpu.memory_space<vmem>>, vector<1x32xf32>
    %cst_115 = arith.constant dense<0.000000e+00> : vector<5xf32>
    %226 = vector.multi_reduction <add>, %223, %cst_115 [1] : vector<5x32xf32> to vector<5xf32>
    %227 = vector.shape_cast %226 : vector<5xf32> to vector<5x1xf32>
    %cst_116 = arith.constant 3.200000e+01 : f32
    %228 = vector.broadcast %cst_116 : f32 to vector<5x1xf32>
    %229 = arith.divf %227, %228 : vector<5x1xf32>
    %230 = vector.broadcast %229 : vector<5x1xf32> to vector<5x32xf32>
    %231 = arith.subf %223, %230 : vector<5x32xf32>
    %232 = arith.mulf %231, %231 : vector<5x32xf32>
    %cst_117 = arith.constant dense<0.000000e+00> : vector<5xf32>
    %233 = vector.multi_reduction <add>, %232, %cst_117 [1] : vector<5x32xf32> to vector<5xf32>
    %234 = vector.shape_cast %233 : vector<5xf32> to vector<5x1xf32>
    %cst_118 = arith.constant 3.200000e+01 : f32
    %235 = vector.broadcast %cst_118 : f32 to vector<5x1xf32>
    %236 = arith.divf %234, %235 : vector<5x1xf32>
    %cst_119 = arith.constant 9.99999974E-6 : f32
    %237 = vector.broadcast %cst_119 : f32 to vector<5x1xf32>
    %238 = arith.addf %236, %237 : vector<5x1xf32>
    %239 = math.rsqrt %238 : vector<5x1xf32>
    %240 = vector.broadcast %239 : vector<5x1xf32> to vector<5x32xf32>
    %241 = arith.mulf %231, %240 : vector<5x32xf32>
    %242 = vector.broadcast %224 : vector<1x32xf32> to vector<5x32xf32>
    %243 = arith.mulf %241, %242 : vector<5x32xf32>
    %244 = vector.broadcast %225 : vector<1x32xf32> to vector<5x32xf32>
    %245 = arith.addf %243, %244 : vector<5x32xf32>
    %246 = arith.addf %245, %5 : vector<5x32xf32>
    %247 = arith.addf %3, %7 : vector<16x32xf32>
    %c0_120 = arith.constant 0 : index
    %c0_121 = arith.constant 0 : index
    %c0_122 = arith.constant 0 : index
    %248 = vector.load %arg23[%c0_120, %c0_121, %c0_122] : memref<3x32x16xbf16, #tpu.memory_space<vmem>>, vector<1x32x16xbf16>
    %249 = vector.shape_cast %248 : vector<1x32x16xbf16> to vector<32x16xbf16>
    %250 = arith.truncf %247 : vector<16x32xf32> to vector<16x32xbf16>
    %cst_123 = arith.constant dense<0.000000e+00> : vector<16x16xf32>
    %251 = tpu.matmul %250, %249, %cst_123 {dimension_numbers = #tpu.dot_dimension_numbers<[1], [0], [0], [1], [0, 0, 1, 1], [], []>} : vector<16x32xbf16>, vector<32x16xbf16>, vector<16x16xf32> -> vector<16x16xf32>
    %c0_124 = arith.constant 0 : index
    %c0_125 = arith.constant 0 : index
    %c0_126 = arith.constant 0 : index
    %252 = vector.load %arg24[%c0_124, %c0_125, %c0_126] : memref<3x1x16xf32, #tpu.memory_space<vmem>>, vector<1x1x16xf32>
    %253 = vector.shape_cast %252 : vector<1x1x16xf32> to vector<1x16xf32>
    %254 = vector.broadcast %253 : vector<1x16xf32> to vector<16x16xf32>
    %255 = arith.addf %251, %254 : vector<16x16xf32>
    %c1_127 = arith.constant 1 : index
    %c0_128 = arith.constant 0 : index
    %c0_129 = arith.constant 0 : index
    %256 = vector.load %arg23[%c1_127, %c0_128, %c0_129] : memref<3x32x16xbf16, #tpu.memory_space<vmem>>, vector<1x32x16xbf16>
    %257 = vector.shape_cast %256 : vector<1x32x16xbf16> to vector<32x16xbf16>
    %258 = arith.truncf %246 : vector<5x32xf32> to vector<5x32xbf16>
    %cst_130 = arith.constant dense<0.000000e+00> : vector<5x16xf32>
    %259 = tpu.matmul %258, %257, %cst_130 {dimension_numbers = #tpu.dot_dimension_numbers<[1], [0], [0], [1], [0, 0, 1, 1], [], []>} : vector<5x32xbf16>, vector<32x16xbf16>, vector<5x16xf32> -> vector<5x16xf32>
    %c1_131 = arith.constant 1 : index
    %c0_132 = arith.constant 0 : index
    %c0_133 = arith.constant 0 : index
    %260 = vector.load %arg24[%c1_131, %c0_132, %c0_133] : memref<3x1x16xf32, #tpu.memory_space<vmem>>, vector<1x1x16xf32>
    %261 = vector.shape_cast %260 : vector<1x1x16xf32> to vector<1x16xf32>
    %262 = vector.broadcast %261 : vector<1x16xf32> to vector<5x16xf32>
    %263 = arith.addf %259, %262 : vector<5x16xf32>
    %c2_134 = arith.constant 2 : index
    %c0_135 = arith.constant 0 : index
    %c0_136 = arith.constant 0 : index
    %264 = vector.load %arg23[%c2_134, %c0_135, %c0_136] : memref<3x32x16xbf16, #tpu.memory_space<vmem>>, vector<1x32x16xbf16>
    %265 = vector.shape_cast %264 : vector<1x32x16xbf16> to vector<32x16xbf16>
    %266 = arith.truncf %245 : vector<5x32xf32> to vector<5x32xbf16>
    %cst_137 = arith.constant dense<0.000000e+00> : vector<5x16xf32>
    %267 = tpu.matmul %266, %265, %cst_137 {dimension_numbers = #tpu.dot_dimension_numbers<[1], [0], [0], [1], [0, 0, 1, 1], [], []>} : vector<5x32xbf16>, vector<32x16xbf16>, vector<5x16xf32> -> vector<5x16xf32>
    %c2_138 = arith.constant 2 : index
    %c0_139 = arith.constant 0 : index
    %c0_140 = arith.constant 0 : index
    %268 = vector.load %arg24[%c2_138, %c0_139, %c0_140] : memref<3x1x16xf32, #tpu.memory_space<vmem>>, vector<1x1x16xf32>
    %269 = vector.shape_cast %268 : vector<1x1x16xf32> to vector<1x16xf32>
    %270 = vector.broadcast %269 : vector<1x16xf32> to vector<5x16xf32>
    %271 = arith.addf %267, %270 : vector<5x16xf32>
    %c0_141 = arith.constant 0 : index
    %c0_142 = arith.constant 0 : index
    %272 = vector.load %arg25[%c0_141, %c0_142] : memref<16x32xbf16, #tpu.memory_space<vmem>>, vector<16x32xbf16>
    %273 = vector.extract_strided_slice %255 {offsets = [0, 0], sizes = [16, 8], strides = [1, 1]} : vector<16x16xf32> to vector<16x8xf32>
    %274 = vector.extract_strided_slice %263 {offsets = [0, 0], sizes = [5, 8], strides = [1, 1]} : vector<5x16xf32> to vector<5x8xf32>
    %275 = vector.extract_strided_slice %271 {offsets = [0, 0], sizes = [5, 8], strides = [1, 1]} : vector<5x16xf32> to vector<5x8xf32>
    %276 = arith.truncf %273 : vector<16x8xf32> to vector<16x8xbf16>
    %277 = arith.truncf %274 : vector<5x8xf32> to vector<5x8xbf16>
    %cst_143 = arith.constant dense<0.000000e+00> : vector<16x5xf32>
    %278 = tpu.matmul %276, %277, %cst_143 {dimension_numbers = #tpu.dot_dimension_numbers<[1], [1], [0], [0], [0, 0, 1, 0], [], []>} : vector<16x8xbf16>, vector<5x8xbf16>, vector<16x5xf32> -> vector<16x5xf32>
    %cst_144 = arith.constant 0.353553385 : f32
    %279 = vector.broadcast %cst_144 : f32 to vector<16x5xf32>
    %280 = arith.mulf %278, %279 : vector<16x5xf32>
    %cst_145 = arith.constant dense<0xFF800000> : vector<16xf32>
    %281 = vector.multi_reduction <maximumf>, %280, %cst_145 [1] : vector<16x5xf32> to vector<16xf32>
    %282 = vector.shape_cast %281 : vector<16xf32> to vector<16x1xf32>
    %283 = vector.broadcast %282 : vector<16x1xf32> to vector<16x5xf32>
    %284 = arith.subf %280, %283 : vector<16x5xf32>
    %285 = math.exp %284 : vector<16x5xf32>
    %cst_146 = arith.constant dense<0.000000e+00> : vector<16xf32>
    %286 = vector.multi_reduction <add>, %285, %cst_146 [1] : vector<16x5xf32> to vector<16xf32>
    %287 = vector.shape_cast %286 : vector<16xf32> to vector<16x1xf32>
    %288 = tpu.reciprocal %287 {approx = true} : vector<16x1xf32> -> vector<16x1xf32>
    %289 = vector.broadcast %288 : vector<16x1xf32> to vector<16x5xf32>
    %290 = arith.mulf %285, %289 : vector<16x5xf32>
    %291 = arith.truncf %290 : vector<16x5xf32> to vector<16x5xbf16>
    %292 = arith.truncf %275 : vector<5x8xf32> to vector<5x8xbf16>
    %cst_147 = arith.constant dense<0.000000e+00> : vector<16x8xf32>
    %293 = tpu.matmul %291, %292, %cst_147 {dimension_numbers = #tpu.dot_dimension_numbers<[1], [0], [0], [1], [0, 0, 1, 1], [], []>} : vector<16x5xbf16>, vector<5x8xbf16>, vector<16x8xf32> -> vector<16x8xf32>
    %294 = vector.extract_strided_slice %272 {offsets = [0, 0], sizes = [8, 32], strides = [1, 1]} : vector<16x32xbf16> to vector<8x32xbf16>
    %295 = arith.truncf %293 : vector<16x8xf32> to vector<16x8xbf16>
    %cst_148 = arith.constant dense<0.000000e+00> : vector<16x32xf32>
    %296 = tpu.matmul %295, %294, %cst_148 {dimension_numbers = #tpu.dot_dimension_numbers<[1], [0], [0], [1], [0, 0, 1, 1], [], []>} : vector<16x8xbf16>, vector<8x32xbf16>, vector<16x32xf32> -> vector<16x32xf32>
    %297 = vector.extract_strided_slice %255 {offsets = [0, 8], sizes = [16, 8], strides = [1, 1]} : vector<16x16xf32> to vector<16x8xf32>
    %298 = vector.extract_strided_slice %263 {offsets = [0, 8], sizes = [5, 8], strides = [1, 1]} : vector<5x16xf32> to vector<5x8xf32>
    %299 = vector.extract_strided_slice %271 {offsets = [0, 8], sizes = [5, 8], strides = [1, 1]} : vector<5x16xf32> to vector<5x8xf32>
    %300 = arith.truncf %297 : vector<16x8xf32> to vector<16x8xbf16>
    %301 = arith.truncf %298 : vector<5x8xf32> to vector<5x8xbf16>
    %cst_149 = arith.constant dense<0.000000e+00> : vector<16x5xf32>
    %302 = tpu.matmul %300, %301, %cst_149 {dimension_numbers = #tpu.dot_dimension_numbers<[1], [1], [0], [0], [0, 0, 1, 0], [], []>} : vector<16x8xbf16>, vector<5x8xbf16>, vector<16x5xf32> -> vector<16x5xf32>
    %cst_150 = arith.constant 0.353553385 : f32
    %303 = vector.broadcast %cst_150 : f32 to vector<16x5xf32>
    %304 = arith.mulf %302, %303 : vector<16x5xf32>
    %cst_151 = arith.constant dense<0xFF800000> : vector<16xf32>
    %305 = vector.multi_reduction <maximumf>, %304, %cst_151 [1] : vector<16x5xf32> to vector<16xf32>
    %306 = vector.shape_cast %305 : vector<16xf32> to vector<16x1xf32>
    %307 = vector.broadcast %306 : vector<16x1xf32> to vector<16x5xf32>
    %308 = arith.subf %304, %307 : vector<16x5xf32>
    %309 = math.exp %308 : vector<16x5xf32>
    %cst_152 = arith.constant dense<0.000000e+00> : vector<16xf32>
    %310 = vector.multi_reduction <add>, %309, %cst_152 [1] : vector<16x5xf32> to vector<16xf32>
    %311 = vector.shape_cast %310 : vector<16xf32> to vector<16x1xf32>
    %312 = tpu.reciprocal %311 {approx = true} : vector<16x1xf32> -> vector<16x1xf32>
    %313 = vector.broadcast %312 : vector<16x1xf32> to vector<16x5xf32>
    %314 = arith.mulf %309, %313 : vector<16x5xf32>
    %315 = arith.truncf %314 : vector<16x5xf32> to vector<16x5xbf16>
    %316 = arith.truncf %299 : vector<5x8xf32> to vector<5x8xbf16>
    %cst_153 = arith.constant dense<0.000000e+00> : vector<16x8xf32>
    %317 = tpu.matmul %315, %316, %cst_153 {dimension_numbers = #tpu.dot_dimension_numbers<[1], [0], [0], [1], [0, 0, 1, 1], [], []>} : vector<16x5xbf16>, vector<5x8xbf16>, vector<16x8xf32> -> vector<16x8xf32>
    %318 = vector.extract_strided_slice %272 {offsets = [8, 0], sizes = [8, 32], strides = [1, 1]} : vector<16x32xbf16> to vector<8x32xbf16>
    %319 = arith.truncf %317 : vector<16x8xf32> to vector<16x8xbf16>
    %cst_154 = arith.constant dense<0.000000e+00> : vector<16x32xf32>
    %320 = tpu.matmul %319, %318, %cst_154 {dimension_numbers = #tpu.dot_dimension_numbers<[1], [0], [0], [1], [0, 0, 1, 1], [], []>} : vector<16x8xbf16>, vector<8x32xbf16>, vector<16x32xf32> -> vector<16x32xf32>
    %321 = arith.addf %296, %320 : vector<16x32xf32>
    %c0_155 = arith.constant 0 : index
    %c0_156 = arith.constant 0 : index
    %322 = vector.load %arg26[%c0_155, %c0_156] : memref<1x32xf32, #tpu.memory_space<vmem>>, vector<1x32xf32>
    %323 = vector.broadcast %322 : vector<1x32xf32> to vector<16x32xf32>
    %324 = arith.addf %321, %323 : vector<16x32xf32>
    %325 = arith.addf %3, %324 : vector<16x32xf32>
    %c0_157 = arith.constant 0 : index
    %c0_158 = arith.constant 0 : index
    %326 = vector.load %arg27[%c0_157, %c0_158] : memref<1x32xf32, #tpu.memory_space<vmem>>, vector<1x32xf32>
    %c0_159 = arith.constant 0 : index
    %c0_160 = arith.constant 0 : index
    %327 = vector.load %arg28[%c0_159, %c0_160] : memref<1x32xf32, #tpu.memory_space<vmem>>, vector<1x32xf32>
    %cst_161 = arith.constant dense<0.000000e+00> : vector<16xf32>
    %328 = vector.multi_reduction <add>, %325, %cst_161 [1] : vector<16x32xf32> to vector<16xf32>
    %329 = vector.shape_cast %328 : vector<16xf32> to vector<16x1xf32>
    %cst_162 = arith.constant 3.200000e+01 : f32
    %330 = vector.broadcast %cst_162 : f32 to vector<16x1xf32>
    %331 = arith.divf %329, %330 : vector<16x1xf32>
    %332 = vector.broadcast %331 : vector<16x1xf32> to vector<16x32xf32>
    %333 = arith.subf %325, %332 : vector<16x32xf32>
    %334 = arith.mulf %333, %333 : vector<16x32xf32>
    %cst_163 = arith.constant dense<0.000000e+00> : vector<16xf32>
    %335 = vector.multi_reduction <add>, %334, %cst_163 [1] : vector<16x32xf32> to vector<16xf32>
    %336 = vector.shape_cast %335 : vector<16xf32> to vector<16x1xf32>
    %cst_164 = arith.constant 3.200000e+01 : f32
    %337 = vector.broadcast %cst_164 : f32 to vector<16x1xf32>
    %338 = arith.divf %336, %337 : vector<16x1xf32>
    %cst_165 = arith.constant 9.99999974E-6 : f32
    %339 = vector.broadcast %cst_165 : f32 to vector<16x1xf32>
    %340 = arith.addf %338, %339 : vector<16x1xf32>
    %341 = math.rsqrt %340 : vector<16x1xf32>
    %342 = vector.broadcast %341 : vector<16x1xf32> to vector<16x32xf32>
    %343 = arith.mulf %333, %342 : vector<16x32xf32>
    %344 = vector.broadcast %326 : vector<1x32xf32> to vector<16x32xf32>
    %345 = arith.mulf %343, %344 : vector<16x32xf32>
    %346 = vector.broadcast %327 : vector<1x32xf32> to vector<16x32xf32>
    %347 = arith.addf %345, %346 : vector<16x32xf32>
    %c0_166 = arith.constant 0 : index
    %c0_167 = arith.constant 0 : index
    %c0_168 = arith.constant 0 : index
    %348 = vector.load %arg29[%c0_166, %c0_167, %c0_168] : memref<1x5x32xf32, #tpu.memory_space<vmem>>, vector<1x5x32xf32>
    %349 = vector.shape_cast %348 : vector<1x5x32xf32> to vector<5x32xf32>
    %350 = vector.shape_cast %245 : vector<5x32xf32> to vector<1x5x32xf32>
    tpu.vector_store %arg29[%c0_166, %c0_167, %c0_168], %350 {strides = array<i32>} : memref<1x5x32xf32, #tpu.memory_space<vmem>>, vector<1x5x32xf32>,
    %c0_169 = arith.constant 0 : index
    %c0_170 = arith.constant 0 : index
    %c0_171 = arith.constant 0 : index
    %351 = vector.load %arg30[%c0_169, %c0_170, %c0_171] : memref<1x16x32xf32, #tpu.memory_space<vmem>>, vector<1x16x32xf32>
    %352 = vector.shape_cast %351 : vector<1x16x32xf32> to vector<16x32xf32>
    %353 = vector.shape_cast %347 : vector<16x32xf32> to vector<1x16x32xf32>
    tpu.vector_store %arg30[%c0_169, %c0_170, %c0_171], %353 {strides = array<i32>} : memref<1x16x32xf32, #tpu.memory_space<vmem>>, vector<1x16x32xf32>,
    return
  }
  func.func @transform_0(%arg0: i32) -> (i32, i32, i32) {
    %c0_i32 = arith.constant 0 : i32
    %c0_i32_0 = arith.constant 0 : i32
    %c0_i32_1 = arith.constant 0 : i32
    return %arg0, %c0_i32, %c0_i32_0 : i32, i32, i32
  }
  func.func @transform_1(%arg0: i32) -> (i32, i32, i32) {
    %c0_i32 = arith.constant 0 : i32
    %c0_i32_0 = arith.constant 0 : i32
    %c0_i32_1 = arith.constant 0 : i32
    return %arg0, %c0_i32, %c0_i32_0 : i32, i32, i32
  }
  func.func @transform_2(%arg0: i32) -> (i32, i32, i32) {
    %c0_i32 = arith.constant 0 : i32
    %c0_i32_0 = arith.constant 0 : i32
    %c0_i32_1 = arith.constant 0 : i32
    return %arg0, %c0_i32, %c0_i32_0 : i32, i32, i32
  }
  func.func @transform_3(%arg0: i32) -> (i32, i32, i32) {
    %c0_i32 = arith.constant 0 : i32
    %c0_i32_0 = arith.constant 0 : i32
    %c0_i32_1 = arith.constant 0 : i32
    %c0_i32_2 = arith.constant 0 : i32
    return %c0_i32, %c0_i32_0, %c0_i32_1 : i32, i32, i32
  }
  func.func @transform_4(%arg0: i32) -> (i32, i32, i32) {
    %c0_i32 = arith.constant 0 : i32
    %c0_i32_0 = arith.constant 0 : i32
    %c0_i32_1 = arith.constant 0 : i32
    %c0_i32_2 = arith.constant 0 : i32
    return %c0_i32, %c0_i32_0, %c0_i32_1 : i32, i32, i32
  }
  func.func @transform_5(%arg0: i32) -> (i32, i32, i32) {
    %c0_i32 = arith.constant 0 : i32
    %c0_i32_0 = arith.constant 0 : i32
    %c0_i32_1 = arith.constant 0 : i32
    %c0_i32_2 = arith.constant 0 : i32
    return %c0_i32, %c0_i32_0, %c0_i32_1 : i32, i32, i32
  }
  func.func @transform_6(%arg0: i32) -> (i32, i32) {
    %c0_i32 = arith.constant 0 : i32
    %c0_i32_0 = arith.constant 0 : i32
    %c0_i32_1 = arith.constant 0 : i32
    return %c0_i32, %c0_i32_0 : i32, i32
  }
  func.func @transform_7(%arg0: i32) -> (i32, i32) {
    %c0_i32 = arith.constant 0 : i32
    %c0_i32_0 = arith.constant 0 : i32
    %c0_i32_1 = arith.constant 0 : i32
    return %c0_i32, %c0_i32_0 : i32, i32
  }
  func.func @transform_8(%arg0: i32) -> (i32, i32) {
    %c0_i32 = arith.constant 0 : i32
    %c0_i32_0 = arith.constant 0 : i32
    %c0_i32_1 = arith.constant 0 : i32
    return %c0_i32, %c0_i32_0 : i32, i32
  }
  func.func @transform_9(%arg0: i32) -> (i32, i32) {
    %c0_i32 = arith.constant 0 : i32
    %c0_i32_0 = arith.constant 0 : i32
    %c0_i32_1 = arith.constant 0 : i32
    return %c0_i32, %c0_i32_0 : i32, i32
  }
  func.func @transform_10(%arg0: i32) -> (i32, i32, i32) {
    %c0_i32 = arith.constant 0 : i32
    %c0_i32_0 = arith.constant 0 : i32
    %c0_i32_1 = arith.constant 0 : i32
    %c0_i32_2 = arith.constant 0 : i32
    return %c0_i32, %c0_i32_0, %c0_i32_1 : i32, i32, i32
  }
  func.func @transform_11(%arg0: i32) -> (i32, i32, i32) {
    %c0_i32 = arith.constant 0 : i32
    %c0_i32_0 = arith.constant 0 : i32
    %c0_i32_1 = arith.constant 0 : i32
    %c0_i32_2 = arith.constant 0 : i32
    return %c0_i32, %c0_i32_0, %c0_i32_1 : i32, i32, i32
  }
  func.func @transform_12(%arg0: i32) -> (i32, i32) {
    %c0_i32 = arith.constant 0 : i32
    %c0_i32_0 = arith.constant 0 : i32
    %c0_i32_1 = arith.constant 0 : i32
    return %c0_i32, %c0_i32_0 : i32, i32
  }
  func.func @transform_13(%arg0: i32) -> (i32, i32) {
    %c0_i32 = arith.constant 0 : i32
    %c0_i32_0 = arith.constant 0 : i32
    %c0_i32_1 = arith.constant 0 : i32
    return %c0_i32, %c0_i32_0 : i32, i32
  }
  func.func @transform_14(%arg0: i32) -> (i32, i32) {
    %c0_i32 = arith.constant 0 : i32
    %c0_i32_0 = arith.constant 0 : i32
    %c0_i32_1 = arith.constant 0 : i32
    return %c0_i32, %c0_i32_0 : i32, i32
  }
  func.func @transform_15(%arg0: i32) -> (i32, i32) {
    %c0_i32 = arith.constant 0 : i32
    %c0_i32_0 = arith.constant 0 : i32
    %c0_i32_1 = arith.constant 0 : i32
    return %c0_i32, %c0_i32_0 : i32, i32
  }
  func.func @transform_16(%arg0: i32) -> (i32, i32) {
    %c0_i32 = arith.constant 0 : i32
    %c0_i32_0 = arith.constant 0 : i32
    %c0_i32_1 = arith.constant 0 : i32
    return %c0_i32, %c0_i32_0 : i32, i32
  }
  func.func @transform_17(%arg0: i32) -> (i32, i32) {
    %c0_i32 = arith.constant 0 : i32
    %c0_i32_0 = arith.constant 0 : i32
    %c0_i32_1 = arith.constant 0 : i32
    return %c0_i32, %c0_i32_0 : i32, i32
  }
  func.func @transform_18(%arg0: i32) -> (i32, i32) {
    %c0_i32 = arith.constant 0 : i32
    %c0_i32_0 = arith.constant 0 : i32
    %c0_i32_1 = arith.constant 0 : i32
    return %c0_i32, %c0_i32_0 : i32, i32
  }
  func.func @transform_19(%arg0: i32) -> (i32, i32) {
    %c0_i32 = arith.constant 0 : i32
    %c0_i32_0 = arith.constant 0 : i32
    %c0_i32_1 = arith.constant 0 : i32
    return %c0_i32, %c0_i32_0 : i32, i32
  }
  func.func @transform_20(%arg0: i32) -> (i32, i32) {
    %c0_i32 = arith.constant 0 : i32
    %c0_i32_0 = arith.constant 0 : i32
    %c0_i32_1 = arith.constant 0 : i32
    return %c0_i32, %c0_i32_0 : i32, i32
  }
  func.func @transform_21(%arg0: i32) -> (i32, i32) {
    %c0_i32 = arith.constant 0 : i32
    %c0_i32_0 = arith.constant 0 : i32
    %c0_i32_1 = arith.constant 0 : i32
    return %c0_i32, %c0_i32_0 : i32, i32
  }
  func.func @transform_22(%arg0: i32) -> (i32, i32, i32) {
    %c0_i32 = arith.constant 0 : i32
    %c0_i32_0 = arith.constant 0 : i32
    %c0_i32_1 = arith.constant 0 : i32
    %c0_i32_2 = arith.constant 0 : i32
    return %c0_i32, %c0_i32_0, %c0_i32_1 : i32, i32, i32
  }
  func.func @transform_23(%arg0: i32) -> (i32, i32, i32) {
    %c0_i32 = arith.constant 0 : i32
    %c0_i32_0 = arith.constant 0 : i32
    %c0_i32_1 = arith.constant 0 : i32
    %c0_i32_2 = arith.constant 0 : i32
    return %c0_i32, %c0_i32_0, %c0_i32_1 : i32, i32, i32
  }
  func.func @transform_24(%arg0: i32) -> (i32, i32) {
    %c0_i32 = arith.constant 0 : i32
    %c0_i32_0 = arith.constant 0 : i32
    %c0_i32_1 = arith.constant 0 : i32
    return %c0_i32, %c0_i32_0 : i32, i32
  }
  func.func @transform_25(%arg0: i32) -> (i32, i32) {
    %c0_i32 = arith.constant 0 : i32
    %c0_i32_0 = arith.constant 0 : i32
    %c0_i32_1 = arith.constant 0 : i32
    return %c0_i32, %c0_i32_0 : i32, i32
  }
  func.func @transform_26(%arg0: i32) -> (i32, i32) {
    %c0_i32 = arith.constant 0 : i32
    %c0_i32_0 = arith.constant 0 : i32
    %c0_i32_1 = arith.constant 0 : i32
    return %c0_i32, %c0_i32_0 : i32, i32
  }
  func.func @transform_27(%arg0: i32) -> (i32, i32) {
    %c0_i32 = arith.constant 0 : i32
    %c0_i32_0 = arith.constant 0 : i32
    %c0_i32_1 = arith.constant 0 : i32
    return %c0_i32, %c0_i32_0 : i32, i32
  }
  func.func @transform_28(%arg0: i32) -> (i32, i32, i32) {
    %c0_i32 = arith.constant 0 : i32
    %c0_i32_0 = arith.constant 0 : i32
    %c0_i32_1 = arith.constant 0 : i32
    return %arg0, %c0_i32, %c0_i32_0 : i32, i32, i32
  }
  func.func @transform_29(%arg0: i32) -> (i32, i32, i32) {
    %c0_i32 = arith.constant 0 : i32
    %c0_i32_0 = arith.constant 0 : i32
    %c0_i32_1 = arith.constant 0 : i32
    return %arg0, %c0_i32, %c0_i32_0 : i32, i32, i32
  }
}

module attributes {stable_mosaic.version = 11 : i64} {
  func.func @_final_attn_ln_kernel(%arg0: i32, %arg1: memref<1x5x32xf32, #tpu.memory_space<vmem>>, %arg2: memref<1x16x32xf32, #tpu.memory_space<vmem>>, %arg3: memref<1x5x32xf32, #tpu.memory_space<vmem>>, %arg4: memref<1x16x32xf32, #tpu.memory_space<vmem>>, %arg5: memref<3x32x16xbf16, #tpu.memory_space<vmem>>, %arg6: memref<3x1x16xf32, #tpu.memory_space<vmem>>, %arg7: memref<16x32xbf16, #tpu.memory_space<vmem>>, %arg8: memref<1x32xf32, #tpu.memory_space<vmem>>, %arg9: memref<1x32xf32, #tpu.memory_space<vmem>>, %arg10: memref<1x32xf32, #tpu.memory_space<vmem>>, %arg11: memref<1x5x32xf32, #tpu.memory_space<vmem>>) attributes {dimension_semantics = [#tpu.dimension_semantics<parallel>], iteration_bounds = array<i64: 2>, scalar_prefetch = 0 : i64, scratch_operands = 0 : i64, tpu.core_type = #tpu.core_type<tc>, window_params = [{transform_indices = @transform_0, window_bounds = array<i64: 1, 5, 32>}, {transform_indices = @transform_1, window_bounds = array<i64: 1, 16, 32>}, {transform_indices = @transform_2, window_bounds = array<i64: 1, 5, 32>}, {pipeline_mode = #tpu.pipeline_mode<synchronous>, transform_indices = @transform_3, window_bounds = array<i64: 1, 16, 32>}, {pipeline_mode = #tpu.pipeline_mode<synchronous>, transform_indices = @transform_4, window_bounds = array<i64: 3, 32, 16>}, {pipeline_mode = #tpu.pipeline_mode<synchronous>, transform_indices = @transform_5, window_bounds = array<i64: 3, 1, 16>}, {pipeline_mode = #tpu.pipeline_mode<synchronous>, transform_indices = @transform_6, window_bounds = array<i64: 16, 32>}, {pipeline_mode = #tpu.pipeline_mode<synchronous>, transform_indices = @transform_7, window_bounds = array<i64: 1, 32>}, {pipeline_mode = #tpu.pipeline_mode<synchronous>, transform_indices = @transform_8, window_bounds = array<i64: 1, 32>}, {pipeline_mode = #tpu.pipeline_mode<synchronous>, transform_indices = @transform_9, window_bounds = array<i64: 1, 32>}, {transform_indices = @transform_10, window_bounds = array<i64: 1, 5, 32>}]} {
    %c0 = arith.constant 0 : index
    %c0_0 = arith.constant 0 : index
    %c0_1 = arith.constant 0 : index
    %0 = vector.load %arg1[%c0, %c0_0, %c0_1] : memref<1x5x32xf32, #tpu.memory_space<vmem>>, vector<1x5x32xf32>
    %1 = vector.shape_cast %0 : vector<1x5x32xf32> to vector<5x32xf32>
    %c0_2 = arith.constant 0 : index
    %c0_3 = arith.constant 0 : index
    %c0_4 = arith.constant 0 : index
    %2 = vector.load %arg2[%c0_2, %c0_3, %c0_4] : memref<1x16x32xf32, #tpu.memory_space<vmem>>, vector<1x16x32xf32>
    %3 = vector.shape_cast %2 : vector<1x16x32xf32> to vector<16x32xf32>
    %c0_5 = arith.constant 0 : index
    %c0_6 = arith.constant 0 : index
    %c0_7 = arith.constant 0 : index
    %4 = vector.load %arg3[%c0_5, %c0_6, %c0_7] : memref<1x5x32xf32, #tpu.memory_space<vmem>>, vector<1x5x32xf32>
    %5 = vector.shape_cast %4 : vector<1x5x32xf32> to vector<5x32xf32>
    %6 = arith.addf %1, %5 : vector<5x32xf32>
    %c0_8 = arith.constant 0 : index
    %c0_9 = arith.constant 0 : index
    %c0_10 = arith.constant 0 : index
    %7 = vector.load %arg4[%c0_8, %c0_9, %c0_10] : memref<1x16x32xf32, #tpu.memory_space<vmem>>, vector<1x16x32xf32>
    %8 = vector.shape_cast %7 : vector<1x16x32xf32> to vector<16x32xf32>
    %9 = arith.addf %3, %8 : vector<16x32xf32>
    %c0_11 = arith.constant 0 : index
    %c0_12 = arith.constant 0 : index
    %c0_13 = arith.constant 0 : index
    %10 = vector.load %arg5[%c0_11, %c0_12, %c0_13] : memref<3x32x16xbf16, #tpu.memory_space<vmem>>, vector<1x32x16xbf16>
    %11 = vector.shape_cast %10 : vector<1x32x16xbf16> to vector<32x16xbf16>
    %12 = arith.truncf %6 : vector<5x32xf32> to vector<5x32xbf16>
    %cst = arith.constant dense<0.000000e+00> : vector<5x16xf32>
    %13 = tpu.matmul %12, %11, %cst {dimension_numbers = #tpu.dot_dimension_numbers<[1], [0], [0], [1], [0, 0, 1, 1], [], []>} : vector<5x32xbf16>, vector<32x16xbf16>, vector<5x16xf32> -> vector<5x16xf32>
    %c0_14 = arith.constant 0 : index
    %c0_15 = arith.constant 0 : index
    %c0_16 = arith.constant 0 : index
    %14 = vector.load %arg6[%c0_14, %c0_15, %c0_16] : memref<3x1x16xf32, #tpu.memory_space<vmem>>, vector<1x1x16xf32>
    %15 = vector.shape_cast %14 : vector<1x1x16xf32> to vector<1x16xf32>
    %16 = vector.broadcast %15 : vector<1x16xf32> to vector<5x16xf32>
    %17 = arith.addf %13, %16 : vector<5x16xf32>
    %c1 = arith.constant 1 : index
    %c0_17 = arith.constant 0 : index
    %c0_18 = arith.constant 0 : index
    %18 = vector.load %arg5[%c1, %c0_17, %c0_18] : memref<3x32x16xbf16, #tpu.memory_space<vmem>>, vector<1x32x16xbf16>
    %19 = vector.shape_cast %18 : vector<1x32x16xbf16> to vector<32x16xbf16>
    %20 = arith.truncf %9 : vector<16x32xf32> to vector<16x32xbf16>
    %cst_19 = arith.constant dense<0.000000e+00> : vector<16x16xf32>
    %21 = tpu.matmul %20, %19, %cst_19 {dimension_numbers = #tpu.dot_dimension_numbers<[1], [0], [0], [1], [0, 0, 1, 1], [], []>} : vector<16x32xbf16>, vector<32x16xbf16>, vector<16x16xf32> -> vector<16x16xf32>
    %c1_20 = arith.constant 1 : index
    %c0_21 = arith.constant 0 : index
    %c0_22 = arith.constant 0 : index
    %22 = vector.load %arg6[%c1_20, %c0_21, %c0_22] : memref<3x1x16xf32, #tpu.memory_space<vmem>>, vector<1x1x16xf32>
    %23 = vector.shape_cast %22 : vector<1x1x16xf32> to vector<1x16xf32>
    %24 = vector.broadcast %23 : vector<1x16xf32> to vector<16x16xf32>
    %25 = arith.addf %21, %24 : vector<16x16xf32>
    %c2 = arith.constant 2 : index
    %c0_23 = arith.constant 0 : index
    %c0_24 = arith.constant 0 : index
    %26 = vector.load %arg5[%c2, %c0_23, %c0_24] : memref<3x32x16xbf16, #tpu.memory_space<vmem>>, vector<1x32x16xbf16>
    %27 = vector.shape_cast %26 : vector<1x32x16xbf16> to vector<32x16xbf16>
    %28 = arith.truncf %3 : vector<16x32xf32> to vector<16x32xbf16>
    %cst_25 = arith.constant dense<0.000000e+00> : vector<16x16xf32>
    %29 = tpu.matmul %28, %27, %cst_25 {dimension_numbers = #tpu.dot_dimension_numbers<[1], [0], [0], [1], [0, 0, 1, 1], [], []>} : vector<16x32xbf16>, vector<32x16xbf16>, vector<16x16xf32> -> vector<16x16xf32>
    %c2_26 = arith.constant 2 : index
    %c0_27 = arith.constant 0 : index
    %c0_28 = arith.constant 0 : index
    %30 = vector.load %arg6[%c2_26, %c0_27, %c0_28] : memref<3x1x16xf32, #tpu.memory_space<vmem>>, vector<1x1x16xf32>
    %31 = vector.shape_cast %30 : vector<1x1x16xf32> to vector<1x16xf32>
    %32 = vector.broadcast %31 : vector<1x16xf32> to vector<16x16xf32>
    %33 = arith.addf %29, %32 : vector<16x16xf32>
    %c0_29 = arith.constant 0 : index
    %c0_30 = arith.constant 0 : index
    %34 = vector.load %arg7[%c0_29, %c0_30] : memref<16x32xbf16, #tpu.memory_space<vmem>>, vector<16x32xbf16>
    %35 = vector.extract_strided_slice %17 {offsets = [0, 0], sizes = [5, 8], strides = [1, 1]} : vector<5x16xf32> to vector<5x8xf32>
    %36 = vector.extract_strided_slice %25 {offsets = [0, 0], sizes = [16, 8], strides = [1, 1]} : vector<16x16xf32> to vector<16x8xf32>
    %37 = vector.extract_strided_slice %33 {offsets = [0, 0], sizes = [16, 8], strides = [1, 1]} : vector<16x16xf32> to vector<16x8xf32>
    %38 = arith.truncf %35 : vector<5x8xf32> to vector<5x8xbf16>
    %39 = arith.truncf %36 : vector<16x8xf32> to vector<16x8xbf16>
    %cst_31 = arith.constant dense<0.000000e+00> : vector<5x16xf32>
    %40 = tpu.matmul %38, %39, %cst_31 {dimension_numbers = #tpu.dot_dimension_numbers<[1], [1], [0], [0], [0, 0, 1, 0], [], []>} : vector<5x8xbf16>, vector<16x8xbf16>, vector<5x16xf32> -> vector<5x16xf32>
    %cst_32 = arith.constant 0.353553385 : f32
    %41 = vector.broadcast %cst_32 : f32 to vector<5x16xf32>
    %42 = arith.mulf %40, %41 : vector<5x16xf32>
    %cst_33 = arith.constant dense<0xFF800000> : vector<5xf32>
    %43 = vector.multi_reduction <maximumf>, %42, %cst_33 [1] : vector<5x16xf32> to vector<5xf32>
    %44 = vector.shape_cast %43 : vector<5xf32> to vector<5x1xf32>
    %45 = vector.broadcast %44 : vector<5x1xf32> to vector<5x16xf32>
    %46 = arith.subf %42, %45 : vector<5x16xf32>
    %47 = math.exp %46 : vector<5x16xf32>
    %cst_34 = arith.constant dense<0.000000e+00> : vector<5xf32>
    %48 = vector.multi_reduction <add>, %47, %cst_34 [1] : vector<5x16xf32> to vector<5xf32>
    %49 = vector.shape_cast %48 : vector<5xf32> to vector<5x1xf32>
    %50 = tpu.reciprocal %49 {approx = true} : vector<5x1xf32> -> vector<5x1xf32>
    %51 = vector.broadcast %50 : vector<5x1xf32> to vector<5x16xf32>
    %52 = arith.mulf %47, %51 : vector<5x16xf32>
    %53 = arith.truncf %52 : vector<5x16xf32> to vector<5x16xbf16>
    %54 = arith.truncf %37 : vector<16x8xf32> to vector<16x8xbf16>
    %cst_35 = arith.constant dense<0.000000e+00> : vector<5x8xf32>
    %55 = tpu.matmul %53, %54, %cst_35 {dimension_numbers = #tpu.dot_dimension_numbers<[1], [0], [0], [1], [0, 0, 1, 1], [], []>} : vector<5x16xbf16>, vector<16x8xbf16>, vector<5x8xf32> -> vector<5x8xf32>
    %56 = vector.extract_strided_slice %34 {offsets = [0, 0], sizes = [8, 32], strides = [1, 1]} : vector<16x32xbf16> to vector<8x32xbf16>
    %57 = arith.truncf %55 : vector<5x8xf32> to vector<5x8xbf16>
    %cst_36 = arith.constant dense<0.000000e+00> : vector<5x32xf32>
    %58 = tpu.matmul %57, %56, %cst_36 {dimension_numbers = #tpu.dot_dimension_numbers<[1], [0], [0], [1], [0, 0, 1, 1], [], []>} : vector<5x8xbf16>, vector<8x32xbf16>, vector<5x32xf32> -> vector<5x32xf32>
    %59 = vector.extract_strided_slice %17 {offsets = [0, 8], sizes = [5, 8], strides = [1, 1]} : vector<5x16xf32> to vector<5x8xf32>
    %60 = vector.extract_strided_slice %25 {offsets = [0, 8], sizes = [16, 8], strides = [1, 1]} : vector<16x16xf32> to vector<16x8xf32>
    %61 = vector.extract_strided_slice %33 {offsets = [0, 8], sizes = [16, 8], strides = [1, 1]} : vector<16x16xf32> to vector<16x8xf32>
    %62 = arith.truncf %59 : vector<5x8xf32> to vector<5x8xbf16>
    %63 = arith.truncf %60 : vector<16x8xf32> to vector<16x8xbf16>
    %cst_37 = arith.constant dense<0.000000e+00> : vector<5x16xf32>
    %64 = tpu.matmul %62, %63, %cst_37 {dimension_numbers = #tpu.dot_dimension_numbers<[1], [1], [0], [0], [0, 0, 1, 0], [], []>} : vector<5x8xbf16>, vector<16x8xbf16>, vector<5x16xf32> -> vector<5x16xf32>
    %cst_38 = arith.constant 0.353553385 : f32
    %65 = vector.broadcast %cst_38 : f32 to vector<5x16xf32>
    %66 = arith.mulf %64, %65 : vector<5x16xf32>
    %cst_39 = arith.constant dense<0xFF800000> : vector<5xf32>
    %67 = vector.multi_reduction <maximumf>, %66, %cst_39 [1] : vector<5x16xf32> to vector<5xf32>
    %68 = vector.shape_cast %67 : vector<5xf32> to vector<5x1xf32>
    %69 = vector.broadcast %68 : vector<5x1xf32> to vector<5x16xf32>
    %70 = arith.subf %66, %69 : vector<5x16xf32>
    %71 = math.exp %70 : vector<5x16xf32>
    %cst_40 = arith.constant dense<0.000000e+00> : vector<5xf32>
    %72 = vector.multi_reduction <add>, %71, %cst_40 [1] : vector<5x16xf32> to vector<5xf32>
    %73 = vector.shape_cast %72 : vector<5xf32> to vector<5x1xf32>
    %74 = tpu.reciprocal %73 {approx = true} : vector<5x1xf32> -> vector<5x1xf32>
    %75 = vector.broadcast %74 : vector<5x1xf32> to vector<5x16xf32>
    %76 = arith.mulf %71, %75 : vector<5x16xf32>
    %77 = arith.truncf %76 : vector<5x16xf32> to vector<5x16xbf16>
    %78 = arith.truncf %61 : vector<16x8xf32> to vector<16x8xbf16>
    %cst_41 = arith.constant dense<0.000000e+00> : vector<5x8xf32>
    %79 = tpu.matmul %77, %78, %cst_41 {dimension_numbers = #tpu.dot_dimension_numbers<[1], [0], [0], [1], [0, 0, 1, 1], [], []>} : vector<5x16xbf16>, vector<16x8xbf16>, vector<5x8xf32> -> vector<5x8xf32>
    %80 = vector.extract_strided_slice %34 {offsets = [8, 0], sizes = [8, 32], strides = [1, 1]} : vector<16x32xbf16> to vector<8x32xbf16>
    %81 = arith.truncf %79 : vector<5x8xf32> to vector<5x8xbf16>
    %cst_42 = arith.constant dense<0.000000e+00> : vector<5x32xf32>
    %82 = tpu.matmul %81, %80, %cst_42 {dimension_numbers = #tpu.dot_dimension_numbers<[1], [0], [0], [1], [0, 0, 1, 1], [], []>} : vector<5x8xbf16>, vector<8x32xbf16>, vector<5x32xf32> -> vector<5x32xf32>
    %83 = arith.addf %58, %82 : vector<5x32xf32>
    %c0_43 = arith.constant 0 : index
    %c0_44 = arith.constant 0 : index
    %84 = vector.load %arg8[%c0_43, %c0_44] : memref<1x32xf32, #tpu.memory_space<vmem>>, vector<1x32xf32>
    %85 = vector.broadcast %84 : vector<1x32xf32> to vector<5x32xf32>
    %86 = arith.addf %83, %85 : vector<5x32xf32>
    %87 = arith.addf %1, %86 : vector<5x32xf32>
    %c0_45 = arith.constant 0 : index
    %c0_46 = arith.constant 0 : index
    %88 = vector.load %arg9[%c0_45, %c0_46] : memref<1x32xf32, #tpu.memory_space<vmem>>, vector<1x32xf32>
    %c0_47 = arith.constant 0 : index
    %c0_48 = arith.constant 0 : index
    %89 = vector.load %arg10[%c0_47, %c0_48] : memref<1x32xf32, #tpu.memory_space<vmem>>, vector<1x32xf32>
    %cst_49 = arith.constant dense<0.000000e+00> : vector<5xf32>
    %90 = vector.multi_reduction <add>, %87, %cst_49 [1] : vector<5x32xf32> to vector<5xf32>
    %91 = vector.shape_cast %90 : vector<5xf32> to vector<5x1xf32>
    %cst_50 = arith.constant 3.200000e+01 : f32
    %92 = vector.broadcast %cst_50 : f32 to vector<5x1xf32>
    %93 = arith.divf %91, %92 : vector<5x1xf32>
    %94 = vector.broadcast %93 : vector<5x1xf32> to vector<5x32xf32>
    %95 = arith.subf %87, %94 : vector<5x32xf32>
    %96 = arith.mulf %95, %95 : vector<5x32xf32>
    %cst_51 = arith.constant dense<0.000000e+00> : vector<5xf32>
    %97 = vector.multi_reduction <add>, %96, %cst_51 [1] : vector<5x32xf32> to vector<5xf32>
    %98 = vector.shape_cast %97 : vector<5xf32> to vector<5x1xf32>
    %cst_52 = arith.constant 3.200000e+01 : f32
    %99 = vector.broadcast %cst_52 : f32 to vector<5x1xf32>
    %100 = arith.divf %98, %99 : vector<5x1xf32>
    %cst_53 = arith.constant 9.99999974E-6 : f32
    %101 = vector.broadcast %cst_53 : f32 to vector<5x1xf32>
    %102 = arith.addf %100, %101 : vector<5x1xf32>
    %103 = math.rsqrt %102 : vector<5x1xf32>
    %104 = vector.broadcast %103 : vector<5x1xf32> to vector<5x32xf32>
    %105 = arith.mulf %95, %104 : vector<5x32xf32>
    %106 = vector.broadcast %88 : vector<1x32xf32> to vector<5x32xf32>
    %107 = arith.mulf %105, %106 : vector<5x32xf32>
    %108 = vector.broadcast %89 : vector<1x32xf32> to vector<5x32xf32>
    %109 = arith.addf %107, %108 : vector<5x32xf32>
    %c0_54 = arith.constant 0 : index
    %c0_55 = arith.constant 0 : index
    %c0_56 = arith.constant 0 : index
    %110 = vector.load %arg11[%c0_54, %c0_55, %c0_56] : memref<1x5x32xf32, #tpu.memory_space<vmem>>, vector<1x5x32xf32>
    %111 = vector.shape_cast %110 : vector<1x5x32xf32> to vector<5x32xf32>
    %112 = vector.shape_cast %109 : vector<5x32xf32> to vector<1x5x32xf32>
    tpu.vector_store %arg11[%c0_54, %c0_55, %c0_56], %112 {strides = array<i32>} : memref<1x5x32xf32, #tpu.memory_space<vmem>>, vector<1x5x32xf32>,
    return
  }
  func.func @transform_0(%arg0: i32) -> (i32, i32, i32) {
    %c0_i32 = arith.constant 0 : i32
    %c0_i32_0 = arith.constant 0 : i32
    %c0_i32_1 = arith.constant 0 : i32
    return %arg0, %c0_i32, %c0_i32_0 : i32, i32, i32
  }
  func.func @transform_1(%arg0: i32) -> (i32, i32, i32) {
    %c0_i32 = arith.constant 0 : i32
    %c0_i32_0 = arith.constant 0 : i32
    %c0_i32_1 = arith.constant 0 : i32
    return %arg0, %c0_i32, %c0_i32_0 : i32, i32, i32
  }
  func.func @transform_2(%arg0: i32) -> (i32, i32, i32) {
    %c0_i32 = arith.constant 0 : i32
    %c0_i32_0 = arith.constant 0 : i32
    %c0_i32_1 = arith.constant 0 : i32
    return %arg0, %c0_i32, %c0_i32_0 : i32, i32, i32
  }
  func.func @transform_3(%arg0: i32) -> (i32, i32, i32) {
    %c0_i32 = arith.constant 0 : i32
    %c0_i32_0 = arith.constant 0 : i32
    %c0_i32_1 = arith.constant 0 : i32
    %c0_i32_2 = arith.constant 0 : i32
    return %c0_i32, %c0_i32_0, %c0_i32_1 : i32, i32, i32
  }
  func.func @transform_4(%arg0: i32) -> (i32, i32, i32) {
    %c0_i32 = arith.constant 0 : i32
    %c0_i32_0 = arith.constant 0 : i32
    %c0_i32_1 = arith.constant 0 : i32
    %c0_i32_2 = arith.constant 0 : i32
    return %c0_i32, %c0_i32_0, %c0_i32_1 : i32, i32, i32
  }
  func.func @transform_5(%arg0: i32) -> (i32, i32, i32) {
    %c0_i32 = arith.constant 0 : i32
    %c0_i32_0 = arith.constant 0 : i32
    %c0_i32_1 = arith.constant 0 : i32
    %c0_i32_2 = arith.constant 0 : i32
    return %c0_i32, %c0_i32_0, %c0_i32_1 : i32, i32, i32
  }
  func.func @transform_6(%arg0: i32) -> (i32, i32) {
    %c0_i32 = arith.constant 0 : i32
    %c0_i32_0 = arith.constant 0 : i32
    %c0_i32_1 = arith.constant 0 : i32
    return %c0_i32, %c0_i32_0 : i32, i32
  }
  func.func @transform_7(%arg0: i32) -> (i32, i32) {
    %c0_i32 = arith.constant 0 : i32
    %c0_i32_0 = arith.constant 0 : i32
    %c0_i32_1 = arith.constant 0 : i32
    return %c0_i32, %c0_i32_0 : i32, i32
  }
  func.func @transform_8(%arg0: i32) -> (i32, i32) {
    %c0_i32 = arith.constant 0 : i32
    %c0_i32_0 = arith.constant 0 : i32
    %c0_i32_1 = arith.constant 0 : i32
    return %c0_i32, %c0_i32_0 : i32, i32
  }
  func.func @transform_9(%arg0: i32) -> (i32, i32) {
    %c0_i32 = arith.constant 0 : i32
    %c0_i32_0 = arith.constant 0 : i32
    %c0_i32_1 = arith.constant 0 : i32
    return %c0_i32, %c0_i32_0 : i32, i32
  }
  func.func @transform_10(%arg0: i32) -> (i32, i32, i32) {
    %c0_i32 = arith.constant 0 : i32
    %c0_i32_0 = arith.constant 0 : i32
    %c0_i32_1 = arith.constant 0 : i32
    return %arg0, %c0_i32, %c0_i32_0 : i32, i32, i32
  }
}

module attributes {stable_mosaic.version = 11 : i64} {
  func.func @_twoway_block_kernel(%arg0: i32, %arg1: memref<1x5x32xf32, #tpu.memory_space<vmem>>, %arg2: memref<1x16x32xf32, #tpu.memory_space<vmem>>, %arg3: memref<1x5x32xf32, #tpu.memory_space<vmem>>, %arg4: memref<1x16x32xf32, #tpu.memory_space<vmem>>, %arg5: memref<3x32x32xbf16, #tpu.memory_space<vmem>>, %arg6: memref<3x1x32xf32, #tpu.memory_space<vmem>>, %arg7: memref<32x32xbf16, #tpu.memory_space<vmem>>, %arg8: memref<1x32xf32, #tpu.memory_space<vmem>>, %arg9: memref<1x32xf32, #tpu.memory_space<vmem>>, %arg10: memref<1x32xf32, #tpu.memory_space<vmem>>, %arg11: memref<3x32x16xbf16, #tpu.memory_space<vmem>>, %arg12: memref<3x1x16xf32, #tpu.memory_space<vmem>>, %arg13: memref<16x32xbf16, #tpu.memory_space<vmem>>, %arg14: memref<1x32xf32, #tpu.memory_space<vmem>>, %arg15: memref<1x32xf32, #tpu.memory_space<vmem>>, %arg16: memref<1x32xf32, #tpu.memory_space<vmem>>, %arg17: memref<32x64xbf16, #tpu.memory_space<vmem>>, %arg18: memref<1x64xf32, #tpu.memory_space<vmem>>, %arg19: memref<64x32xbf16, #tpu.memory_space<vmem>>, %arg20: memref<1x32xf32, #tpu.memory_space<vmem>>, %arg21: memref<1x32xf32, #tpu.memory_space<vmem>>, %arg22: memref<1x32xf32, #tpu.memory_space<vmem>>, %arg23: memref<3x32x16xbf16, #tpu.memory_space<vmem>>, %arg24: memref<3x1x16xf32, #tpu.memory_space<vmem>>, %arg25: memref<16x32xbf16, #tpu.memory_space<vmem>>, %arg26: memref<1x32xf32, #tpu.memory_space<vmem>>, %arg27: memref<1x32xf32, #tpu.memory_space<vmem>>, %arg28: memref<1x32xf32, #tpu.memory_space<vmem>>, %arg29: memref<1x5x32xf32, #tpu.memory_space<vmem>>, %arg30: memref<1x16x32xf32, #tpu.memory_space<vmem>>) attributes {dimension_semantics = [#tpu.dimension_semantics<parallel>], iteration_bounds = array<i64: 2>, scalar_prefetch = 0 : i64, scratch_operands = 0 : i64, tpu.core_type = #tpu.core_type<tc>, window_params = [{transform_indices = @transform_0, window_bounds = array<i64: 1, 5, 32>}, {transform_indices = @transform_1, window_bounds = array<i64: 1, 16, 32>}, {transform_indices = @transform_2, window_bounds = array<i64: 1, 5, 32>}, {pipeline_mode = #tpu.pipeline_mode<synchronous>, transform_indices = @transform_3, window_bounds = array<i64: 1, 16, 32>}, {pipeline_mode = #tpu.pipeline_mode<synchronous>, transform_indices = @transform_4, window_bounds = array<i64: 3, 32, 32>}, {pipeline_mode = #tpu.pipeline_mode<synchronous>, transform_indices = @transform_5, window_bounds = array<i64: 3, 1, 32>}, {pipeline_mode = #tpu.pipeline_mode<synchronous>, transform_indices = @transform_6, window_bounds = array<i64: 32, 32>}, {pipeline_mode = #tpu.pipeline_mode<synchronous>, transform_indices = @transform_7, window_bounds = array<i64: 1, 32>}, {pipeline_mode = #tpu.pipeline_mode<synchronous>, transform_indices = @transform_8, window_bounds = array<i64: 1, 32>}, {pipeline_mode = #tpu.pipeline_mode<synchronous>, transform_indices = @transform_9, window_bounds = array<i64: 1, 32>}, {pipeline_mode = #tpu.pipeline_mode<synchronous>, transform_indices = @transform_10, window_bounds = array<i64: 3, 32, 16>}, {pipeline_mode = #tpu.pipeline_mode<synchronous>, transform_indices = @transform_11, window_bounds = array<i64: 3, 1, 16>}, {pipeline_mode = #tpu.pipeline_mode<synchronous>, transform_indices = @transform_12, window_bounds = array<i64: 16, 32>}, {pipeline_mode = #tpu.pipeline_mode<synchronous>, transform_indices = @transform_13, window_bounds = array<i64: 1, 32>}, {pipeline_mode = #tpu.pipeline_mode<synchronous>, transform_indices = @transform_14, window_bounds = array<i64: 1, 32>}, {pipeline_mode = #tpu.pipeline_mode<synchronous>, transform_indices = @transform_15, window_bounds = array<i64: 1, 32>}, {pipeline_mode = #tpu.pipeline_mode<synchronous>, transform_indices = @transform_16, window_bounds = array<i64: 32, 64>}, {pipeline_mode = #tpu.pipeline_mode<synchronous>, transform_indices = @transform_17, window_bounds = array<i64: 1, 64>}, {pipeline_mode = #tpu.pipeline_mode<synchronous>, transform_indices = @transform_18, window_bounds = array<i64: 64, 32>}, {pipeline_mode = #tpu.pipeline_mode<synchronous>, transform_indices = @transform_19, window_bounds = array<i64: 1, 32>}, {pipeline_mode = #tpu.pipeline_mode<synchronous>, transform_indices = @transform_20, window_bounds = array<i64: 1, 32>}, {pipeline_mode = #tpu.pipeline_mode<synchronous>, transform_indices = @transform_21, window_bounds = array<i64: 1, 32>}, {pipeline_mode = #tpu.pipeline_mode<synchronous>, transform_indices = @transform_22, window_bounds = array<i64: 3, 32, 16>}, {pipeline_mode = #tpu.pipeline_mode<synchronous>, transform_indices = @transform_23, window_bounds = array<i64: 3, 1, 16>}, {pipeline_mode = #tpu.pipeline_mode<synchronous>, transform_indices = @transform_24, window_bounds = array<i64: 16, 32>}, {pipeline_mode = #tpu.pipeline_mode<synchronous>, transform_indices = @transform_25, window_bounds = array<i64: 1, 32>}, {pipeline_mode = #tpu.pipeline_mode<synchronous>, transform_indices = @transform_26, window_bounds = array<i64: 1, 32>}, {pipeline_mode = #tpu.pipeline_mode<synchronous>, transform_indices = @transform_27, window_bounds = array<i64: 1, 32>}, {transform_indices = @transform_28, window_bounds = array<i64: 1, 5, 32>}, {transform_indices = @transform_29, window_bounds = array<i64: 1, 16, 32>}]} {
    %c0 = arith.constant 0 : index
    %c0_0 = arith.constant 0 : index
    %c0_1 = arith.constant 0 : index
    %0 = vector.load %arg1[%c0, %c0_0, %c0_1] : memref<1x5x32xf32, #tpu.memory_space<vmem>>, vector<1x5x32xf32>
    %1 = vector.shape_cast %0 : vector<1x5x32xf32> to vector<5x32xf32>
    %c0_2 = arith.constant 0 : index
    %c0_3 = arith.constant 0 : index
    %c0_4 = arith.constant 0 : index
    %2 = vector.load %arg2[%c0_2, %c0_3, %c0_4] : memref<1x16x32xf32, #tpu.memory_space<vmem>>, vector<1x16x32xf32>
    %3 = vector.shape_cast %2 : vector<1x16x32xf32> to vector<16x32xf32>
    %c0_5 = arith.constant 0 : index
    %c0_6 = arith.constant 0 : index
    %c0_7 = arith.constant 0 : index
    %4 = vector.load %arg3[%c0_5, %c0_6, %c0_7] : memref<1x5x32xf32, #tpu.memory_space<vmem>>, vector<1x5x32xf32>
    %5 = vector.shape_cast %4 : vector<1x5x32xf32> to vector<5x32xf32>
    %c0_8 = arith.constant 0 : index
    %c0_9 = arith.constant 0 : index
    %c0_10 = arith.constant 0 : index
    %6 = vector.load %arg4[%c0_8, %c0_9, %c0_10] : memref<1x16x32xf32, #tpu.memory_space<vmem>>, vector<1x16x32xf32>
    %7 = vector.shape_cast %6 : vector<1x16x32xf32> to vector<16x32xf32>
    %8 = arith.addf %1, %5 : vector<5x32xf32>
    %c0_11 = arith.constant 0 : index
    %c0_12 = arith.constant 0 : index
    %c0_13 = arith.constant 0 : index
    %9 = vector.load %arg5[%c0_11, %c0_12, %c0_13] : memref<3x32x32xbf16, #tpu.memory_space<vmem>>, vector<1x32x32xbf16>
    %10 = vector.shape_cast %9 : vector<1x32x32xbf16> to vector<32x32xbf16>
    %11 = arith.truncf %8 : vector<5x32xf32> to vector<5x32xbf16>
    %cst = arith.constant dense<0.000000e+00> : vector<5x32xf32>
    %12 = tpu.matmul %11, %10, %cst {dimension_numbers = #tpu.dot_dimension_numbers<[1], [0], [0], [1], [0, 0, 1, 1], [], []>} : vector<5x32xbf16>, vector<32x32xbf16>, vector<5x32xf32> -> vector<5x32xf32>
    %c0_14 = arith.constant 0 : index
    %c0_15 = arith.constant 0 : index
    %c0_16 = arith.constant 0 : index
    %13 = vector.load %arg6[%c0_14, %c0_15, %c0_16] : memref<3x1x32xf32, #tpu.memory_space<vmem>>, vector<1x1x32xf32>
    %14 = vector.shape_cast %13 : vector<1x1x32xf32> to vector<1x32xf32>
    %15 = vector.broadcast %14 : vector<1x32xf32> to vector<5x32xf32>
    %16 = arith.addf %12, %15 : vector<5x32xf32>
    %c1 = arith.constant 1 : index
    %c0_17 = arith.constant 0 : index
    %c0_18 = arith.constant 0 : index
    %17 = vector.load %arg5[%c1, %c0_17, %c0_18] : memref<3x32x32xbf16, #tpu.memory_space<vmem>>, vector<1x32x32xbf16>
    %18 = vector.shape_cast %17 : vector<1x32x32xbf16> to vector<32x32xbf16>
    %19 = arith.truncf %8 : vector<5x32xf32> to vector<5x32xbf16>
    %cst_19 = arith.constant dense<0.000000e+00> : vector<5x32xf32>
    %20 = tpu.matmul %19, %18, %cst_19 {dimension_numbers = #tpu.dot_dimension_numbers<[1], [0], [0], [1], [0, 0, 1, 1], [], []>} : vector<5x32xbf16>, vector<32x32xbf16>, vector<5x32xf32> -> vector<5x32xf32>
    %c1_20 = arith.constant 1 : index
    %c0_21 = arith.constant 0 : index
    %c0_22 = arith.constant 0 : index
    %21 = vector.load %arg6[%c1_20, %c0_21, %c0_22] : memref<3x1x32xf32, #tpu.memory_space<vmem>>, vector<1x1x32xf32>
    %22 = vector.shape_cast %21 : vector<1x1x32xf32> to vector<1x32xf32>
    %23 = vector.broadcast %22 : vector<1x32xf32> to vector<5x32xf32>
    %24 = arith.addf %20, %23 : vector<5x32xf32>
    %c2 = arith.constant 2 : index
    %c0_23 = arith.constant 0 : index
    %c0_24 = arith.constant 0 : index
    %25 = vector.load %arg5[%c2, %c0_23, %c0_24] : memref<3x32x32xbf16, #tpu.memory_space<vmem>>, vector<1x32x32xbf16>
    %26 = vector.shape_cast %25 : vector<1x32x32xbf16> to vector<32x32xbf16>
    %27 = arith.truncf %1 : vector<5x32xf32> to vector<5x32xbf16>
    %cst_25 = arith.constant dense<0.000000e+00> : vector<5x32xf32>
    %28 = tpu.matmul %27, %26, %cst_25 {dimension_numbers = #tpu.dot_dimension_numbers<[1], [0], [0], [1], [0, 0, 1, 1], [], []>} : vector<5x32xbf16>, vector<32x32xbf16>, vector<5x32xf32> -> vector<5x32xf32>
    %c2_26 = arith.constant 2 : index
    %c0_27 = arith.constant 0 : index
    %c0_28 = arith.constant 0 : index
    %29 = vector.load %arg6[%c2_26, %c0_27, %c0_28] : memref<3x1x32xf32, #tpu.memory_space<vmem>>, vector<1x1x32xf32>
    %30 = vector.shape_cast %29 : vector<1x1x32xf32> to vector<1x32xf32>
    %31 = vector.broadcast %30 : vector<1x32xf32> to vector<5x32xf32>
    %32 = arith.addf %28, %31 : vector<5x32xf32>
    %c0_29 = arith.constant 0 : index
    %c0_30 = arith.constant 0 : index
    %33 = vector.load %arg7[%c0_29, %c0_30] : memref<32x32xbf16, #tpu.memory_space<vmem>>, vector<32x32xbf16>
    %34 = vector.extract_strided_slice %16 {offsets = [0, 0], sizes = [5, 16], strides = [1, 1]} : vector<5x32xf32> to vector<5x16xf32>
    %35 = vector.extract_strided_slice %24 {offsets = [0, 0], sizes = [5, 16], strides = [1, 1]} : vector<5x32xf32> to vector<5x16xf32>
    %36 = vector.extract_strided_slice %32 {offsets = [0, 0], sizes = [5, 16], strides = [1, 1]} : vector<5x32xf32> to vector<5x16xf32>
    %37 = arith.truncf %34 : vector<5x16xf32> to vector<5x16xbf16>
    %38 = arith.truncf %35 : vector<5x16xf32> to vector<5x16xbf16>
    %cst_31 = arith.constant dense<0.000000e+00> : vector<5x5xf32>
    %39 = tpu.matmul %37, %38, %cst_31 {dimension_numbers = #tpu.dot_dimension_numbers<[1], [1], [0], [0], [0, 0, 1, 0], [], []>} : vector<5x16xbf16>, vector<5x16xbf16>, vector<5x5xf32> -> vector<5x5xf32>
    %cst_32 = arith.constant 2.500000e-01 : f32
    %40 = vector.broadcast %cst_32 : f32 to vector<5x5xf32>
    %41 = arith.mulf %39, %40 : vector<5x5xf32>
    %cst_33 = arith.constant dense<0xFF800000> : vector<5xf32>
    %42 = vector.multi_reduction <maximumf>, %41, %cst_33 [1] : vector<5x5xf32> to vector<5xf32>
    %43 = vector.shape_cast %42 : vector<5xf32> to vector<5x1xf32>
    %44 = vector.broadcast %43 : vector<5x1xf32> to vector<5x5xf32>
    %45 = arith.subf %41, %44 : vector<5x5xf32>
    %46 = math.exp %45 : vector<5x5xf32>
    %cst_34 = arith.constant dense<0.000000e+00> : vector<5xf32>
    %47 = vector.multi_reduction <add>, %46, %cst_34 [1] : vector<5x5xf32> to vector<5xf32>
    %48 = vector.shape_cast %47 : vector<5xf32> to vector<5x1xf32>
    %49 = tpu.reciprocal %48 {approx = true} : vector<5x1xf32> -> vector<5x1xf32>
    %50 = vector.broadcast %49 : vector<5x1xf32> to vector<5x5xf32>
    %51 = arith.mulf %46, %50 : vector<5x5xf32>
    %52 = arith.truncf %51 : vector<5x5xf32> to vector<5x5xbf16>
    %53 = arith.truncf %36 : vector<5x16xf32> to vector<5x16xbf16>
    %cst_35 = arith.constant dense<0.000000e+00> : vector<5x16xf32>
    %54 = tpu.matmul %52, %53, %cst_35 {dimension_numbers = #tpu.dot_dimension_numbers<[1], [0], [0], [1], [0, 0, 1, 1], [], []>} : vector<5x5xbf16>, vector<5x16xbf16>, vector<5x16xf32> -> vector<5x16xf32>
    %55 = vector.extract_strided_slice %33 {offsets = [0, 0], sizes = [16, 32], strides = [1, 1]} : vector<32x32xbf16> to vector<16x32xbf16>
    %56 = arith.truncf %54 : vector<5x16xf32> to vector<5x16xbf16>
    %cst_36 = arith.constant dense<0.000000e+00> : vector<5x32xf32>
    %57 = tpu.matmul %56, %55, %cst_36 {dimension_numbers = #tpu.dot_dimension_numbers<[1], [0], [0], [1], [0, 0, 1, 1], [], []>} : vector<5x16xbf16>, vector<16x32xbf16>, vector<5x32xf32> -> vector<5x32xf32>
    %58 = vector.extract_strided_slice %16 {offsets = [0, 16], sizes = [5, 16], strides = [1, 1]} : vector<5x32xf32> to vector<5x16xf32>
    %59 = vector.extract_strided_slice %24 {offsets = [0, 16], sizes = [5, 16], strides = [1, 1]} : vector<5x32xf32> to vector<5x16xf32>
    %60 = vector.extract_strided_slice %32 {offsets = [0, 16], sizes = [5, 16], strides = [1, 1]} : vector<5x32xf32> to vector<5x16xf32>
    %61 = arith.truncf %58 : vector<5x16xf32> to vector<5x16xbf16>
    %62 = arith.truncf %59 : vector<5x16xf32> to vector<5x16xbf16>
    %cst_37 = arith.constant dense<0.000000e+00> : vector<5x5xf32>
    %63 = tpu.matmul %61, %62, %cst_37 {dimension_numbers = #tpu.dot_dimension_numbers<[1], [1], [0], [0], [0, 0, 1, 0], [], []>} : vector<5x16xbf16>, vector<5x16xbf16>, vector<5x5xf32> -> vector<5x5xf32>
    %cst_38 = arith.constant 2.500000e-01 : f32
    %64 = vector.broadcast %cst_38 : f32 to vector<5x5xf32>
    %65 = arith.mulf %63, %64 : vector<5x5xf32>
    %cst_39 = arith.constant dense<0xFF800000> : vector<5xf32>
    %66 = vector.multi_reduction <maximumf>, %65, %cst_39 [1] : vector<5x5xf32> to vector<5xf32>
    %67 = vector.shape_cast %66 : vector<5xf32> to vector<5x1xf32>
    %68 = vector.broadcast %67 : vector<5x1xf32> to vector<5x5xf32>
    %69 = arith.subf %65, %68 : vector<5x5xf32>
    %70 = math.exp %69 : vector<5x5xf32>
    %cst_40 = arith.constant dense<0.000000e+00> : vector<5xf32>
    %71 = vector.multi_reduction <add>, %70, %cst_40 [1] : vector<5x5xf32> to vector<5xf32>
    %72 = vector.shape_cast %71 : vector<5xf32> to vector<5x1xf32>
    %73 = tpu.reciprocal %72 {approx = true} : vector<5x1xf32> -> vector<5x1xf32>
    %74 = vector.broadcast %73 : vector<5x1xf32> to vector<5x5xf32>
    %75 = arith.mulf %70, %74 : vector<5x5xf32>
    %76 = arith.truncf %75 : vector<5x5xf32> to vector<5x5xbf16>
    %77 = arith.truncf %60 : vector<5x16xf32> to vector<5x16xbf16>
    %cst_41 = arith.constant dense<0.000000e+00> : vector<5x16xf32>
    %78 = tpu.matmul %76, %77, %cst_41 {dimension_numbers = #tpu.dot_dimension_numbers<[1], [0], [0], [1], [0, 0, 1, 1], [], []>} : vector<5x5xbf16>, vector<5x16xbf16>, vector<5x16xf32> -> vector<5x16xf32>
    %79 = vector.extract_strided_slice %33 {offsets = [16, 0], sizes = [16, 32], strides = [1, 1]} : vector<32x32xbf16> to vector<16x32xbf16>
    %80 = arith.truncf %78 : vector<5x16xf32> to vector<5x16xbf16>
    %cst_42 = arith.constant dense<0.000000e+00> : vector<5x32xf32>
    %81 = tpu.matmul %80, %79, %cst_42 {dimension_numbers = #tpu.dot_dimension_numbers<[1], [0], [0], [1], [0, 0, 1, 1], [], []>} : vector<5x16xbf16>, vector<16x32xbf16>, vector<5x32xf32> -> vector<5x32xf32>
    %82 = arith.addf %57, %81 : vector<5x32xf32>
    %c0_43 = arith.constant 0 : index
    %c0_44 = arith.constant 0 : index
    %83 = vector.load %arg8[%c0_43, %c0_44] : memref<1x32xf32, #tpu.memory_space<vmem>>, vector<1x32xf32>
    %84 = vector.broadcast %83 : vector<1x32xf32> to vector<5x32xf32>
    %85 = arith.addf %82, %84 : vector<5x32xf32>
    %86 = arith.addf %1, %85 : vector<5x32xf32>
    %c0_45 = arith.constant 0 : index
    %c0_46 = arith.constant 0 : index
    %87 = vector.load %arg9[%c0_45, %c0_46] : memref<1x32xf32, #tpu.memory_space<vmem>>, vector<1x32xf32>
    %c0_47 = arith.constant 0 : index
    %c0_48 = arith.constant 0 : index
    %88 = vector.load %arg10[%c0_47, %c0_48] : memref<1x32xf32, #tpu.memory_space<vmem>>, vector<1x32xf32>
    %cst_49 = arith.constant dense<0.000000e+00> : vector<5xf32>
    %89 = vector.multi_reduction <add>, %86, %cst_49 [1] : vector<5x32xf32> to vector<5xf32>
    %90 = vector.shape_cast %89 : vector<5xf32> to vector<5x1xf32>
    %cst_50 = arith.constant 3.200000e+01 : f32
    %91 = vector.broadcast %cst_50 : f32 to vector<5x1xf32>
    %92 = arith.divf %90, %91 : vector<5x1xf32>
    %93 = vector.broadcast %92 : vector<5x1xf32> to vector<5x32xf32>
    %94 = arith.subf %86, %93 : vector<5x32xf32>
    %95 = arith.mulf %94, %94 : vector<5x32xf32>
    %cst_51 = arith.constant dense<0.000000e+00> : vector<5xf32>
    %96 = vector.multi_reduction <add>, %95, %cst_51 [1] : vector<5x32xf32> to vector<5xf32>
    %97 = vector.shape_cast %96 : vector<5xf32> to vector<5x1xf32>
    %cst_52 = arith.constant 3.200000e+01 : f32
    %98 = vector.broadcast %cst_52 : f32 to vector<5x1xf32>
    %99 = arith.divf %97, %98 : vector<5x1xf32>
    %cst_53 = arith.constant 9.99999974E-6 : f32
    %100 = vector.broadcast %cst_53 : f32 to vector<5x1xf32>
    %101 = arith.addf %99, %100 : vector<5x1xf32>
    %102 = math.rsqrt %101 : vector<5x1xf32>
    %103 = vector.broadcast %102 : vector<5x1xf32> to vector<5x32xf32>
    %104 = arith.mulf %94, %103 : vector<5x32xf32>
    %105 = vector.broadcast %87 : vector<1x32xf32> to vector<5x32xf32>
    %106 = arith.mulf %104, %105 : vector<5x32xf32>
    %107 = vector.broadcast %88 : vector<1x32xf32> to vector<5x32xf32>
    %108 = arith.addf %106, %107 : vector<5x32xf32>
    %109 = arith.addf %108, %5 : vector<5x32xf32>
    %110 = arith.addf %3, %7 : vector<16x32xf32>
    %c0_54 = arith.constant 0 : index
    %c0_55 = arith.constant 0 : index
    %c0_56 = arith.constant 0 : index
    %111 = vector.load %arg11[%c0_54, %c0_55, %c0_56] : memref<3x32x16xbf16, #tpu.memory_space<vmem>>, vector<1x32x16xbf16>
    %112 = vector.shape_cast %111 : vector<1x32x16xbf16> to vector<32x16xbf16>
    %113 = arith.truncf %109 : vector<5x32xf32> to vector<5x32xbf16>
    %cst_57 = arith.constant dense<0.000000e+00> : vector<5x16xf32>
    %114 = tpu.matmul %113, %112, %cst_57 {dimension_numbers = #tpu.dot_dimension_numbers<[1], [0], [0], [1], [0, 0, 1, 1], [], []>} : vector<5x32xbf16>, vector<32x16xbf16>, vector<5x16xf32> -> vector<5x16xf32>
    %c0_58 = arith.constant 0 : index
    %c0_59 = arith.constant 0 : index
    %c0_60 = arith.constant 0 : index
    %115 = vector.load %arg12[%c0_58, %c0_59, %c0_60] : memref<3x1x16xf32, #tpu.memory_space<vmem>>, vector<1x1x16xf32>
    %116 = vector.shape_cast %115 : vector<1x1x16xf32> to vector<1x16xf32>
    %117 = vector.broadcast %116 : vector<1x16xf32> to vector<5x16xf32>
    %118 = arith.addf %114, %117 : vector<5x16xf32>
    %c1_61 = arith.constant 1 : index
    %c0_62 = arith.constant 0 : index
    %c0_63 = arith.constant 0 : index
    %119 = vector.load %arg11[%c1_61, %c0_62, %c0_63] : memref<3x32x16xbf16, #tpu.memory_space<vmem>>, vector<1x32x16xbf16>
    %120 = vector.shape_cast %119 : vector<1x32x16xbf16> to vector<32x16xbf16>
    %121 = arith.truncf %110 : vector<16x32xf32> to vector<16x32xbf16>
    %cst_64 = arith.constant dense<0.000000e+00> : vector<16x16xf32>
    %122 = tpu.matmul %121, %120, %cst_64 {dimension_numbers = #tpu.dot_dimension_numbers<[1], [0], [0], [1], [0, 0, 1, 1], [], []>} : vector<16x32xbf16>, vector<32x16xbf16>, vector<16x16xf32> -> vector<16x16xf32>
    %c1_65 = arith.constant 1 : index
    %c0_66 = arith.constant 0 : index
    %c0_67 = arith.constant 0 : index
    %123 = vector.load %arg12[%c1_65, %c0_66, %c0_67] : memref<3x1x16xf32, #tpu.memory_space<vmem>>, vector<1x1x16xf32>
    %124 = vector.shape_cast %123 : vector<1x1x16xf32> to vector<1x16xf32>
    %125 = vector.broadcast %124 : vector<1x16xf32> to vector<16x16xf32>
    %126 = arith.addf %122, %125 : vector<16x16xf32>
    %c2_68 = arith.constant 2 : index
    %c0_69 = arith.constant 0 : index
    %c0_70 = arith.constant 0 : index
    %127 = vector.load %arg11[%c2_68, %c0_69, %c0_70] : memref<3x32x16xbf16, #tpu.memory_space<vmem>>, vector<1x32x16xbf16>
    %128 = vector.shape_cast %127 : vector<1x32x16xbf16> to vector<32x16xbf16>
    %129 = arith.truncf %3 : vector<16x32xf32> to vector<16x32xbf16>
    %cst_71 = arith.constant dense<0.000000e+00> : vector<16x16xf32>
    %130 = tpu.matmul %129, %128, %cst_71 {dimension_numbers = #tpu.dot_dimension_numbers<[1], [0], [0], [1], [0, 0, 1, 1], [], []>} : vector<16x32xbf16>, vector<32x16xbf16>, vector<16x16xf32> -> vector<16x16xf32>
    %c2_72 = arith.constant 2 : index
    %c0_73 = arith.constant 0 : index
    %c0_74 = arith.constant 0 : index
    %131 = vector.load %arg12[%c2_72, %c0_73, %c0_74] : memref<3x1x16xf32, #tpu.memory_space<vmem>>, vector<1x1x16xf32>
    %132 = vector.shape_cast %131 : vector<1x1x16xf32> to vector<1x16xf32>
    %133 = vector.broadcast %132 : vector<1x16xf32> to vector<16x16xf32>
    %134 = arith.addf %130, %133 : vector<16x16xf32>
    %c0_75 = arith.constant 0 : index
    %c0_76 = arith.constant 0 : index
    %135 = vector.load %arg13[%c0_75, %c0_76] : memref<16x32xbf16, #tpu.memory_space<vmem>>, vector<16x32xbf16>
    %136 = vector.extract_strided_slice %118 {offsets = [0, 0], sizes = [5, 8], strides = [1, 1]} : vector<5x16xf32> to vector<5x8xf32>
    %137 = vector.extract_strided_slice %126 {offsets = [0, 0], sizes = [16, 8], strides = [1, 1]} : vector<16x16xf32> to vector<16x8xf32>
    %138 = vector.extract_strided_slice %134 {offsets = [0, 0], sizes = [16, 8], strides = [1, 1]} : vector<16x16xf32> to vector<16x8xf32>
    %139 = arith.truncf %136 : vector<5x8xf32> to vector<5x8xbf16>
    %140 = arith.truncf %137 : vector<16x8xf32> to vector<16x8xbf16>
    %cst_77 = arith.constant dense<0.000000e+00> : vector<5x16xf32>
    %141 = tpu.matmul %139, %140, %cst_77 {dimension_numbers = #tpu.dot_dimension_numbers<[1], [1], [0], [0], [0, 0, 1, 0], [], []>} : vector<5x8xbf16>, vector<16x8xbf16>, vector<5x16xf32> -> vector<5x16xf32>
    %cst_78 = arith.constant 0.353553385 : f32
    %142 = vector.broadcast %cst_78 : f32 to vector<5x16xf32>
    %143 = arith.mulf %141, %142 : vector<5x16xf32>
    %cst_79 = arith.constant dense<0xFF800000> : vector<5xf32>
    %144 = vector.multi_reduction <maximumf>, %143, %cst_79 [1] : vector<5x16xf32> to vector<5xf32>
    %145 = vector.shape_cast %144 : vector<5xf32> to vector<5x1xf32>
    %146 = vector.broadcast %145 : vector<5x1xf32> to vector<5x16xf32>
    %147 = arith.subf %143, %146 : vector<5x16xf32>
    %148 = math.exp %147 : vector<5x16xf32>
    %cst_80 = arith.constant dense<0.000000e+00> : vector<5xf32>
    %149 = vector.multi_reduction <add>, %148, %cst_80 [1] : vector<5x16xf32> to vector<5xf32>
    %150 = vector.shape_cast %149 : vector<5xf32> to vector<5x1xf32>
    %151 = tpu.reciprocal %150 {approx = true} : vector<5x1xf32> -> vector<5x1xf32>
    %152 = vector.broadcast %151 : vector<5x1xf32> to vector<5x16xf32>
    %153 = arith.mulf %148, %152 : vector<5x16xf32>
    %154 = arith.truncf %153 : vector<5x16xf32> to vector<5x16xbf16>
    %155 = arith.truncf %138 : vector<16x8xf32> to vector<16x8xbf16>
    %cst_81 = arith.constant dense<0.000000e+00> : vector<5x8xf32>
    %156 = tpu.matmul %154, %155, %cst_81 {dimension_numbers = #tpu.dot_dimension_numbers<[1], [0], [0], [1], [0, 0, 1, 1], [], []>} : vector<5x16xbf16>, vector<16x8xbf16>, vector<5x8xf32> -> vector<5x8xf32>
    %157 = vector.extract_strided_slice %135 {offsets = [0, 0], sizes = [8, 32], strides = [1, 1]} : vector<16x32xbf16> to vector<8x32xbf16>
    %158 = arith.truncf %156 : vector<5x8xf32> to vector<5x8xbf16>
    %cst_82 = arith.constant dense<0.000000e+00> : vector<5x32xf32>
    %159 = tpu.matmul %158, %157, %cst_82 {dimension_numbers = #tpu.dot_dimension_numbers<[1], [0], [0], [1], [0, 0, 1, 1], [], []>} : vector<5x8xbf16>, vector<8x32xbf16>, vector<5x32xf32> -> vector<5x32xf32>
    %160 = vector.extract_strided_slice %118 {offsets = [0, 8], sizes = [5, 8], strides = [1, 1]} : vector<5x16xf32> to vector<5x8xf32>
    %161 = vector.extract_strided_slice %126 {offsets = [0, 8], sizes = [16, 8], strides = [1, 1]} : vector<16x16xf32> to vector<16x8xf32>
    %162 = vector.extract_strided_slice %134 {offsets = [0, 8], sizes = [16, 8], strides = [1, 1]} : vector<16x16xf32> to vector<16x8xf32>
    %163 = arith.truncf %160 : vector<5x8xf32> to vector<5x8xbf16>
    %164 = arith.truncf %161 : vector<16x8xf32> to vector<16x8xbf16>
    %cst_83 = arith.constant dense<0.000000e+00> : vector<5x16xf32>
    %165 = tpu.matmul %163, %164, %cst_83 {dimension_numbers = #tpu.dot_dimension_numbers<[1], [1], [0], [0], [0, 0, 1, 0], [], []>} : vector<5x8xbf16>, vector<16x8xbf16>, vector<5x16xf32> -> vector<5x16xf32>
    %cst_84 = arith.constant 0.353553385 : f32
    %166 = vector.broadcast %cst_84 : f32 to vector<5x16xf32>
    %167 = arith.mulf %165, %166 : vector<5x16xf32>
    %cst_85 = arith.constant dense<0xFF800000> : vector<5xf32>
    %168 = vector.multi_reduction <maximumf>, %167, %cst_85 [1] : vector<5x16xf32> to vector<5xf32>
    %169 = vector.shape_cast %168 : vector<5xf32> to vector<5x1xf32>
    %170 = vector.broadcast %169 : vector<5x1xf32> to vector<5x16xf32>
    %171 = arith.subf %167, %170 : vector<5x16xf32>
    %172 = math.exp %171 : vector<5x16xf32>
    %cst_86 = arith.constant dense<0.000000e+00> : vector<5xf32>
    %173 = vector.multi_reduction <add>, %172, %cst_86 [1] : vector<5x16xf32> to vector<5xf32>
    %174 = vector.shape_cast %173 : vector<5xf32> to vector<5x1xf32>
    %175 = tpu.reciprocal %174 {approx = true} : vector<5x1xf32> -> vector<5x1xf32>
    %176 = vector.broadcast %175 : vector<5x1xf32> to vector<5x16xf32>
    %177 = arith.mulf %172, %176 : vector<5x16xf32>
    %178 = arith.truncf %177 : vector<5x16xf32> to vector<5x16xbf16>
    %179 = arith.truncf %162 : vector<16x8xf32> to vector<16x8xbf16>
    %cst_87 = arith.constant dense<0.000000e+00> : vector<5x8xf32>
    %180 = tpu.matmul %178, %179, %cst_87 {dimension_numbers = #tpu.dot_dimension_numbers<[1], [0], [0], [1], [0, 0, 1, 1], [], []>} : vector<5x16xbf16>, vector<16x8xbf16>, vector<5x8xf32> -> vector<5x8xf32>
    %181 = vector.extract_strided_slice %135 {offsets = [8, 0], sizes = [8, 32], strides = [1, 1]} : vector<16x32xbf16> to vector<8x32xbf16>
    %182 = arith.truncf %180 : vector<5x8xf32> to vector<5x8xbf16>
    %cst_88 = arith.constant dense<0.000000e+00> : vector<5x32xf32>
    %183 = tpu.matmul %182, %181, %cst_88 {dimension_numbers = #tpu.dot_dimension_numbers<[1], [0], [0], [1], [0, 0, 1, 1], [], []>} : vector<5x8xbf16>, vector<8x32xbf16>, vector<5x32xf32> -> vector<5x32xf32>
    %184 = arith.addf %159, %183 : vector<5x32xf32>
    %c0_89 = arith.constant 0 : index
    %c0_90 = arith.constant 0 : index
    %185 = vector.load %arg14[%c0_89, %c0_90] : memref<1x32xf32, #tpu.memory_space<vmem>>, vector<1x32xf32>
    %186 = vector.broadcast %185 : vector<1x32xf32> to vector<5x32xf32>
    %187 = arith.addf %184, %186 : vector<5x32xf32>
    %188 = arith.addf %108, %187 : vector<5x32xf32>
    %c0_91 = arith.constant 0 : index
    %c0_92 = arith.constant 0 : index
    %189 = vector.load %arg15[%c0_91, %c0_92] : memref<1x32xf32, #tpu.memory_space<vmem>>, vector<1x32xf32>
    %c0_93 = arith.constant 0 : index
    %c0_94 = arith.constant 0 : index
    %190 = vector.load %arg16[%c0_93, %c0_94] : memref<1x32xf32, #tpu.memory_space<vmem>>, vector<1x32xf32>
    %cst_95 = arith.constant dense<0.000000e+00> : vector<5xf32>
    %191 = vector.multi_reduction <add>, %188, %cst_95 [1] : vector<5x32xf32> to vector<5xf32>
    %192 = vector.shape_cast %191 : vector<5xf32> to vector<5x1xf32>
    %cst_96 = arith.constant 3.200000e+01 : f32
    %193 = vector.broadcast %cst_96 : f32 to vector<5x1xf32>
    %194 = arith.divf %192, %193 : vector<5x1xf32>
    %195 = vector.broadcast %194 : vector<5x1xf32> to vector<5x32xf32>
    %196 = arith.subf %188, %195 : vector<5x32xf32>
    %197 = arith.mulf %196, %196 : vector<5x32xf32>
    %cst_97 = arith.constant dense<0.000000e+00> : vector<5xf32>
    %198 = vector.multi_reduction <add>, %197, %cst_97 [1] : vector<5x32xf32> to vector<5xf32>
    %199 = vector.shape_cast %198 : vector<5xf32> to vector<5x1xf32>
    %cst_98 = arith.constant 3.200000e+01 : f32
    %200 = vector.broadcast %cst_98 : f32 to vector<5x1xf32>
    %201 = arith.divf %199, %200 : vector<5x1xf32>
    %cst_99 = arith.constant 9.99999974E-6 : f32
    %202 = vector.broadcast %cst_99 : f32 to vector<5x1xf32>
    %203 = arith.addf %201, %202 : vector<5x1xf32>
    %204 = math.rsqrt %203 : vector<5x1xf32>
    %205 = vector.broadcast %204 : vector<5x1xf32> to vector<5x32xf32>
    %206 = arith.mulf %196, %205 : vector<5x32xf32>
    %207 = vector.broadcast %189 : vector<1x32xf32> to vector<5x32xf32>
    %208 = arith.mulf %206, %207 : vector<5x32xf32>
    %209 = vector.broadcast %190 : vector<1x32xf32> to vector<5x32xf32>
    %210 = arith.addf %208, %209 : vector<5x32xf32>
    %c0_100 = arith.constant 0 : index
    %c0_101 = arith.constant 0 : index
    %211 = vector.load %arg17[%c0_100, %c0_101] : memref<32x64xbf16, #tpu.memory_space<vmem>>, vector<32x64xbf16>
    %212 = arith.truncf %210 : vector<5x32xf32> to vector<5x32xbf16>
    %cst_102 = arith.constant dense<0.000000e+00> : vector<5x64xf32>
    %213 = tpu.matmul %212, %211, %cst_102 {dimension_numbers = #tpu.dot_dimension_numbers<[1], [0], [0], [1], [0, 0, 1, 1], [], []>} : vector<5x32xbf16>, vector<32x64xbf16>, vector<5x64xf32> -> vector<5x64xf32>
    %c0_103 = arith.constant 0 : index
    %c0_104 = arith.constant 0 : index
    %214 = vector.load %arg18[%c0_103, %c0_104] : memref<1x64xf32, #tpu.memory_space<vmem>>, vector<1x64xf32>
    %215 = vector.broadcast %214 : vector<1x64xf32> to vector<5x64xf32>
    %216 = arith.addf %213, %215 : vector<5x64xf32>
    %cst_105 = arith.constant 0.000000e+00 : f32
    %217 = vector.broadcast %cst_105 : f32 to vector<5x64xf32>
    %218 = arith.maximumf %216, %217 : vector<5x64xf32>
    %c0_106 = arith.constant 0 : index
    %c0_107 = arith.constant 0 : index
    %219 = vector.load %arg19[%c0_106, %c0_107] : memref<64x32xbf16, #tpu.memory_space<vmem>>, vector<64x32xbf16>
    %220 = arith.truncf %218 : vector<5x64xf32> to vector<5x64xbf16>
    %cst_108 = arith.constant dense<0.000000e+00> : vector<5x32xf32>
    %221 = tpu.matmul %220, %219, %cst_108 {dimension_numbers = #tpu.dot_dimension_numbers<[1], [0], [0], [1], [0, 0, 1, 1], [], []>} : vector<5x64xbf16>, vector<64x32xbf16>, vector<5x32xf32> -> vector<5x32xf32>
    %c0_109 = arith.constant 0 : index
    %c0_110 = arith.constant 0 : index
    %222 = vector.load %arg20[%c0_109, %c0_110] : memref<1x32xf32, #tpu.memory_space<vmem>>, vector<1x32xf32>
    %223 = vector.broadcast %222 : vector<1x32xf32> to vector<5x32xf32>
    %224 = arith.addf %221, %223 : vector<5x32xf32>
    %225 = arith.addf %210, %224 : vector<5x32xf32>
    %c0_111 = arith.constant 0 : index
    %c0_112 = arith.constant 0 : index
    %226 = vector.load %arg21[%c0_111, %c0_112] : memref<1x32xf32, #tpu.memory_space<vmem>>, vector<1x32xf32>
    %c0_113 = arith.constant 0 : index
    %c0_114 = arith.constant 0 : index
    %227 = vector.load %arg22[%c0_113, %c0_114] : memref<1x32xf32, #tpu.memory_space<vmem>>, vector<1x32xf32>
    %cst_115 = arith.constant dense<0.000000e+00> : vector<5xf32>
    %228 = vector.multi_reduction <add>, %225, %cst_115 [1] : vector<5x32xf32> to vector<5xf32>
    %229 = vector.shape_cast %228 : vector<5xf32> to vector<5x1xf32>
    %cst_116 = arith.constant 3.200000e+01 : f32
    %230 = vector.broadcast %cst_116 : f32 to vector<5x1xf32>
    %231 = arith.divf %229, %230 : vector<5x1xf32>
    %232 = vector.broadcast %231 : vector<5x1xf32> to vector<5x32xf32>
    %233 = arith.subf %225, %232 : vector<5x32xf32>
    %234 = arith.mulf %233, %233 : vector<5x32xf32>
    %cst_117 = arith.constant dense<0.000000e+00> : vector<5xf32>
    %235 = vector.multi_reduction <add>, %234, %cst_117 [1] : vector<5x32xf32> to vector<5xf32>
    %236 = vector.shape_cast %235 : vector<5xf32> to vector<5x1xf32>
    %cst_118 = arith.constant 3.200000e+01 : f32
    %237 = vector.broadcast %cst_118 : f32 to vector<5x1xf32>
    %238 = arith.divf %236, %237 : vector<5x1xf32>
    %cst_119 = arith.constant 9.99999974E-6 : f32
    %239 = vector.broadcast %cst_119 : f32 to vector<5x1xf32>
    %240 = arith.addf %238, %239 : vector<5x1xf32>
    %241 = math.rsqrt %240 : vector<5x1xf32>
    %242 = vector.broadcast %241 : vector<5x1xf32> to vector<5x32xf32>
    %243 = arith.mulf %233, %242 : vector<5x32xf32>
    %244 = vector.broadcast %226 : vector<1x32xf32> to vector<5x32xf32>
    %245 = arith.mulf %243, %244 : vector<5x32xf32>
    %246 = vector.broadcast %227 : vector<1x32xf32> to vector<5x32xf32>
    %247 = arith.addf %245, %246 : vector<5x32xf32>
    %248 = arith.addf %247, %5 : vector<5x32xf32>
    %249 = arith.addf %3, %7 : vector<16x32xf32>
    %c0_120 = arith.constant 0 : index
    %c0_121 = arith.constant 0 : index
    %c0_122 = arith.constant 0 : index
    %250 = vector.load %arg23[%c0_120, %c0_121, %c0_122] : memref<3x32x16xbf16, #tpu.memory_space<vmem>>, vector<1x32x16xbf16>
    %251 = vector.shape_cast %250 : vector<1x32x16xbf16> to vector<32x16xbf16>
    %252 = arith.truncf %249 : vector<16x32xf32> to vector<16x32xbf16>
    %cst_123 = arith.constant dense<0.000000e+00> : vector<16x16xf32>
    %253 = tpu.matmul %252, %251, %cst_123 {dimension_numbers = #tpu.dot_dimension_numbers<[1], [0], [0], [1], [0, 0, 1, 1], [], []>} : vector<16x32xbf16>, vector<32x16xbf16>, vector<16x16xf32> -> vector<16x16xf32>
    %c0_124 = arith.constant 0 : index
    %c0_125 = arith.constant 0 : index
    %c0_126 = arith.constant 0 : index
    %254 = vector.load %arg24[%c0_124, %c0_125, %c0_126] : memref<3x1x16xf32, #tpu.memory_space<vmem>>, vector<1x1x16xf32>
    %255 = vector.shape_cast %254 : vector<1x1x16xf32> to vector<1x16xf32>
    %256 = vector.broadcast %255 : vector<1x16xf32> to vector<16x16xf32>
    %257 = arith.addf %253, %256 : vector<16x16xf32>
    %c1_127 = arith.constant 1 : index
    %c0_128 = arith.constant 0 : index
    %c0_129 = arith.constant 0 : index
    %258 = vector.load %arg23[%c1_127, %c0_128, %c0_129] : memref<3x32x16xbf16, #tpu.memory_space<vmem>>, vector<1x32x16xbf16>
    %259 = vector.shape_cast %258 : vector<1x32x16xbf16> to vector<32x16xbf16>
    %260 = arith.truncf %248 : vector<5x32xf32> to vector<5x32xbf16>
    %cst_130 = arith.constant dense<0.000000e+00> : vector<5x16xf32>
    %261 = tpu.matmul %260, %259, %cst_130 {dimension_numbers = #tpu.dot_dimension_numbers<[1], [0], [0], [1], [0, 0, 1, 1], [], []>} : vector<5x32xbf16>, vector<32x16xbf16>, vector<5x16xf32> -> vector<5x16xf32>
    %c1_131 = arith.constant 1 : index
    %c0_132 = arith.constant 0 : index
    %c0_133 = arith.constant 0 : index
    %262 = vector.load %arg24[%c1_131, %c0_132, %c0_133] : memref<3x1x16xf32, #tpu.memory_space<vmem>>, vector<1x1x16xf32>
    %263 = vector.shape_cast %262 : vector<1x1x16xf32> to vector<1x16xf32>
    %264 = vector.broadcast %263 : vector<1x16xf32> to vector<5x16xf32>
    %265 = arith.addf %261, %264 : vector<5x16xf32>
    %c2_134 = arith.constant 2 : index
    %c0_135 = arith.constant 0 : index
    %c0_136 = arith.constant 0 : index
    %266 = vector.load %arg23[%c2_134, %c0_135, %c0_136] : memref<3x32x16xbf16, #tpu.memory_space<vmem>>, vector<1x32x16xbf16>
    %267 = vector.shape_cast %266 : vector<1x32x16xbf16> to vector<32x16xbf16>
    %268 = arith.truncf %247 : vector<5x32xf32> to vector<5x32xbf16>
    %cst_137 = arith.constant dense<0.000000e+00> : vector<5x16xf32>
    %269 = tpu.matmul %268, %267, %cst_137 {dimension_numbers = #tpu.dot_dimension_numbers<[1], [0], [0], [1], [0, 0, 1, 1], [], []>} : vector<5x32xbf16>, vector<32x16xbf16>, vector<5x16xf32> -> vector<5x16xf32>
    %c2_138 = arith.constant 2 : index
    %c0_139 = arith.constant 0 : index
    %c0_140 = arith.constant 0 : index
    %270 = vector.load %arg24[%c2_138, %c0_139, %c0_140] : memref<3x1x16xf32, #tpu.memory_space<vmem>>, vector<1x1x16xf32>
    %271 = vector.shape_cast %270 : vector<1x1x16xf32> to vector<1x16xf32>
    %272 = vector.broadcast %271 : vector<1x16xf32> to vector<5x16xf32>
    %273 = arith.addf %269, %272 : vector<5x16xf32>
    %c0_141 = arith.constant 0 : index
    %c0_142 = arith.constant 0 : index
    %274 = vector.load %arg25[%c0_141, %c0_142] : memref<16x32xbf16, #tpu.memory_space<vmem>>, vector<16x32xbf16>
    %275 = vector.extract_strided_slice %257 {offsets = [0, 0], sizes = [16, 8], strides = [1, 1]} : vector<16x16xf32> to vector<16x8xf32>
    %276 = vector.extract_strided_slice %265 {offsets = [0, 0], sizes = [5, 8], strides = [1, 1]} : vector<5x16xf32> to vector<5x8xf32>
    %277 = vector.extract_strided_slice %273 {offsets = [0, 0], sizes = [5, 8], strides = [1, 1]} : vector<5x16xf32> to vector<5x8xf32>
    %278 = arith.truncf %275 : vector<16x8xf32> to vector<16x8xbf16>
    %279 = arith.truncf %276 : vector<5x8xf32> to vector<5x8xbf16>
    %cst_143 = arith.constant dense<0.000000e+00> : vector<16x5xf32>
    %280 = tpu.matmul %278, %279, %cst_143 {dimension_numbers = #tpu.dot_dimension_numbers<[1], [1], [0], [0], [0, 0, 1, 0], [], []>} : vector<16x8xbf16>, vector<5x8xbf16>, vector<16x5xf32> -> vector<16x5xf32>
    %cst_144 = arith.constant 0.353553385 : f32
    %281 = vector.broadcast %cst_144 : f32 to vector<16x5xf32>
    %282 = arith.mulf %280, %281 : vector<16x5xf32>
    %cst_145 = arith.constant dense<0xFF800000> : vector<16xf32>
    %283 = vector.multi_reduction <maximumf>, %282, %cst_145 [1] : vector<16x5xf32> to vector<16xf32>
    %284 = vector.shape_cast %283 : vector<16xf32> to vector<16x1xf32>
    %285 = vector.broadcast %284 : vector<16x1xf32> to vector<16x5xf32>
    %286 = arith.subf %282, %285 : vector<16x5xf32>
    %287 = math.exp %286 : vector<16x5xf32>
    %cst_146 = arith.constant dense<0.000000e+00> : vector<16xf32>
    %288 = vector.multi_reduction <add>, %287, %cst_146 [1] : vector<16x5xf32> to vector<16xf32>
    %289 = vector.shape_cast %288 : vector<16xf32> to vector<16x1xf32>
    %290 = tpu.reciprocal %289 {approx = true} : vector<16x1xf32> -> vector<16x1xf32>
    %291 = vector.broadcast %290 : vector<16x1xf32> to vector<16x5xf32>
    %292 = arith.mulf %287, %291 : vector<16x5xf32>
    %293 = arith.truncf %292 : vector<16x5xf32> to vector<16x5xbf16>
    %294 = arith.truncf %277 : vector<5x8xf32> to vector<5x8xbf16>
    %cst_147 = arith.constant dense<0.000000e+00> : vector<16x8xf32>
    %295 = tpu.matmul %293, %294, %cst_147 {dimension_numbers = #tpu.dot_dimension_numbers<[1], [0], [0], [1], [0, 0, 1, 1], [], []>} : vector<16x5xbf16>, vector<5x8xbf16>, vector<16x8xf32> -> vector<16x8xf32>
    %296 = vector.extract_strided_slice %274 {offsets = [0, 0], sizes = [8, 32], strides = [1, 1]} : vector<16x32xbf16> to vector<8x32xbf16>
    %297 = arith.truncf %295 : vector<16x8xf32> to vector<16x8xbf16>
    %cst_148 = arith.constant dense<0.000000e+00> : vector<16x32xf32>
    %298 = tpu.matmul %297, %296, %cst_148 {dimension_numbers = #tpu.dot_dimension_numbers<[1], [0], [0], [1], [0, 0, 1, 1], [], []>} : vector<16x8xbf16>, vector<8x32xbf16>, vector<16x32xf32> -> vector<16x32xf32>
    %299 = vector.extract_strided_slice %257 {offsets = [0, 8], sizes = [16, 8], strides = [1, 1]} : vector<16x16xf32> to vector<16x8xf32>
    %300 = vector.extract_strided_slice %265 {offsets = [0, 8], sizes = [5, 8], strides = [1, 1]} : vector<5x16xf32> to vector<5x8xf32>
    %301 = vector.extract_strided_slice %273 {offsets = [0, 8], sizes = [5, 8], strides = [1, 1]} : vector<5x16xf32> to vector<5x8xf32>
    %302 = arith.truncf %299 : vector<16x8xf32> to vector<16x8xbf16>
    %303 = arith.truncf %300 : vector<5x8xf32> to vector<5x8xbf16>
    %cst_149 = arith.constant dense<0.000000e+00> : vector<16x5xf32>
    %304 = tpu.matmul %302, %303, %cst_149 {dimension_numbers = #tpu.dot_dimension_numbers<[1], [1], [0], [0], [0, 0, 1, 0], [], []>} : vector<16x8xbf16>, vector<5x8xbf16>, vector<16x5xf32> -> vector<16x5xf32>
    %cst_150 = arith.constant 0.353553385 : f32
    %305 = vector.broadcast %cst_150 : f32 to vector<16x5xf32>
    %306 = arith.mulf %304, %305 : vector<16x5xf32>
    %cst_151 = arith.constant dense<0xFF800000> : vector<16xf32>
    %307 = vector.multi_reduction <maximumf>, %306, %cst_151 [1] : vector<16x5xf32> to vector<16xf32>
    %308 = vector.shape_cast %307 : vector<16xf32> to vector<16x1xf32>
    %309 = vector.broadcast %308 : vector<16x1xf32> to vector<16x5xf32>
    %310 = arith.subf %306, %309 : vector<16x5xf32>
    %311 = math.exp %310 : vector<16x5xf32>
    %cst_152 = arith.constant dense<0.000000e+00> : vector<16xf32>
    %312 = vector.multi_reduction <add>, %311, %cst_152 [1] : vector<16x5xf32> to vector<16xf32>
    %313 = vector.shape_cast %312 : vector<16xf32> to vector<16x1xf32>
    %314 = tpu.reciprocal %313 {approx = true} : vector<16x1xf32> -> vector<16x1xf32>
    %315 = vector.broadcast %314 : vector<16x1xf32> to vector<16x5xf32>
    %316 = arith.mulf %311, %315 : vector<16x5xf32>
    %317 = arith.truncf %316 : vector<16x5xf32> to vector<16x5xbf16>
    %318 = arith.truncf %301 : vector<5x8xf32> to vector<5x8xbf16>
    %cst_153 = arith.constant dense<0.000000e+00> : vector<16x8xf32>
    %319 = tpu.matmul %317, %318, %cst_153 {dimension_numbers = #tpu.dot_dimension_numbers<[1], [0], [0], [1], [0, 0, 1, 1], [], []>} : vector<16x5xbf16>, vector<5x8xbf16>, vector<16x8xf32> -> vector<16x8xf32>
    %320 = vector.extract_strided_slice %274 {offsets = [8, 0], sizes = [8, 32], strides = [1, 1]} : vector<16x32xbf16> to vector<8x32xbf16>
    %321 = arith.truncf %319 : vector<16x8xf32> to vector<16x8xbf16>
    %cst_154 = arith.constant dense<0.000000e+00> : vector<16x32xf32>
    %322 = tpu.matmul %321, %320, %cst_154 {dimension_numbers = #tpu.dot_dimension_numbers<[1], [0], [0], [1], [0, 0, 1, 1], [], []>} : vector<16x8xbf16>, vector<8x32xbf16>, vector<16x32xf32> -> vector<16x32xf32>
    %323 = arith.addf %298, %322 : vector<16x32xf32>
    %c0_155 = arith.constant 0 : index
    %c0_156 = arith.constant 0 : index
    %324 = vector.load %arg26[%c0_155, %c0_156] : memref<1x32xf32, #tpu.memory_space<vmem>>, vector<1x32xf32>
    %325 = vector.broadcast %324 : vector<1x32xf32> to vector<16x32xf32>
    %326 = arith.addf %323, %325 : vector<16x32xf32>
    %327 = arith.addf %3, %326 : vector<16x32xf32>
    %c0_157 = arith.constant 0 : index
    %c0_158 = arith.constant 0 : index
    %328 = vector.load %arg27[%c0_157, %c0_158] : memref<1x32xf32, #tpu.memory_space<vmem>>, vector<1x32xf32>
    %c0_159 = arith.constant 0 : index
    %c0_160 = arith.constant 0 : index
    %329 = vector.load %arg28[%c0_159, %c0_160] : memref<1x32xf32, #tpu.memory_space<vmem>>, vector<1x32xf32>
    %cst_161 = arith.constant dense<0.000000e+00> : vector<16xf32>
    %330 = vector.multi_reduction <add>, %327, %cst_161 [1] : vector<16x32xf32> to vector<16xf32>
    %331 = vector.shape_cast %330 : vector<16xf32> to vector<16x1xf32>
    %cst_162 = arith.constant 3.200000e+01 : f32
    %332 = vector.broadcast %cst_162 : f32 to vector<16x1xf32>
    %333 = arith.divf %331, %332 : vector<16x1xf32>
    %334 = vector.broadcast %333 : vector<16x1xf32> to vector<16x32xf32>
    %335 = arith.subf %327, %334 : vector<16x32xf32>
    %336 = arith.mulf %335, %335 : vector<16x32xf32>
    %cst_163 = arith.constant dense<0.000000e+00> : vector<16xf32>
    %337 = vector.multi_reduction <add>, %336, %cst_163 [1] : vector<16x32xf32> to vector<16xf32>
    %338 = vector.shape_cast %337 : vector<16xf32> to vector<16x1xf32>
    %cst_164 = arith.constant 3.200000e+01 : f32
    %339 = vector.broadcast %cst_164 : f32 to vector<16x1xf32>
    %340 = arith.divf %338, %339 : vector<16x1xf32>
    %cst_165 = arith.constant 9.99999974E-6 : f32
    %341 = vector.broadcast %cst_165 : f32 to vector<16x1xf32>
    %342 = arith.addf %340, %341 : vector<16x1xf32>
    %343 = math.rsqrt %342 : vector<16x1xf32>
    %344 = vector.broadcast %343 : vector<16x1xf32> to vector<16x32xf32>
    %345 = arith.mulf %335, %344 : vector<16x32xf32>
    %346 = vector.broadcast %328 : vector<1x32xf32> to vector<16x32xf32>
    %347 = arith.mulf %345, %346 : vector<16x32xf32>
    %348 = vector.broadcast %329 : vector<1x32xf32> to vector<16x32xf32>
    %349 = arith.addf %347, %348 : vector<16x32xf32>
    %c0_166 = arith.constant 0 : index
    %c0_167 = arith.constant 0 : index
    %c0_168 = arith.constant 0 : index
    %350 = vector.load %arg29[%c0_166, %c0_167, %c0_168] : memref<1x5x32xf32, #tpu.memory_space<vmem>>, vector<1x5x32xf32>
    %351 = vector.shape_cast %350 : vector<1x5x32xf32> to vector<5x32xf32>
    %352 = vector.shape_cast %247 : vector<5x32xf32> to vector<1x5x32xf32>
    tpu.vector_store %arg29[%c0_166, %c0_167, %c0_168], %352 {strides = array<i32>} : memref<1x5x32xf32, #tpu.memory_space<vmem>>, vector<1x5x32xf32>,
    %c0_169 = arith.constant 0 : index
    %c0_170 = arith.constant 0 : index
    %c0_171 = arith.constant 0 : index
    %353 = vector.load %arg30[%c0_169, %c0_170, %c0_171] : memref<1x16x32xf32, #tpu.memory_space<vmem>>, vector<1x16x32xf32>
    %354 = vector.shape_cast %353 : vector<1x16x32xf32> to vector<16x32xf32>
    %355 = vector.shape_cast %349 : vector<16x32xf32> to vector<1x16x32xf32>
    tpu.vector_store %arg30[%c0_169, %c0_170, %c0_171], %355 {strides = array<i32>} : memref<1x16x32xf32, #tpu.memory_space<vmem>>, vector<1x16x32xf32>,
    return
  }
  func.func @transform_0(%arg0: i32) -> (i32, i32, i32) {
    %c0_i32 = arith.constant 0 : i32
    %c0_i32_0 = arith.constant 0 : i32
    %c0_i32_1 = arith.constant 0 : i32
    return %arg0, %c0_i32, %c0_i32_0 : i32, i32, i32
  }
  func.func @transform_1(%arg0: i32) -> (i32, i32, i32) {
    %c0_i32 = arith.constant 0 : i32
    %c0_i32_0 = arith.constant 0 : i32
    %c0_i32_1 = arith.constant 0 : i32
    return %arg0, %c0_i32, %c0_i32_0 : i32, i32, i32
  }
  func.func @transform_2(%arg0: i32) -> (i32, i32, i32) {
    %c0_i32 = arith.constant 0 : i32
    %c0_i32_0 = arith.constant 0 : i32
    %c0_i32_1 = arith.constant 0 : i32
    return %arg0, %c0_i32, %c0_i32_0 : i32, i32, i32
  }
  func.func @transform_3(%arg0: i32) -> (i32, i32, i32) {
    %c0_i32 = arith.constant 0 : i32
    %c0_i32_0 = arith.constant 0 : i32
    %c0_i32_1 = arith.constant 0 : i32
    %c0_i32_2 = arith.constant 0 : i32
    return %c0_i32, %c0_i32_0, %c0_i32_1 : i32, i32, i32
  }
  func.func @transform_4(%arg0: i32) -> (i32, i32, i32) {
    %c0_i32 = arith.constant 0 : i32
    %c0_i32_0 = arith.constant 0 : i32
    %c0_i32_1 = arith.constant 0 : i32
    %c0_i32_2 = arith.constant 0 : i32
    return %c0_i32, %c0_i32_0, %c0_i32_1 : i32, i32, i32
  }
  func.func @transform_5(%arg0: i32) -> (i32, i32, i32) {
    %c0_i32 = arith.constant 0 : i32
    %c0_i32_0 = arith.constant 0 : i32
    %c0_i32_1 = arith.constant 0 : i32
    %c0_i32_2 = arith.constant 0 : i32
    return %c0_i32, %c0_i32_0, %c0_i32_1 : i32, i32, i32
  }
  func.func @transform_6(%arg0: i32) -> (i32, i32) {
    %c0_i32 = arith.constant 0 : i32
    %c0_i32_0 = arith.constant 0 : i32
    %c0_i32_1 = arith.constant 0 : i32
    return %c0_i32, %c0_i32_0 : i32, i32
  }
  func.func @transform_7(%arg0: i32) -> (i32, i32) {
    %c0_i32 = arith.constant 0 : i32
    %c0_i32_0 = arith.constant 0 : i32
    %c0_i32_1 = arith.constant 0 : i32
    return %c0_i32, %c0_i32_0 : i32, i32
  }
  func.func @transform_8(%arg0: i32) -> (i32, i32) {
    %c0_i32 = arith.constant 0 : i32
    %c0_i32_0 = arith.constant 0 : i32
    %c0_i32_1 = arith.constant 0 : i32
    return %c0_i32, %c0_i32_0 : i32, i32
  }
  func.func @transform_9(%arg0: i32) -> (i32, i32) {
    %c0_i32 = arith.constant 0 : i32
    %c0_i32_0 = arith.constant 0 : i32
    %c0_i32_1 = arith.constant 0 : i32
    return %c0_i32, %c0_i32_0 : i32, i32
  }
  func.func @transform_10(%arg0: i32) -> (i32, i32, i32) {
    %c0_i32 = arith.constant 0 : i32
    %c0_i32_0 = arith.constant 0 : i32
    %c0_i32_1 = arith.constant 0 : i32
    %c0_i32_2 = arith.constant 0 : i32
    return %c0_i32, %c0_i32_0, %c0_i32_1 : i32, i32, i32
  }
  func.func @transform_11(%arg0: i32) -> (i32, i32, i32) {
    %c0_i32 = arith.constant 0 : i32
    %c0_i32_0 = arith.constant 0 : i32
    %c0_i32_1 = arith.constant 0 : i32
    %c0_i32_2 = arith.constant 0 : i32
    return %c0_i32, %c0_i32_0, %c0_i32_1 : i32, i32, i32
  }
  func.func @transform_12(%arg0: i32) -> (i32, i32) {
    %c0_i32 = arith.constant 0 : i32
    %c0_i32_0 = arith.constant 0 : i32
    %c0_i32_1 = arith.constant 0 : i32
    return %c0_i32, %c0_i32_0 : i32, i32
  }
  func.func @transform_13(%arg0: i32) -> (i32, i32) {
    %c0_i32 = arith.constant 0 : i32
    %c0_i32_0 = arith.constant 0 : i32
    %c0_i32_1 = arith.constant 0 : i32
    return %c0_i32, %c0_i32_0 : i32, i32
  }
  func.func @transform_14(%arg0: i32) -> (i32, i32) {
    %c0_i32 = arith.constant 0 : i32
    %c0_i32_0 = arith.constant 0 : i32
    %c0_i32_1 = arith.constant 0 : i32
    return %c0_i32, %c0_i32_0 : i32, i32
  }
  func.func @transform_15(%arg0: i32) -> (i32, i32) {
    %c0_i32 = arith.constant 0 : i32
    %c0_i32_0 = arith.constant 0 : i32
    %c0_i32_1 = arith.constant 0 : i32
    return %c0_i32, %c0_i32_0 : i32, i32
  }
  func.func @transform_16(%arg0: i32) -> (i32, i32) {
    %c0_i32 = arith.constant 0 : i32
    %c0_i32_0 = arith.constant 0 : i32
    %c0_i32_1 = arith.constant 0 : i32
    return %c0_i32, %c0_i32_0 : i32, i32
  }
  func.func @transform_17(%arg0: i32) -> (i32, i32) {
    %c0_i32 = arith.constant 0 : i32
    %c0_i32_0 = arith.constant 0 : i32
    %c0_i32_1 = arith.constant 0 : i32
    return %c0_i32, %c0_i32_0 : i32, i32
  }
  func.func @transform_18(%arg0: i32) -> (i32, i32) {
    %c0_i32 = arith.constant 0 : i32
    %c0_i32_0 = arith.constant 0 : i32
    %c0_i32_1 = arith.constant 0 : i32
    return %c0_i32, %c0_i32_0 : i32, i32
  }
  func.func @transform_19(%arg0: i32) -> (i32, i32) {
    %c0_i32 = arith.constant 0 : i32
    %c0_i32_0 = arith.constant 0 : i32
    %c0_i32_1 = arith.constant 0 : i32
    return %c0_i32, %c0_i32_0 : i32, i32
  }
  func.func @transform_20(%arg0: i32) -> (i32, i32) {
    %c0_i32 = arith.constant 0 : i32
    %c0_i32_0 = arith.constant 0 : i32
    %c0_i32_1 = arith.constant 0 : i32
    return %c0_i32, %c0_i32_0 : i32, i32
  }
  func.func @transform_21(%arg0: i32) -> (i32, i32) {
    %c0_i32 = arith.constant 0 : i32
    %c0_i32_0 = arith.constant 0 : i32
    %c0_i32_1 = arith.constant 0 : i32
    return %c0_i32, %c0_i32_0 : i32, i32
  }
  func.func @transform_22(%arg0: i32) -> (i32, i32, i32) {
    %c0_i32 = arith.constant 0 : i32
    %c0_i32_0 = arith.constant 0 : i32
    %c0_i32_1 = arith.constant 0 : i32
    %c0_i32_2 = arith.constant 0 : i32
    return %c0_i32, %c0_i32_0, %c0_i32_1 : i32, i32, i32
  }
  func.func @transform_23(%arg0: i32) -> (i32, i32, i32) {
    %c0_i32 = arith.constant 0 : i32
    %c0_i32_0 = arith.constant 0 : i32
    %c0_i32_1 = arith.constant 0 : i32
    %c0_i32_2 = arith.constant 0 : i32
    return %c0_i32, %c0_i32_0, %c0_i32_1 : i32, i32, i32
  }
  func.func @transform_24(%arg0: i32) -> (i32, i32) {
    %c0_i32 = arith.constant 0 : i32
    %c0_i32_0 = arith.constant 0 : i32
    %c0_i32_1 = arith.constant 0 : i32
    return %c0_i32, %c0_i32_0 : i32, i32
  }
  func.func @transform_25(%arg0: i32) -> (i32, i32) {
    %c0_i32 = arith.constant 0 : i32
    %c0_i32_0 = arith.constant 0 : i32
    %c0_i32_1 = arith.constant 0 : i32
    return %c0_i32, %c0_i32_0 : i32, i32
  }
  func.func @transform_26(%arg0: i32) -> (i32, i32) {
    %c0_i32 = arith.constant 0 : i32
    %c0_i32_0 = arith.constant 0 : i32
    %c0_i32_1 = arith.constant 0 : i32
    return %c0_i32, %c0_i32_0 : i32, i32
  }
  func.func @transform_27(%arg0: i32) -> (i32, i32) {
    %c0_i32 = arith.constant 0 : i32
    %c0_i32_0 = arith.constant 0 : i32
    %c0_i32_1 = arith.constant 0 : i32
    return %c0_i32, %c0_i32_0 : i32, i32
  }
  func.func @transform_28(%arg0: i32) -> (i32, i32, i32) {
    %c0_i32 = arith.constant 0 : i32
    %c0_i32_0 = arith.constant 0 : i32
    %c0_i32_1 = arith.constant 0 : i32
    return %arg0, %c0_i32, %c0_i32_0 : i32, i32, i32
  }
  func.func @transform_29(%arg0: i32) -> (i32, i32, i32) {
    %c0_i32 = arith.constant 0 : i32
    %c0_i32_0 = arith.constant 0 : i32
    %c0_i32_1 = arith.constant 0 : i32
    return %arg0, %c0_i32, %c0_i32_0 : i32, i32, i32
  }
}

module attributes {stable_mosaic.version = 11 : i64} {
  func.func @_upscale_kernel(%arg0: i32, %arg1: memref<32x32xf32, #tpu.memory_space<vmem>>, %arg2: memref<32x32xbf16, #tpu.memory_space<vmem>>, %arg3: memref<1x32xf32, #tpu.memory_space<vmem>>, %arg4: memref<1x8xf32, #tpu.memory_space<vmem>>, %arg5: memref<1x8xf32, #tpu.memory_space<vmem>>, %arg6: memref<8x16xbf16, #tpu.memory_space<vmem>>, %arg7: memref<1x16xf32, #tpu.memory_space<vmem>>, %arg8: memref<32x64xf32, #tpu.memory_space<vmem>>) attributes {dimension_semantics = [#tpu.dimension_semantics<arbitrary>], iteration_bounds = array<i64: 1>, scalar_prefetch = 0 : i64, scratch_operands = 0 : i64, tpu.core_type = #tpu.core_type<tc>, window_params = [{pipeline_mode = #tpu.pipeline_mode<synchronous>, transform_indices = @transform_0, window_bounds = array<i64: 32, 32>}, {pipeline_mode = #tpu.pipeline_mode<synchronous>, transform_indices = @transform_1, window_bounds = array<i64: 32, 32>}, {pipeline_mode = #tpu.pipeline_mode<synchronous>, transform_indices = @transform_2, window_bounds = array<i64: 1, 32>}, {pipeline_mode = #tpu.pipeline_mode<synchronous>, transform_indices = @transform_3, window_bounds = array<i64: 1, 8>}, {pipeline_mode = #tpu.pipeline_mode<synchronous>, transform_indices = @transform_4, window_bounds = array<i64: 1, 8>}, {pipeline_mode = #tpu.pipeline_mode<synchronous>, transform_indices = @transform_5, window_bounds = array<i64: 8, 16>}, {pipeline_mode = #tpu.pipeline_mode<synchronous>, transform_indices = @transform_6, window_bounds = array<i64: 1, 16>}, {pipeline_mode = #tpu.pipeline_mode<synchronous>, transform_indices = @transform_7, window_bounds = array<i64: 32, 64>}]} {
    %c0 = arith.constant 0 : index
    %c0_0 = arith.constant 0 : index
    %0 = vector.load %arg1[%c0, %c0_0] : memref<32x32xf32, #tpu.memory_space<vmem>>, vector<32x32xf32>
    %c0_1 = arith.constant 0 : index
    %c0_2 = arith.constant 0 : index
    %1 = vector.load %arg2[%c0_1, %c0_2] : memref<32x32xbf16, #tpu.memory_space<vmem>>, vector<32x32xbf16>
    %2 = arith.truncf %0 : vector<32x32xf32> to vector<32x32xbf16>
    %cst = arith.constant dense<0.000000e+00> : vector<32x32xf32>
    %3 = tpu.matmul %2, %1, %cst {dimension_numbers = #tpu.dot_dimension_numbers<[1], [0], [0], [1], [0, 0, 1, 1], [], []>} : vector<32x32xbf16>, vector<32x32xbf16>, vector<32x32xf32> -> vector<32x32xf32>
    %c0_3 = arith.constant 0 : index
    %c0_4 = arith.constant 0 : index
    %4 = vector.load %arg3[%c0_3, %c0_4] : memref<1x32xf32, #tpu.memory_space<vmem>>, vector<1x32xf32>
    %5 = vector.broadcast %4 : vector<1x32xf32> to vector<32x32xf32>
    %6 = arith.addf %3, %5 : vector<32x32xf32>
    %c0_5 = arith.constant 0 : index
    %c0_6 = arith.constant 0 : index
    %7 = vector.load %arg6[%c0_5, %c0_6] : memref<8x16xbf16, #tpu.memory_space<vmem>>, vector<8x16xbf16>
    %c0_7 = arith.constant 0 : index
    %c0_8 = arith.constant 0 : index
    %8 = vector.load %arg7[%c0_7, %c0_8] : memref<1x16xf32, #tpu.memory_space<vmem>>, vector<1x16xf32>
    %9 = vector.extract_strided_slice %6 {offsets = [0, 0], sizes = [32, 8], strides = [1, 1]} : vector<32x32xf32> to vector<32x8xf32>
    %c0_9 = arith.constant 0 : index
    %c0_10 = arith.constant 0 : index
    %10 = vector.load %arg4[%c0_9, %c0_10] : memref<1x8xf32, #tpu.memory_space<vmem>>, vector<1x8xf32>
    %c0_11 = arith.constant 0 : index
    %c0_12 = arith.constant 0 : index
    %11 = vector.load %arg5[%c0_11, %c0_12] : memref<1x8xf32, #tpu.memory_space<vmem>>, vector<1x8xf32>
    %cst_13 = arith.constant dense<0.000000e+00> : vector<32xf32>
    %12 = vector.multi_reduction <add>, %9, %cst_13 [1] : vector<32x8xf32> to vector<32xf32>
    %13 = vector.shape_cast %12 : vector<32xf32> to vector<32x1xf32>
    %cst_14 = arith.constant 8.000000e+00 : f32
    %14 = vector.broadcast %cst_14 : f32 to vector<32x1xf32>
    %15 = arith.divf %13, %14 : vector<32x1xf32>
    %16 = vector.broadcast %15 : vector<32x1xf32> to vector<32x8xf32>
    %17 = arith.subf %9, %16 : vector<32x8xf32>
    %18 = arith.mulf %17, %17 : vector<32x8xf32>
    %cst_15 = arith.constant dense<0.000000e+00> : vector<32xf32>
    %19 = vector.multi_reduction <add>, %18, %cst_15 [1] : vector<32x8xf32> to vector<32xf32>
    %20 = vector.shape_cast %19 : vector<32xf32> to vector<32x1xf32>
    %cst_16 = arith.constant 8.000000e+00 : f32
    %21 = vector.broadcast %cst_16 : f32 to vector<32x1xf32>
    %22 = arith.divf %20, %21 : vector<32x1xf32>
    %cst_17 = arith.constant 9.99999997E-7 : f32
    %23 = vector.broadcast %cst_17 : f32 to vector<32x1xf32>
    %24 = arith.addf %22, %23 : vector<32x1xf32>
    %25 = math.rsqrt %24 : vector<32x1xf32>
    %26 = vector.broadcast %25 : vector<32x1xf32> to vector<32x8xf32>
    %27 = arith.mulf %17, %26 : vector<32x8xf32>
    %28 = vector.broadcast %10 : vector<1x8xf32> to vector<32x8xf32>
    %29 = arith.mulf %27, %28 : vector<32x8xf32>
    %30 = vector.broadcast %11 : vector<1x8xf32> to vector<32x8xf32>
    %31 = arith.addf %29, %30 : vector<32x8xf32>
    %32 = arith.mulf %31, %31 : vector<32x8xf32>
    %33 = arith.mulf %31, %32 : vector<32x8xf32>
    %cst_18 = arith.constant 4.471500e-02 : f32
    %34 = vector.broadcast %cst_18 : f32 to vector<32x8xf32>
    %35 = arith.mulf %34, %33 : vector<32x8xf32>
    %36 = arith.addf %31, %35 : vector<32x8xf32>
    %cst_19 = arith.constant 0.797884583 : f32
    %37 = vector.broadcast %cst_19 : f32 to vector<32x8xf32>
    %38 = arith.mulf %37, %36 : vector<32x8xf32>
    %39 = math.tanh %38 : vector<32x8xf32>
    %cst_20 = arith.constant 1.000000e+00 : f32
    %40 = vector.broadcast %cst_20 : f32 to vector<32x8xf32>
    %41 = arith.addf %40, %39 : vector<32x8xf32>
    %cst_21 = arith.constant 5.000000e-01 : f32
    %42 = vector.broadcast %cst_21 : f32 to vector<32x8xf32>
    %43 = arith.mulf %42, %41 : vector<32x8xf32>
    %44 = arith.mulf %31, %43 : vector<32x8xf32>
    %45 = arith.truncf %44 : vector<32x8xf32> to vector<32x8xbf16>
    %cst_22 = arith.constant dense<0.000000e+00> : vector<32x16xf32>
    %46 = tpu.matmul %45, %7, %cst_22 {dimension_numbers = #tpu.dot_dimension_numbers<[1], [0], [0], [1], [0, 0, 1, 1], [], []>} : vector<32x8xbf16>, vector<8x16xbf16>, vector<32x16xf32> -> vector<32x16xf32>
    %47 = vector.broadcast %8 : vector<1x16xf32> to vector<32x16xf32>
    %48 = arith.addf %46, %47 : vector<32x16xf32>
    %49 = arith.mulf %48, %48 : vector<32x16xf32>
    %50 = arith.mulf %48, %49 : vector<32x16xf32>
    %cst_23 = arith.constant 4.471500e-02 : f32
    %51 = vector.broadcast %cst_23 : f32 to vector<32x16xf32>
    %52 = arith.mulf %51, %50 : vector<32x16xf32>
    %53 = arith.addf %48, %52 : vector<32x16xf32>
    %cst_24 = arith.constant 0.797884583 : f32
    %54 = vector.broadcast %cst_24 : f32 to vector<32x16xf32>
    %55 = arith.mulf %54, %53 : vector<32x16xf32>
    %56 = math.tanh %55 : vector<32x16xf32>
    %cst_25 = arith.constant 1.000000e+00 : f32
    %57 = vector.broadcast %cst_25 : f32 to vector<32x16xf32>
    %58 = arith.addf %57, %56 : vector<32x16xf32>
    %cst_26 = arith.constant 5.000000e-01 : f32
    %59 = vector.broadcast %cst_26 : f32 to vector<32x16xf32>
    %60 = arith.mulf %59, %58 : vector<32x16xf32>
    %61 = arith.mulf %48, %60 : vector<32x16xf32>
    %62 = vector.extract_strided_slice %6 {offsets = [0, 8], sizes = [32, 8], strides = [1, 1]} : vector<32x32xf32> to vector<32x8xf32>
    %c0_27 = arith.constant 0 : index
    %c0_28 = arith.constant 0 : index
    %63 = vector.load %arg4[%c0_27, %c0_28] : memref<1x8xf32, #tpu.memory_space<vmem>>, vector<1x8xf32>
    %c0_29 = arith.constant 0 : index
    %c0_30 = arith.constant 0 : index
    %64 = vector.load %arg5[%c0_29, %c0_30] : memref<1x8xf32, #tpu.memory_space<vmem>>, vector<1x8xf32>
    %cst_31 = arith.constant dense<0.000000e+00> : vector<32xf32>
    %65 = vector.multi_reduction <add>, %62, %cst_31 [1] : vector<32x8xf32> to vector<32xf32>
    %66 = vector.shape_cast %65 : vector<32xf32> to vector<32x1xf32>
    %cst_32 = arith.constant 8.000000e+00 : f32
    %67 = vector.broadcast %cst_32 : f32 to vector<32x1xf32>
    %68 = arith.divf %66, %67 : vector<32x1xf32>
    %69 = vector.broadcast %68 : vector<32x1xf32> to vector<32x8xf32>
    %70 = arith.subf %62, %69 : vector<32x8xf32>
    %71 = arith.mulf %70, %70 : vector<32x8xf32>
    %cst_33 = arith.constant dense<0.000000e+00> : vector<32xf32>
    %72 = vector.multi_reduction <add>, %71, %cst_33 [1] : vector<32x8xf32> to vector<32xf32>
    %73 = vector.shape_cast %72 : vector<32xf32> to vector<32x1xf32>
    %cst_34 = arith.constant 8.000000e+00 : f32
    %74 = vector.broadcast %cst_34 : f32 to vector<32x1xf32>
    %75 = arith.divf %73, %74 : vector<32x1xf32>
    %cst_35 = arith.constant 9.99999997E-7 : f32
    %76 = vector.broadcast %cst_35 : f32 to vector<32x1xf32>
    %77 = arith.addf %75, %76 : vector<32x1xf32>
    %78 = math.rsqrt %77 : vector<32x1xf32>
    %79 = vector.broadcast %78 : vector<32x1xf32> to vector<32x8xf32>
    %80 = arith.mulf %70, %79 : vector<32x8xf32>
    %81 = vector.broadcast %63 : vector<1x8xf32> to vector<32x8xf32>
    %82 = arith.mulf %80, %81 : vector<32x8xf32>
    %83 = vector.broadcast %64 : vector<1x8xf32> to vector<32x8xf32>
    %84 = arith.addf %82, %83 : vector<32x8xf32>
    %85 = arith.mulf %84, %84 : vector<32x8xf32>
    %86 = arith.mulf %84, %85 : vector<32x8xf32>
    %cst_36 = arith.constant 4.471500e-02 : f32
    %87 = vector.broadcast %cst_36 : f32 to vector<32x8xf32>
    %88 = arith.mulf %87, %86 : vector<32x8xf32>
    %89 = arith.addf %84, %88 : vector<32x8xf32>
    %cst_37 = arith.constant 0.797884583 : f32
    %90 = vector.broadcast %cst_37 : f32 to vector<32x8xf32>
    %91 = arith.mulf %90, %89 : vector<32x8xf32>
    %92 = math.tanh %91 : vector<32x8xf32>
    %cst_38 = arith.constant 1.000000e+00 : f32
    %93 = vector.broadcast %cst_38 : f32 to vector<32x8xf32>
    %94 = arith.addf %93, %92 : vector<32x8xf32>
    %cst_39 = arith.constant 5.000000e-01 : f32
    %95 = vector.broadcast %cst_39 : f32 to vector<32x8xf32>
    %96 = arith.mulf %95, %94 : vector<32x8xf32>
    %97 = arith.mulf %84, %96 : vector<32x8xf32>
    %98 = arith.truncf %97 : vector<32x8xf32> to vector<32x8xbf16>
    %cst_40 = arith.constant dense<0.000000e+00> : vector<32x16xf32>
    %99 = tpu.matmul %98, %7, %cst_40 {dimension_numbers = #tpu.dot_dimension_numbers<[1], [0], [0], [1], [0, 0, 1, 1], [], []>} : vector<32x8xbf16>, vector<8x16xbf16>, vector<32x16xf32> -> vector<32x16xf32>
    %100 = vector.broadcast %8 : vector<1x16xf32> to vector<32x16xf32>
    %101 = arith.addf %99, %100 : vector<32x16xf32>
    %102 = arith.mulf %101, %101 : vector<32x16xf32>
    %103 = arith.mulf %101, %102 : vector<32x16xf32>
    %cst_41 = arith.constant 4.471500e-02 : f32
    %104 = vector.broadcast %cst_41 : f32 to vector<32x16xf32>
    %105 = arith.mulf %104, %103 : vector<32x16xf32>
    %106 = arith.addf %101, %105 : vector<32x16xf32>
    %cst_42 = arith.constant 0.797884583 : f32
    %107 = vector.broadcast %cst_42 : f32 to vector<32x16xf32>
    %108 = arith.mulf %107, %106 : vector<32x16xf32>
    %109 = math.tanh %108 : vector<32x16xf32>
    %cst_43 = arith.constant 1.000000e+00 : f32
    %110 = vector.broadcast %cst_43 : f32 to vector<32x16xf32>
    %111 = arith.addf %110, %109 : vector<32x16xf32>
    %cst_44 = arith.constant 5.000000e-01 : f32
    %112 = vector.broadcast %cst_44 : f32 to vector<32x16xf32>
    %113 = arith.mulf %112, %111 : vector<32x16xf32>
    %114 = arith.mulf %101, %113 : vector<32x16xf32>
    %115 = vector.extract_strided_slice %6 {offsets = [0, 16], sizes = [32, 8], strides = [1, 1]} : vector<32x32xf32> to vector<32x8xf32>
    %c0_45 = arith.constant 0 : index
    %c0_46 = arith.constant 0 : index
    %116 = vector.load %arg4[%c0_45, %c0_46] : memref<1x8xf32, #tpu.memory_space<vmem>>, vector<1x8xf32>
    %c0_47 = arith.constant 0 : index
    %c0_48 = arith.constant 0 : index
    %117 = vector.load %arg5[%c0_47, %c0_48] : memref<1x8xf32, #tpu.memory_space<vmem>>, vector<1x8xf32>
    %cst_49 = arith.constant dense<0.000000e+00> : vector<32xf32>
    %118 = vector.multi_reduction <add>, %115, %cst_49 [1] : vector<32x8xf32> to vector<32xf32>
    %119 = vector.shape_cast %118 : vector<32xf32> to vector<32x1xf32>
    %cst_50 = arith.constant 8.000000e+00 : f32
    %120 = vector.broadcast %cst_50 : f32 to vector<32x1xf32>
    %121 = arith.divf %119, %120 : vector<32x1xf32>
    %122 = vector.broadcast %121 : vector<32x1xf32> to vector<32x8xf32>
    %123 = arith.subf %115, %122 : vector<32x8xf32>
    %124 = arith.mulf %123, %123 : vector<32x8xf32>
    %cst_51 = arith.constant dense<0.000000e+00> : vector<32xf32>
    %125 = vector.multi_reduction <add>, %124, %cst_51 [1] : vector<32x8xf32> to vector<32xf32>
    %126 = vector.shape_cast %125 : vector<32xf32> to vector<32x1xf32>
    %cst_52 = arith.constant 8.000000e+00 : f32
    %127 = vector.broadcast %cst_52 : f32 to vector<32x1xf32>
    %128 = arith.divf %126, %127 : vector<32x1xf32>
    %cst_53 = arith.constant 9.99999997E-7 : f32
    %129 = vector.broadcast %cst_53 : f32 to vector<32x1xf32>
    %130 = arith.addf %128, %129 : vector<32x1xf32>
    %131 = math.rsqrt %130 : vector<32x1xf32>
    %132 = vector.broadcast %131 : vector<32x1xf32> to vector<32x8xf32>
    %133 = arith.mulf %123, %132 : vector<32x8xf32>
    %134 = vector.broadcast %116 : vector<1x8xf32> to vector<32x8xf32>
    %135 = arith.mulf %133, %134 : vector<32x8xf32>
    %136 = vector.broadcast %117 : vector<1x8xf32> to vector<32x8xf32>
    %137 = arith.addf %135, %136 : vector<32x8xf32>
    %138 = arith.mulf %137, %137 : vector<32x8xf32>
    %139 = arith.mulf %137, %138 : vector<32x8xf32>
    %cst_54 = arith.constant 4.471500e-02 : f32
    %140 = vector.broadcast %cst_54 : f32 to vector<32x8xf32>
    %141 = arith.mulf %140, %139 : vector<32x8xf32>
    %142 = arith.addf %137, %141 : vector<32x8xf32>
    %cst_55 = arith.constant 0.797884583 : f32
    %143 = vector.broadcast %cst_55 : f32 to vector<32x8xf32>
    %144 = arith.mulf %143, %142 : vector<32x8xf32>
    %145 = math.tanh %144 : vector<32x8xf32>
    %cst_56 = arith.constant 1.000000e+00 : f32
    %146 = vector.broadcast %cst_56 : f32 to vector<32x8xf32>
    %147 = arith.addf %146, %145 : vector<32x8xf32>
    %cst_57 = arith.constant 5.000000e-01 : f32
    %148 = vector.broadcast %cst_57 : f32 to vector<32x8xf32>
    %149 = arith.mulf %148, %147 : vector<32x8xf32>
    %150 = arith.mulf %137, %149 : vector<32x8xf32>
    %151 = arith.truncf %150 : vector<32x8xf32> to vector<32x8xbf16>
    %cst_58 = arith.constant dense<0.000000e+00> : vector<32x16xf32>
    %152 = tpu.matmul %151, %7, %cst_58 {dimension_numbers = #tpu.dot_dimension_numbers<[1], [0], [0], [1], [0, 0, 1, 1], [], []>} : vector<32x8xbf16>, vector<8x16xbf16>, vector<32x16xf32> -> vector<32x16xf32>
    %153 = vector.broadcast %8 : vector<1x16xf32> to vector<32x16xf32>
    %154 = arith.addf %152, %153 : vector<32x16xf32>
    %155 = arith.mulf %154, %154 : vector<32x16xf32>
    %156 = arith.mulf %154, %155 : vector<32x16xf32>
    %cst_59 = arith.constant 4.471500e-02 : f32
    %157 = vector.broadcast %cst_59 : f32 to vector<32x16xf32>
    %158 = arith.mulf %157, %156 : vector<32x16xf32>
    %159 = arith.addf %154, %158 : vector<32x16xf32>
    %cst_60 = arith.constant 0.797884583 : f32
    %160 = vector.broadcast %cst_60 : f32 to vector<32x16xf32>
    %161 = arith.mulf %160, %159 : vector<32x16xf32>
    %162 = math.tanh %161 : vector<32x16xf32>
    %cst_61 = arith.constant 1.000000e+00 : f32
    %163 = vector.broadcast %cst_61 : f32 to vector<32x16xf32>
    %164 = arith.addf %163, %162 : vector<32x16xf32>
    %cst_62 = arith.constant 5.000000e-01 : f32
    %165 = vector.broadcast %cst_62 : f32 to vector<32x16xf32>
    %166 = arith.mulf %165, %164 : vector<32x16xf32>
    %167 = arith.mulf %154, %166 : vector<32x16xf32>
    %168 = vector.extract_strided_slice %6 {offsets = [0, 24], sizes = [32, 8], strides = [1, 1]} : vector<32x32xf32> to vector<32x8xf32>
    %c0_63 = arith.constant 0 : index
    %c0_64 = arith.constant 0 : index
    %169 = vector.load %arg4[%c0_63, %c0_64] : memref<1x8xf32, #tpu.memory_space<vmem>>, vector<1x8xf32>
    %c0_65 = arith.constant 0 : index
    %c0_66 = arith.constant 0 : index
    %170 = vector.load %arg5[%c0_65, %c0_66] : memref<1x8xf32, #tpu.memory_space<vmem>>, vector<1x8xf32>
    %cst_67 = arith.constant dense<0.000000e+00> : vector<32xf32>
    %171 = vector.multi_reduction <add>, %168, %cst_67 [1] : vector<32x8xf32> to vector<32xf32>
    %172 = vector.shape_cast %171 : vector<32xf32> to vector<32x1xf32>
    %cst_68 = arith.constant 8.000000e+00 : f32
    %173 = vector.broadcast %cst_68 : f32 to vector<32x1xf32>
    %174 = arith.divf %172, %173 : vector<32x1xf32>
    %175 = vector.broadcast %174 : vector<32x1xf32> to vector<32x8xf32>
    %176 = arith.subf %168, %175 : vector<32x8xf32>
    %177 = arith.mulf %176, %176 : vector<32x8xf32>
    %cst_69 = arith.constant dense<0.000000e+00> : vector<32xf32>
    %178 = vector.multi_reduction <add>, %177, %cst_69 [1] : vector<32x8xf32> to vector<32xf32>
    %179 = vector.shape_cast %178 : vector<32xf32> to vector<32x1xf32>
    %cst_70 = arith.constant 8.000000e+00 : f32
    %180 = vector.broadcast %cst_70 : f32 to vector<32x1xf32>
    %181 = arith.divf %179, %180 : vector<32x1xf32>
    %cst_71 = arith.constant 9.99999997E-7 : f32
    %182 = vector.broadcast %cst_71 : f32 to vector<32x1xf32>
    %183 = arith.addf %181, %182 : vector<32x1xf32>
    %184 = math.rsqrt %183 : vector<32x1xf32>
    %185 = vector.broadcast %184 : vector<32x1xf32> to vector<32x8xf32>
    %186 = arith.mulf %176, %185 : vector<32x8xf32>
    %187 = vector.broadcast %169 : vector<1x8xf32> to vector<32x8xf32>
    %188 = arith.mulf %186, %187 : vector<32x8xf32>
    %189 = vector.broadcast %170 : vector<1x8xf32> to vector<32x8xf32>
    %190 = arith.addf %188, %189 : vector<32x8xf32>
    %191 = arith.mulf %190, %190 : vector<32x8xf32>
    %192 = arith.mulf %190, %191 : vector<32x8xf32>
    %cst_72 = arith.constant 4.471500e-02 : f32
    %193 = vector.broadcast %cst_72 : f32 to vector<32x8xf32>
    %194 = arith.mulf %193, %192 : vector<32x8xf32>
    %195 = arith.addf %190, %194 : vector<32x8xf32>
    %cst_73 = arith.constant 0.797884583 : f32
    %196 = vector.broadcast %cst_73 : f32 to vector<32x8xf32>
    %197 = arith.mulf %196, %195 : vector<32x8xf32>
    %198 = math.tanh %197 : vector<32x8xf32>
    %cst_74 = arith.constant 1.000000e+00 : f32
    %199 = vector.broadcast %cst_74 : f32 to vector<32x8xf32>
    %200 = arith.addf %199, %198 : vector<32x8xf32>
    %cst_75 = arith.constant 5.000000e-01 : f32
    %201 = vector.broadcast %cst_75 : f32 to vector<32x8xf32>
    %202 = arith.mulf %201, %200 : vector<32x8xf32>
    %203 = arith.mulf %190, %202 : vector<32x8xf32>
    %204 = arith.truncf %203 : vector<32x8xf32> to vector<32x8xbf16>
    %cst_76 = arith.constant dense<0.000000e+00> : vector<32x16xf32>
    %205 = tpu.matmul %204, %7, %cst_76 {dimension_numbers = #tpu.dot_dimension_numbers<[1], [0], [0], [1], [0, 0, 1, 1], [], []>} : vector<32x8xbf16>, vector<8x16xbf16>, vector<32x16xf32> -> vector<32x16xf32>
    %206 = vector.broadcast %8 : vector<1x16xf32> to vector<32x16xf32>
    %207 = arith.addf %205, %206 : vector<32x16xf32>
    %208 = arith.mulf %207, %207 : vector<32x16xf32>
    %209 = arith.mulf %207, %208 : vector<32x16xf32>
    %cst_77 = arith.constant 4.471500e-02 : f32
    %210 = vector.broadcast %cst_77 : f32 to vector<32x16xf32>
    %211 = arith.mulf %210, %209 : vector<32x16xf32>
    %212 = arith.addf %207, %211 : vector<32x16xf32>
    %cst_78 = arith.constant 0.797884583 : f32
    %213 = vector.broadcast %cst_78 : f32 to vector<32x16xf32>
    %214 = arith.mulf %213, %212 : vector<32x16xf32>
    %215 = math.tanh %214 : vector<32x16xf32>
    %cst_79 = arith.constant 1.000000e+00 : f32
    %216 = vector.broadcast %cst_79 : f32 to vector<32x16xf32>
    %217 = arith.addf %216, %215 : vector<32x16xf32>
    %cst_80 = arith.constant 5.000000e-01 : f32
    %218 = vector.broadcast %cst_80 : f32 to vector<32x16xf32>
    %219 = arith.mulf %218, %217 : vector<32x16xf32>
    %220 = arith.mulf %207, %219 : vector<32x16xf32>
    %221 = tpu.concatenate %61, %114, %167, %220 in 1 : vector<32x16xf32>, vector<32x16xf32>, vector<32x16xf32>, vector<32x16xf32> -> vector<32x64xf32>
    %c0_81 = arith.constant 0 : index
    %c0_82 = arith.constant 0 : index
    %222 = vector.load %arg8[%c0_81, %c0_82] : memref<32x64xf32, #tpu.memory_space<vmem>>, vector<32x64xf32>
    tpu.vector_store %arg8[%c0_81, %c0_82], %221 {strides = array<i32>} : memref<32x64xf32, #tpu.memory_space<vmem>>, vector<32x64xf32>,
    return
  }
  func.func @transform_0(%arg0: i32) -> (i32, i32) {
    %c0_i32 = arith.constant 0 : i32
    %c0_i32_0 = arith.constant 0 : i32
    %c0_i32_1 = arith.constant 0 : i32
    return %c0_i32, %c0_i32_0 : i32, i32
  }
  func.func @transform_1(%arg0: i32) -> (i32, i32) {
    %c0_i32 = arith.constant 0 : i32
    %c0_i32_0 = arith.constant 0 : i32
    %c0_i32_1 = arith.constant 0 : i32
    return %c0_i32, %c0_i32_0 : i32, i32
  }
  func.func @transform_2(%arg0: i32) -> (i32, i32) {
    %c0_i32 = arith.constant 0 : i32
    %c0_i32_0 = arith.constant 0 : i32
    %c0_i32_1 = arith.constant 0 : i32
    return %c0_i32, %c0_i32_0 : i32, i32
  }
  func.func @transform_3(%arg0: i32) -> (i32, i32) {
    %c0_i32 = arith.constant 0 : i32
    %c0_i32_0 = arith.constant 0 : i32
    %c0_i32_1 = arith.constant 0 : i32
    return %c0_i32, %c0_i32_0 : i32, i32
  }
  func.func @transform_4(%arg0: i32) -> (i32, i32) {
    %c0_i32 = arith.constant 0 : i32
    %c0_i32_0 = arith.constant 0 : i32
    %c0_i32_1 = arith.constant 0 : i32
    return %c0_i32, %c0_i32_0 : i32, i32
  }
  func.func @transform_5(%arg0: i32) -> (i32, i32) {
    %c0_i32 = arith.constant 0 : i32
    %c0_i32_0 = arith.constant 0 : i32
    %c0_i32_1 = arith.constant 0 : i32
    return %c0_i32, %c0_i32_0 : i32, i32
  }
  func.func @transform_6(%arg0: i32) -> (i32, i32) {
    %c0_i32 = arith.constant 0 : i32
    %c0_i32_0 = arith.constant 0 : i32
    %c0_i32_1 = arith.constant 0 : i32
    return %c0_i32, %c0_i32_0 : i32, i32
  }
  func.func @transform_7(%arg0: i32) -> (i32, i32) {
    %c0_i32 = arith.constant 0 : i32
    %c0_i32_0 = arith.constant 0 : i32
    %c0_i32_1 = arith.constant 0 : i32
    return %c0_i32, %c0_i32_0 : i32, i32
  }
}

module attributes {stable_mosaic.version = 11 : i64} {
  func.func @_hyper_masks_kernel(%arg0: i32, %arg1: memref<1x4x32xf32, #tpu.memory_space<vmem>>, %arg2: memref<4x32x32xbf16, #tpu.memory_space<vmem>>, %arg3: memref<4x1x32xf32, #tpu.memory_space<vmem>>, %arg4: memref<4x32x32xbf16, #tpu.memory_space<vmem>>, %arg5: memref<4x1x32xf32, #tpu.memory_space<vmem>>, %arg6: memref<4x32x4xbf16, #tpu.memory_space<vmem>>, %arg7: memref<4x1x4xf32, #tpu.memory_space<vmem>>, %arg8: memref<1x4x256xf32, #tpu.memory_space<vmem>>, %arg9: memref<1x4x256xf32, #tpu.memory_space<vmem>>) attributes {dimension_semantics = [#tpu.dimension_semantics<parallel>], iteration_bounds = array<i64: 2>, scalar_prefetch = 0 : i64, scratch_operands = 0 : i64, tpu.core_type = #tpu.core_type<tc>, window_params = [{transform_indices = @transform_0, window_bounds = array<i64: 1, 4, 32>}, {pipeline_mode = #tpu.pipeline_mode<synchronous>, transform_indices = @transform_1, window_bounds = array<i64: 4, 32, 32>}, {pipeline_mode = #tpu.pipeline_mode<synchronous>, transform_indices = @transform_2, window_bounds = array<i64: 4, 1, 32>}, {pipeline_mode = #tpu.pipeline_mode<synchronous>, transform_indices = @transform_3, window_bounds = array<i64: 4, 32, 32>}, {pipeline_mode = #tpu.pipeline_mode<synchronous>, transform_indices = @transform_4, window_bounds = array<i64: 4, 1, 32>}, {pipeline_mode = #tpu.pipeline_mode<synchronous>, transform_indices = @transform_5, window_bounds = array<i64: 4, 32, 4>}, {pipeline_mode = #tpu.pipeline_mode<synchronous>, transform_indices = @transform_6, window_bounds = array<i64: 4, 1, 4>}, {transform_indices = @transform_7, window_bounds = array<i64: 1, 4, 256>}, {transform_indices = @transform_8, window_bounds = array<i64: 1, 4, 256>}]} {
    %c0 = arith.constant 0 : index
    %c0_0 = arith.constant 0 : index
    %c0_1 = arith.constant 0 : index
    %0 = vector.load %arg1[%c0, %c0_0, %c0_1] : memref<1x4x32xf32, #tpu.memory_space<vmem>>, vector<1x4x32xf32>
    %1 = vector.shape_cast %0 : vector<1x4x32xf32> to vector<4x32xf32>
    %2 = vector.extract_strided_slice %1 {offsets = [0, 0], sizes = [1, 32], strides = [1, 1]} : vector<4x32xf32> to vector<1x32xf32>
    %c0_2 = arith.constant 0 : index
    %c0_3 = arith.constant 0 : index
    %c0_4 = arith.constant 0 : index
    %3 = vector.load %arg2[%c0_2, %c0_3, %c0_4] : memref<4x32x32xbf16, #tpu.memory_space<vmem>>, vector<1x32x32xbf16>
    %4 = vector.shape_cast %3 : vector<1x32x32xbf16> to vector<32x32xbf16>
    %5 = arith.truncf %2 : vector<1x32xf32> to vector<1x32xbf16>
    %cst = arith.constant dense<0.000000e+00> : vector<1x32xf32>
    %6 = tpu.matmul %5, %4, %cst {dimension_numbers = #tpu.dot_dimension_numbers<[1], [0], [0], [1], [0, 0, 1, 1], [], []>} : vector<1x32xbf16>, vector<32x32xbf16>, vector<1x32xf32> -> vector<1x32xf32>
    %c0_5 = arith.constant 0 : index
    %c0_6 = arith.constant 0 : index
    %c0_7 = arith.constant 0 : index
    %7 = vector.load %arg3[%c0_5, %c0_6, %c0_7] : memref<4x1x32xf32, #tpu.memory_space<vmem>>, vector<1x1x32xf32>
    %8 = vector.shape_cast %7 : vector<1x1x32xf32> to vector<1x32xf32>
    %9 = arith.addf %6, %8 : vector<1x32xf32>
    %cst_8 = arith.constant 0.000000e+00 : f32
    %10 = vector.broadcast %cst_8 : f32 to vector<1x32xf32>
    %11 = arith.maximumf %9, %10 : vector<1x32xf32>
    %c0_9 = arith.constant 0 : index
    %c0_10 = arith.constant 0 : index
    %c0_11 = arith.constant 0 : index
    %12 = vector.load %arg4[%c0_9, %c0_10, %c0_11] : memref<4x32x32xbf16, #tpu.memory_space<vmem>>, vector<1x32x32xbf16>
    %13 = vector.shape_cast %12 : vector<1x32x32xbf16> to vector<32x32xbf16>
    %14 = arith.truncf %11 : vector<1x32xf32> to vector<1x32xbf16>
    %cst_12 = arith.constant dense<0.000000e+00> : vector<1x32xf32>
    %15 = tpu.matmul %14, %13, %cst_12 {dimension_numbers = #tpu.dot_dimension_numbers<[1], [0], [0], [1], [0, 0, 1, 1], [], []>} : vector<1x32xbf16>, vector<32x32xbf16>, vector<1x32xf32> -> vector<1x32xf32>
    %c0_13 = arith.constant 0 : index
    %c0_14 = arith.constant 0 : index
    %c0_15 = arith.constant 0 : index
    %16 = vector.load %arg5[%c0_13, %c0_14, %c0_15] : memref<4x1x32xf32, #tpu.memory_space<vmem>>, vector<1x1x32xf32>
    %17 = vector.shape_cast %16 : vector<1x1x32xf32> to vector<1x32xf32>
    %18 = arith.addf %15, %17 : vector<1x32xf32>
    %cst_16 = arith.constant 0.000000e+00 : f32
    %19 = vector.broadcast %cst_16 : f32 to vector<1x32xf32>
    %20 = arith.maximumf %18, %19 : vector<1x32xf32>
    %c0_17 = arith.constant 0 : index
    %c0_18 = arith.constant 0 : index
    %c0_19 = arith.constant 0 : index
    %21 = vector.load %arg6[%c0_17, %c0_18, %c0_19] : memref<4x32x4xbf16, #tpu.memory_space<vmem>>, vector<1x32x4xbf16>
    %22 = vector.shape_cast %21 : vector<1x32x4xbf16> to vector<32x4xbf16>
    %23 = arith.truncf %20 : vector<1x32xf32> to vector<1x32xbf16>
    %cst_20 = arith.constant dense<0.000000e+00> : vector<1x4xf32>
    %24 = tpu.matmul %23, %22, %cst_20 {dimension_numbers = #tpu.dot_dimension_numbers<[1], [0], [0], [1], [0, 0, 1, 1], [], []>} : vector<1x32xbf16>, vector<32x4xbf16>, vector<1x4xf32> -> vector<1x4xf32>
    %c0_21 = arith.constant 0 : index
    %c0_22 = arith.constant 0 : index
    %c0_23 = arith.constant 0 : index
    %25 = vector.load %arg7[%c0_21, %c0_22, %c0_23] : memref<4x1x4xf32, #tpu.memory_space<vmem>>, vector<1x1x4xf32>
    %26 = vector.shape_cast %25 : vector<1x1x4xf32> to vector<1x4xf32>
    %27 = arith.addf %24, %26 : vector<1x4xf32>
    %28 = vector.extract_strided_slice %1 {offsets = [1, 0], sizes = [1, 32], strides = [1, 1]} : vector<4x32xf32> to vector<1x32xf32>
    %c1 = arith.constant 1 : index
    %c0_24 = arith.constant 0 : index
    %c0_25 = arith.constant 0 : index
    %29 = vector.load %arg2[%c1, %c0_24, %c0_25] : memref<4x32x32xbf16, #tpu.memory_space<vmem>>, vector<1x32x32xbf16>
    %30 = vector.shape_cast %29 : vector<1x32x32xbf16> to vector<32x32xbf16>
    %31 = arith.truncf %28 : vector<1x32xf32> to vector<1x32xbf16>
    %cst_26 = arith.constant dense<0.000000e+00> : vector<1x32xf32>
    %32 = tpu.matmul %31, %30, %cst_26 {dimension_numbers = #tpu.dot_dimension_numbers<[1], [0], [0], [1], [0, 0, 1, 1], [], []>} : vector<1x32xbf16>, vector<32x32xbf16>, vector<1x32xf32> -> vector<1x32xf32>
    %c1_27 = arith.constant 1 : index
    %c0_28 = arith.constant 0 : index
    %c0_29 = arith.constant 0 : index
    %33 = vector.load %arg3[%c1_27, %c0_28, %c0_29] : memref<4x1x32xf32, #tpu.memory_space<vmem>>, vector<1x1x32xf32>
    %34 = vector.shape_cast %33 : vector<1x1x32xf32> to vector<1x32xf32>
    %35 = arith.addf %32, %34 : vector<1x32xf32>
    %cst_30 = arith.constant 0.000000e+00 : f32
    %36 = vector.broadcast %cst_30 : f32 to vector<1x32xf32>
    %37 = arith.maximumf %35, %36 : vector<1x32xf32>
    %c1_31 = arith.constant 1 : index
    %c0_32 = arith.constant 0 : index
    %c0_33 = arith.constant 0 : index
    %38 = vector.load %arg4[%c1_31, %c0_32, %c0_33] : memref<4x32x32xbf16, #tpu.memory_space<vmem>>, vector<1x32x32xbf16>
    %39 = vector.shape_cast %38 : vector<1x32x32xbf16> to vector<32x32xbf16>
    %40 = arith.truncf %37 : vector<1x32xf32> to vector<1x32xbf16>
    %cst_34 = arith.constant dense<0.000000e+00> : vector<1x32xf32>
    %41 = tpu.matmul %40, %39, %cst_34 {dimension_numbers = #tpu.dot_dimension_numbers<[1], [0], [0], [1], [0, 0, 1, 1], [], []>} : vector<1x32xbf16>, vector<32x32xbf16>, vector<1x32xf32> -> vector<1x32xf32>
    %c1_35 = arith.constant 1 : index
    %c0_36 = arith.constant 0 : index
    %c0_37 = arith.constant 0 : index
    %42 = vector.load %arg5[%c1_35, %c0_36, %c0_37] : memref<4x1x32xf32, #tpu.memory_space<vmem>>, vector<1x1x32xf32>
    %43 = vector.shape_cast %42 : vector<1x1x32xf32> to vector<1x32xf32>
    %44 = arith.addf %41, %43 : vector<1x32xf32>
    %cst_38 = arith.constant 0.000000e+00 : f32
    %45 = vector.broadcast %cst_38 : f32 to vector<1x32xf32>
    %46 = arith.maximumf %44, %45 : vector<1x32xf32>
    %c1_39 = arith.constant 1 : index
    %c0_40 = arith.constant 0 : index
    %c0_41 = arith.constant 0 : index
    %47 = vector.load %arg6[%c1_39, %c0_40, %c0_41] : memref<4x32x4xbf16, #tpu.memory_space<vmem>>, vector<1x32x4xbf16>
    %48 = vector.shape_cast %47 : vector<1x32x4xbf16> to vector<32x4xbf16>
    %49 = arith.truncf %46 : vector<1x32xf32> to vector<1x32xbf16>
    %cst_42 = arith.constant dense<0.000000e+00> : vector<1x4xf32>
    %50 = tpu.matmul %49, %48, %cst_42 {dimension_numbers = #tpu.dot_dimension_numbers<[1], [0], [0], [1], [0, 0, 1, 1], [], []>} : vector<1x32xbf16>, vector<32x4xbf16>, vector<1x4xf32> -> vector<1x4xf32>
    %c1_43 = arith.constant 1 : index
    %c0_44 = arith.constant 0 : index
    %c0_45 = arith.constant 0 : index
    %51 = vector.load %arg7[%c1_43, %c0_44, %c0_45] : memref<4x1x4xf32, #tpu.memory_space<vmem>>, vector<1x1x4xf32>
    %52 = vector.shape_cast %51 : vector<1x1x4xf32> to vector<1x4xf32>
    %53 = arith.addf %50, %52 : vector<1x4xf32>
    %54 = vector.extract_strided_slice %1 {offsets = [2, 0], sizes = [1, 32], strides = [1, 1]} : vector<4x32xf32> to vector<1x32xf32>
    %c2 = arith.constant 2 : index
    %c0_46 = arith.constant 0 : index
    %c0_47 = arith.constant 0 : index
    %55 = vector.load %arg2[%c2, %c0_46, %c0_47] : memref<4x32x32xbf16, #tpu.memory_space<vmem>>, vector<1x32x32xbf16>
    %56 = vector.shape_cast %55 : vector<1x32x32xbf16> to vector<32x32xbf16>
    %57 = arith.truncf %54 : vector<1x32xf32> to vector<1x32xbf16>
    %cst_48 = arith.constant dense<0.000000e+00> : vector<1x32xf32>
    %58 = tpu.matmul %57, %56, %cst_48 {dimension_numbers = #tpu.dot_dimension_numbers<[1], [0], [0], [1], [0, 0, 1, 1], [], []>} : vector<1x32xbf16>, vector<32x32xbf16>, vector<1x32xf32> -> vector<1x32xf32>
    %c2_49 = arith.constant 2 : index
    %c0_50 = arith.constant 0 : index
    %c0_51 = arith.constant 0 : index
    %59 = vector.load %arg3[%c2_49, %c0_50, %c0_51] : memref<4x1x32xf32, #tpu.memory_space<vmem>>, vector<1x1x32xf32>
    %60 = vector.shape_cast %59 : vector<1x1x32xf32> to vector<1x32xf32>
    %61 = arith.addf %58, %60 : vector<1x32xf32>
    %cst_52 = arith.constant 0.000000e+00 : f32
    %62 = vector.broadcast %cst_52 : f32 to vector<1x32xf32>
    %63 = arith.maximumf %61, %62 : vector<1x32xf32>
    %c2_53 = arith.constant 2 : index
    %c0_54 = arith.constant 0 : index
    %c0_55 = arith.constant 0 : index
    %64 = vector.load %arg4[%c2_53, %c0_54, %c0_55] : memref<4x32x32xbf16, #tpu.memory_space<vmem>>, vector<1x32x32xbf16>
    %65 = vector.shape_cast %64 : vector<1x32x32xbf16> to vector<32x32xbf16>
    %66 = arith.truncf %63 : vector<1x32xf32> to vector<1x32xbf16>
    %cst_56 = arith.constant dense<0.000000e+00> : vector<1x32xf32>
    %67 = tpu.matmul %66, %65, %cst_56 {dimension_numbers = #tpu.dot_dimension_numbers<[1], [0], [0], [1], [0, 0, 1, 1], [], []>} : vector<1x32xbf16>, vector<32x32xbf16>, vector<1x32xf32> -> vector<1x32xf32>
    %c2_57 = arith.constant 2 : index
    %c0_58 = arith.constant 0 : index
    %c0_59 = arith.constant 0 : index
    %68 = vector.load %arg5[%c2_57, %c0_58, %c0_59] : memref<4x1x32xf32, #tpu.memory_space<vmem>>, vector<1x1x32xf32>
    %69 = vector.shape_cast %68 : vector<1x1x32xf32> to vector<1x32xf32>
    %70 = arith.addf %67, %69 : vector<1x32xf32>
    %cst_60 = arith.constant 0.000000e+00 : f32
    %71 = vector.broadcast %cst_60 : f32 to vector<1x32xf32>
    %72 = arith.maximumf %70, %71 : vector<1x32xf32>
    %c2_61 = arith.constant 2 : index
    %c0_62 = arith.constant 0 : index
    %c0_63 = arith.constant 0 : index
    %73 = vector.load %arg6[%c2_61, %c0_62, %c0_63] : memref<4x32x4xbf16, #tpu.memory_space<vmem>>, vector<1x32x4xbf16>
    %74 = vector.shape_cast %73 : vector<1x32x4xbf16> to vector<32x4xbf16>
    %75 = arith.truncf %72 : vector<1x32xf32> to vector<1x32xbf16>
    %cst_64 = arith.constant dense<0.000000e+00> : vector<1x4xf32>
    %76 = tpu.matmul %75, %74, %cst_64 {dimension_numbers = #tpu.dot_dimension_numbers<[1], [0], [0], [1], [0, 0, 1, 1], [], []>} : vector<1x32xbf16>, vector<32x4xbf16>, vector<1x4xf32> -> vector<1x4xf32>
    %c2_65 = arith.constant 2 : index
    %c0_66 = arith.constant 0 : index
    %c0_67 = arith.constant 0 : index
    %77 = vector.load %arg7[%c2_65, %c0_66, %c0_67] : memref<4x1x4xf32, #tpu.memory_space<vmem>>, vector<1x1x4xf32>
    %78 = vector.shape_cast %77 : vector<1x1x4xf32> to vector<1x4xf32>
    %79 = arith.addf %76, %78 : vector<1x4xf32>
    %80 = vector.extract_strided_slice %1 {offsets = [3, 0], sizes = [1, 32], strides = [1, 1]} : vector<4x32xf32> to vector<1x32xf32>
    %c3 = arith.constant 3 : index
    %c0_68 = arith.constant 0 : index
    %c0_69 = arith.constant 0 : index
    %81 = vector.load %arg2[%c3, %c0_68, %c0_69] : memref<4x32x32xbf16, #tpu.memory_space<vmem>>, vector<1x32x32xbf16>
    %82 = vector.shape_cast %81 : vector<1x32x32xbf16> to vector<32x32xbf16>
    %83 = arith.truncf %80 : vector<1x32xf32> to vector<1x32xbf16>
    %cst_70 = arith.constant dense<0.000000e+00> : vector<1x32xf32>
    %84 = tpu.matmul %83, %82, %cst_70 {dimension_numbers = #tpu.dot_dimension_numbers<[1], [0], [0], [1], [0, 0, 1, 1], [], []>} : vector<1x32xbf16>, vector<32x32xbf16>, vector<1x32xf32> -> vector<1x32xf32>
    %c3_71 = arith.constant 3 : index
    %c0_72 = arith.constant 0 : index
    %c0_73 = arith.constant 0 : index
    %85 = vector.load %arg3[%c3_71, %c0_72, %c0_73] : memref<4x1x32xf32, #tpu.memory_space<vmem>>, vector<1x1x32xf32>
    %86 = vector.shape_cast %85 : vector<1x1x32xf32> to vector<1x32xf32>
    %87 = arith.addf %84, %86 : vector<1x32xf32>
    %cst_74 = arith.constant 0.000000e+00 : f32
    %88 = vector.broadcast %cst_74 : f32 to vector<1x32xf32>
    %89 = arith.maximumf %87, %88 : vector<1x32xf32>
    %c3_75 = arith.constant 3 : index
    %c0_76 = arith.constant 0 : index
    %c0_77 = arith.constant 0 : index
    %90 = vector.load %arg4[%c3_75, %c0_76, %c0_77] : memref<4x32x32xbf16, #tpu.memory_space<vmem>>, vector<1x32x32xbf16>
    %91 = vector.shape_cast %90 : vector<1x32x32xbf16> to vector<32x32xbf16>
    %92 = arith.truncf %89 : vector<1x32xf32> to vector<1x32xbf16>
    %cst_78 = arith.constant dense<0.000000e+00> : vector<1x32xf32>
    %93 = tpu.matmul %92, %91, %cst_78 {dimension_numbers = #tpu.dot_dimension_numbers<[1], [0], [0], [1], [0, 0, 1, 1], [], []>} : vector<1x32xbf16>, vector<32x32xbf16>, vector<1x32xf32> -> vector<1x32xf32>
    %c3_79 = arith.constant 3 : index
    %c0_80 = arith.constant 0 : index
    %c0_81 = arith.constant 0 : index
    %94 = vector.load %arg5[%c3_79, %c0_80, %c0_81] : memref<4x1x32xf32, #tpu.memory_space<vmem>>, vector<1x1x32xf32>
    %95 = vector.shape_cast %94 : vector<1x1x32xf32> to vector<1x32xf32>
    %96 = arith.addf %93, %95 : vector<1x32xf32>
    %cst_82 = arith.constant 0.000000e+00 : f32
    %97 = vector.broadcast %cst_82 : f32 to vector<1x32xf32>
    %98 = arith.maximumf %96, %97 : vector<1x32xf32>
    %c3_83 = arith.constant 3 : index
    %c0_84 = arith.constant 0 : index
    %c0_85 = arith.constant 0 : index
    %99 = vector.load %arg6[%c3_83, %c0_84, %c0_85] : memref<4x32x4xbf16, #tpu.memory_space<vmem>>, vector<1x32x4xbf16>
    %100 = vector.shape_cast %99 : vector<1x32x4xbf16> to vector<32x4xbf16>
    %101 = arith.truncf %98 : vector<1x32xf32> to vector<1x32xbf16>
    %cst_86 = arith.constant dense<0.000000e+00> : vector<1x4xf32>
    %102 = tpu.matmul %101, %100, %cst_86 {dimension_numbers = #tpu.dot_dimension_numbers<[1], [0], [0], [1], [0, 0, 1, 1], [], []>} : vector<1x32xbf16>, vector<32x4xbf16>, vector<1x4xf32> -> vector<1x4xf32>
    %c3_87 = arith.constant 3 : index
    %c0_88 = arith.constant 0 : index
    %c0_89 = arith.constant 0 : index
    %103 = vector.load %arg7[%c3_87, %c0_88, %c0_89] : memref<4x1x4xf32, #tpu.memory_space<vmem>>, vector<1x1x4xf32>
    %104 = vector.shape_cast %103 : vector<1x1x4xf32> to vector<1x4xf32>
    %105 = arith.addf %102, %104 : vector<1x4xf32>
    %106 = tpu.concatenate %27, %53, %79, %105 in 0 : vector<1x4xf32>, vector<1x4xf32>, vector<1x4xf32>, vector<1x4xf32> -> vector<4x4xf32>
    %c0_90 = arith.constant 0 : index
    %c0_91 = arith.constant 0 : index
    %c0_92 = arith.constant 0 : index
    %107 = vector.load %arg8[%c0_90, %c0_91, %c0_92] : memref<1x4x256xf32, #tpu.memory_space<vmem>>, vector<1x4x256xf32>
    %108 = vector.shape_cast %107 : vector<1x4x256xf32> to vector<4x256xf32>
    %109 = arith.truncf %106 : vector<4x4xf32> to vector<4x4xbf16>
    %110 = arith.truncf %108 : vector<4x256xf32> to vector<4x256xbf16>
    %cst_93 = arith.constant dense<0.000000e+00> : vector<4x256xf32>
    %111 = tpu.matmul %109, %110, %cst_93 {dimension_numbers = #tpu.dot_dimension_numbers<[1], [0], [0], [1], [0, 0, 1, 1], [], []>} : vector<4x4xbf16>, vector<4x256xbf16>, vector<4x256xf32> -> vector<4x256xf32>
    %c0_94 = arith.constant 0 : index
    %c0_95 = arith.constant 0 : index
    %c0_96 = arith.constant 0 : index
    %112 = vector.load %arg9[%c0_94, %c0_95, %c0_96] : memref<1x4x256xf32, #tpu.memory_space<vmem>>, vector<1x4x256xf32>
    %113 = vector.shape_cast %112 : vector<1x4x256xf32> to vector<4x256xf32>
    %114 = vector.shape_cast %111 : vector<4x256xf32> to vector<1x4x256xf32>
    tpu.vector_store %arg9[%c0_94, %c0_95, %c0_96], %114 {strides = array<i32>} : memref<1x4x256xf32, #tpu.memory_space<vmem>>, vector<1x4x256xf32>,
    return
  }
  func.func @transform_0(%arg0: i32) -> (i32, i32, i32) {
    %c0_i32 = arith.constant 0 : i32
    %c0_i32_0 = arith.constant 0 : i32
    %c0_i32_1 = arith.constant 0 : i32
    return %arg0, %c0_i32, %c0_i32_0 : i32, i32, i32
  }
  func.func @transform_1(%arg0: i32) -> (i32, i32, i32) {
    %c0_i32 = arith.constant 0 : i32
    %c0_i32_0 = arith.constant 0 : i32
    %c0_i32_1 = arith.constant 0 : i32
    %c0_i32_2 = arith.constant 0 : i32
    return %c0_i32, %c0_i32_0, %c0_i32_1 : i32, i32, i32
  }
  func.func @transform_2(%arg0: i32) -> (i32, i32, i32) {
    %c0_i32 = arith.constant 0 : i32
    %c0_i32_0 = arith.constant 0 : i32
    %c0_i32_1 = arith.constant 0 : i32
    %c0_i32_2 = arith.constant 0 : i32
    return %c0_i32, %c0_i32_0, %c0_i32_1 : i32, i32, i32
  }
  func.func @transform_3(%arg0: i32) -> (i32, i32, i32) {
    %c0_i32 = arith.constant 0 : i32
    %c0_i32_0 = arith.constant 0 : i32
    %c0_i32_1 = arith.constant 0 : i32
    %c0_i32_2 = arith.constant 0 : i32
    return %c0_i32, %c0_i32_0, %c0_i32_1 : i32, i32, i32
  }
  func.func @transform_4(%arg0: i32) -> (i32, i32, i32) {
    %c0_i32 = arith.constant 0 : i32
    %c0_i32_0 = arith.constant 0 : i32
    %c0_i32_1 = arith.constant 0 : i32
    %c0_i32_2 = arith.constant 0 : i32
    return %c0_i32, %c0_i32_0, %c0_i32_1 : i32, i32, i32
  }
  func.func @transform_5(%arg0: i32) -> (i32, i32, i32) {
    %c0_i32 = arith.constant 0 : i32
    %c0_i32_0 = arith.constant 0 : i32
    %c0_i32_1 = arith.constant 0 : i32
    %c0_i32_2 = arith.constant 0 : i32
    return %c0_i32, %c0_i32_0, %c0_i32_1 : i32, i32, i32
  }
  func.func @transform_6(%arg0: i32) -> (i32, i32, i32) {
    %c0_i32 = arith.constant 0 : i32
    %c0_i32_0 = arith.constant 0 : i32
    %c0_i32_1 = arith.constant 0 : i32
    %c0_i32_2 = arith.constant 0 : i32
    return %c0_i32, %c0_i32_0, %c0_i32_1 : i32, i32, i32
  }
  func.func @transform_7(%arg0: i32) -> (i32, i32, i32) {
    %c0_i32 = arith.constant 0 : i32
    %c0_i32_0 = arith.constant 0 : i32
    %c0_i32_1 = arith.constant 0 : i32
    return %arg0, %c0_i32, %c0_i32_0 : i32, i32, i32
  }
  func.func @transform_8(%arg0: i32) -> (i32, i32, i32) {
    %c0_i32 = arith.constant 0 : i32
    %c0_i32_0 = arith.constant 0 : i32
    %c0_i32_1 = arith.constant 0 : i32
    return %arg0, %c0_i32, %c0_i32_0 : i32, i32, i32
  }
}

</mosaic_0001>

<bundles_post_ra>
// kernel: bk_medsam_forward.10
= control target key start
LH: loop header
LB: loop body
LE: loop exit
PB: predicated region body
PF: predicated region fallthrough
CT: control target
= control target key end

     0   :  { %s515_s15 = smov 0   ;;  %s581_s0 = inlined_call_operand.vmem [shape: f32[2,16,192], index: 0, kind: input, shape index: {}]   ;;  %s582_s1 = inlined_call_operand.vmem [shape: bf16[192,32], index: 1, kind: input, shape index: {}]   ;;  %s583_s2 = inlined_call_operand.vmem [shape: f32[1,32], index: 2, kind: input, shape index: {}]   ;;  %s584_s3 = inlined_call_operand.vmem [shape: f32[1,16,32], index: 3, kind: input, shape index: {}]   ;;  %s585_s4 = inlined_call_operand.vmem [shape: f32[2,16,32], index: 4, kind: output, shape index: {}]  }
   0x1 LB: > { %s399_s16 = sadd.s32 4294967295, %s488_s15   ;;  %p403_p0 = scmp.ge.s32.totalorder %s488_s15, 1  ;;  %s488_s15 = sphi %s515_s15, %s14_s15  }
   0x2   : > { %p162_p1 = scmp.lt.s32.totalorder %s488_s15, 3 }
   0x4   : > { %p163_p2 = pnand %p403_p0, %p162_p1 }
   0x5   : > { %p188_p3 = scmp.lt.s32.totalorder (!%p163_p2), %s399_s16, 1 }
   0x6   : > { %166 = sbr.rel (%p163_p2) target bundleno = 184 (0xb8), region = 36 }
   0xb   : > { %v468_v0 = vld [vmem:[%s582_s1 + $0x38] sm:$0xff]  ;;  %v467_v2 = vld [vmem:[%s582_s1 + $0x30] sm:$0xff]  ;;  %s587_s16 = smov (!%p188_p3, %s399_s16), 1  ;;  %v466_v4 = vld [vmem:[%s582_s1 + $0x28] sm:$0xff]  ;;  %vm305_vm0 = vcmask 523264   ;;  %vm341_vm1 = vcmask 261120  }
   0xc   : > { %v472_v1 = vld [vmem:[%s582_s1 + $0x58] sm:$0xff]  ;;  %309 = vmatpush.bf16.msra.mxu0 %v468_v0  ;;  %v471_v3 = vld [vmem:[%s582_s1 + $0x50] sm:$0xff]  ;;  %s459_s25 = sshll.u32 %s587_s16, 5  ;;  %v470_v5 = vld [vmem:[%s582_s1 + $0x48] sm:$0xff]  ;;  %s460_s23 = sshll.u32 %s587_s16, 4 }
   0xd   : > { %327 = vmatpush.bf16.msra.mxu1 %v472_v1  ;;  %s192_s6 = scalar_lea.vmem %s581_s0, %s459_s25  ;;  %v465_v6 = vld [vmem:[%s582_s1 + $0x20] sm:$0xff]  ;;  %v464_v10 = vld [vmem:[%s582_s1 + $0x18] sm:$0xff]  ;;  %v463_v12 = vld [vmem:[%s582_s1 + $0x10] sm:$0xff]  ;;  %s197_s28 = scalar_lea.vmem %s585_s4, %s460_s23 }
   0xe   : > { %v469_v7 = vld [vmem:[%s582_s1 + $0x40] sm:$0xff]  ;;  %v200_v8 = vld [vmem:[%s192_s6 + $0x8] sm:$0xff]  ;;  %v202_v9 = vld [vmem:[%s192_s6 + $0x18] sm:$0xff] }
   0xf   : > { %v228_v11 = vpack.c.bf16 %v202_v9, %v200_v8  ;;  %v462_v13 = vld [vmem:[%s582_s1 + $0x8] sm:$0xff]  ;;  %v461_v14 = vld [vmem:[%s582_s1] sm:$0xff]  ;;  %v201_v16 = vld [vmem:[%s192_s6 + $0x10] sm:$0xff] }
  0x10   : > { %310 = vmatpush.bf16.msra.mxu0 %v467_v2  ;;  %v199_v15 = vld [vmem:[%s192_s6] sm:$0xff]  ;;  %v338_v28 = vld [vmem:[%s584_s3 + $0x8] sm:$0xff] }
  0x11   : > { %328 = vmatpush.bf16.msra.mxu1 %v471_v3  ;;  %v227_v17 = vpack.c.bf16 %v201_v16, %v199_v15  ;;  %v481_v18 = vld [vmem:[%s583_s2] ss:$0 sm:$0xff] }
  0x12   : > { %v337_v22 = vld [vmem:[%s584_s3] sm:$0xff] }
  0x14   : > { %311 = vmatpush.bf16.msra.mxu0 %v466_v4 }
  0x15   : > { %329 = vmatpush.bf16.msra.mxu1 %v470_v5 }
  0x18   : > { %312 = vmatpush.bf16.msra.mxu0 %v465_v6 }
  0x19   : > { %330 = vmatpush.bf16.msra.mxu1 %v469_v7 }
  0x1c   : > { %313 = vmatpush.bf16.msra.mxu0 %v464_v10  ;;  %456 = vmatmul.msk.bf16.vlgmr.msra.gmra.mxu1 %vm305_vm0, %v228_v11 }
  0x20   : > { %314 = vmatpush.bf16.msra.mxu0 %v463_v12 }
  0x24   : > { %315 = vmatpush.bf16.msra.mxu0 %v462_v13 }
  0x28   : > { %316 = vmatpush.bf16.msra.mxu0 %v461_v14 }
  0x2b   : > { %317 = vmatmul.bf16.vlgmr.msra.gmra.mxu0 %v227_v17 }
  0x99   : > { %v332_v19 = vpop.f32.mrf.mxu1 }
  0xa1   : > { %v334_v27 = vpop.f32.mrf.mxu1 }
  0xa8   : > { %v318_v20 = vpop.f32.mrf.mxu0 }
  0xa9   : > { %v319_v21 = vadd.f32 %v481_v18, %v318_v20 }
  0xab   : > { %v333_v23 = vadd.f32 %v332_v19, %v319_v21 }
  0xad   : > { %v339_v24 = vadd.f32 %v337_v22, %v333_v23 }
  0xaf   : > { %342 = vst.msk [vmem:[%s197_s28] sm:$0xff] %vm341_vm1, %v339_v24 }
  0xb0   : > { %v320_v25 = vpop.f32.mrf.mxu0 }
  0xb1   : > { %v321_v26 = vadd.f32 %v481_v18, %v320_v25 }
  0xb3   : > { %v335_v29 = vadd.f32 %v334_v27, %v321_v26 }
  0xb5   : > { %v340_v30 = vadd.f32 %v338_v28, %v335_v29 }
  0xb7   : > { %343 = vst.msk [vmem:[%s197_s28 + $0x8] sm:$0xff] %vm341_vm1, %v340_v30 }
  0xb8 PF: > { %s14_s15 = sadd.s32 1, %s488_s15  }
  0xb9   : > { %p11_p4 = scmp.ge.s32.totalorder %s14_s15, 4  }
  0xbb   :  { %13 = sbr.rel (!%p11_p4) target bundleno = 1 (0x1), region = 66 }

// kernel: bk_medsam_forward.13
= control target key start
LH: loop header
LB: loop body
LE: loop exit
PB: predicated region body
PF: predicated region fallthrough
CT: control target
= control target key end

     0   :  { %vm47_vm0 = vcmask 261120   ;;  %v220_v21 = vmov 32.0   ;;  %s319_s1 = inlined_call_operand.vmem [shape: bf16[32,32], index: 1, kind: input, shape index: {}]   ;;  %s320_s0 = inlined_call_operand.vmem [shape: f32[32,32], index: 0, kind: input, shape index: {}]   ;;  %s321_s2 = inlined_call_operand.vmem [shape: f32[1,32], index: 2, kind: input, shape index: {}]   ;;  %s322_s3 = inlined_call_operand.vmem [shape: f32[1,32], index: 3, kind: input, shape index: {}]   ;;  %s323_s4 = inlined_call_operand.vmem [shape: f32[1,32], index: 4, kind: input, shape index: {}]   ;;  %s324_s5 = inlined_call_operand.vmem [shape: f32[32,32], index: 5, kind: output, shape index: {}]  }
   0x1   :  { %v203_v0 = vld [vmem:[%s319_s1 + $0x8] sm:$0xff]  ;;  %v202_v1 = vld [vmem:[%s319_s1] sm:$0xff]  ;;  %v23_v4 = vld [vmem:[%s320_s0 + $0x10] sm:$0xff]  ;;  %210 = vrcp.f32 %v220_v21 }
   0x2   :  { %v21_v2 = vld [vmem:[%s320_s0] sm:$0xff]  ;;  %v22_v3 = vld [vmem:[%s320_s0 + $0x8] sm:$0xff]  ;;  %60 = vmatpush.bf16.msra.mxu0 %v203_v0  ;;  %204 = vmatpush.bf16.msra.mxu1 %v203_v0  ;;  %v24_v5 = vld [vmem:[%s320_s0 + $0x18] sm:$0xff] }
   0x3   :  { %v29_v6 = vpack.c.bf16 %v22_v3, %v21_v2  ;;  %v30_v7 = vpack.c.bf16 %v24_v5, %v23_v4  ;;  %v207_v8 = vld [vmem:[%s321_s2] ss:$0 sm:$0xff] }
   0x6   :  { %61 = vmatpush.bf16.msra.mxu0 %v202_v1  ;;  %205 = vmatpush.bf16.msra.mxu1 %v202_v1 }
   0x7   :  { %v211_v22 = vpop.eup %210 }
   0x8   :  { %v88_v23 = vmul.f32 32.0, %v211_v22  ;;  %vm92_vm1 = vweird.f32 %v211_v22 }
   0x9   :  { %200 = vmatmul.msk.bf16.vlgmr.msra.gmra.mxu0 %vm47_vm0, %v29_v6  ;;  %201 = vmatmul.msk.bf16.vlgmr.msra.gmra.mxu1 %vm47_vm0, %v30_v7 }
   0xa   :  { %v89_v24 = vsub.f32 1.0, %v88_v23 }
   0xc   :  { %v90_v25 = vmul.f32 %v211_v22, %v89_v24 }
   0xe   :  { %v91_v26 = vadd.f32 %v211_v22, %v90_v25 }
  0x10   :  { %v93_v27 = vsel %vm92_vm1, %v211_v22, %v91_v26 }
  0x86   :  { %v63_v9 = vpop.f32.mrf.mxu0  ;;  %v68_v10 = vpop.f32.mrf.mxu1 }
  0x87   :  { %v64_v11 = vadd.f32 %v207_v8, %v63_v9  ;;  %v69_v12 = vadd.f32 %v207_v8, %v68_v10  ;;  %v208_v10 = vld [vmem:[%s322_s3] ss:$0 sm:$0xff] }
  0x89   :  { %v81_v13 = vsel %vm47_vm0, %v69_v12, 0.0  ;;  %v75_v14 = vsel %vm47_vm0, %v64_v11, 0.0 }
  0x8a   :  { %82 = vadd.xlane.f32.xlu1 %v81_v13  ;;  %76 = vadd.xlane.f32.xlu0 %v75_v14 }
  0x8e   :  { %v65_v15 = vpop.f32.mrf.mxu0  ;;  %v70_v16 = vpop.f32.mrf.mxu1 }
  0x8f   :  { %v66_v17 = vadd.f32 %v207_v8, %v65_v15  ;;  %v71_v18 = vadd.f32 %v207_v8, %v70_v16  ;;  %v209_v15 = vld [vmem:[%s323_s4] ss:$0 sm:$0xff] }
  0x91   :  { %v84_v19 = vsel %vm47_vm0, %v71_v18, 0.0  ;;  %v78_v20 = vsel %vm47_vm0, %v66_v17, 0.0 }
  0x92   :  { %85 = vadd.xlane.f32.xlu1 %v84_v19  ;;  %79 = vadd.xlane.f32.xlu0 %v78_v20 }
  0xfd   :  { %v83_v28 = vpop.xlane.xlu1 %82  ;;  %v77_v29 = vpop.xlane.xlu0 %76 }
  0xfe   :  { %v96_v30 = vmul.f32 %v93_v27, %v83_v28  ;;  %v94_v31 = vmul.f32 %v93_v27, %v77_v29 }
 0x100   :  { %v278_v32 = vsub.f32 %v69_v12, %v96_v30  ;;  %v98_v33 = vsub.f32 %v64_v11, %v94_v31 }
 0x102   :  { %v104_v34 = vmul.f32 %v278_v32, %v278_v32  ;;  %v102_v35 = vmul.f32 %v98_v33, %v98_v33 }
 0x104   :  { %v112_v36 = vsel %vm47_vm0, %v104_v34, 0.0  ;;  %v106_v37 = vsel %vm47_vm0, %v102_v35, 0.0 }
 0x105   :  { %v86_v38 = vpop.xlane.xlu1 %85  ;;  %113 = vadd.xlane.f32.xlu0 %v112_v36  ;;  %107 = vadd.xlane.f32.xlu2 %v106_v37  ;;  %v80_v39 = vpop.xlane.xlu0 %79 }
 0x106   :  { %v97_v40 = vmul.f32 %v93_v27, %v86_v38  ;;  %v95_v41 = vmul.f32 %v93_v27, %v80_v39 }
 0x108   :  { %v284_v42 = vsub.f32 %v71_v18, %v97_v40  ;;  %v286_v43 = vsub.f32 %v66_v17, %v95_v41 }
 0x10a   :  { %v105_v44 = vmul.f32 %v284_v42, %v284_v42  ;;  %v103_v45 = vmul.f32 %v286_v43, %v286_v43 }
 0x10c   :  { %v115_v46 = vsel %vm47_vm0, %v105_v44, 0.0  ;;  %v109_v47 = vsel %vm47_vm0, %v103_v45, 0.0 }
 0x10d   :  { %116 = vadd.xlane.f32.xlu1 %v115_v46  ;;  %110 = vadd.xlane.f32.xlu2 %v109_v47 }
 0x178   :  { %v108_v48 = vpop.xlane.xlu2 %107  ;;  %v114_v49 = vpop.xlane.xlu0 %113 }
 0x179   :  { %v118_v50 = vmul.f32 %v108_v48, %v93_v27  ;;  %v120_v51 = vmul.f32 %v114_v49, %v93_v27 }
 0x17b   :  { %v122_v52 = vadd.f32 1e-06, %v118_v50  ;;  %v124_v53 = vadd.f32 1e-06, %v120_v51 }
 0x17d   :  { %212 = vrsqrt.f32 %v122_v52  ;;  %vm132_vm4 = vweird.f32 %v122_v52  ;;  %vm152_vm6 = vweird.f32 %v124_v53 }
 0x17e   :  { %214 = vrsqrt.f32 %v124_v53 }
 0x180   :  { %v117_v54 = vpop.xlane.xlu1 %116  ;;  %v111_v55 = vpop.xlane.xlu2 %110 }
 0x181   :  { %v121_v56 = vmul.f32 %v117_v54, %v93_v27  ;;  %v119_v57 = vmul.f32 %v111_v55, %v93_v27 }
 0x183   :  { %v213_v58 = vpop.eup %212  ;;  %v125_v59 = vadd.f32 1e-06, %v121_v56  ;;  %v123_v60 = vadd.f32 1e-06, %v119_v57 }
 0x184   :  { %v215_v61 = vpop.eup %214  ;;  %v127_v62 = vmul.f32 %v213_v58, %v122_v52  ;;  %vm133_vm2 = vweird.f32 %v213_v58 }
 0x185   :  { %v147_v63 = vmul.f32 %v215_v61, %v124_v53  ;;  %216 = vrsqrt.f32 %v125_v59  ;;  %vm153_vm3 = vweird.f32 %v215_v61  ;;  %vm134_vm5 = vmor %vm132_vm4, %vm133_vm2  ;;  %vm162_vm10 = vweird.f32 %v125_v59 }
 0x186   :  { %v128_v0 = vmul.f32 %v213_v58, %v127_v62  ;;  %218 = vrsqrt.f32 %v123_v60  ;;  %vm154_vm7 = vmor %vm152_vm6, %vm153_vm3  ;;  %vm142_vm12 = vweird.f32 %v123_v60 }
 0x187   :  { %v148_v1 = vmul.f32 %v215_v61, %v147_v63 }
 0x188   :  { %v129_v2 = vmul.f32 0.5, %v128_v0 }
 0x189   :  { %v149_v3 = vmul.f32 0.5, %v148_v1 }
 0x18a   :  { %v130_v4 = vsub.f32 1.5, %v129_v2 }
 0x18b   :  { %v217_v5 = vpop.eup %216  ;;  %v150_v6 = vsub.f32 1.5, %v149_v3 }
 0x18c   :  { %v219_v7 = vpop.eup %218  ;;  %v131_v8 = vmul.f32 %v213_v58, %v130_v4  ;;  %v157_v9 = vmul.f32 %v217_v5, %v125_v59  ;;  %vm163_vm8 = vweird.f32 %v217_v5 }
 0x18d   :  { %v151_v11 = vmul.f32 %v215_v61, %v150_v6  ;;  %v137_v12 = vmul.f32 %v219_v7, %v123_v60  ;;  %vm143_vm9 = vweird.f32 %v219_v7  ;;  %vm164_vm11 = vmor %vm162_vm10, %vm163_vm8 }
 0x18e   :  { %v135_v13 = vsel %vm134_vm5, %v213_v58, %v131_v8  ;;  %v158_v14 = vmul.f32 %v217_v5, %v157_v9  ;;  %vm144_vm13 = vmor %vm142_vm12, %vm143_vm9 }
 0x18f   :  { %v166_v16 = vmul.f32 %v135_v13, %v98_v33  ;;  %v155_v17 = vsel %vm154_vm7, %v215_v61, %v151_v11  ;;  %v138_v18 = vmul.f32 %v219_v7, %v137_v12 }
 0x190   :  { %v168_v19 = vmul.f32 %v155_v17, %v278_v32  ;;  %v159_v20 = vmul.f32 0.5, %v158_v14 }
 0x191   :  { %v173_v21 = vmul.f32 %v208_v10, %v166_v16  ;;  %v139_v22 = vmul.f32 0.5, %v138_v18 }
 0x192   :  { %v175_v23 = vmul.f32 %v208_v10, %v168_v19  ;;  %v160_v24 = vsub.f32 1.5, %v159_v20 }
 0x193   :  { %v180_v25 = vadd.f32 %v209_v15, %v173_v21  ;;  %v140_v26 = vsub.f32 1.5, %v139_v22 }
 0x194   :  { %v182_v27 = vadd.f32 %v209_v15, %v175_v23  ;;  %v161_v28 = vmul.f32 %v217_v5, %v160_v24 }
 0x195   :  { %184 = vst.msk [vmem:[%s324_s5] sm:$0xff] %vm47_vm0, %v180_v25  ;;  %v141_v29 = vmul.f32 %v219_v7, %v140_v26 }
 0x196   :  { %186 = vst.msk [vmem:[%s324_s5 + $0x10] sm:$0xff] %vm47_vm0, %v182_v27  ;;  %v165_v30 = vsel %vm164_vm11, %v217_v5, %v161_v28 }
 0x197   :  { %v169_v31 = vmul.f32 %v165_v30, %v284_v42  ;;  %v145_v32 = vsel %vm144_vm13, %v219_v7, %v141_v29 }
 0x198   :  { %v167_v33 = vmul.f32 %v145_v32, %v286_v43 }
 0x199   :  { %v176_v34 = vmul.f32 %v208_v10, %v169_v31 }
 0x19a   :  { %v174_v35 = vmul.f32 %v208_v10, %v167_v33 }
 0x19b   :  { %v183_v36 = vadd.f32 %v209_v15, %v176_v34 }
 0x19c   :  { %v181_v37 = vadd.f32 %v209_v15, %v174_v35 }
 0x19d   :  { %187 = vst.msk [vmem:[%s324_s5 + $0x18] sm:$0xff] %vm47_vm0, %v183_v36 }
 0x19e   :  { %185 = vst.msk [vmem:[%s324_s5 + $0x8] sm:$0xff] %vm47_vm0, %v181_v37 }

// kernel: bk_medsam_forward.11
= control target key start
LH: loop header
LB: loop body
LE: loop exit
PB: predicated region body
PF: predicated region fallthrough
CT: control target
= control target key end

     0   :  { %s1179_s25 = smov 0   ;;  %s1323_s0 = inlined_call_operand.vmem [shape: f32[2,16,32], index: 0, kind: input, shape index: {}]   ;;  %s1324_s1 = inlined_call_operand.vmem [shape: f32[1,32], index: 1, kind: input, shape index: {}]   ;;  %s1325_s2 = inlined_call_operand.vmem [shape: f32[1,32], index: 2, kind: input, shape index: {}]   ;;  %s1326_s3 = inlined_call_operand.vmem [shape: bf16[32,96], index: 3, kind: input, shape index: {}]   ;;  %s1327_s4 = inlined_call_operand.vmem [shape: f32[1,96], index: 4, kind: input, shape index: {}]   ;;  %s1328_s5 = inlined_call_operand.vmem [shape: bf16[32,32], index: 5, kind: input, shape index: {}]   ;;  %s1329_s6 = inlined_call_operand.vmem [shape: f32[1,32], index: 6, kind: input, shape index: {}]   ;;  %s1330_s7 = inlined_call_operand.vmem [shape: f32[1,32], index: 7, kind: input, shape index: {}]   ;;  %s1331_s8 = inlined_call_operand.vmem [shape: f32[1,32], index: 8, kind: input, shape index: {}]   ;;  %s1332_s9 = inlined_call_operand.vmem [shape: bf16[32,64], index: 9, kind: input, shape index: {}]   ;;  %s1333_s10 = inlined_call_operand.vmem [shape: f32[1,64], index: 10, kind: input, shape index: {}]   ;;  %s1334_s11 = inlined_call_operand.vmem [shape: bf16[64,32], index: 11, kind: input, shape index: {}]   ;;  %s1335_s12 = inlined_call_operand.vmem [shape: f32[1,32], index: 12, kind: input, shape index: {}]   ;;  %s1336_s13 = inlined_call_operand.vmem [shape: f32[2,16,32], index: 13, kind: output, shape index: {}]  }
   0x1 LB: > { %s971_s26 = sadd.s32 4294967295, %s1101_s25   ;;  %p975_p0 = scmp.ge.s32.totalorder %s1101_s25, 1  ;;  %s1101_s25 = sphi %s1179_s25, %s23_s25  }
   0x2   : > { %p387_p1 = scmp.lt.s32.totalorder %s1101_s25, 3 }
   0x4   : > { %p388_p2 = pnand %p975_p0, %p387_p1 }
   0x5   : > { %p431_p3 = scmp.lt.s32.totalorder (!%p388_p2), %s971_s26, 1  ;;  %s1104_s24 = smov (!%p388_p2), 112  }
   0x6   : > { %391 = sbr.rel (%p388_p2) target bundleno = 1808 (0x710), region = 72  ;;  %s1105_s28 = smov (!%p388_p2), 96  }
   0x7   : > { %s1106_s29 = smov (!%p388_p2), 80   ;;  %s1108_s14 = smov (!%p388_p2), 48  }
   0xb   : > { %s1338_s26 = smov (!%p431_p3, %s971_s26), 1  ;;  %vm446_vm0 = vcmask 261120   ;;  %v1103_v4 = vmov 32.0   ;;  %v1034_v21 = vld [vmem:[%s1326_s3 + $0x8] sm:$0xff]  ;;  %v1033_v23 = vld [vmem:[%s1326_s3] sm:$0xff]  ;;  %vm554_vm8 = vcmask 130048  }
   0xc   : > { %s1031_s27 = sshll.u32 %s1338_s26, 4  ;;  %1065 = vrcp.f32 %v1103_v4  ;;  %538 = vmatpush.bf16.msra.mxu0 %v1034_v21  ;;  %v1057_v42 = vld [vmem:[%s1324_s1] ss:$0 sm:$0xff]  ;;  %vm894_vm15 = vcmask 523264  }
   0xd   : > { %s435_s30 = scalar_lea.vmem %s1323_s0, %s1031_s27  ;;  %v1058_v47 = vld [vmem:[%s1325_s2] ss:$0 sm:$0xff]  ;;  %s440_s15 = scalar_lea.vmem %s1336_s13, %s1031_s27 }
   0xe   : > { %v1195_v0 = vld [vmem:[%s435_s30] sm:$0xff]  ;;  %v1199_v2 = vld [vmem:[%s435_s30 + $0x8] sm:$0xff]  ;;  %s1107_s30 = smov 64  }
   0xf   : > { %v447_v1 = vsel %vm446_vm0, %v1195_v0, 0.0  ;;  %v450_v3 = vsel %vm446_vm0, %v1199_v2, 0.0  ;;  %v1059_v53 = vld [vmem:[%s1327_s4] ss:$0 sm:$0xff] }
  0x10   : > { %448 = vadd.xlane.f32.xlu0 %v447_v1  ;;  %539 = vmatpush.bf16.msra.mxu0 %v1033_v23 }
  0x12   : > { %v1066_v5 = vpop.eup %1065 }
  0x13   : > { %v454_v6 = vmul.f32 32.0, %v1066_v5  ;;  %vm458_vm1 = vweird.f32 %v1066_v5 }
  0x15   : > { %v455_v7 = vsub.f32 1.0, %v454_v6 }
  0x17   : > { %v456_v8 = vmul.f32 %v1066_v5, %v455_v7 }
  0x18   : > { %451 = vadd.xlane.f32.xlu0 %v450_v3 }
  0x19   : > { %v457_v9 = vadd.f32 %v1066_v5, %v456_v8 }
  0x1b   : > { %v1203_v10 = vsel %vm458_vm1, %v1066_v5, %v457_v9 }
  0x83   : > { %v449_v11 = vpop.xlane.xlu0 %448 }
  0x84   : > { %v460_v12 = vmul.f32 %v1203_v10, %v449_v11 }
  0x86   : > { %v462_v13 = vsub.f32 %v1195_v0, %v460_v12 }
  0x88   : > { %v464_v14 = vmul.f32 %v462_v13, %v462_v13 }
  0x8a   : > { %v466_v15 = vsel %vm446_vm0, %v464_v14, 0.0 }
  0x8b   : > { %467 = vadd.xlane.f32.xlu1 %v466_v15  ;;  %v452_v16 = vpop.xlane.xlu0 %451 }
  0x8c   : > { %v461_v17 = vmul.f32 %v1203_v10, %v452_v16 }
  0x8e   : > { %v463_v18 = vsub.f32 %v1199_v2, %v461_v17 }
  0x90   : > { %v465_v19 = vmul.f32 %v463_v18, %v463_v18 }
  0x92   : > { %v469_v20 = vsel %vm446_vm0, %v465_v19, 0.0 }
  0x93   : > { %470 = vadd.xlane.f32.xlu1 %v469_v20 }
  0xfe   : > { %v468_v22 = vpop.xlane.xlu1 %467 }
  0xff   : > { %v472_v24 = vmul.f32 %v468_v22, %v1203_v10 }
 0x101   : > { %v474_v25 = vadd.f32 1e-06, %v472_v24 }
 0x103   : > { %1067 = vrsqrt.f32 %v474_v25  ;;  %vm482_vm3 = vweird.f32 %v474_v25 }
 0x106   : > { %v471_v26 = vpop.xlane.xlu1 %470 }
 0x107   : > { %v473_v27 = vmul.f32 %v471_v26, %v1203_v10 }
 0x109   : > { %v1068_v28 = vpop.eup %1067  ;;  %v475_v29 = vadd.f32 1e-06, %v473_v27 }
 0x10a   : > { %v477_v30 = vmul.f32 %v1068_v28, %v474_v25  ;;  %vm483_vm2 = vweird.f32 %v1068_v28 }
 0x10b   : > { %1069 = vrsqrt.f32 %v475_v29  ;;  %vm484_vm4 = vmor %vm482_vm3, %vm483_vm2  ;;  %vm492_vm6 = vweird.f32 %v475_v29 }
 0x10c   : > { %v478_v31 = vmul.f32 %v1068_v28, %v477_v30 }
 0x10e   : > { %v479_v32 = vmul.f32 0.5, %v478_v31 }
 0x110   : > { %v480_v33 = vsub.f32 1.5, %v479_v32 }
 0x111   : > { %v1070_v34 = vpop.eup %1069 }
 0x112   : > { %v481_v35 = vmul.f32 %v1068_v28, %v480_v33  ;;  %v487_v36 = vmul.f32 %v1070_v34, %v475_v29  ;;  %vm493_vm5 = vweird.f32 %v1070_v34 }
 0x113   : > { %vm494_vm7 = vmor %vm492_vm6, %vm493_vm5 }
 0x114   : > { %v488_v37 = vmul.f32 %v1070_v34, %v487_v36  ;;  %v485_v38 = vsel %vm484_vm4, %v1068_v28, %v481_v35 }
 0x115   : > { %v496_v41 = vmul.f32 %v485_v38, %v462_v13 }
 0x116   : > { %v489_v39 = vmul.f32 0.5, %v488_v37 }
 0x117   : > { %v501_v46 = vmul.f32 %v1057_v42, %v496_v41 }
 0x118   : > { %v490_v40 = vsub.f32 1.5, %v489_v39 }
 0x119   : > { %v506_v49 = vadd.f32 %v1058_v47, %v501_v46 }
 0x11a   : > { %v491_v43 = vmul.f32 %v1070_v34, %v490_v40 }
 0x11c   : > { %v495_v44 = vsel %vm494_vm7, %v1070_v34, %v491_v43 }
 0x11d   : > { %v497_v45 = vmul.f32 %v495_v44, %v463_v18 }
 0x11f   : > { %v502_v48 = vmul.f32 %v1057_v42, %v497_v45 }
 0x121   : > { %v507_v50 = vadd.f32 %v1058_v47, %v502_v48 }
 0x123   : > { %v512_v51 = vpack.c.bf16 %v507_v50, %v506_v49  ;;  %v1035_v50 = vld [vmem:[%s1328_s5] sm:$0xff] }
 0x125   : > { %988 = vmatmul.msk.bf16.vlgmr.msra.gmra.mxu0 %vm446_vm0, %v512_v51  ;;  %v1036_v51 = vld [vmem:[%s1328_s5 + $0x8] sm:$0xff] }
 0x126   : > { %707 = vmatpush.bf16.msrb.mxu0 %v1036_v51  ;;  %v1063_v51 = vld [vmem:[%s1333_s10] ss:$0 sm:$0xff] }
 0x1a2   : > { %v541_v52 = vpop.f32.mrf.mxu0 }
 0x1a3   : > { %v542_v55 = vadd.f32 %v1059_v53, %v541_v52 }
 0x1aa   : > { %v543_v54 = vpop.f32.mrf.mxu0 }
 0x1ab   : > { %v544_v56 = vadd.f32 %v1059_v53, %v543_v54 }
 0x1ad   : > { %v1229_v57 = vpack.c.bf16 %v544_v56, %v542_v55 }
 0x1af   : > { %621 = vrot.lane.b32.xlu0 %v1229_v57, %s1104_s24  ;;  %552 = vrot.lane.b32.xlu2 %v1229_v57, %s1105_s28 }
 0x1b7   : > { %623 = vrot.lane.b32.xlu2 %v1229_v57, %s1106_s29 }
 0x209   : > { %v553_v58 = vpop.permute.xlu2 %552 }
 0x20a   : > { %v559_v59 = vsel %vm554_vm8, %v553_v58, 0 }
 0x20b   : > { %568 = vmatpush.bf16.xpose.msra.mxu1 %v559_v59 }
 0x211   : > { %v624_v60 = vpop.permute.xlu2 %623 }
 0x212   : > { %989 = vmatmul.msk.bf16.vlgmr.msra.gmra.mxu1 %vm554_vm8, %v1229_v57  ;;  %v629_v61 = vsel %vm554_vm8, %v624_v60, 0 }
 0x213   : > { %638 = vmatpush.bf16.xpose.msra.mxu3 %v629_v61  ;;  %730 = vmatpush.bf16.msrb.mxu1 %v1035_v50  ;;  %v1060_v61 = vld [vmem:[%s1329_s6] ss:$0 sm:$0xff]  ;;  %v1040_v50 = vld [vmem:[%s1334_s11 + $0x8] sm:$0xff] }
 0x221   : > { %v622_v62 = vpop.permute.xlu0 %621 }
 0x222   : > { %991 = vmatmul.msk.bf16.vlgmr.msra.gmra.mxu3 %vm554_vm8, %v622_v62 }
 0x28f   : > { %v570_v63 = vpop.f32.mrf.mxu1 }
 0x290   : > { %v575_v1 = vmul.f32 0.25, %v570_v63 }
 0x292   : > { %v577_v3 = vsel %vm554_vm8, %v575_v1, -inf }
 0x293   : > { %578 = vmax.xlane.f32.xlu1 %v577_v3 }
 0x297   : > { %v572_v4 = vpop.f32.mrf.mxu1 }
 0x298   : > { %v576_v5 = vmul.f32 0.25, %v572_v4 }
 0x29a   : > { %v580_v6 = vsel %vm554_vm8, %v576_v5, -inf }
 0x29b   : > { %581 = vmax.xlane.f32.xlu2 %v580_v6 }
 0x2a5   : > { %v640_v7 = vpop.f32.mrf.mxu3 }
 0x2a6   : > { %v645_v8 = vmul.f32 0.25, %v640_v7 }
 0x2a8   : > { %v647_v9 = vsel %vm554_vm8, %v645_v8, -inf }
 0x2a9   : > { %648 = vmax.xlane.f32.xlu1 %v647_v9 }
 0x2ad   : > { %v642_v11 = vpop.f32.mrf.mxu3 }
 0x2ae   : > { %v646_v12 = vmul.f32 0.25, %v642_v11 }
 0x2b0   : > { %v650_v13 = vsel %vm554_vm8, %v646_v12, -inf }
 0x2b1   : > { %651 = vmax.xlane.f32.xlu1 %v650_v13 }
 0x2ca   : > { %600 = vrot.lane.b32.xlu1 %v1229_v57, %s1107_s30 }
 0x306   : > { %v579_v14 = vpop.xlane.xlu1 %578 }
 0x307   : > { %v583_v15 = vsub.f32 %v575_v1, %v579_v14 }
 0x309   : > { %v585_v16 = vmul.f32 1.442695, %v583_v15 }
 0x30b   : > { %1071 = vpow2.f32 %v585_v16 }
 0x30e   : > { %v582_v17 = vpop.xlane.xlu2 %581 }
 0x30f   : > { %v584_v18 = vsub.f32 %v576_v5, %v582_v17 }
 0x311   : > { %v1072_v19 = vpop.eup %1071  ;;  %v587_v20 = vmul.f32 1.442695, %v584_v18  ;;  %v1038_v18 = vld [vmem:[%s1332_s9 + $0x8] sm:$0xff] }
 0x312   : > { %v589_v21 = vsel %vm554_vm8, %v1072_v19, 0.0  ;;  %831 = vmatpush.bf16.msrb.mxu3 %v1038_v18 }
 0x313   : > { %1073 = vpow2.f32 %v587_v20  ;;  %590 = vadd.xlane.f32.xlu0 %v589_v21  ;;  %v1037_v20 = vld [vmem:[%s1332_s9] sm:$0xff] }
 0x316   : > { %832 = vmatpush.bf16.msrb.mxu3 %v1037_v20 }
 0x319   : > { %v1074_v22 = vpop.eup %1073 }
 0x31a   : > { %v592_v23 = vsel %vm554_vm8, %v1074_v22, 0.0 }
 0x31b   : > { %593 = vadd.xlane.f32.xlu1 %v592_v23 }
 0x31c   : > { %v649_v24 = vpop.xlane.xlu1 %648 }
 0x31d   : > { %v653_v25 = vsub.f32 %v645_v8, %v649_v24 }
 0x31f   : > { %v655_v26 = vmul.f32 1.442695, %v653_v25 }
 0x321   : > { %1075 = vpow2.f32 %v655_v26 }
 0x324   : > { %v652_v27 = vpop.xlane.xlu1 %651 }
 0x325   : > { %v654_v28 = vsub.f32 %v646_v12, %v652_v27 }
 0x327   : > { %v1076_v29 = vpop.eup %1075  ;;  %v657_v30 = vmul.f32 1.442695, %v654_v28 }
 0x328   : > { %v659_v31 = vsel %vm554_vm8, %v1076_v29, 0.0 }
 0x329   : > { %1077 = vpow2.f32 %v657_v30  ;;  %660 = vadd.xlane.f32.xlu2 %v659_v31 }
 0x32f   : > { %v1078_v32 = vpop.eup %1077 }
 0x330   : > { %v662_v33 = vsel %vm554_vm8, %v1078_v32, 0.0 }
 0x331   : > { %663 = vadd.xlane.f32.xlu2 %v662_v33 }
 0x334   : > { %670 = vrot.lane.b32.xlu1 %v1229_v57, %s1108_s14 }
 0x33c   : > { %v601_v34 = vpop.permute.xlu1 %600 }
 0x33d   : > { %613 = vmatpush.bf16.msra.mxu2 %v601_v34 }
 0x386   : > { %v591_v35 = vpop.xlane.xlu0 %590 }
 0x387   : > { %1079 = vrcp.f32 %v591_v35 }
 0x38d   : > { %v1080_v37 = vpop.eup %1079 }
 0x38e   : > { %v594_v36 = vpop.xlane.xlu1 %593  ;;  %v597_v39 = vmul.f32 %v1080_v37, %v1072_v19 }
 0x38f   : > { %1081 = vrcp.f32 %v594_v36 }
 0x395   : > { %v1082_v38 = vpop.eup %1081 }
 0x396   : > { %v598_v40 = vmul.f32 %v1082_v38, %v1074_v22 }
 0x398   : > { %v599_v41 = vpack.c.bf16 %v598_v40, %v597_v39 }
 0x39a   : > { %990 = vmatmul.msk.bf16.vlgmr.msra.gmra.mxu2 %vm554_vm8, %v599_v41 }
 0x39c   : > { %v661_v42 = vpop.xlane.xlu2 %660 }
 0x39d   : > { %1083 = vrcp.f32 %v661_v42 }
 0x3a3   : > { %v1084_v45 = vpop.eup %1083 }
 0x3a4   : > { %v664_v43 = vpop.xlane.xlu2 %663  ;;  %v667_v47 = vmul.f32 %v1084_v45, %v1076_v29 }
 0x3a5   : > { %1085 = vrcp.f32 %v664_v43  ;;  %v1062_v43 = vld [vmem:[%s1331_s8] ss:$0 sm:$0xff] }
 0x3a6   : > { %v671_v44 = vpop.permute.xlu1 %670 }
 0x3a7   : > { %683 = vmatpush.bf16.msrb.mxu2 %v671_v44 }
 0x3ab   : > { %v1086_v46 = vpop.eup %1085 }
 0x3ac   : > { %v668_v48 = vmul.f32 %v1086_v46, %v1078_v32 }
 0x3ae   : > { %v669_v49 = vpack.c.bf16 %v668_v48, %v667_v47  ;;  %v1042_v48 = vld [vmem:[%s1334_s11 + $0x18] sm:$0xff] }
 0x3af   : > { %902 = vmatpush.bf16.msra.mxu2 %v1042_v48 }
 0x3b0   : > { %992 = vmatmul.msk.bf16.vlgmr.msrb.gmra.mxu2 %vm554_vm8, %v669_v49  ;;  %v1041_v49 = vld [vmem:[%s1334_s11 + $0x10] sm:$0xff] }
 0x3b3   : > { %903 = vmatpush.bf16.msra.mxu2 %v1041_v49 }
 0x3b7   : > { %904 = vmatpush.bf16.msra.mxu2 %v1040_v50 }
 0x41d   : > { %v615_v52 = vpop.f32.mrf.mxu2 }
 0x425   : > { %v617_v53 = vpop.f32.mrf.mxu2 }
 0x426   : > { %v620_v54 = vpack.c.bf16 %v617_v53, %v615_v52  ;;  %v1039_v52 = vld [vmem:[%s1334_s11] sm:$0xff] }
 0x427   : > { %905 = vmatpush.bf16.msra.mxu2 %v1039_v52 }
 0x428   : > { %1002 = vmatmul.msk.bf16.vlgmr.msrb.gmra.mxu1 %vm554_vm8, %v620_v54 }
 0x433   : > { %v685_v55 = vpop.f32.mrf.mxu2 }
 0x43b   : > { %v687_v56 = vpop.f32.mrf.mxu2 }
 0x43c   : > { %v690_v57 = vpack.c.bf16 %v687_v56, %v685_v55 }
 0x43e   : > { %997 = vmatmul.msk.bf16.vlgmr.msrb.gmra.mxu0 %vm554_vm8, %v690_v57 }
 0x4a5   : > { %v732_v58 = vpop.f32.mrf.mxu1 }
 0x4ad   : > { %v734_v3 = vpop.f32.mrf.mxu1 }
 0x4bb   : > { %v709_v59 = vpop.f32.mrf.mxu0 }
 0x4bc   : > { %v733_v60 = vadd.f32 %v732_v58, %v709_v59 }
 0x4be   : > { %v737_v62 = vadd.f32 %v733_v60, %v1195_v0 }
 0x4c0   : > { %v1263_v63 = vadd.f32 %v1060_v61, %v737_v62 }
 0x4c2   : > { %v747_v1 = vsel %vm446_vm0, %v1263_v63, 0.0 }
 0x4c3   : > { %748 = vadd.xlane.f32.xlu2 %v747_v1  ;;  %v711_v4 = vpop.f32.mrf.mxu0 }
 0x4c4   : > { %v735_v5 = vadd.f32 %v734_v3, %v711_v4 }
 0x4c6   : > { %v738_v6 = vadd.f32 %v735_v5, %v1199_v2 }
 0x4c8   : > { %v1268_v7 = vadd.f32 %v1060_v61, %v738_v6 }
 0x4ca   : > { %v750_v8 = vsel %vm446_vm0, %v1268_v7, 0.0 }
 0x4cb   : > { %751 = vadd.xlane.f32.xlu0 %v750_v8 }
 0x536   : > { %v749_v9 = vpop.xlane.xlu2 %748 }
 0x537   : > { %v753_v0 = vmul.f32 %v749_v9, %v1203_v10 }
 0x539   : > { %v755_v11 = vsub.f32 %v1263_v63, %v753_v0 }
 0x53b   : > { %v757_v12 = vmul.f32 %v755_v11, %v755_v11 }
 0x53d   : > { %v759_v13 = vsel %vm446_vm0, %v757_v12, 0.0 }
 0x53e   : > { %760 = vadd.xlane.f32.xlu1 %v759_v13  ;;  %v752_v14 = vpop.xlane.xlu0 %751 }
 0x53f   : > { %v754_v15 = vmul.f32 %v752_v14, %v1203_v10 }
 0x541   : > { %v756_v2 = vsub.f32 %v1268_v7, %v754_v15 }
 0x543   : > { %v758_v16 = vmul.f32 %v756_v2, %v756_v2 }
 0x545   : > { %v762_v17 = vsel %vm446_vm0, %v758_v16, 0.0 }
 0x546   : > { %763 = vadd.xlane.f32.xlu2 %v762_v17 }
 0x5b1   : > { %v761_v19 = vpop.xlane.xlu1 %760 }
 0x5b2   : > { %v765_v21 = vmul.f32 %v761_v19, %v1203_v10 }
 0x5b4   : > { %v767_v22 = vadd.f32 1e-06, %v765_v21 }
 0x5b6   : > { %1087 = vrsqrt.f32 %v767_v22  ;;  %vm775_vm10 = vweird.f32 %v767_v22 }
 0x5b9   : > { %v764_v23 = vpop.xlane.xlu2 %763 }
 0x5ba   : > { %v766_v24 = vmul.f32 %v764_v23, %v1203_v10  ;;  %v1061_v10 = vld [vmem:[%s1330_s7] ss:$0 sm:$0xff] }
 0x5bc   : > { %v1088_v25 = vpop.eup %1087  ;;  %v768_v26 = vadd.f32 1e-06, %v766_v24 }
 0x5bd   : > { %v770_v27 = vmul.f32 %v1088_v25, %v767_v22  ;;  %vm776_vm9 = vweird.f32 %v1088_v25 }
 0x5be   : > { %1089 = vrsqrt.f32 %v768_v26  ;;  %vm777_vm11 = vmor %vm775_vm10, %vm776_vm9  ;;  %vm785_vm13 = vweird.f32 %v768_v26 }
 0x5bf   : > { %v771_v28 = vmul.f32 %v1088_v25, %v770_v27 }
 0x5c1   : > { %v772_v29 = vmul.f32 0.5, %v771_v28 }
 0x5c3   : > { %v773_v30 = vsub.f32 1.5, %v772_v29 }
 0x5c4   : > { %v1090_v31 = vpop.eup %1089 }
 0x5c5   : > { %v774_v32 = vmul.f32 %v1088_v25, %v773_v30  ;;  %v780_v33 = vmul.f32 %v1090_v31, %v768_v26  ;;  %vm786_vm12 = vweird.f32 %v1090_v31 }
 0x5c6   : > { %vm787_vm14 = vmor %vm785_vm13, %vm786_vm12 }
 0x5c7   : > { %v781_v34 = vmul.f32 %v1090_v31, %v780_v33  ;;  %v778_v35 = vsel %vm777_vm11, %v1088_v25, %v774_v32 }
 0x5c8   : > { %v789_v38 = vmul.f32 %v778_v35, %v755_v11 }
 0x5c9   : > { %v782_v36 = vmul.f32 0.5, %v781_v34 }
 0x5ca   : > { %v794_v42 = vmul.f32 %v1061_v10, %v789_v38 }
 0x5cb   : > { %v783_v37 = vsub.f32 1.5, %v782_v36 }
 0x5cc   : > { %v799_v45 = vadd.f32 %v1062_v43, %v794_v42 }
 0x5cd   : > { %v784_v39 = vmul.f32 %v1090_v31, %v783_v37 }
 0x5cf   : > { %v788_v40 = vsel %vm787_vm14, %v1090_v31, %v784_v39 }
 0x5d0   : > { %v790_v41 = vmul.f32 %v788_v40, %v756_v2  ;;  %v1064_v2 = vld [vmem:[%s1335_s12] ss:$0 sm:$0xff] }
 0x5d2   : > { %v795_v44 = vmul.f32 %v1061_v10, %v790_v41 }
 0x5d4   : > { %v800_v46 = vadd.f32 %v1062_v43, %v795_v44 }
 0x5d6   : > { %v805_v47 = vpack.c.bf16 %v800_v46, %v799_v45 }
 0x5d8   : > { %1011 = vmatmul.msk.bf16.vlgmr.msrb.gmra.mxu3 %vm446_vm0, %v805_v47 }
 0x65b   : > { %v834_v53 = vpop.f32.mrf.mxu3 }
 0x65c   : > { %v835_v54 = vadd.f32 %v1063_v51, %v834_v53 }
 0x65e   : > { %v839_v55 = vmul.f32 %v835_v54, %v835_v54 }
 0x660   : > { %v841_v56 = vmul.f32 %v839_v55, %v835_v54 }
 0x662   : > { %v843_v57 = vmul.f32 0.044715, %v841_v56 }
 0x663   : > { %v836_v58 = vpop.f32.mrf.mxu3 }
 0x664   : > { %v845_v59 = vadd.f32 %v843_v57, %v835_v54  ;;  %v837_v60 = vadd.f32 %v1063_v51, %v836_v58 }
 0x666   : > { %v847_v61 = vmul.f32 0.7978846, %v845_v59  ;;  %v840_v62 = vmul.f32 %v837_v60, %v837_v60 }
 0x668   : > { %v842_v1 = vmul.f32 %v840_v62, %v837_v60  ;;  %1091 = vtanh.f32 %v847_v61 }
 0x66a   : > { %v844_v3 = vmul.f32 0.044715, %v842_v1 }
 0x66c   : > { %v846_v4 = vadd.f32 %v844_v3, %v837_v60 }
 0x66e   : > { %v848_v5 = vmul.f32 0.7978846, %v846_v4  ;;  %v1092_v6 = vpop.eup %1091 }
 0x66f   : > { %v851_v8 = vadd.f32 1.0, %v1092_v6 }
 0x670   : > { %1093 = vtanh.f32 %v848_v5 }
 0x671   : > { %v853_v0 = vmul.f32 0.5, %v851_v8 }
 0x673   : > { %v855_v13 = vmul.f32 %v853_v0, %v835_v54 }
 0x676   : > { %v1094_v9 = vpop.eup %1093 }
 0x677   : > { %v852_v11 = vadd.f32 1.0, %v1094_v9 }
 0x679   : > { %v854_v12 = vmul.f32 0.5, %v852_v11 }
 0x67b   : > { %v856_v14 = vmul.f32 %v854_v12, %v837_v60 }
 0x67d   : > { %v865_v15 = vpack.c.bf16 %v856_v14, %v855_v13 }
 0x67f   : > { %1028 = vmatmul.msk.bf16.vlgmr.msra.gmra.mxu2 %vm894_vm15, %v865_v15 }
 0x702   : > { %v907_v16 = vpop.f32.mrf.mxu2 }
 0x703   : > { %v908_v17 = vadd.f32 %v1064_v2, %v907_v16 }
 0x705   : > { %v912_v18 = vadd.f32 %v908_v17, %v1263_v63 }
 0x707   : > { %914 = vst.msk [vmem:[%s440_s15] sm:$0xff] %vm446_vm0, %v912_v18 }
 0x70a   : > { %v909_v19 = vpop.f32.mrf.mxu2 }
 0x70b   : > { %v910_v20 = vadd.f32 %v1064_v2, %v909_v19 }
 0x70d   : > { %v913_v21 = vadd.f32 %v910_v20, %v1268_v7 }
 0x70f   : > { %915 = vst.msk [vmem:[%s440_s15 + $0x8] sm:$0xff] %vm446_vm0, %v913_v21 }
 0x710 PF: > { %s23_s25 = sadd.s32 1, %s1101_s25  }
 0x711   : > { %p20_p4 = scmp.ge.s32.totalorder %s23_s25, 4  }
 0x713   :  { %22 = sbr.rel (!%p20_p4) target bundleno = 1 (0x1), region = 102 }

// kernel: bk_medsam_forward.14
= control target key start
LH: loop header
LB: loop body
LE: loop exit
PB: predicated region body
PF: predicated region fallthrough
CT: control target
= control target key end

     0   :  { %vm187_vm0 = vcmask 261120   ;;  %s655_s1 = inlined_call_operand.vmem [shape: bf16[288,32], index: 1, kind: input, shape index: {}]   ;;  %s656_s0 = inlined_call_operand.vmem [shape: f32[32,288], index: 0, kind: input, shape index: {}]   ;;  %s657_s2 = inlined_call_operand.vmem [shape: f32[1,32], index: 2, kind: input, shape index: {}]   ;;  %s658_s3 = inlined_call_operand.vmem [shape: f32[1,32], index: 3, kind: input, shape index: {}]   ;;  %s659_s4 = inlined_call_operand.vmem [shape: f32[1,32], index: 4, kind: input, shape index: {}]   ;;  %s660_s5 = inlined_call_operand.vmem [shape: f32[32,32], index: 5, kind: output, shape index: {}]  }
   0x1   :  { %v451_v0 = vld [vmem:[%s655_s1 + $0x38] sm:$0xff]  ;;  %v450_v2 = vld [vmem:[%s655_s1 + $0x30] sm:$0xff]  ;;  %v461_v3 = vld [vmem:[%s655_s1 + $0x88] sm:$0xff] }
   0x2   :  { %v459_v1 = vld [vmem:[%s655_s1 + $0x78] sm:$0xff]  ;;  %194 = vmatpush.bf16.msra.mxu0 %v451_v0  ;;  %462 = vmatpush.bf16.msra.mxu3 %v451_v0  ;;  %v458_v4 = vld [vmem:[%s655_s1 + $0x70] sm:$0xff]  ;;  %v460_v5 = vld [vmem:[%s655_s1 + $0x80] sm:$0xff] }
   0x3   :  { %213 = vmatpush.bf16.msra.mxu1 %v459_v1  ;;  %238 = vmatpush.bf16.msra.mxu2 %v461_v3  ;;  %v23_v6 = vld [vmem:[%s656_s0 + $0x10] sm:$0xff]  ;;  %v26_v7 = vld [vmem:[%s656_s0 + $0x28] sm:$0xff]  ;;  %v448_v11 = vld [vmem:[%s655_s1 + $0x20] sm:$0xff]  ;;  %v484_v1 = vmov 32.0  }
   0x4   :  { %v449_v8 = vld [vmem:[%s655_s1 + $0x28] sm:$0xff]  ;;  %v71_v10 = vpack.c.bf16 %v26_v7, %v23_v6  ;;  %v456_v12 = vld [vmem:[%s655_s1 + $0x60] sm:$0xff]  ;;  %v447_v13 = vld [vmem:[%s655_s1 + $0x18] sm:$0xff]  ;;  %474 = vrcp.f32 %v484_v1 }
   0x5   :  { %v457_v9 = vld [vmem:[%s655_s1 + $0x68] sm:$0xff]  ;;  %v455_v14 = vld [vmem:[%s655_s1 + $0x58] sm:$0xff]  ;;  %v446_v15 = vld [vmem:[%s655_s1 + $0x10] sm:$0xff] }
   0x6   :  { %195 = vmatpush.bf16.msra.mxu0 %v450_v2  ;;  %463 = vmatpush.bf16.msra.mxu3 %v450_v2  ;;  %v454_v16 = vld [vmem:[%s655_s1 + $0x50] sm:$0xff]  ;;  %v29_v17 = vld [vmem:[%s656_s0 + $0x40] sm:$0xff]  ;;  %v32_v18 = vld [vmem:[%s656_s0 + $0x58] sm:$0xff] }
   0x7   :  { %214 = vmatpush.bf16.msra.mxu1 %v458_v4  ;;  %239 = vmatpush.bf16.msra.mxu2 %v460_v5  ;;  %v445_v19 = vld [vmem:[%s655_s1 + $0x8] sm:$0xff]  ;;  %v74_v21 = vpack.c.bf16 %v32_v18, %v29_v17  ;;  %v444_v22 = vld [vmem:[%s655_s1] sm:$0xff]  ;;  %v24_v24 = vld [vmem:[%s656_s0 + $0x18] sm:$0xff] }
   0x8   :  { %v453_v20 = vld [vmem:[%s655_s1 + $0x48] sm:$0xff]  ;;  %v21_v23 = vld [vmem:[%s656_s0] sm:$0xff]  ;;  %v27_v25 = vld [vmem:[%s656_s0 + $0x30] sm:$0xff] }
   0x9   :  { %v30_v26 = vld [vmem:[%s656_s0 + $0x48] sm:$0xff]  ;;  %v452_v27 = vld [vmem:[%s655_s1 + $0x40] sm:$0xff]  ;;  %v69_v30 = vpack.c.bf16 %v24_v24, %v21_v23  ;;  %v28_v33 = vld [vmem:[%s656_s0 + $0x38] sm:$0xff] }
   0xa   :  { %196 = vmatpush.bf16.msra.mxu0 %v449_v8  ;;  %464 = vmatpush.bf16.msra.mxu3 %v449_v8  ;;  %v22_v28 = vld [vmem:[%s656_s0 + $0x8] sm:$0xff]  ;;  %v25_v29 = vld [vmem:[%s656_s0 + $0x20] sm:$0xff]  ;;  %v72_v31 = vpack.c.bf16 %v30_v26, %v27_v25  ;;  %v31_v34 = vld [vmem:[%s656_s0 + $0x50] sm:$0xff]  ;;  %v475_v2 = vpop.eup %474 }
   0xb   :  { %215 = vmatpush.bf16.msra.mxu1 %v457_v9  ;;  %442 = vmatmul.msk.bf16.vlgmr.msra.gmra.mxu2 %vm187_vm0, %v71_v10  ;;  %v70_v32 = vpack.c.bf16 %v25_v29, %v22_v28  ;;  %v73_v35 = vpack.c.bf16 %v31_v34, %v28_v33  ;;  %v471_v37 = vld [vmem:[%s657_s2] ss:$0 sm:$0xff]  ;;  %v266_v3 = vmul.f32 32.0, %v475_v2  ;;  %vm270_vm1 = vweird.f32 %v475_v2 }
   0xd   :  { %v267_v4 = vsub.f32 1.0, %v266_v3 }
   0xe   :  { %197 = vmatpush.bf16.msra.mxu0 %v448_v11  ;;  %465 = vmatpush.bf16.msra.mxu3 %v448_v11 }
   0xf   :  { %216 = vmatpush.bf16.msra.mxu1 %v456_v12  ;;  %v268_v5 = vmul.f32 %v475_v2, %v267_v4 }
  0x11   :  { %v269_v6 = vadd.f32 %v475_v2, %v268_v5 }
  0x12   :  { %198 = vmatpush.bf16.msra.mxu0 %v447_v13  ;;  %466 = vmatpush.bf16.msra.mxu3 %v447_v13 }
  0x13   :  { %217 = vmatpush.bf16.msra.mxu1 %v455_v14  ;;  %v271_v7 = vsel %vm270_vm1, %v475_v2, %v269_v6 }
  0x16   :  { %199 = vmatpush.bf16.msra.mxu0 %v446_v15  ;;  %467 = vmatpush.bf16.msra.mxu3 %v446_v15 }
  0x17   :  { %218 = vmatpush.bf16.msra.mxu1 %v454_v16 }
  0x1a   :  { %200 = vmatpush.bf16.msra.mxu0 %v445_v19  ;;  %468 = vmatpush.bf16.msra.mxu3 %v445_v19 }
  0x1b   :  { %219 = vmatpush.bf16.msra.mxu1 %v453_v20  ;;  %443 = vmatmul.msk.bf16.gmra.mxu2 %vm187_vm0, %v74_v21 }
  0x1e   :  { %201 = vmatpush.bf16.msra.mxu0 %v444_v22  ;;  %469 = vmatpush.bf16.msra.mxu3 %v444_v22 }
  0x1f   :  { %220 = vmatpush.bf16.msra.mxu1 %v452_v27 }
  0x21   :  { %202 = vmatmul.bf16.vlgmr.msra.gmra.mxu0 %v69_v30  ;;  %207 = vmatmul.bf16.vlgmr.msra.gmra.mxu3 %v72_v31 }
  0x22   :  { %221 = vmatmul.bf16.vlgmr.msra.gmra.mxu1 %v70_v32 }
  0x32   :  { %226 = vmatmul.bf16.gmra.mxu1 %v73_v35 }
  0x8e   :  { %v241_v36 = vpop.f32.mrf.mxu2 }
  0x96   :  { %v243_v43 = vpop.f32.mrf.mxu2 }
  0x9e   :  { %v203_v38 = vpop.f32.mrf.mxu0  ;;  %v246_v53 = vpop.f32.mrf.mxu2 }
  0x9f   :  { %v204_v39 = vadd.f32 %v471_v37, %v203_v38  ;;  %v222_v40 = vpop.f32.mrf.mxu1 }
  0xa1   :  { %v223_v41 = vadd.f32 %v222_v40, %v204_v39 }
  0xa3   :  { %v242_v42 = vadd.f32 %v241_v36, %v223_v41 }
  0xa4   :  { %v208_v48 = vpop.f32.mrf.mxu3 }
  0xa5   :  { %v253_v44 = vsel %vm187_vm0, %v242_v42, 0.0  ;;  %v209_v51 = vadd.f32 %v471_v37, %v208_v48  ;;  %v473_v48 = vld [vmem:[%s659_s4] ss:$0 sm:$0xff] }
  0xa6   :  { %v205_v45 = vpop.f32.mrf.mxu0  ;;  %254 = vadd.xlane.f32.xlu0 %v253_v44  ;;  %v248_v62 = vpop.f32.mrf.mxu2 }
  0xa7   :  { %v206_v46 = vadd.f32 %v471_v37, %v205_v45  ;;  %v224_v47 = vpop.f32.mrf.mxu1  ;;  %v472_v45 = vld [vmem:[%s658_s3] ss:$0 sm:$0xff] }
  0xa9   :  { %v225_v49 = vadd.f32 %v224_v47, %v206_v46 }
  0xab   :  { %v244_v50 = vadd.f32 %v243_v43, %v225_v49 }
  0xac   :  { %v210_v57 = vpop.f32.mrf.mxu3 }
  0xad   :  { %v256_v52 = vsel %vm187_vm0, %v244_v50, 0.0  ;;  %v211_v59 = vadd.f32 %v471_v37, %v210_v57 }
  0xae   :  { %257 = vadd.xlane.f32.xlu0 %v256_v52 }
  0xaf   :  { %v227_v54 = vpop.f32.mrf.mxu1 }
  0xb0   :  { %v228_v55 = vadd.f32 %v227_v54, %v209_v51 }
  0xb2   :  { %v247_v56 = vadd.f32 %v246_v53, %v228_v55 }
  0xb4   :  { %v259_v58 = vsel %vm187_vm0, %v247_v56, 0.0 }
  0xb5   :  { %260 = vadd.xlane.f32.xlu1 %v259_v58 }
  0xb7   :  { %v229_v60 = vpop.f32.mrf.mxu1 }
  0xb8   :  { %v230_v61 = vadd.f32 %v229_v60, %v211_v59 }
  0xba   :  { %v249_v63 = vadd.f32 %v248_v62, %v230_v61 }
  0xbc   :  { %v262_v0 = vsel %vm187_vm0, %v249_v63, 0.0 }
  0xbd   :  { %263 = vadd.xlane.f32.xlu1 %v262_v0 }
 0x119   :  { %v255_v8 = vpop.xlane.xlu0 %254 }
 0x11a   :  { %v272_v9 = vmul.f32 %v271_v7, %v255_v8 }
 0x11c   :  { %v276_v10 = vsub.f32 %v242_v42, %v272_v9 }
 0x11e   :  { %v280_v11 = vmul.f32 %v276_v10, %v276_v10 }
 0x120   :  { %v284_v12 = vsel %vm187_vm0, %v280_v11, 0.0 }
 0x121   :  { %285 = vadd.xlane.f32.xlu2 %v284_v12  ;;  %v258_v13 = vpop.xlane.xlu0 %257 }
 0x122   :  { %v273_v14 = vmul.f32 %v271_v7, %v258_v13 }
 0x124   :  { %v615_v15 = vsub.f32 %v244_v50, %v273_v14 }
 0x126   :  { %v281_v16 = vmul.f32 %v615_v15, %v615_v15 }
 0x128   :  { %v261_v17 = vpop.xlane.xlu1 %260  ;;  %v287_v18 = vsel %vm187_vm0, %v281_v16, 0.0 }
 0x129   :  { %v274_v19 = vmul.f32 %v271_v7, %v261_v17  ;;  %288 = vadd.xlane.f32.xlu2 %v287_v18 }
 0x12b   :  { %v620_v20 = vsub.f32 %v247_v56, %v274_v19 }
 0x12d   :  { %v282_v21 = vmul.f32 %v620_v20, %v620_v20 }
 0x12f   :  { %v290_v22 = vsel %vm187_vm0, %v282_v21, 0.0 }
 0x130   :  { %v264_v23 = vpop.xlane.xlu1 %263  ;;  %291 = vadd.xlane.f32.xlu0 %v290_v22 }
 0x131   :  { %v275_v24 = vmul.f32 %v271_v7, %v264_v23 }
 0x133   :  { %v625_v25 = vsub.f32 %v249_v63, %v275_v24 }
 0x135   :  { %v283_v26 = vmul.f32 %v625_v25, %v625_v25 }
 0x137   :  { %v293_v27 = vsel %vm187_vm0, %v283_v26, 0.0 }
 0x138   :  { %294 = vadd.xlane.f32.xlu1 %v293_v27 }
 0x194   :  { %v286_v28 = vpop.xlane.xlu2 %285 }
 0x195   :  { %v296_v29 = vmul.f32 %v286_v28, %v271_v7 }
 0x197   :  { %v300_v30 = vadd.f32 1e-06, %v296_v29 }
 0x199   :  { %476 = vrsqrt.f32 %v300_v30  ;;  %vm310_vm3 = vweird.f32 %v300_v30 }
 0x19c   :  { %v289_v31 = vpop.xlane.xlu2 %288 }
 0x19d   :  { %v297_v32 = vmul.f32 %v289_v31, %v271_v7 }
 0x19f   :  { %v477_v33 = vpop.eup %476  ;;  %v301_v34 = vadd.f32 1e-06, %v297_v32 }
 0x1a0   :  { %v305_v35 = vmul.f32 %v477_v33, %v300_v30  ;;  %vm311_vm2 = vweird.f32 %v477_v33 }
 0x1a1   :  { %478 = vrsqrt.f32 %v301_v34  ;;  %vm312_vm4 = vmor %vm310_vm3, %vm311_vm2  ;;  %vm320_vm6 = vweird.f32 %v301_v34 }
 0x1a2   :  { %v306_v36 = vmul.f32 %v477_v33, %v305_v35 }
 0x1a3   :  { %v292_v37 = vpop.xlane.xlu0 %291 }
 0x1a4   :  { %v307_v38 = vmul.f32 0.5, %v306_v36  ;;  %v298_v39 = vmul.f32 %v292_v37, %v271_v7 }
 0x1a6   :  { %v308_v40 = vsub.f32 1.5, %v307_v38  ;;  %v302_v41 = vadd.f32 1e-06, %v298_v39 }
 0x1a7   :  { %v479_v42 = vpop.eup %478 }
 0x1a8   :  { %v309_v43 = vmul.f32 %v477_v33, %v308_v40  ;;  %v315_v44 = vmul.f32 %v479_v42, %v301_v34  ;;  %480 = vrsqrt.f32 %v302_v41  ;;  %vm321_vm5 = vweird.f32 %v479_v42 }
 0x1a9   :  { %vm322_vm7 = vmor %vm320_vm6, %vm321_vm5  ;;  %vm330_vm9 = vweird.f32 %v302_v41 }
 0x1aa   :  { %v313_v46 = vsel %vm312_vm4, %v477_v33, %v309_v43  ;;  %v316_v47 = vmul.f32 %v479_v42, %v315_v44 }
 0x1ab   :  { %v344_v49 = vmul.f32 %v313_v46, %v276_v10  ;;  %v295_v50 = vpop.xlane.xlu1 %294 }
 0x1ac   :  { %v317_v51 = vmul.f32 0.5, %v316_v47  ;;  %v299_v52 = vmul.f32 %v295_v50, %v271_v7 }
 0x1ad   :  { %v351_v53 = vmul.f32 %v472_v45, %v344_v49 }
 0x1ae   :  { %v481_v54 = vpop.eup %480  ;;  %v318_v55 = vsub.f32 1.5, %v317_v51  ;;  %v303_v56 = vadd.f32 1e-06, %v299_v52 }
 0x1af   :  { %v358_v57 = vadd.f32 %v473_v48, %v351_v53  ;;  %v325_v58 = vmul.f32 %v481_v54, %v302_v41  ;;  %vm331_vm8 = vweird.f32 %v481_v54 }
 0x1b0   :  { %v319_v59 = vmul.f32 %v479_v42, %v318_v55  ;;  %482 = vrsqrt.f32 %v303_v56  ;;  %vm332_vm10 = vmor %vm330_vm9, %vm331_vm8  ;;  %vm340_vm12 = vweird.f32 %v303_v56 }
 0x1b1   :  { %362 = vst.msk [vmem:[%s660_s5] sm:$0xff] %vm187_vm0, %v358_v57  ;;  %v326_v60 = vmul.f32 %v481_v54, %v325_v58 }
 0x1b2   :  { %v323_v61 = vsel %vm322_vm7, %v479_v42, %v319_v59 }
 0x1b3   :  { %v345_v62 = vmul.f32 %v323_v61, %v615_v15  ;;  %v327_v63 = vmul.f32 0.5, %v326_v60 }
 0x1b5   :  { %v352_v0 = vmul.f32 %v472_v45, %v345_v62  ;;  %v328_v1 = vsub.f32 1.5, %v327_v63 }
 0x1b6   :  { %v483_v2 = vpop.eup %482 }
 0x1b7   :  { %v359_v3 = vadd.f32 %v473_v48, %v352_v0  ;;  %v329_v4 = vmul.f32 %v481_v54, %v328_v1  ;;  %v335_v5 = vmul.f32 %v483_v2, %v303_v56  ;;  %vm341_vm11 = vweird.f32 %v483_v2 }
 0x1b8   :  { %vm342_vm13 = vmor %vm340_vm12, %vm341_vm11 }
 0x1b9   :  { %363 = vst.msk [vmem:[%s660_s5 + $0x8] sm:$0xff] %vm187_vm0, %v359_v3  ;;  %v333_v6 = vsel %vm332_vm10, %v481_v54, %v329_v4  ;;  %v336_v7 = vmul.f32 %v483_v2, %v335_v5 }
 0x1ba   :  { %v346_v8 = vmul.f32 %v333_v6, %v620_v20 }
 0x1bb   :  { %v337_v9 = vmul.f32 0.5, %v336_v7 }
 0x1bc   :  { %v353_v10 = vmul.f32 %v472_v45, %v346_v8 }
 0x1bd   :  { %v338_v11 = vsub.f32 1.5, %v337_v9 }
 0x1be   :  { %v360_v12 = vadd.f32 %v473_v48, %v353_v10 }
 0x1bf   :  { %v339_v13 = vmul.f32 %v483_v2, %v338_v11 }
 0x1c0   :  { %364 = vst.msk [vmem:[%s660_s5 + $0x10] sm:$0xff] %vm187_vm0, %v360_v12 }
 0x1c1   :  { %v343_v14 = vsel %vm342_vm13, %v483_v2, %v339_v13 }
 0x1c2   :  { %v347_v15 = vmul.f32 %v343_v14, %v625_v25 }
 0x1c4   :  { %v354_v16 = vmul.f32 %v472_v45, %v347_v15 }
 0x1c6   :  { %v361_v17 = vadd.f32 %v473_v48, %v354_v16 }
 0x1c8   :  { %365 = vst.msk [vmem:[%s660_s5 + $0x18] sm:$0xff] %vm187_vm0, %v361_v17 }

// kernel: bk_medsam_forward.17
= control target key start
LH: loop header
LB: loop body
LE: loop exit
PB: predicated region body
PF: predicated region fallthrough
CT: control target
= control target key end

     0   :  { %s954_s13 = smov 0   ;;  %s1053_s0 = inlined_call_operand.vmem [shape: f32[2,5,32], index: 0, kind: input, shape index: {}]   ;;  %s1054_s1 = inlined_call_operand.vmem [shape: f32[2,16,32], index: 1, kind: input, shape index: {}]   ;;  %s1055_s2 = inlined_call_operand.vmem [shape: f32[2,5,32], index: 2, kind: input, shape index: {}]   ;;  %s1056_s3 = inlined_call_operand.vmem [shape: f32[1,16,32], index: 3, kind: input, shape index: {}]   ;;  %s1057_s4 = inlined_call_operand.vmem [shape: bf16[3,32,16], index: 4, kind: input, shape index: {}]   ;;  %s1058_s5 = inlined_call_operand.vmem [shape: f32[3,1,16], index: 5, kind: input, shape index: {}]   ;;  %s1059_s6 = inlined_call_operand.vmem [shape: bf16[16,32], index: 6, kind: input, shape index: {}]   ;;  %s1060_s7 = inlined_call_operand.vmem [shape: f32[1,32], index: 7, kind: input, shape index: {}]   ;;  %s1061_s8 = inlined_call_operand.vmem [shape: f32[1,32], index: 8, kind: input, shape index: {}]   ;;  %s1062_s9 = inlined_call_operand.vmem [shape: f32[1,32], index: 9, kind: input, shape index: {}]   ;;  %s1063_s10 = inlined_call_operand.vmem [shape: f32[2,5,32], index: 10, kind: output, shape index: {}]  }
   0x1 LB: > { %s799_s14 = sadd.s32 4294967295, %s895_s13   ;;  %p803_p0 = scmp.ge.s32.totalorder %s895_s13, 1  ;;  %s895_s13 = sphi %s954_s13, %s20_s13  }
   0x2   : > { %p330_p1 = scmp.lt.s32.totalorder %s895_s13, 3 }
   0x4   : > { %p331_p2 = pnand %p803_p0, %p330_p1 }
   0x5   : > { %p375_p3 = scmp.lt.s32.totalorder (!%p331_p2), %s799_s14, 1  ;;  %s897_s23 = smov (!%p331_p2), 120  }
   0x6   : > { %334 = sbr.rel (%p331_p2) target bundleno = 1205 (0x4b5), region = 60 }
   0xb   : > { %v858_v0 = vld [vmem:[%s1057_s4 + $0x18] sm:$0xff]  ;;  %v857_v1 = vld [vmem:[%s1057_s4 + $0x10] sm:$0xff]  ;;  %v856_v2 = vld [vmem:[%s1057_s4 + $0x8] sm:$0xff]  ;;  %s1065_s14 = smov (!%p375_p3, %s799_s14), 1  ;;  %vm423_vm0 = vcmask 261120   ;;  %vm524_vm1 = vcmask 64512  }
   0xc   : > { %472 = vmatpush.bf16.msra.mxu1 %v858_v0  ;;  %v398_v3 = vld [vmem:[%s1056_s3] sm:$0xff]  ;;  %v399_v4 = vld [vmem:[%s1056_s3 + $0x8] sm:$0xff]  ;;  %433 = vmatpush.bf16.msra.mxu0 %v856_v2  ;;  %s854_s27 = sshll.u32 %s1065_s14, 4  ;;  %s980_s28 = sshll.u32 %s1065_s14, 3  ;;  %vm545_vm2 = vcmask 126976   ;;  %vm559_vm3 = vcmask 130048  }
   0xd   : > { %v855_v5 = vld [vmem:[%s1057_s4] sm:$0xff]  ;;  %s383_s11 = scalar_lea.vmem %s1054_s1, %s854_s27  ;;  %s378_s16 = scalar_lea.vmem %s1053_s0, %s980_s28  ;;  %v860_v32 = vld [vmem:[%s1057_s4 + $0x28] sm:$0xff]  ;;  %vm639_vm4 = vcmask 1043456   ;;  %vm683_vm5 = vcmask 258048  }
   0xe   : > { %v394_v6 = vld [vmem:[%s383_s11] sm:$0xff]  ;;  %v395_v7 = vld [vmem:[%s383_s11 + $0x8] sm:$0xff]  ;;  %s387_s19 = scalar_lea.vmem %s1055_s2, %s980_s28  ;;  %512 = vmatpush.bf16.msra.mxu2 %v860_v32  ;;  %s391_s24 = scalar_lea.vmem %s1063_s10, %s980_s28 }
   0xf   : > { %v993_v8 = vld [vmem:[%s378_s16] sm:$0x1f]  ;;  %v400_v9 = vadd.f32 %v398_v3, %v394_v6  ;;  %v401_v10 = vadd.f32 %v399_v4, %v395_v7  ;;  %v485_v34 = vpack.c.bf16 %v395_v7, %v394_v6 }
  0x10   : > { %473 = vmatpush.bf16.msra.mxu1 %v857_v1  ;;  %434 = vmatpush.bf16.msra.mxu0 %v855_v5  ;;  %v396_v11 = vld [vmem:[%s387_s19] sm:$0x1f] }
  0x11   : > { %v397_v12 = vadd.f32 %v396_v11, %v993_v8  ;;  %v445_v13 = vpack.c.bf16 %v401_v10, %v400_v9  ;;  %v871_v17 = vld [vmem:[%s1058_s5 + $0x1] ss:$0 sm:$0xff]  ;;  %v872_v20 = vld [vmem:[%s1058_s5] ss:$0 sm:$0xff]  ;;  %v873_v42 = vld [vmem:[%s1058_s5 + $0x2] ss:$0 sm:$0xff] }
  0x12   : > { %v859_v33 = vld [vmem:[%s1057_s4 + $0x20] sm:$0xff] }
  0x13   : > { %v406_v14 = vpack.c.bf16 %v397_v12, %v397_v12  ;;  %831 = vmatmul.msk.bf16.vlgmr.msra.gmra.mxu1 %vm423_vm0, %v445_v13  ;;  %513 = vmatpush.bf16.msra.mxu2 %v859_v33  ;;  %v521_v2 = vld [vmem:[%s1059_s6 + $0x4] sm:$0xf]  ;;  %v520_v4 = vld [vmem:[%s1059_s6] sm:$0xf] }
  0x14   : > { %v641_v3 = vsel %vm639_vm4, %v521_v2, 0  ;;  %v660_v5 = vsel %vm639_vm4, %v520_v4, 0 }
  0x15   : > { %817 = vmatmul.msk.bf16.vlgmr.msra.gmra.mxu0 %vm423_vm0, %v406_v14  ;;  %v874_v14 = vld [vmem:[%s1060_s7] ss:$0 sm:$0xff] }
  0x16   : > { %845 = vmatmul.msk.bf16.vlgmr.msra.gmra.mxu2 %vm423_vm0, %v485_v34 }
  0x90   : > { %v475_v15 = vpop.f32.mrf.mxu1 }
  0x91   : > { %v476_v19 = vadd.f32 %v871_v17, %v475_v15 }
  0x92   : > { %v436_v16 = vpop.f32.mrf.mxu0 }
  0x93   : > { %v437_v24 = vadd.f32 %v872_v20, %v436_v16 }
  0x95   : > { %v522_v26 = vpack.c.bf16 %v437_v24, %v437_v24 }
  0x98   : > { %v477_v18 = vpop.f32.mrf.mxu1 }
  0x99   : > { %v478_v21 = vadd.f32 %v871_v17, %v477_v18  ;;  %v515_v41 = vpop.f32.mrf.mxu2 }
  0x9a   : > { %v438_v22 = vpop.f32.mrf.mxu0  ;;  %v516_v44 = vadd.f32 %v873_v42, %v515_v41 }
  0x9b   : > { %v523_v23 = vpack.c.bf16 %v478_v21, %v476_v19  ;;  %v898_v22 = vmov 32.0  }
  0x9d   : > { %581 = vrot.lane.b32.xlu0 %v523_v23, %s897_s23  ;;  %v529_v25 = vsel %vm524_vm1, %v523_v23, 0 }
  0x9e   : > { %538 = vmatpush.bf16.xpose.msra.mxu3 %v529_v25 }
  0xa1   : > { %v517_v46 = vpop.f32.mrf.mxu2 }
  0xa2   : > { %v518_v47 = vadd.f32 %v873_v42, %v517_v46  ;;  %v875_v42 = vld [vmem:[%s1061_s8] ss:$0 sm:$0xff] }
  0xa4   : > { %v558_v49 = vpack.c.bf16 %v518_v47, %v516_v44  ;;  %v876_v44 = vld [vmem:[%s1062_s9] ss:$0 sm:$0xff] }
  0xa5   : > { %578 = vrot.lane.b32.xlu0 %v522_v26, %s897_s23  ;;  %846 = vmatmul.msk.bf16.vlgmr.msra.gmra.mxu3 %vm524_vm1, %v522_v26 }
  0xa6   : > { %570 = vmatpush.bf16.msrb.mxu0 %v558_v49  ;;  %650 = vmatpush.bf16.msrb.mxu3 %v641_v3 }
  0xaa   : > { %669 = vmatpush.bf16.msra.mxu0 %v660_v5 }
 0x10f   : > { %v582_v27 = vpop.permute.xlu0 %581 }
 0x110   : > { %v587_v28 = vsel %vm524_vm1, %v582_v27, 0 }
 0x111   : > { %596 = vmatpush.bf16.xpose.msrb.mxu1 %v587_v28 }
 0x117   : > { %v579_v29 = vpop.permute.xlu0 %578 }
 0x118   : > { %848 = vmatmul.msk.bf16.vlgmr.msrb.gmra.mxu1 %vm524_vm1, %v579_v29 }
 0x128   : > { %v540_v30 = vpop.f32.mrf.mxu3 }
 0x129   : > { %v544_v38 = vmul.f32 0.35355338, %v540_v30 }
 0x12b   : > { %v546_v40 = vsel %vm545_vm2, %v544_v38, -inf }
 0x130   : > { %v542_v31 = vpop.f32.mrf.mxu3 }
 0x195   : > { %v598_v35 = vpop.f32.mrf.mxu1 }
 0x196   : > { %v602_v36 = vmul.f32 0.35355338, %v598_v35 }
 0x198   : > { %v603_v37 = vsel %vm545_vm2, %v602_v36, -inf }
 0x199   : > { %604 = vmax.xlane.f32.xlu1 %v603_v37 }
 0x19d   : > { %v600_v39 = vpop.f32.mrf.mxu1 }
 0x1a1   : > { %547 = vmax.xlane.f32.xlu1 %v546_v40 }
 0x20c   : > { %v605_v43 = vpop.xlane.xlu1 %604 }
 0x20d   : > { %v606_v45 = vsub.f32 %v602_v36, %v605_v43 }
 0x20f   : > { %v607_v48 = vmul.f32 1.442695, %v606_v45 }
 0x211   : > { %877 = vpow2.f32 %v607_v48 }
 0x214   : > { %v548_v50 = vpop.xlane.xlu1 %547 }
 0x215   : > { %v549_v51 = vsub.f32 %v544_v38, %v548_v50 }
 0x217   : > { %v878_v52 = vpop.eup %877  ;;  %v550_v53 = vmul.f32 1.442695, %v549_v51 }
 0x218   : > { %v609_v54 = vsel %vm545_vm2, %v878_v52, 0.0 }
 0x219   : > { %879 = vpow2.f32 %v550_v53  ;;  %610 = vadd.xlane.f32.xlu2 %v609_v54 }
 0x21f   : > { %v880_v55 = vpop.eup %879 }
 0x220   : > { %v552_v56 = vsel %vm545_vm2, %v880_v55, 0.0 }
 0x221   : > { %553 = vadd.xlane.f32.xlu0 %v552_v56 }
 0x231   : > { %616 = vrot.lane.b32.xlu2 %v558_v49, %s897_s23 }
 0x28c   : > { %v611_v57 = vpop.xlane.xlu2 %610 }
 0x28d   : > { %881 = vrcp.f32 %v611_v57 }
 0x293   : > { %v882_v58 = vpop.eup %881 }
 0x294   : > { %v613_v59 = vmul.f32 %v882_v58, %v878_v52  ;;  %v617_v60 = vpop.permute.xlu2 %616  ;;  %v554_v61 = vpop.xlane.xlu0 %553 }
 0x295   : > { %883 = vrcp.f32 %v554_v61  ;;  %629 = vmatpush.bf16.msrb.mxu2 %v617_v60 }
 0x296   : > { %v614_v62 = vpack.c.bf16 %v613_v59, %v613_v59  ;;  %885 = vrcp.f32 %v898_v22 }
 0x298   : > { %849 = vmatmul.msk.bf16.vlgmr.msrb.gmra.mxu2 %vm559_vm3, %v614_v62 }
 0x29b   : > { %v884_v63 = vpop.eup %883 }
 0x29c   : > { %v556_v0 = vmul.f32 %v884_v63, %v880_v55  ;;  %v886_v23 = vpop.eup %885 }
 0x29d   : > { %v688_v24 = vmul.f32 32.0, %v886_v23  ;;  %vm692_vm6 = vweird.f32 %v886_v23 }
 0x29e   : > { %v557_v1 = vpack.c.bf16 %v556_v0, %v556_v0 }
 0x29f   : > { %v689_v25 = vsub.f32 1.0, %v688_v24 }
 0x2a0   : > { %847 = vmatmul.msk.bf16.vlgmr.msrb.gmra.mxu0 %vm559_vm3, %v557_v1 }
 0x2a1   : > { %v690_v26 = vmul.f32 %v886_v23, %v689_v25 }
 0x2a3   : > { %v691_v27 = vadd.f32 %v886_v23, %v690_v26 }
 0x2a5   : > { %v693_v28 = vsel %vm692_vm6, %v886_v23, %v691_v27 }
 0x31b   : > { %v631_v6 = vpop.f32.mrf.mxu2 }
 0x31c   : > { %v635_v7 = vpack.c.bf16 %v631_v6, %v631_v6 }
 0x31d   : > { %v572_v9 = vpop.f32.mrf.mxu0 }
 0x31e   : > { %v576_v10 = vpack.c.bf16 %v572_v9, %v572_v9  ;;  %850 = vmatmul.msk.bf16.vlgmr.msrb.gmra.mxu3 %vm524_vm1, %v635_v7 }
 0x320   : > { %851 = vmatmul.msk.bf16.vlgmr.msra.gmra.mxu0 %vm524_vm1, %v576_v10 }
 0x323   : > { %v633_v11 = vpop.f32.mrf.mxu2 }
 0x325   : > { %v574_v12 = vpop.f32.mrf.mxu0 }
 0x39d   : > { %v671_v13 = vpop.f32.mrf.mxu0 }
 0x3a1   : > { %v652_v15 = vpop.f32.mrf.mxu3 }
 0x3a2   : > { %v672_v16 = vadd.f32 %v671_v13, %v652_v15 }
 0x3a4   : > { %v679_v17 = vadd.f32 %v874_v14, %v672_v16 }
 0x3a5   : > { %v673_v18 = vpop.f32.mrf.mxu0 }
 0x3a6   : > { %v680_v19 = vadd.f32 %v679_v17, %v993_v8 }
 0x3a8   : > { %v684_v20 = vsel %vm683_vm5, %v680_v19, 0.0 }
 0x3a9   : > { %685 = vadd.xlane.f32.xlu1 %v684_v20  ;;  %v654_v21 = vpop.f32.mrf.mxu3 }
 0x41c   : > { %v686_v29 = vpop.xlane.xlu1 %685 }
 0x41d   : > { %v694_v30 = vmul.f32 %v693_v28, %v686_v29 }
 0x41f   : > { %v695_v31 = vsub.f32 %v680_v19, %v694_v30 }
 0x421   : > { %v696_v32 = vmul.f32 %v695_v31, %v695_v31 }
 0x423   : > { %v697_v33 = vsel %vm683_vm5, %v696_v32, 0.0 }
 0x424   : > { %698 = vadd.xlane.f32.xlu1 %v697_v33 }
 0x497   : > { %v699_v8 = vpop.xlane.xlu1 %698 }
 0x498   : > { %v700_v34 = vmul.f32 %v699_v8, %v693_v28 }
 0x49a   : > { %v701_v35 = vadd.f32 1e-05, %v700_v34 }
 0x49c   : > { %887 = vrsqrt.f32 %v701_v35  ;;  %vm708_vm8 = vweird.f32 %v701_v35 }
 0x4a2   : > { %v888_v36 = vpop.eup %887 }
 0x4a3   : > { %v703_v37 = vmul.f32 %v888_v36, %v701_v35  ;;  %vm709_vm7 = vweird.f32 %v888_v36 }
 0x4a4   : > { %vm710_vm9 = vmor %vm708_vm8, %vm709_vm7 }
 0x4a5   : > { %v704_v38 = vmul.f32 %v888_v36, %v703_v37 }
 0x4a7   : > { %v705_v39 = vmul.f32 0.5, %v704_v38 }
 0x4a9   : > { %v706_v40 = vsub.f32 1.5, %v705_v39 }
 0x4ab   : > { %v707_v41 = vmul.f32 %v888_v36, %v706_v40 }
 0x4ad   : > { %v711_v43 = vsel %vm710_vm9, %v888_v36, %v707_v41 }
 0x4ae   : > { %v712_v45 = vmul.f32 %v711_v43, %v695_v31 }
 0x4b0   : > { %v716_v46 = vmul.f32 %v875_v42, %v712_v45 }
 0x4b2   : > { %v720_v47 = vadd.f32 %v876_v44, %v716_v46 }
 0x4b4   : > { %721 = vst.msk [vmem:[%s391_s24] sm:$0x1f] %vm683_vm5, %v720_v47 }
 0x4b5 PF: > { %s20_s13 = sadd.s32 1, %s895_s13  }
 0x4b6   : > { %p17_p4 = scmp.ge.s32.totalorder %s20_s13, 4  }
 0x4b8   :  { %19 = sbr.rel (!%p17_p4) target bundleno = 1 (0x1), region = 100 }

// kernel: bk_medsam_forward.18
= control target key start
LH: loop header
LB: loop body
LE: loop exit
PB: predicated region body
PF: predicated region fallthrough
CT: control target
= control target key end

     0   :  { %s1212_s11 = smov 8   ;;  %vm53_vm0 = vcmask 261120   ;;  %s1213_s17 = smov 104   ;;  %vm83_vm1 = vcmask 64512   ;;  %v1216_v35 = vmov 8.0   ;;  %vm240_vm6 = vcmask 1043456   ;;  %s1848_s1 = inlined_call_operand.vmem [shape: bf16[32,32], index: 1, kind: input, shape index: {}]   ;;  %s1849_s0 = inlined_call_operand.vmem [shape: f32[32,32], index: 0, kind: input, shape index: {}]   ;;  %s1850_s3 = inlined_call_operand.vmem [shape: f32[1,8], index: 3, kind: input, shape index: {}]   ;;  %s1851_s2 = inlined_call_operand.vmem [shape: f32[1,32], index: 2, kind: input, shape index: {}]   ;;  %s1852_s4 = inlined_call_operand.vmem [shape: f32[1,8], index: 4, kind: input, shape index: {}]   ;;  %s1853_s5 = inlined_call_operand.vmem [shape: bf16[8,16], index: 5, kind: input, shape index: {}]   ;;  %s1854_s6 = inlined_call_operand.vmem [shape: f32[1,16], index: 6, kind: input, shape index: {}]   ;;  %s1855_s7 = inlined_call_operand.vmem [shape: f32[32,64], index: 7, kind: output, shape index: {}]  }
   0x1   :  { %v1098_v0 = vld [vmem:[%s1848_s1 + $0x8] sm:$0xff]  ;;  %v1097_v1 = vld [vmem:[%s1848_s1] sm:$0xff]  ;;  %v29_v6 = vld [vmem:[%s1849_s0 + $0x10] sm:$0xff]  ;;  %s1214_s18 = smov 112   ;;  %s1215_s19 = smov 120   ;;  %1113 = vrcp.f32 %v1216_v35 }
   0x2   :  { %v27_v2 = vld [vmem:[%s1849_s0] sm:$0xff]  ;;  %v28_v3 = vld [vmem:[%s1849_s0 + $0x8] sm:$0xff]  ;;  %66 = vmatpush.bf16.msra.mxu0 %v1098_v0  ;;  %v30_v7 = vld [vmem:[%s1849_s0 + $0x18] sm:$0xff]  ;;  %s1220_s25 = smov 48  }
   0x3   :  { %v1276_v4 = vld [vmem:[%s1850_s3] ss:$0 sm:$0xff]  ;;  %v35_v5 = vpack.c.bf16 %v28_v3, %v27_v2  ;;  %v36_v8 = vpack.c.bf16 %v30_v7, %v29_v6 }
   0x4   :  { %419 = vrot.lane.b32.xlu0 %v1276_v4, %s1212_s11  ;;  %v1110_v9 = vld [vmem:[%s1851_s2] ss:$0 sm:$0xff] }
   0x6   :  { %67 = vmatpush.bf16.msra.mxu0 %v1097_v1 }
   0x7   :  { %v1114_v37 = vpop.eup %1113 }
   0x8   :  { %v97_v39 = vmul.f32 8.0, %v1114_v37  ;;  %vm101_vm2 = vweird.f32 %v1114_v37 }
   0x9   :  { %1087 = vmatmul.msk.bf16.vlgmr.msra.gmra.mxu0 %vm53_vm0, %v35_v5 }
   0xa   :  { %v98_v41 = vsub.f32 1.0, %v97_v39 }
   0xc   :  { %v99_v45 = vmul.f32 %v1114_v37, %v98_v41 }
   0xe   :  { %v100_v47 = vadd.f32 %v1114_v37, %v99_v45 }
  0x10   :  { %v1347_v52 = vsel %vm101_vm2, %v1114_v37, %v100_v47 }
  0x19   :  { %1088 = vmatmul.msk.bf16.gmra.mxu0 %vm53_vm0, %v36_v8 }
  0x76   :  { %v1327_v21 = vpop.permute.xlu0 %419 }
  0x86   :  { %v69_v10 = vpop.f32.mrf.mxu0 }
  0x87   :  { %v1291_v11 = vadd.f32 %v1110_v9, %v69_v10 }
  0x89   :  { %773 = vrot.lane.b32.xlu2 %v1291_v11, %s1213_s17  ;;  %538 = vrot.lane.b32.xlu1 %v1291_v11, %s1214_s18  ;;  %v84_v18 = vsel %vm83_vm1, %v1291_v11, 0.0 }
  0x8a   :  { %303 = vrot.lane.b32.xlu0 %v1291_v11, %s1215_s19 }
  0x8e   :  { %v71_v12 = vpop.f32.mrf.mxu0 }
  0x8f   :  { %v1299_v13 = vadd.f32 %v1110_v9, %v71_v12 }
  0x91   :  { %775 = vrot.lane.b32.xlu2 %v1299_v13, %s1213_s17  ;;  %v87_v19 = vsel %vm83_vm1, %v1299_v13, 0.0 }
  0x92   :  { %305 = vrot.lane.b32.xlu0 %v1299_v13, %s1215_s19 }
  0x96   :  { %v74_v14 = vpop.f32.mrf.mxu0 }
  0x97   :  { %v1305_v15 = vadd.f32 %v1110_v9, %v74_v14 }
  0x99   :  { %542 = vrot.lane.b32.xlu2 %v1305_v15, %s1214_s18  ;;  %v90_v22 = vsel %vm83_vm1, %v1305_v15, 0.0 }
  0x9e   :  { %v76_v16 = vpop.f32.mrf.mxu0 }
  0x9f   :  { %v1309_v17 = vadd.f32 %v1110_v9, %v76_v16 }
  0xa1   :  { %779 = vrot.lane.b32.xlu2 %v1309_v17, %s1213_s17  ;;  %v93_v20 = vsel %vm83_vm1, %v1309_v17, 0.0 }
  0xb3   :  { %85 = vadd.xlane.f32.xlu1 %v84_v18 }
  0xbc   :  { %88 = vadd.xlane.f32.xlu0 %v87_v19 }
  0xca   :  { %94 = vadd.xlane.f32.xlu2 %v93_v20 }
  0xcc   :  { %540 = vrot.lane.b32.xlu1 %v1299_v13, %s1214_s18 }
  0xd0   :  { %307 = vrot.lane.b32.xlu0 %v1305_v15, %s1215_s19 }
  0xd4   :  { %777 = vrot.lane.b32.xlu1 %v1305_v15, %s1213_s17 }
  0xdc   :  { %309 = vrot.lane.b32.xlu1 %v1309_v17, %s1215_s19 }
  0xe3   :  { %v774_v24 = vpop.permute.xlu2 %773 }
  0xe4   :  { %v785_v43 = vsel %vm83_vm1, %v774_v24, 0.0 }
  0xeb   :  { %v776_v29 = vpop.permute.xlu2 %775 }
  0xec   :  { %v788_v30 = vsel %vm83_vm1, %v776_v29, 0.0 }
  0xf3   :  { %v543_v31 = vpop.permute.xlu2 %542 }
  0xf4   :  { %v556_v32 = vsel %vm83_vm1, %v543_v31, 0.0 }
  0xfa   :  { %91 = vadd.xlane.f32.xlu0 %v90_v22 }
  0xfb   :  { %v539_v23 = vpop.permute.xlu1 %538  ;;  %v780_v33 = vpop.permute.xlu2 %779 }
  0xfc   :  { %v304_v25 = vpop.permute.xlu0 %303  ;;  %v550_v26 = vsel %vm83_vm1, %v539_v23, 0.0  ;;  %v794_v34 = vsel %vm83_vm1, %v780_v33, 0.0 }
  0xfd   :  { %551 = vadd.xlane.f32.xlu2 %v550_v26  ;;  %v315_v38 = vsel %vm83_vm1, %v304_v25, 0.0 }
 0x104   :  { %v306_v27 = vpop.permute.xlu0 %305 }
 0x105   :  { %v318_v28 = vsel %vm83_vm1, %v306_v27, 0.0 }
 0x106   :  { %319 = vadd.xlane.f32.xlu1 %v318_v28 }
 0x10e   :  { %544 = vrot.lane.b32.xlu0 %v1309_v17, %s1214_s18  ;;  %789 = vadd.xlane.f32.xlu1 %v788_v30 }
 0x116   :  { %557 = vadd.xlane.f32.xlu1 %v556_v32 }
 0x11e   :  { %795 = vadd.xlane.f32.xlu1 %v794_v34 }
 0x126   :  { %v1338_v36 = vpop.xlane.xlu1 %85 }
 0x12f   :  { %v1341_v40 = vpop.xlane.xlu0 %88 }
 0x138   :  { %316 = vadd.xlane.f32.xlu0 %v315_v38 }
 0x13d   :  { %v95_v51 = vpop.xlane.xlu2 %94 }
 0x13e   :  { %v541_v42 = vpop.permute.xlu1 %540  ;;  %v106_v53 = vmul.f32 %v1347_v52, %v95_v51 }
 0x13f   :  { %v553_v44 = vsel %vm83_vm1, %v541_v42, 0.0 }
 0x140   :  { %786 = vadd.xlane.f32.xlu0 %v785_v43  ;;  %554 = vadd.xlane.f32.xlu2 %v553_v44  ;;  %v1351_v55 = vsub.f32 %v1309_v17, %v106_v53 }
 0x142   :  { %v308_v46 = vpop.permute.xlu0 %307  ;;  %v114_v57 = vmul.f32 %v1351_v55, %v1351_v55 }
 0x143   :  { %v321_v49 = vsel %vm83_vm1, %v308_v46, 0.0 }
 0x144   :  { %v124_v58 = vsel %vm83_vm1, %v114_v57, 0.0 }
 0x146   :  { %v778_v48 = vpop.permute.xlu1 %777 }
 0x147   :  { %v791_v50 = vsel %vm83_vm1, %v778_v48, 0.0 }
 0x148   :  { %322 = vadd.xlane.f32.xlu2 %v321_v49  ;;  %792 = vadd.xlane.f32.xlu0 %v791_v50 }
 0x14e   :  { %v310_v54 = vpop.permute.xlu1 %309 }
 0x14f   :  { %v324_v56 = vsel %vm83_vm1, %v310_v54, 0.0 }
 0x150   :  { %325 = vadd.xlane.f32.xlu0 %v324_v56 }
 0x158   :  { %125 = vadd.xlane.f32.xlu0 %v124_v58 }
 0x16d   :  { %v92_v59 = vpop.xlane.xlu0 %91 }
 0x16e   :  { %v105_v60 = vmul.f32 %v1347_v52, %v92_v59 }
 0x170   :  { %v1359_v61 = vsub.f32 %v1305_v15, %v105_v60  ;;  %v552_v6 = vpop.xlane.xlu2 %551 }
 0x171   :  { %v562_v8 = vmul.f32 %v552_v6, %v1347_v52 }
 0x172   :  { %v113_v62 = vmul.f32 %v1359_v61, %v1359_v61 }
 0x173   :  { %v1374_v9 = vsub.f32 %v1291_v11, %v562_v8  ;;  %v1448_v8 = vld [vmem:[%s1852_s4] ss:$0 sm:$0xff]  ;;  %s1217_s4 = smov 16  }
 0x174   :  { %v121_v63 = vsel %vm83_vm1, %v113_v62, 0.0 }
 0x175   :  { %122 = vadd.xlane.f32.xlu1 %v121_v63  ;;  %v570_v14 = vmul.f32 %v1374_v9, %v1374_v9 }
 0x179   :  { %v320_v0 = vpop.xlane.xlu1 %319 }
 0x17a   :  { %v328_v1 = vmul.f32 %v320_v0, %v1347_v52 }
 0x17c   :  { %v1366_v2 = vsub.f32 %v1299_v13, %v328_v1 }
 0x17e   :  { %v336_v3 = vmul.f32 %v1366_v2, %v1366_v2 }
 0x180   :  { %v545_v5 = vpop.permute.xlu0 %544  ;;  %345 = vrot.lane.b32.xlu0 %v336_v3, %s1215_s19 }
 0x181   :  { %v559_v7 = vsel %vm83_vm1, %v545_v5, 0.0  ;;  %v790_v10 = vpop.xlane.xlu1 %789 }
 0x182   :  { %560 = vadd.xlane.f32.xlu2 %v559_v7  ;;  %v798_v12 = vmul.f32 %v790_v10, %v1347_v52 }
 0x184   :  { %v1381_v16 = vsub.f32 %v1299_v13, %v798_v12 }
 0x186   :  { %v806_v18 = vmul.f32 %v1381_v16, %v1381_v16 }
 0x189   :  { %v558_v20 = vpop.xlane.xlu1 %557 }
 0x18a   :  { %v564_v44 = vmul.f32 %v558_v20, %v1347_v52 }
 0x18c   :  { %v1430_v49 = vsub.f32 %v1305_v15, %v564_v44 }
 0x18e   :  { %578 = vrot.lane.b32.xlu1 %v570_v14, %s1214_s18  ;;  %v572_v51 = vmul.f32 %v1430_v49, %v1430_v49 }
 0x191   :  { %v796_v29 = vpop.xlane.xlu1 %795 }
 0x192   :  { %v800_v34 = vmul.f32 %v796_v29, %v1347_v52 }
 0x194   :  { %v1411_v41 = vsub.f32 %v1309_v17, %v800_v34 }
 0x196   :  { %815 = vrot.lane.b32.xlu1 %v806_v18, %s1213_s17  ;;  %v808_v47 = vmul.f32 %v1411_v41, %v1411_v41 }
 0x1ab   :  { %v317_v19 = vpop.xlane.xlu0 %316 }
 0x1ac   :  { %v327_v22 = vmul.f32 %v317_v19, %v1347_v52 }
 0x1ae   :  { %v1388_v23 = vsub.f32 %v1291_v11, %v327_v22 }
 0x1b0   :  { %v335_v24 = vmul.f32 %v1388_v23, %v1388_v23 }
 0x1b2   :  { %343 = vrot.lane.b32.xlu2 %v335_v24, %s1215_s19 }
 0x1b3   :  { %v787_v25 = vpop.xlane.xlu0 %786  ;;  %v555_v26 = vpop.xlane.xlu2 %554 }
 0x1b4   :  { %v797_v27 = vmul.f32 %v787_v25, %v1347_v52  ;;  %v563_v28 = vmul.f32 %v555_v26, %v1347_v52 }
 0x1b6   :  { %v1396_v30 = vsub.f32 %v1291_v11, %v797_v27  ;;  %v1399_v31 = vsub.f32 %v1299_v13, %v563_v28 }
 0x1b8   :  { %v805_v32 = vmul.f32 %v1396_v30, %v1396_v30  ;;  %v571_v33 = vmul.f32 %v1399_v31, %v1399_v31 }
 0x1ba   :  { %813 = vrot.lane.b32.xlu2 %v805_v32, %s1213_s17  ;;  %580 = vrot.lane.b32.xlu0 %v571_v33, %s1214_s18 }
 0x1bb   :  { %v323_v35 = vpop.xlane.xlu2 %322  ;;  %v793_v37 = vpop.xlane.xlu0 %792 }
 0x1bc   :  { %v329_v38 = vmul.f32 %v323_v35, %v1347_v52  ;;  %v799_v39 = vmul.f32 %v793_v37, %v1347_v52 }
 0x1be   :  { %v1414_v42 = vsub.f32 %v1305_v15, %v329_v38  ;;  %v1417_v43 = vsub.f32 %v1305_v15, %v799_v39 }
 0x1c0   :  { %v807_v45 = vmul.f32 %v1417_v43, %v1417_v43  ;;  %v337_v46 = vmul.f32 %v1414_v42, %v1414_v42 }
 0x1c2   :  { %817 = vrot.lane.b32.xlu2 %v807_v45, %s1213_s17  ;;  %347 = vrot.lane.b32.xlu1 %v337_v46, %s1215_s19 }
 0x1c3   :  { %819 = vrot.lane.b32.xlu0 %v808_v47, %s1213_s17  ;;  %v326_v48 = vpop.xlane.xlu0 %325 }
 0x1c4   :  { %v330_v50 = vmul.f32 %v326_v48, %v1347_v52 }
 0x1c6   :  { %v1437_v54 = vsub.f32 %v1309_v17, %v330_v50 }
 0x1c8   :  { %v338_v58 = vmul.f32 %v1437_v54, %v1437_v54 }
 0x1ca   :  { %582 = vrot.lane.b32.xlu1 %v572_v51, %s1214_s18 }
 0x1cb   :  { %v126_v53 = vpop.xlane.xlu0 %125 }
 0x1cc   :  { %v130_v56 = vmul.f32 %v126_v53, %v1347_v52 }
 0x1ce   :  { %v134_v57 = vadd.f32 1e-06, %v130_v56 }
 0x1d0   :  { %1115 = vrsqrt.f32 %v134_v57  ;;  %vm171_vm4 = vweird.f32 %v134_v57 }
 0x1d2   :  { %349 = vrot.lane.b32.xlu1 %v338_v58, %s1215_s19 }
 0x1d6   :  { %v1116_v15 = vpop.eup %1115 }
 0x1d7   :  { %v166_v59 = vmul.f32 %v1116_v15, %v134_v57  ;;  %vm172_vm3 = vweird.f32 %v1116_v15 }
 0x1d8   :  { %vm173_vm5 = vmor %vm171_vm4, %vm172_vm3 }
 0x1d9   :  { %v167_v60 = vmul.f32 %v1116_v15, %v166_v59 }
 0x1db   :  { %v168_v62 = vmul.f32 0.5, %v167_v60 }
 0x1dd   :  { %v169_v63 = vsub.f32 1.5, %v168_v62 }
 0x1df   :  { %v170_v0 = vmul.f32 %v1116_v15, %v169_v63 }
 0x1e1   :  { %v174_v1 = vsel %vm173_vm5, %v1116_v15, %v170_v0 }
 0x1e2   :  { %v178_v5 = vmul.f32 %v174_v1, %v1351_v55  ;;  %v79_v55 = vld [vmem:[%s1853_s5] sm:$0xf]  ;;  %s1218_s5 = smov 24  }
 0x1e3   :  { %v242_v24 = vsel %vm240_vm6, %v79_v55, 0 }
 0x1e4   :  { %v185_v10 = vmul.f32 %v1276_v4, %v178_v5  ;;  %1099 = vmatpush.bf16.msra.mxu2 %v242_v24  ;;  %251 = vmatpush.bf16.msra.mxu1 %v242_v24 }
 0x1e5   :  { %725 = vmatpush.bf16.msra.mxu3 %v242_v24 }
 0x1e6   :  { %v192_v12 = vadd.f32 %v1448_v8, %v185_v10 }
 0x1e8   :  { %v123_v3 = vpop.xlane.xlu1 %122  ;;  %v196_v25 = vmul.f32 %v192_v12, %v192_v12  ;;  %490 = vmatpush.bf16.msrb.mxu2 %v242_v24  ;;  %960 = vmatpush.bf16.msrb.mxu1 %v242_v24 }
 0x1e9   :  { %v129_v6 = vmul.f32 %v123_v3, %v1347_v52 }
 0x1ea   :  { %v200_v32 = vmul.f32 %v196_v25, %v192_v12 }
 0x1eb   :  { %v133_v7 = vadd.f32 1e-06, %v129_v6 }
 0x1ec   :  { %v204_v37 = vmul.f32 0.044715, %v200_v32 }
 0x1ed   :  { %1117 = vrsqrt.f32 %v133_v7  ;;  %vm161_vm8 = vweird.f32 %v133_v7 }
 0x1f2   :  { %v346_v14 = vpop.permute.xlu0 %345 }
 0x1f3   :  { %v1118_v18 = vpop.eup %1117  ;;  %v358_v19 = vsel %vm83_vm1, %v346_v14, 0.0 }
 0x1f4   :  { %v156_v20 = vmul.f32 %v1118_v18, %v133_v7  ;;  %359 = vadd.xlane.f32.xlu0 %v358_v19  ;;  %vm162_vm7 = vweird.f32 %v1118_v18 }
 0x1f5   :  { %v561_v22 = vpop.xlane.xlu2 %560  ;;  %vm163_vm9 = vmor %vm161_vm8, %vm162_vm7 }
 0x1f6   :  { %v157_v26 = vmul.f32 %v1118_v18, %v156_v20  ;;  %v565_v27 = vmul.f32 %v561_v22, %v1347_v52 }
 0x1f8   :  { %v158_v28 = vmul.f32 0.5, %v157_v26  ;;  %v1458_v29 = vsub.f32 %v1309_v17, %v565_v27  ;;  %v208_v17 = vadd.f32 %v204_v37, %v192_v12 }
 0x1fa   :  { %v159_v33 = vsub.f32 1.5, %v158_v28  ;;  %v573_v34 = vmul.f32 %v1458_v29, %v1458_v29  ;;  %v212_v47 = vmul.f32 0.7978846, %v208_v17 }
 0x1fc   :  { %v160_v35 = vmul.f32 %v1118_v18, %v159_v33  ;;  %584 = vrot.lane.b32.xlu1 %v573_v34, %s1214_s18  ;;  %1119 = vtanh.f32 %v212_v47  ;;  %v103_v33 = vmul.f32 %v1347_v52, %v1338_v36 }
 0x1fe   :  { %v164_v38 = vsel %vm163_vm9, %v1118_v18, %v160_v35  ;;  %v1485_v34 = vsub.f32 %v1291_v11, %v103_v33 }
 0x1ff   :  { %v177_v39 = vmul.f32 %v164_v38, %v1359_v61 }
 0x200   :  { %v579_v3 = vpop.permute.xlu1 %578  ;;  %v111_v35 = vmul.f32 %v1485_v34, %v1485_v34 }
 0x201   :  { %v184_v44 = vmul.f32 %v1276_v4, %v177_v39  ;;  %v590_v5 = vsel %vm83_vm1, %v579_v3, 0.0 }
 0x202   :  { %v1120_v58 = vpop.eup %1119  ;;  %v115_v37 = vsel %vm83_vm1, %v111_v35, 0.0 }
 0x203   :  { %v191_v45 = vadd.f32 %v1448_v8, %v184_v44  ;;  %v220_v15 = vadd.f32 1.0, %v1120_v58 }
 0x205   :  { %v195_v46 = vmul.f32 %v191_v45, %v191_v45  ;;  %v224_v60 = vmul.f32 0.5, %v220_v15 }
 0x207   :  { %v199_v48 = vmul.f32 %v195_v46, %v191_v45  ;;  %v228_v0 = vmul.f32 %v224_v60, %v192_v12  ;;  %v104_v46 = vmul.f32 %v1347_v52, %v1341_v40 }
 0x208   :  { %v816_v7 = vpop.permute.xlu1 %815 }
 0x209   :  { %v203_v50 = vmul.f32 0.044715, %v199_v48  ;;  %v828_v22 = vsel %vm83_vm1, %v816_v7, 0.0 }
 0x20b   :  { %v207_v51 = vadd.f32 %v203_v50, %v191_v45  ;;  %v1500_v50 = vsub.f32 %v1299_v13, %v104_v46 }
 0x20c   :  { %v344_v53 = vpop.permute.xlu2 %343 }
 0x20d   :  { %v355_v56 = vsel %vm83_vm1, %v344_v53, 0.0  ;;  %v211_v57 = vmul.f32 0.7978846, %v207_v51 }
 0x20e   :  { %356 = vadd.xlane.f32.xlu2 %v355_v56 }
 0x20f   :  { %1121 = vtanh.f32 %v211_v57  ;;  %v112_v57 = vmul.f32 %v1500_v50, %v1500_v50 }
 0x211   :  { %v118_v40 = vsel %vm83_vm1, %v112_v57, 0.0 }
 0x214   :  { %v814_v6 = vpop.permute.xlu2 %813 }
 0x215   :  { %v1122_v61 = vpop.eup %1121  ;;  %v825_v10 = vsel %vm83_vm1, %v814_v6, 0.0 }
 0x216   :  { %v219_v59 = vadd.f32 1.0, %v1122_v61 }
 0x218   :  { %v223_v62 = vmul.f32 0.5, %v219_v59 }
 0x21a   :  { %v227_v63 = vmul.f32 %v223_v62, %v191_v45 }
 0x21c   :  { %v230_v1 = vpack.c.bf16 %v228_v0, %v227_v63  ;;  %v818_v12 = vpop.permute.xlu2 %817 }
 0x21d   :  { %v831_v24 = vsel %vm83_vm1, %v818_v12, 0.0 }
 0x21e   :  { %1090 = vmatmul.msk.bf16.vlgmr.msra.gmra.mxu2 %vm83_vm1, %v230_v1 }
 0x226   :  { %591 = vadd.xlane.f32.xlu1 %v590_v5 }
 0x22c   :  { %v581_v14 = vpop.permute.xlu0 %580 }
 0x22d   :  { %v593_v19 = vsel %vm83_vm1, %v581_v14, 0.0 }
 0x22e   :  { %826 = vadd.xlane.f32.xlu1 %v825_v10 }
 0x234   :  { %v348_v18 = vpop.permute.xlu1 %347 }
 0x235   :  { %v361_v20 = vsel %vm83_vm1, %v348_v18, 0.0  ;;  %v820_v38 = vpop.permute.xlu0 %819 }
 0x236   :  { %594 = vadd.xlane.f32.xlu1 %v593_v19  ;;  %362 = vadd.xlane.f32.xlu2 %v361_v20  ;;  %v834_v39 = vsel %vm83_vm1, %v820_v38, 0.0 }
 0x23c   :  { %v583_v55 = vpop.permute.xlu1 %582 }
 0x23d   :  { %v596_v25 = vsel %vm83_vm1, %v583_v55, 0.0 }
 0x23e   :  { %829 = vadd.xlane.f32.xlu1 %v828_v22  ;;  %832 = vadd.xlane.f32.xlu2 %v831_v24 }
 0x23f   :  { %597 = vadd.xlane.f32.xlu0 %v596_v25 }
 0x244   :  { %v350_v26 = vpop.permute.xlu1 %349 }
 0x245   :  { %v364_v27 = vsel %vm83_vm1, %v350_v26, 0.0 }
 0x246   :  { %365 = vadd.xlane.f32.xlu1 %v364_v27 }
 0x253   :  { %661 = vrot.lane.b32.xlu0 %v1448_v8, %s1217_s4 }
 0x25f   :  { %426 = vrot.lane.b32.xlu1 %v1448_v8, %s1212_s11 }
 0x267   :  { %889 = vrot.lane.b32.xlu1 %v1276_v4, %s1218_s5  ;;  %v360_v17 = vpop.xlane.xlu0 %359 }
 0x268   :  { %v368_v11 = vmul.f32 %v360_v17, %v1347_v52 }
 0x26a   :  { %v372_v48 = vadd.f32 1e-06, %v368_v11 }
 0x26c   :  { %1123 = vrsqrt.f32 %v372_v48  ;;  %vm391_vm11 = vweird.f32 %v372_v48 }
 0x26e   :  { %v585_v28 = vpop.permute.xlu1 %584 }
 0x26f   :  { %v599_v32 = vsel %vm83_vm1, %v585_v28, 0.0 }
 0x270   :  { %600 = vadd.xlane.f32.xlu2 %v599_v32 }
 0x272   :  { %v1124_v15 = vpop.eup %1123 }
 0x273   :  { %v386_v59 = vmul.f32 %v1124_v15, %v372_v48  ;;  %vm392_vm10 = vweird.f32 %v1124_v15 }
 0x274   :  { %vm1517_vm14 = vmor %vm391_vm11, %vm392_vm10 }
 0x275   :  { %v387_v0 = vmul.f32 %v1124_v15, %v386_v59 }
 0x277   :  { %v388_v7 = vmul.f32 0.5, %v387_v0 }
 0x279   :  { %v389_v12 = vsub.f32 1.5, %v388_v7 }
 0x27b   :  { %v390_v28 = vmul.f32 %v1124_v15, %v389_v12 }
 0x27d   :  { %116 = vadd.xlane.f32.xlu0 %v115_v37  ;;  %v394_v17 = vsel %vm1517_vm14, %v1124_v15, %v390_v28 }
 0x281   :  { %v357_v36 = vpop.xlane.xlu2 %356 }
 0x282   :  { %v367_v47 = vmul.f32 %v357_v36, %v1347_v52 }
 0x288   :  { %654 = vrot.lane.b32.xlu2 %v1276_v4, %s1217_s4  ;;  %v371_v4 = vadd.f32 1e-06, %v367_v47 }
 0x28a   :  { %1125 = vrsqrt.f32 %v371_v4  ;;  %vm381_vm15 = vweird.f32 %v371_v4 }
 0x290   :  { %v1126_v61 = vpop.eup %1125 }
 0x291   :  { %835 = vadd.xlane.f32.xlu1 %v834_v39  ;;  %v376_v60 = vmul.f32 %v1126_v61, %v371_v4  ;;  %vm382_vm12 = vweird.f32 %v1126_v61  ;;  %v416_v4 = vmul.f32 %v394_v17, %v1366_v2 }
 0x292   :  { %vm383_vm2 = vmor %vm381_vm15, %vm382_vm12 }
 0x293   :  { %v377_v1 = vmul.f32 %v1126_v61, %v376_v60 }
 0x295   :  { %v378_v14 = vmul.f32 0.5, %v377_v1 }
 0x297   :  { %v379_v22 = vsub.f32 1.5, %v378_v14 }
 0x299   :  { %v592_v44 = vpop.xlane.xlu1 %591  ;;  %v380_v33 = vmul.f32 %v1126_v61, %v379_v22 }
 0x29a   :  { %v602_v19 = vmul.f32 %v592_v44, %v1347_v52 }
 0x29b   :  { %v384_v36 = vsel %vm383_vm2, %v1126_v61, %v380_v33 }
 0x29c   :  { %v1513_v26 = vadd.f32 1e-06, %v602_v19  ;;  %v415_v48 = vmul.f32 %v384_v36, %v1388_v23  ;;  %v423_v23 = vmul.f32 %v1327_v21, %v416_v4 }
 0x29e   :  { %v422_v61 = vmul.f32 %v1327_v21, %v415_v48  ;;  %vm616_vm10 = vweird.f32 %v1513_v26 }
 0x2a1   :  { %v1493_v45 = vpop.xlane.xlu1 %826 }
 0x2a9   :  { %v595_v51 = vpop.xlane.xlu1 %594  ;;  %v363_v53 = vpop.xlane.xlu2 %362 }
 0x2aa   :  { %896 = vrot.lane.b32.xlu1 %v1448_v8, %s1218_s5  ;;  %v369_v56 = vmul.f32 %v363_v53, %v1347_v52  ;;  %v603_v55 = vmul.f32 %v595_v51, %v1347_v52 }
 0x2ac   :  { %v373_v58 = vadd.f32 1e-06, %v369_v56  ;;  %v1515_v32 = vadd.f32 1e-06, %v603_v55 }
 0x2ae   :  { %1127 = vrsqrt.f32 %v373_v58  ;;  %vm401_vm3 = vweird.f32 %v373_v58 }
 0x2b1   :  { %119 = vadd.xlane.f32.xlu2 %v118_v40  ;;  %v1507_v13 = vpop.xlane.xlu1 %829 }
 0x2b2   :  { %v598_v20 = vpop.xlane.xlu0 %597 }
 0x2b3   :  { %v604_v25 = vmul.f32 %v598_v20, %v1347_v52 }
 0x2b4   :  { %v1128_v62 = vpop.eup %1127 }
 0x2b5   :  { %v396_v63 = vmul.f32 %v1128_v62, %v373_v58  ;;  %vm402_vm13 = vweird.f32 %v1128_v62  ;;  %v1521_v39 = vadd.f32 1e-06, %v604_v25 }
 0x2b6   :  { %vm403_vm4 = vmor %vm401_vm3, %vm402_vm13  ;;  %vm626_vm13 = vweird.f32 %v1515_v32 }
 0x2b7   :  { %v397_v3 = vmul.f32 %v1128_v62, %v396_v63  ;;  %vm636_vm15 = vweird.f32 %v1521_v39 }
 0x2b9   :  { %v366_v5 = vpop.xlane.xlu1 %365  ;;  %v398_v18 = vmul.f32 0.5, %v397_v3 }
 0x2ba   :  { %v370_v6 = vmul.f32 %v366_v5, %v1347_v52 }
 0x2bb   :  { %v399_v24 = vsub.f32 1.5, %v398_v18 }
 0x2bc   :  { %v374_v10 = vadd.f32 1e-06, %v370_v6 }
 0x2bd   :  { %v400_v35 = vmul.f32 %v1128_v62, %v399_v24 }
 0x2be   :  { %1129 = vrsqrt.f32 %v374_v10  ;;  %vm411_vm6 = vweird.f32 %v374_v10 }
 0x2bf   :  { %1131 = vrsqrt.f32 %v1513_v26  ;;  %v404_v11 = vsel %vm403_vm4, %v1128_v62, %v400_v35  ;;  %v1572_v35 = vpop.xlane.xlu2 %832 }
 0x2c0   :  { %1133 = vrsqrt.f32 %v1515_v32  ;;  %v417_v51 = vmul.f32 %v404_v11, %v1414_v42 }
 0x2c1   :  { %1135 = vrsqrt.f32 %v1521_v39 }
 0x2c2   :  { %v424_v2 = vmul.f32 %v1327_v21, %v417_v51 }
 0x2c4   :  { %v1130_v27 = vpop.eup %1129 }
 0x2c5   :  { %v406_v37 = vmul.f32 %v1130_v27, %v374_v10  ;;  %vm412_vm5 = vweird.f32 %v1130_v27  ;;  %v1531_v53 = vpop.eup %1131 }
 0x2c6   :  { %v1533_v57 = vpop.eup %1133  ;;  %vm413_vm7 = vmor %vm411_vm6, %vm412_vm5  ;;  %v611_v42 = vmul.f32 %v1531_v53, %v1513_v26  ;;  %vm617_vm8 = vweird.f32 %v1531_v53 }
 0x2c7   :  { %v407_v44 = vmul.f32 %v1130_v27, %v406_v37  ;;  %v1535_v40 = vpop.eup %1135  ;;  %v621_v59 = vmul.f32 %v1533_v57, %v1515_v32  ;;  %vm627_vm9 = vweird.f32 %v1533_v57  ;;  %vm1584_vm12 = vmor %vm616_vm10, %vm617_vm8 }
 0x2c8   :  { %v631_v1 = vmul.f32 %v1535_v40, %v1521_v39  ;;  %v612_v7 = vmul.f32 %v1531_v53, %v611_v42  ;;  %vm637_vm11 = vweird.f32 %v1535_v40  ;;  %vm1590_vm14 = vmor %vm626_vm13, %vm627_vm9 }
 0x2c9   :  { %v408_v46 = vmul.f32 0.5, %v407_v44  ;;  %v622_v10 = vmul.f32 %v1533_v57, %v621_v59  ;;  %vm638_vm2 = vmor %vm636_vm15, %vm637_vm11 }
 0x2ca   :  { %v632_v12 = vmul.f32 %v1535_v40, %v631_v1 }
 0x2cb   :  { %v409_v47 = vsub.f32 1.5, %v408_v46  ;;  %v623_v28 = vmul.f32 0.5, %v622_v10 }
 0x2cc   :  { %v633_v37 = vmul.f32 0.5, %v632_v12 }
 0x2cd   :  { %v410_v56 = vmul.f32 %v1130_v27, %v409_v47  ;;  %v624_v4 = vsub.f32 1.5, %v623_v28 }
 0x2ce   :  { %v634_v51 = vsub.f32 1.5, %v633_v37  ;;  %v662_v37 = vpop.permute.xlu0 %661 }
 0x2cf   :  { %v414_v58 = vsel %vm413_vm7, %v1130_v27, %v410_v56  ;;  %v613_v27 = vmul.f32 0.5, %v612_v7 }
 0x2d0   :  { %v418_v15 = vmul.f32 %v414_v58, %v1437_v54 }
 0x2d1   :  { %v427_v60 = vpop.permute.xlu1 %426  ;;  %v614_v48 = vsub.f32 1.5, %v613_v27 }
 0x2d2   :  { %v425_v62 = vmul.f32 %v1327_v21, %v418_v15  ;;  %v1546_v63 = vadd.f32 %v427_v60, %v422_v61  ;;  %v1548_v0 = vadd.f32 %v427_v60, %v423_v23  ;;  %v1550_v54 = vadd.f32 %v427_v60, %v424_v2 }
 0x2d3   :  { %v615_v58 = vmul.f32 %v1531_v53, %v614_v48  ;;  %v625_v15 = vmul.f32 %v1533_v57, %v624_v4  ;;  %v635_v61 = vmul.f32 %v1535_v40, %v634_v51 }
 0x2d4   :  { %v1554_v3 = vadd.f32 %v427_v60, %v425_v62  ;;  %v433_v5 = vmul.f32 %v1546_v63, %v1546_v63  ;;  %v434_v6 = vmul.f32 %v1548_v0, %v1548_v0  ;;  %v435_v21 = vmul.f32 %v1550_v54, %v1550_v54 }
 0x2d5   :  { %v639_v32 = vsel %vm638_vm2, %v1535_v40, %v635_v61  ;;  %v629_v10 = vsel %vm1590_vm14, %v1533_v57, %v625_v15 }
 0x2d6   :  { %v436_v14 = vmul.f32 %v1554_v3, %v1554_v3  ;;  %v437_v18 = vmul.f32 %v433_v5, %v1546_v63  ;;  %v438_v19 = vmul.f32 %v434_v6, %v1548_v0  ;;  %v439_v20 = vmul.f32 %v435_v21, %v1550_v54 }
 0x2d7   :  { %v619_v6 = vsel %vm1584_vm12, %v1531_v53, %v615_v58  ;;  %v652_v53 = vmul.f32 %v639_v32, %v1430_v49 }
 0x2d8   :  { %v441_v55 = vmul.f32 0.044715, %v437_v18  ;;  %v442_v22 = vmul.f32 0.044715, %v438_v19  ;;  %v440_v24 = vmul.f32 %v436_v14, %v1554_v3  ;;  %v443_v25 = vmul.f32 0.044715, %v439_v20 }
 0x2d9   :  { %v650_v20 = vmul.f32 %v619_v6, %v1374_v9  ;;  %v1645_v32 = vpop.permute.xlu1 %889 }
 0x2da   :  { %v445_v33 = vadd.f32 %v441_v55, %v1546_v63  ;;  %v446_v38 = vadd.f32 %v442_v22, %v1548_v0  ;;  %v444_v44 = vmul.f32 0.044715, %v440_v24  ;;  %v447_v17 = vadd.f32 %v443_v25, %v1550_v54 }
 0x2db   :  { %v651_v22 = vmul.f32 %v629_v10, %v1399_v31  ;;  %v837_v31 = vmul.f32 %v1493_v45, %v1347_v52 }
 0x2dc   :  { %v449_v36 = vmul.f32 0.7978846, %v445_v33  ;;  %v450_v11 = vmul.f32 0.7978846, %v446_v38  ;;  %v448_v46 = vadd.f32 %v444_v44, %v1554_v3  ;;  %v451_v47 = vmul.f32 0.7978846, %v447_v17 }
 0x2de   :  { %1137 = vtanh.f32 %v449_v36  ;;  %v452_v56 = vmul.f32 0.7978846, %v448_v46 }
 0x2df   :  { %1139 = vtanh.f32 %v450_v11  ;;  %v838_v11 = vmul.f32 %v1507_v13, %v1347_v52  ;;  %v1631_v13 = vadd.f32 1e-06, %v837_v31 }
 0x2e0   :  { %1141 = vtanh.f32 %v451_v47  ;;  %v839_v47 = vmul.f32 %v1572_v35, %v1347_v52 }
 0x2e1   :  { %1143 = vtanh.f32 %v452_v56  ;;  %v1633_v56 = vadd.f32 1e-06, %v838_v11  ;;  %vm851_vm6 = vweird.f32 %v1631_v13 }
 0x2e3   :  { %v601_v23 = vpop.xlane.xlu2 %600  ;;  %vm861_vm11 = vweird.f32 %v1633_v56 }
 0x2e4   :  { %v1138_v2 = vpop.eup %1137  ;;  %v605_v59 = vmul.f32 %v601_v23, %v1347_v52  ;;  %v1636_v23 = vadd.f32 1e-06, %v839_v47 }
 0x2e5   :  { %v1140_v60 = vpop.eup %1139  ;;  %v457_v26 = vadd.f32 1.0, %v1138_v2 }
 0x2e6   :  { %v1142_v1 = vpop.eup %1141  ;;  %v609_v5 = vadd.f32 1e-06, %v605_v59  ;;  %v458_v21 = vadd.f32 1.0, %v1140_v60  ;;  %vm871_vm13 = vweird.f32 %v1636_v23 }
 0x2e7   :  { %v1144_v7 = vpop.eup %1143  ;;  %v461_v14 = vmul.f32 0.5, %v457_v26  ;;  %v459_v18 = vadd.f32 1.0, %v1142_v1 }
 0x2e8   :  { %1145 = vrsqrt.f32 %v609_v5  ;;  %v462_v39 = vmul.f32 0.5, %v458_v21  ;;  %v460_v19 = vadd.f32 1.0, %v1144_v7  ;;  %vm646_vm4 = vweird.f32 %v609_v5 }
 0x2e9   :  { %v465_v12 = vmul.f32 %v461_v14, %v1546_v63  ;;  %v463_v55 = vmul.f32 0.5, %v459_v18  ;;  %1147 = vrsqrt.f32 %v1631_v13 }
 0x2ea   :  { %v466_v40 = vmul.f32 %v462_v39, %v1548_v0  ;;  %v464_v24 = vmul.f32 0.5, %v460_v19  ;;  %1149 = vrsqrt.f32 %v1633_v56 }
 0x2eb   :  { %v655_v25 = vpop.permute.xlu2 %654  ;;  %v467_v38 = vmul.f32 %v463_v55, %v1550_v54  ;;  %1151 = vrsqrt.f32 %v1636_v23 }
 0x2ec   :  { %v657_v27 = vmul.f32 %v655_v25, %v650_v20  ;;  %v658_v57 = vmul.f32 %v655_v25, %v651_v22  ;;  %v659_v28 = vmul.f32 %v655_v25, %v652_v53  ;;  %v469_v33 = vpack.c.bf16 %v466_v40, %v465_v12 }
 0x2ed   :  { %v468_v9 = vmul.f32 %v464_v24, %v1554_v3 }
 0x2ee   :  { %v1146_v44 = vpop.eup %1145  ;;  %v1609_v63 = vadd.f32 %v662_v37, %v657_v27  ;;  %v1611_v17 = vadd.f32 %v662_v37, %v658_v57  ;;  %v1613_v49 = vadd.f32 %v662_v37, %v659_v28  ;;  %473 = vrot.lane.b32.xlu1 %v469_v33, %s1215_s19 }
 0x2ef   :  { %v641_v0 = vmul.f32 %v1146_v44, %v609_v5  ;;  %v470_v36 = vpack.c.bf16 %v468_v9, %v467_v38  ;;  %vm647_vm3 = vweird.f32 %v1146_v44  ;;  %v1648_v14 = vpop.eup %1147 }
 0x2f0   :  { %v668_v54 = vmul.f32 %v1609_v63, %v1609_v63  ;;  %v669_v3 = vmul.f32 %v1611_v17, %v1611_v17  ;;  %v670_v46 = vmul.f32 %v1613_v49, %v1613_v49  ;;  %vm648_vm5 = vmor %vm646_vm4, %vm647_vm3  ;;  %v117_v60 = vpop.xlane.xlu0 %116  ;;  %v1650_v18 = vpop.eup %1149  ;;  %v846_v22 = vmul.f32 %v1648_v14, %v1631_v13 }
 0x2f1   :  { %v642_v48 = vmul.f32 %v1146_v44, %v641_v0  ;;  %475 = vrot.lane.b32.xlu0 %v470_v36, %s1215_s19  ;;  %v127_v7 = vmul.f32 %v117_v60, %v1347_v52  ;;  %v1654_v19 = vpop.eup %1151  ;;  %v856_v24 = vmul.f32 %v1650_v18, %v1633_v56  ;;  %vm852_vm7 = vweird.f32 %v1648_v14 }
 0x2f2   :  { %v672_v45 = vmul.f32 %v668_v54, %v1609_v63  ;;  %v673_v4 = vmul.f32 %v669_v3, %v1611_v17  ;;  %v674_v61 = vmul.f32 %v670_v46, %v1613_v49  ;;  %v847_v9 = vmul.f32 %v1648_v14, %v846_v22  ;;  %vm1688_vm10 = vmor %vm851_vm6, %vm852_vm7 }
 0x2f3   :  { %v643_v51 = vmul.f32 0.5, %v642_v48  ;;  %v1656_v20 = vadd.f32 1e-06, %v127_v7  ;;  %v857_v0 = vmul.f32 %v1650_v18, %v856_v24  ;;  %vm862_vm8 = vweird.f32 %v1650_v18 }
 0x2f4   :  { %v676_v58 = vmul.f32 0.044715, %v672_v45  ;;  %v677_v15 = vmul.f32 0.044715, %v673_v4  ;;  %v678_v1 = vmul.f32 0.044715, %v674_v61  ;;  %vm872_vm9 = vweird.f32 %v1654_v19  ;;  %vm1693_vm12 = vmor %vm861_vm11, %vm862_vm8 }
 0x2f5   :  { %v644_v2 = vsub.f32 1.5, %v643_v51  ;;  %v848_v45 = vmul.f32 0.5, %v847_v9  ;;  %v858_v51 = vmul.f32 0.5, %v857_v0  ;;  %vm873_vm14 = vmor %vm871_vm13, %vm872_vm9  ;;  %vm1070_vm11 = vcmask 523264  }
 0x2f6   :  { %v680_v35 = vadd.f32 %v676_v58, %v1609_v63  ;;  %v681_v42 = vadd.f32 %v677_v15, %v1611_v17  ;;  %v682_v5 = vadd.f32 %v678_v1, %v1613_v49 }
 0x2f7   :  { %v645_v59 = vmul.f32 %v1146_v44, %v644_v2  ;;  %v849_v15 = vsub.f32 1.5, %v848_v45  ;;  %v859_v61 = vsub.f32 1.5, %v858_v51 }
 0x2f8   :  { %v684_v62 = vmul.f32 0.7978846, %v680_v35  ;;  %v685_v26 = vmul.f32 0.7978846, %v681_v42  ;;  %v686_v55 = vmul.f32 0.7978846, %v682_v5 }
 0x2f9   :  { %v649_v6 = vsel %vm648_vm5, %v1146_v44, %v645_v59  ;;  %vm141_vm5 = vweird.f32 %v1656_v20 }
 0x2fa   :  { %v653_v21 = vmul.f32 %v649_v6, %v1458_v29  ;;  %1153 = vtanh.f32 %v684_v62  ;;  %v850_v62 = vmul.f32 %v1648_v14, %v849_v15  ;;  %v860_v6 = vmul.f32 %v1650_v18, %v859_v61 }
 0x2fb   :  { %1155 = vtanh.f32 %v685_v26 }
 0x2fc   :  { %v660_v10 = vmul.f32 %v655_v25, %v653_v21  ;;  %v866_v25 = vmul.f32 %v1654_v19, %v1636_v23  ;;  %1157 = vrsqrt.f32 %v1656_v20  ;;  %v864_v56 = vsel %vm1693_vm12, %v1650_v18, %v860_v6 }
 0x2fd   :  { %1159 = vtanh.f32 %v686_v55  ;;  %v854_v55 = vsel %vm1688_vm10, %v1648_v14, %v850_v62  ;;  %v886_v14 = vmul.f32 %v864_v56, %v1381_v16  ;;  %vm1065_vm10 = vcmask 392192  }
 0x2fe   :  { %v1652_v39 = vadd.f32 %v662_v37, %v660_v10  ;;  %v867_v36 = vmul.f32 %v1654_v19, %v866_v25 }
 0x300   :  { %v1154_v29 = vpop.eup %1153  ;;  %v671_v12 = vmul.f32 %v1652_v39, %v1652_v39  ;;  %v868_v58 = vmul.f32 0.5, %v867_v36 }
 0x301   :  { %v1156_v53 = vpop.eup %1155  ;;  %v692_v40 = vadd.f32 1.0, %v1154_v29 }
 0x302   :  { %v693_v27 = vadd.f32 1.0, %v1156_v53  ;;  %v675_v57 = vmul.f32 %v671_v12, %v1652_v39  ;;  %v1675_v48 = vpop.eup %1157  ;;  %v869_v2 = vsub.f32 1.5, %v868_v58 }
 0x303   :  { %v696_v28 = vmul.f32 0.5, %v692_v40  ;;  %v1160_v4 = vpop.eup %1159  ;;  %vm142_vm4 = vweird.f32 %v1675_v48 }
 0x304   :  { %v836_v33 = vpop.xlane.xlu1 %835  ;;  %v697_v37 = vmul.f32 0.5, %v693_v27  ;;  %v679_v38 = vmul.f32 0.044715, %v675_v57  ;;  %v870_v21 = vmul.f32 %v1654_v19, %v869_v2  ;;  %v885_v57 = vmul.f32 %v854_v55, %v1396_v30  ;;  %vm143_vm6 = vmor %vm141_vm5, %vm142_vm4 }
 0x305   :  { %v840_v44 = vmul.f32 %v836_v33, %v1347_v52  ;;  %v700_v31 = vmul.f32 %v696_v28, %v1609_v63  ;;  %v136_v63 = vmul.f32 %v1675_v48, %v1656_v20 }
 0x306   :  { %v701_v11 = vmul.f32 %v697_v37, %v1611_v17  ;;  %v683_v54 = vadd.f32 %v679_v38, %v1652_v39  ;;  %v694_v17 = vadd.f32 1.0, %v1160_v4  ;;  %v874_v40 = vsel %vm873_vm14, %v1654_v19, %v870_v21 }
 0x307   :  { %v844_v3 = vadd.f32 1e-06, %v840_v44  ;;  %v137_v59 = vmul.f32 %v1675_v48, %v136_v63  ;;  %v892_v18 = vmul.f32 %v1645_v32, %v885_v57  ;;  %v893_v19 = vmul.f32 %v1645_v32, %v886_v14 }
 0x308   :  { %v704_v46 = vpack.c.bf16 %v701_v11, %v700_v31  ;;  %v687_v47 = vmul.f32 0.7978846, %v683_v54  ;;  %v698_v1 = vmul.f32 0.5, %v694_v17 }
 0x309   :  { %1161 = vrsqrt.f32 %v844_v3  ;;  %v138_v29 = vmul.f32 0.5, %v137_v59  ;;  %vm881_vm2 = vweird.f32 %v844_v3 }
 0x30a   :  { %708 = vrot.lane.b32.xlu1 %v704_v46, %s1214_s18  ;;  %1163 = vtanh.f32 %v687_v47  ;;  %v702_v53 = vmul.f32 %v698_v1, %v1613_v49  ;;  %v887_v49 = vmul.f32 %v874_v40, %v1417_v43 }
 0x30b   :  { %v139_v25 = vsub.f32 1.5, %v138_v29 }
 0x30c   :  { %v894_v28 = vmul.f32 %v1645_v32, %v887_v49 }
 0x30d   :  { %v140_v37 = vmul.f32 %v1675_v48, %v139_v25 }
 0x30f   :  { %v1162_v35 = vpop.eup %1161  ;;  %v144_v36 = vsel %vm143_vm6, %v1675_v48, %v140_v37 }
 0x310   :  { %v1164_v42 = vpop.eup %1163  ;;  %v876_v60 = vmul.f32 %v1162_v35, %v844_v3  ;;  %vm882_vm15 = vweird.f32 %v1162_v35  ;;  %v175_v4 = vmul.f32 %v144_v36, %v1485_v34 }
 0x311   :  { %v695_v26 = vadd.f32 1.0, %v1164_v42  ;;  %vm883_vm3 = vmor %vm881_vm2, %vm882_vm15 }
 0x312   :  { %v877_v7 = vmul.f32 %v1162_v35, %v876_v60  ;;  %v1211_v60 = vld [vmem:[%s1850_s3] ss:$0 sm:$0xff] }
 0x313   :  { %v699_v10 = vmul.f32 0.5, %v695_v26  ;;  %v182_v62 = vmul.f32 %v1211_v60, %v175_v4 }
 0x314   :  { %v878_v12 = vmul.f32 0.5, %v877_v7 }
 0x315   :  { %v703_v22 = vmul.f32 %v699_v10, %v1652_v39 }
 0x316   :  { %v879_v24 = vsub.f32 1.5, %v878_v12 }
 0x317   :  { %v705_v23 = vpack.c.bf16 %v703_v22, %v702_v53 }
 0x318   :  { %v880_v27 = vmul.f32 %v1162_v35, %v879_v24 }
 0x319   :  { %710 = vrot.lane.b32.xlu2 %v705_v23, %s1214_s18 }
 0x31a   :  { %v884_v39 = vsel %vm883_vm3, %v1162_v35, %v880_v27 }
 0x31b   :  { %v888_v33 = vmul.f32 %v884_v39, %v1411_v41 }
 0x31c   :  { %v897_v30 = vpop.permute.xlu1 %896 }
 0x31d   :  { %v895_v16 = vmul.f32 %v1645_v32, %v888_v33  ;;  %v899_v43 = vadd.f32 %v897_v30, %v892_v18  ;;  %v900_v38 = vadd.f32 %v897_v30, %v893_v19  ;;  %v1718_v9 = vadd.f32 %v897_v30, %v894_v28 }
 0x31f   :  { %v1721_v44 = vadd.f32 %v897_v30, %v895_v16  ;;  %v903_v31 = vmul.f32 %v899_v43, %v899_v43  ;;  %v904_v0 = vmul.f32 %v900_v38, %v900_v38  ;;  %v905_v41 = vmul.f32 %v1718_v9, %v1718_v9 }
 0x321   :  { %v906_v11 = vmul.f32 %v1721_v44, %v1721_v44  ;;  %v907_v32 = vmul.f32 %v903_v31, %v899_v43  ;;  %v908_v54 = vmul.f32 %v904_v0, %v900_v38  ;;  %v909_v3 = vmul.f32 %v905_v41, %v1718_v9 }
 0x323   :  { %v911_v46 = vmul.f32 0.044715, %v907_v32  ;;  %v912_v47 = vmul.f32 0.044715, %v908_v54  ;;  %v910_v20 = vmul.f32 %v906_v11, %v1721_v44  ;;  %v913_v45 = vmul.f32 0.044715, %v909_v3 }
 0x324   :  { %v120_v51 = vpop.xlane.xlu2 %119 }
 0x325   :  { %v128_v58 = vmul.f32 %v120_v51, %v1347_v52  ;;  %v915_v63 = vadd.f32 %v911_v46, %v899_v43  ;;  %v916_v15 = vadd.f32 %v912_v47, %v900_v38  ;;  %v914_v48 = vmul.f32 0.044715, %v910_v20 }
 0x326   :  { %v917_v17 = vadd.f32 %v913_v45, %v1718_v9  ;;  %v189_v52 = vadd.f32 %v1448_v8, %v182_v62 }
 0x327   :  { %v132_v61 = vadd.f32 1e-06, %v128_v58  ;;  %v919_v2 = vmul.f32 0.7978846, %v915_v63  ;;  %v920_v35 = vmul.f32 0.7978846, %v916_v15  ;;  %v918_v42 = vadd.f32 %v914_v48, %v1721_v44  ;;  %v1751_v48 = vpop.f32.mrf.mxu2 }
 0x328   :  { %v921_v59 = vmul.f32 0.7978846, %v917_v17  ;;  %v193_v13 = vmul.f32 %v189_v52, %v189_v52 }
 0x329   :  { %1165 = vrsqrt.f32 %v132_v61  ;;  %v922_v34 = vmul.f32 0.7978846, %v918_v42  ;;  %vm151_vm8 = vweird.f32 %v132_v61 }
 0x32a   :  { %1167 = vtanh.f32 %v919_v2  ;;  %v197_v24 = vmul.f32 %v193_v13, %v189_v52 }
 0x32b   :  { %1169 = vtanh.f32 %v920_v35 }
 0x32c   :  { %1171 = vtanh.f32 %v921_v59  ;;  %v201_v39 = vmul.f32 0.044715, %v197_v24 }
 0x32d   :  { %1173 = vtanh.f32 %v922_v34 }
 0x32e   :  { %v205_v30 = vadd.f32 %v201_v39, %v189_v52 }
 0x32f   :  { %v1166_v26 = vpop.eup %1165  ;;  %v1753_v17 = vpop.f32.mrf.mxu2 }
 0x330   :  { %v1168_v1 = vpop.eup %1167  ;;  %v146_v6 = vmul.f32 %v1166_v26, %v132_v61  ;;  %vm152_vm7 = vweird.f32 %v1166_v26  ;;  %v209_v0 = vmul.f32 0.7978846, %v205_v30  ;;  %v1758_v61 = vld [vmem:[%s1854_s6] ss:$0 sm:$0xff]  ;;  %s1219_s6 = smov 32  }
 0x331   :  { %v1170_v21 = vpop.eup %1169  ;;  %v927_v7 = vadd.f32 1.0, %v1168_v1  ;;  %vm153_vm9 = vmor %vm151_vm8, %vm152_vm7 }
 0x332   :  { %v1172_v10 = vpop.eup %1171  ;;  %v147_v5 = vmul.f32 %v1166_v26, %v146_v6  ;;  %v928_v29 = vadd.f32 1.0, %v1170_v21  ;;  %1175 = vtanh.f32 %v209_v0 }
 0x333   :  { %v1174_v12 = vpop.eup %1173  ;;  %v931_v55 = vmul.f32 0.5, %v927_v7  ;;  %v929_v27 = vadd.f32 1.0, %v1172_v10 }
 0x334   :  { %v148_v53 = vmul.f32 0.5, %v147_v5  ;;  %v932_v22 = vmul.f32 0.5, %v928_v29  ;;  %v930_v56 = vadd.f32 1.0, %v1174_v12 }
 0x335   :  { %v935_v40 = vmul.f32 %v931_v55, %v899_v43  ;;  %v933_v19 = vmul.f32 0.5, %v929_v27 }
 0x336   :  { %v149_v23 = vsub.f32 1.5, %v148_v53  ;;  %v936_v25 = vmul.f32 %v932_v22, %v900_v38  ;;  %v934_v49 = vmul.f32 0.5, %v930_v56 }
 0x337   :  { %v937_v16 = vmul.f32 %v933_v19, %v1718_v9 }
 0x338   :  { %v150_v57 = vmul.f32 %v1166_v26, %v149_v23  ;;  %v939_v14 = vpack.c.bf16 %v936_v25, %v935_v40  ;;  %v938_v33 = vmul.f32 %v934_v49, %v1721_v44  ;;  %v1176_v54 = vpop.eup %1175 }
 0x33a   :  { %v154_v18 = vsel %vm153_vm9, %v1166_v26, %v150_v57  ;;  %943 = vrot.lane.b32.xlu1 %v939_v14, %s1213_s17  ;;  %v940_v38 = vpack.c.bf16 %v938_v33, %v937_v16 }
 0x33b   :  { %v176_v28 = vmul.f32 %v154_v18, %v1500_v50  ;;  %v217_v50 = vadd.f32 1.0, %v1176_v54 }
 0x33d   :  { %v183_v37 = vmul.f32 %v1211_v60, %v176_v28  ;;  %v221_v46 = vmul.f32 0.5, %v217_v50 }
 0x33f   :  { %v190_v43 = vadd.f32 %v1448_v8, %v183_v37  ;;  %v225_v9 = vmul.f32 %v221_v46, %v189_v52 }
 0x341   :  { %v194_v31 = vmul.f32 %v190_v43, %v190_v43 }
 0x342   :  { %945 = vrot.lane.b32.xlu1 %v940_v38, %s1213_s17 }
 0x343   :  { %v198_v41 = vmul.f32 %v194_v31, %v190_v43 }
 0x345   :  { %v202_v36 = vmul.f32 0.044715, %v198_v41 }
 0x347   :  { %v206_v11 = vadd.f32 %v202_v36, %v190_v43 }
 0x349   :  { %v210_v32 = vmul.f32 0.7978846, %v206_v11 }
 0x34b   :  { %1177 = vtanh.f32 %v210_v32 }
 0x351   :  { %v1178_v44 = vpop.eup %1177 }
 0x352   :  { %v218_v3 = vadd.f32 1.0, %v1178_v44 }
 0x354   :  { %v222_v47 = vmul.f32 0.5, %v218_v3 }
 0x356   :  { %v226_v20 = vmul.f32 %v222_v47, %v190_v43 }
 0x358   :  { %v229_v8 = vpack.c.bf16 %v226_v20, %v225_v9 }
 0x35a   :  { %1089 = vmatmul.msk.bf16.vlgmr.msra.gmra.mxu1 %vm83_vm1, %v229_v8 }
 0x360   :  { %v474_v45 = vpop.permute.xlu1 %473 }
 0x361   :  { %1091 = vmatmul.msk.bf16.vlgmr.msrb.gmra.mxu2 %vm83_vm1, %v474_v45 }
 0x363   :  { %v476_v4 = vpop.permute.xlu0 %475 }
 0x371   :  { %1092 = vmatmul.msk.bf16.gmra.mxu2 %vm83_vm1, %v476_v4 }
 0x373   :  { %v711_v58 = vpop.permute.xlu2 %710 }
 0x37c   :  { %v709_v51 = vpop.permute.xlu1 %708 }
 0x37d   :  { %1093 = vmatmul.msk.bf16.vlgmr.msra.gmra.mxu3 %vm83_vm1, %v709_v51 }
 0x38d   :  { %1094 = vmatmul.msk.bf16.gmra.mxu3 %vm83_vm1, %v711_v58 }
 0x3ac   :  { %v944_v63 = vpop.permute.xlu1 %943 }
 0x3ad   :  { %1095 = vmatmul.msk.bf16.vlgmr.msrb.gmra.mxu1 %vm83_vm1, %v944_v63 }
 0x3b4   :  { %v946_v15 = vpop.permute.xlu1 %945 }
 0x3bd   :  { %1096 = vmatmul.msk.bf16.gmra.mxu1 %vm83_vm1, %v946_v15  ;;  %vm1056_vm1 = vcmask 130048  }
 0x3d7   :  { %v1774_v41 = vpop.f32.mrf.mxu1 }
 0x3df   :  { %v1781_v51 = vpop.f32.mrf.mxu1 }
 0x3e4   :  { %v492_v2 = vpop.f32.mrf.mxu2 }
 0x3e5   :  { %v493_v35 = vadd.f32 %v1758_v61, %v492_v2 }
 0x3e7   :  { %v502_v42 = vmul.f32 %v493_v35, %v493_v35 }
 0x3e9   :  { %v506_v59 = vmul.f32 %v502_v42, %v493_v35 }
 0x3eb   :  { %v510_v60 = vmul.f32 0.044715, %v506_v59 }
 0x3ec   :  { %v494_v52 = vpop.f32.mrf.mxu2 }
 0x3ed   :  { %v514_v62 = vadd.f32 %v510_v60, %v493_v35  ;;  %v495_v1 = vadd.f32 %v1758_v61, %v494_v52 }
 0x3ef   :  { %v518_v34 = vmul.f32 0.7978846, %v514_v62  ;;  %v503_v13 = vmul.f32 %v495_v1, %v495_v1 }
 0x3f1   :  { %1179 = vtanh.f32 %v518_v34  ;;  %v507_v5 = vmul.f32 %v503_v13, %v495_v1 }
 0x3f3   :  { %v511_v55 = vmul.f32 0.044715, %v507_v5 }
 0x3f4   :  { %v1762_v21 = vpop.f32.mrf.mxu2 }
 0x3f5   :  { %v515_v40 = vadd.f32 %v511_v55, %v495_v1  ;;  %v1788_v62 = vadd.f32 %v1758_v61, %v1762_v21 }
 0x3f7   :  { %v1180_v26 = vpop.eup %1179  ;;  %v519_v49 = vmul.f32 0.7978846, %v515_v40  ;;  %v504_v13 = vmul.f32 %v1788_v62, %v1788_v62 }
 0x3f8   :  { %v526_v6 = vadd.f32 1.0, %v1180_v26 }
 0x3fa   :  { %v530_v7 = vmul.f32 0.5, %v526_v6 }
 0x3fc   :  { %v534_v10 = vmul.f32 %v530_v7, %v493_v35  ;;  %v499_v22 = vpop.f32.mrf.mxu2 }
 0x3fd   :  { %v1767_v24 = vadd.f32 %v1758_v61, %v499_v22 }
 0x3fe   :  { %1012 = vrot.lane.b32.xlu1 %v534_v10, %s1217_s4 }
 0x3ff   :  { %v505_v57 = vmul.f32 %v1767_v24, %v1767_v24 }
 0x400   :  { %v727_v29 = vpop.f32.mrf.mxu3 }
 0x401   :  { %v728_v12 = vadd.f32 %v1758_v61, %v727_v29  ;;  %v509_v39 = vmul.f32 %v505_v57, %v1767_v24 }
 0x403   :  { %v737_v53 = vmul.f32 %v728_v12, %v728_v12  ;;  %v513_v33 = vmul.f32 0.044715, %v509_v39 }
 0x405   :  { %v741_v56 = vmul.f32 %v737_v53, %v728_v12  ;;  %v517_v31 = vadd.f32 %v513_v33, %v1767_v24  ;;  %v508_v53 = vmul.f32 %v504_v13, %v1788_v62 }
 0x407   :  { %v745_v23 = vmul.f32 0.044715, %v741_v56  ;;  %v521_v46 = vmul.f32 0.7978846, %v517_v31 }
 0x408   :  { %v729_v25 = vpop.f32.mrf.mxu3 }
 0x409   :  { %v749_v27 = vadd.f32 %v745_v23, %v728_v12  ;;  %v1779_v45 = vadd.f32 %v1758_v61, %v729_v25 }
 0x40b   :  { %v753_v14 = vmul.f32 0.7978846, %v749_v27  ;;  %v738_v35 = vmul.f32 %v1779_v45, %v1779_v45  ;;  %v512_v27 = vmul.f32 0.044715, %v508_v53 }
 0x40d   :  { %1181 = vtanh.f32 %v753_v14  ;;  %v742_v34 = vmul.f32 %v738_v35, %v1779_v45 }
 0x40e   :  { %1183 = vtanh.f32 %v519_v49 }
 0x40f   :  { %v746_v10 = vmul.f32 0.044715, %v742_v34 }
 0x410   :  { %v732_v18 = vpop.f32.mrf.mxu3 }
 0x411   :  { %v733_v19 = vadd.f32 %v1758_v61, %v732_v18  ;;  %v750_v22 = vadd.f32 %v746_v10, %v1779_v45 }
 0x413   :  { %v1182_v28 = vpop.eup %1181  ;;  %v739_v37 = vmul.f32 %v733_v19, %v733_v19  ;;  %v754_v49 = vmul.f32 0.7978846, %v750_v22 }
 0x414   :  { %v761_v30 = vadd.f32 1.0, %v1182_v28  ;;  %v1184_v16 = vpop.eup %1183 }
 0x415   :  { %v743_v43 = vmul.f32 %v739_v37, %v733_v19  ;;  %v527_v32 = vadd.f32 1.0, %v1184_v16 }
 0x416   :  { %v765_v38 = vmul.f32 0.5, %v761_v30 }
 0x417   :  { %v747_v0 = vmul.f32 0.044715, %v743_v43  ;;  %v531_v47 = vmul.f32 0.5, %v527_v32 }
 0x418   :  { %v734_v36 = vpop.f32.mrf.mxu3  ;;  %v769_v11 = vmul.f32 %v765_v38, %v728_v12 }
 0x419   :  { %v751_v54 = vadd.f32 %v747_v0, %v733_v19  ;;  %v735_v50 = vadd.f32 %v1758_v61, %v734_v36  ;;  %v535_v8 = vmul.f32 %v531_v47, %v495_v1 }
 0x41a   :  { %1028 = vrot.lane.b32.xlu1 %v769_v11, %s1219_s6 }
 0x41b   :  { %v740_v44 = vmul.f32 %v735_v50, %v735_v50  ;;  %v755_v3 = vmul.f32 0.7978846, %v751_v54 }
 0x41d   :  { %v744_v9 = vmul.f32 %v740_v44, %v735_v50  ;;  %1185 = vtanh.f32 %v755_v3 }
 0x41e   :  { %1187 = vtanh.f32 %v521_v46 }
 0x41f   :  { %v748_v20 = vmul.f32 0.044715, %v744_v9 }
 0x421   :  { %v752_v4 = vadd.f32 %v748_v20, %v735_v50 }
 0x422   :  { %1014 = vrot.lane.b32.xlu1 %v535_v8, %s1217_s4 }
 0x423   :  { %v1186_v58 = vpop.eup %1185  ;;  %v756_v63 = vmul.f32 0.7978846, %v752_v4 }
 0x424   :  { %v763_v15 = vadd.f32 1.0, %v1186_v58  ;;  %v1188_v2 = vpop.eup %1187 }
 0x425   :  { %1189 = vtanh.f32 %v756_v63  ;;  %v529_v60 = vadd.f32 1.0, %v1188_v2 }
 0x426   :  { %v767_v42 = vmul.f32 0.5, %v763_v15 }
 0x427   :  { %v533_v6 = vmul.f32 0.5, %v529_v60 }
 0x428   :  { %v771_v59 = vmul.f32 %v767_v42, %v733_v19 }
 0x429   :  { %v537_v21 = vmul.f32 %v533_v6, %v1767_v24  ;;  %v516_v24 = vadd.f32 %v512_v27, %v1788_v62 }
 0x42a   :  { %1032 = vrot.lane.b32.xlu2 %v771_v59, %s1219_s6  ;;  %v962_v52 = vpop.f32.mrf.mxu1 }
 0x42b   :  { %v1190_v26 = vpop.eup %1189  ;;  %v963_v1 = vadd.f32 %v1758_v61, %v962_v52  ;;  %v520_v43 = vmul.f32 0.7978846, %v516_v24 }
 0x42c   :  { %v764_v7 = vadd.f32 1.0, %v1190_v26 }
 0x42d   :  { %v972_v5 = vmul.f32 %v963_v1, %v963_v1 }
 0x42e   :  { %v768_v29 = vmul.f32 0.5, %v764_v7 }
 0x42f   :  { %v976_v12 = vmul.f32 %v972_v5, %v963_v1 }
 0x430   :  { %v772_v55 = vmul.f32 %v768_v29, %v735_v50  ;;  %v254_v29 = vadd.f32 %v1758_v61, %v1774_v41 }
 0x431   :  { %v980_v56 = vmul.f32 0.044715, %v976_v12 }
 0x432   :  { %1018 = vrot.lane.b32.xlu2 %v537_v21, %s1217_s4  ;;  %1034 = vrot.lane.b32.xlu1 %v772_v55, %s1219_s6  ;;  %v964_v40 = vpop.f32.mrf.mxu1  ;;  %v263_v12 = vmul.f32 %v254_v29, %v254_v29  ;;  %v256_v55 = vadd.f32 %v1758_v61, %v1781_v51 }
 0x433   :  { %v984_v23 = vadd.f32 %v980_v56, %v963_v1  ;;  %v965_v25 = vadd.f32 %v1758_v61, %v964_v40  ;;  %v259_v40 = vadd.f32 %v1758_v61, %v1751_v48 }
 0x434   :  { %v267_v21 = vmul.f32 %v263_v12, %v254_v29  ;;  %v264_v53 = vmul.f32 %v256_v55, %v256_v55 }
 0x435   :  { %v973_v57 = vmul.f32 %v965_v25, %v965_v25  ;;  %v988_v14 = vmul.f32 0.7978846, %v984_v23  ;;  %v265_v27 = vmul.f32 %v259_v40, %v259_v40 }
 0x436   :  { %v268_v56 = vmul.f32 %v264_v53, %v256_v55 }
 0x437   :  { %v977_v39 = vmul.f32 %v973_v57, %v965_v25  ;;  %1191 = vtanh.f32 %v988_v14  ;;  %v261_v57 = vadd.f32 %v1758_v61, %v1753_v17  ;;  %v269_v14 = vmul.f32 %v265_v27, %v259_v40 }
 0x438   :  { %1193 = vtanh.f32 %v754_v49 }
 0x439   :  { %v981_v18 = vmul.f32 0.044715, %v977_v39  ;;  %v266_v49 = vmul.f32 %v261_v57, %v261_v57 }
 0x43a   :  { %v967_v19 = vpop.f32.mrf.mxu1 }
 0x43b   :  { %v985_v28 = vadd.f32 %v981_v18, %v965_v25  ;;  %v968_v33 = vadd.f32 %v1758_v61, %v967_v19  ;;  %v273_v18 = vmul.f32 0.044715, %v269_v14  ;;  %v270_v19 = vmul.f32 %v266_v49, %v261_v57 }
 0x43d   :  { %v1192_v37 = vpop.eup %1191  ;;  %v974_v30 = vmul.f32 %v968_v33, %v968_v33  ;;  %v989_v16 = vmul.f32 0.7978846, %v985_v28  ;;  %v274_v48 = vmul.f32 0.044715, %v270_v19 }
 0x43e   :  { %v996_v38 = vadd.f32 1.0, %v1192_v37  ;;  %v1194_v31 = vpop.eup %1193 }
 0x43f   :  { %v978_v0 = vmul.f32 %v974_v30, %v968_v33  ;;  %1195 = vtanh.f32 %v989_v16  ;;  %v762_v50 = vadd.f32 1.0, %v1194_v31  ;;  %v278_v31 = vadd.f32 %v274_v48, %v261_v57 }
 0x440   :  { %v1000_v36 = vmul.f32 0.5, %v996_v38  ;;  %1197 = vtanh.f32 %v520_v43 }
 0x441   :  { %v982_v11 = vmul.f32 0.044715, %v978_v0  ;;  %v766_v8 = vmul.f32 0.5, %v762_v50 }
 0x442   :  { %v969_v32 = vpop.f32.mrf.mxu1  ;;  %v1004_v54 = vmul.f32 %v1000_v36, %v963_v1  ;;  %v282_v36 = vmul.f32 0.7978846, %v278_v31 }
 0x443   :  { %v986_v44 = vadd.f32 %v982_v11, %v968_v33  ;;  %v970_v3 = vadd.f32 %v1758_v61, %v969_v32  ;;  %v770_v35 = vmul.f32 %v766_v8, %v1779_v45 }
 0x444   :  { %1044 = vrot.lane.b32.xlu0 %v1004_v54, %s1220_s25 }
 0x445   :  { %v1196_v46 = vpop.eup %1195  ;;  %v975_v47 = vmul.f32 %v970_v3, %v970_v3  ;;  %v990_v9 = vmul.f32 0.7978846, %v986_v44 }
 0x446   :  { %v997_v20 = vadd.f32 1.0, %v1196_v46  ;;  %v1198_v4 = vpop.eup %1197 }
 0x447   :  { %v979_v58 = vmul.f32 %v975_v47, %v970_v3  ;;  %1199 = vtanh.f32 %v990_v9  ;;  %v528_v42 = vadd.f32 1.0, %v1198_v4 }
 0x448   :  { %v1001_v63 = vmul.f32 0.5, %v997_v20 }
 0x449   :  { %v983_v15 = vmul.f32 0.044715, %v979_v58  ;;  %v532_v52 = vmul.f32 0.5, %v528_v42 }
 0x44a   :  { %v1005_v2 = vmul.f32 %v1001_v63, %v965_v25  ;;  %v272_v25 = vmul.f32 0.044715, %v268_v56 }
 0x44b   :  { %v987_v59 = vadd.f32 %v983_v15, %v970_v3  ;;  %v536_v6 = vmul.f32 %v532_v52, %v1788_v62  ;;  %v271_v62 = vmul.f32 0.044715, %v267_v21 }
 0x44c   :  { %1046 = vrot.lane.b32.xlu2 %v1005_v2, %s1220_s25  ;;  %1030 = vrot.lane.b32.xlu0 %v770_v35, %s1219_s6  ;;  %v276_v41 = vadd.f32 %v272_v25, %v256_v55 }
 0x44d   :  { %v1200_v60 = vpop.eup %1199  ;;  %v991_v34 = vmul.f32 0.7978846, %v987_v59  ;;  %v275_v22 = vadd.f32 %v271_v62, %v254_v29 }
 0x44e   :  { %v998_v26 = vadd.f32 1.0, %v1200_v60  ;;  %v280_v24 = vmul.f32 0.7978846, %v276_v41 }
 0x44f   :  { %1201 = vtanh.f32 %v991_v34  ;;  %v279_v23 = vmul.f32 0.7978846, %v275_v22 }
 0x450   :  { %v1002_v1 = vmul.f32 0.5, %v998_v26 }
 0x451   :  { %1203 = vtanh.f32 %v279_v23 }
 0x452   :  { %v1006_v7 = vmul.f32 %v1002_v1, %v968_v33  ;;  %1205 = vtanh.f32 %v280_v24  ;;  %v277_v33 = vadd.f32 %v273_v18, %v259_v40 }
 0x454   :  { %1016 = vrot.lane.b32.xlu0 %v536_v6, %s1217_s4  ;;  %1048 = vrot.lane.b32.xlu1 %v1006_v7, %s1220_s25  ;;  %v281_v43 = vmul.f32 0.7978846, %v277_v33 }
 0x455   :  { %v1202_v45 = vpop.eup %1201 }
 0x456   :  { %v999_v13 = vadd.f32 1.0, %v1202_v45  ;;  %1207 = vtanh.f32 %v281_v43 }
 0x457   :  { %v1204_v51 = vpop.eup %1203  ;;  %1209 = vtanh.f32 %v282_v36 }
 0x458   :  { %v1003_v10 = vmul.f32 0.5, %v999_v13  ;;  %v287_v28 = vadd.f32 1.0, %v1204_v51  ;;  %v1206_v38 = vpop.eup %1205 }
 0x459   :  { %v288_v61 = vadd.f32 1.0, %v1206_v38 }
 0x45a   :  { %v1007_v5 = vmul.f32 %v1003_v10, %v970_v3  ;;  %v291_v16 = vmul.f32 0.5, %v287_v28 }
 0x45b   :  { %v292_v44 = vmul.f32 0.5, %v288_v61 }
 0x45c   :  { %1050 = vrot.lane.b32.xlu0 %v1007_v5, %s1220_s25  ;;  %v295_v17 = vmul.f32 %v291_v16, %v254_v29  ;;  %v1208_v46 = vpop.eup %1207 }
 0x45d   :  { %v296_v47 = vmul.f32 %v292_v44, %v256_v55  ;;  %v289_v9 = vadd.f32 1.0, %v1208_v46  ;;  %v1210_v63 = vpop.eup %1209 }
 0x45e   :  { %v290_v42 = vadd.f32 1.0, %v1210_v63 }
 0x45f   :  { %v293_v35 = vmul.f32 0.5, %v289_v9 }
 0x460   :  { %v294_v34 = vmul.f32 0.5, %v290_v42 }
 0x461   :  { %v297_v59 = vmul.f32 %v293_v35, %v259_v40 }
 0x462   :  { %v298_v7 = vmul.f32 %v294_v34, %v261_v57 }
 0x470   :  { %v1013_v39 = vpop.permute.xlu1 %1012 }
 0x471   :  { %v1057_v0 = vsel %vm1056_vm1, %v295_v17, %v1013_v39 }
 0x484   :  { %v1033_v37 = vpop.permute.xlu2 %1032 }
 0x48c   :  { %v1029_v30 = vpop.permute.xlu1 %1028  ;;  %v1019_v54 = vpop.permute.xlu2 %1018 }
 0x48d   :  { %v1061_v11 = vsel %vm53_vm0, %v1057_v0, %v1029_v30  ;;  %v1060_v45 = vsel %vm1056_vm1, %v298_v7, %v1019_v54 }
 0x494   :  { %v1015_v3 = vpop.permute.xlu1 %1014 }
 0x495   :  { %v1058_v20 = vsel %vm1056_vm1, %v296_v47, %v1015_v3 }
 0x4a4   :  { %v1035_v15 = vpop.permute.xlu1 %1034 }
 0x4a5   :  { %v1064_v13 = vsel %vm53_vm0, %v1060_v45, %v1035_v15 }
 0x4a6   :  { %v1047_v4 = vpop.permute.xlu2 %1046 }
 0x4b6   :  { %v1045_v32 = vpop.permute.xlu0 %1044 }
 0x4b7   :  { %v1066_v50 = vsel %vm1065_vm10, %v1061_v11, %v1045_v32 }
 0x4b8   :  { %1071 = vst.msk [vmem:[%s1855_s7] sm:$0xff] %vm1070_vm11, %v1066_v50 }
 0x4be   :  { %v1031_v8 = vpop.permute.xlu0 %1030 }
 0x4bf   :  { %v1062_v58 = vsel %vm53_vm0, %v1058_v20, %v1031_v8 }
 0x4c0   :  { %v1067_v2 = vsel %vm1065_vm10, %v1062_v58, %v1047_v4 }
 0x4c1   :  { %1072 = vst.msk [vmem:[%s1855_s7 + $0x8] sm:$0xff] %vm1070_vm11, %v1067_v2 }
 0x4c6   :  { %v1017_v60 = vpop.permute.xlu0 %1016  ;;  %v1049_v1 = vpop.permute.xlu1 %1048 }
 0x4c7   :  { %v1059_v52 = vsel %vm1056_vm1, %v297_v59, %v1017_v60 }
 0x4c8   :  { %v1063_v26 = vsel %vm53_vm0, %v1059_v52, %v1033_v37 }
 0x4c9   :  { %v1068_v6 = vsel %vm1065_vm10, %v1063_v26, %v1049_v1 }
 0x4ca   :  { %1073 = vst.msk [vmem:[%s1855_s7 + $0x10] sm:$0xff] %vm1070_vm11, %v1068_v6 }
 0x4ce   :  { %v1051_v10 = vpop.permute.xlu0 %1050 }
 0x4cf   :  { %v1069_v5 = vsel %vm1065_vm10, %v1064_v13, %v1051_v10 }
 0x4d0   :  { %1074 = vst.msk [vmem:[%s1855_s7 + $0x18] sm:$0xff] %vm1070_vm11, %v1069_v5 }

// kernel: bk_medsam_forward.15
= control target key start
LH: loop header
LB: loop body
LE: loop exit
PB: predicated region body
PF: predicated region fallthrough
CT: control target
= control target key end

     0   :  { %s2541_s6 = smov 1   ;;  %s2542_s10 = smov 2   ;;  %s2928_s0 = inlined_call_operand.smem [shape: u32[30], index: -1, kind: input, shape index: {}] }
   0x1   :  { %s2582_s5 = sld [smem:[%s2928_s0]]   ;;  %s2543_s14 = smov 3  }
   0x2   :  { %s2587_s9 = sld [smem:[%s2928_s0 + %s2541_s6]]   ;;  %s2544_s18 = smov 4  }
   0x3   :  { %s2592_s13 = sld [smem:[%s2928_s0 + %s2542_s10]]   ;;  %s2545_s22 = smov 5  }
   0x4   :  { %s2597_s17 = sld [smem:[%s2928_s0 + %s2543_s14]]   ;;  %s2546_s26 = smov 6  }
   0x5   :  { %s2602_s21 = sld [smem:[%s2928_s0 + %s2544_s18]]   ;;  %s2547_s30 = smov 7  }
   0x6   :  { %s2607_s25 = sld [smem:[%s2928_s0 + %s2545_s22]]   ;;  %s2548_s4 = smov 8  }
   0x7   :  { %s2612_s29 = sld [smem:[%s2928_s0 + %s2546_s26]]   ;;  %s2549_s10 = smov 9  }
   0x8   :  { %s2617_s3 = sld [smem:[%s2928_s0 + %s2547_s30]]   ;;  %s2550_s15 = smov 10  }
   0x9   :  { %s2622_s8 = sld [smem:[%s2928_s0 + %s2548_s4]]   ;;  %s2551_s20 = smov 11  }
   0xa   :  { %s2627_s14 = sld [smem:[%s2928_s0 + %s2549_s10]]   ;;  %s2552_s26 = smov 12  }
   0xb   :  { %s2632_s19 = sld [smem:[%s2928_s0 + %s2550_s15]]   ;;  %s2553_s1 = smov 13  }
   0xc   :  { %s2637_s24 = sld [smem:[%s2928_s0 + %s2551_s20]]   ;;  %s2554_s7 = smov 14  }
   0xd   :  { %s2642_s30 = sld [smem:[%s2928_s0 + %s2552_s26]]   ;;  %s2555_s15 = smov 15  }
   0xe   :  { %s2647_s6 = sld [smem:[%s2928_s0 + %s2553_s1]]   ;;  %s2556_s22 = smov 16  }
   0xf   :  { %s2652_s12 = sld [smem:[%s2928_s0 + %s2554_s7]]   ;;  %s2557_s28 = smov 17  }
  0x10   :  { %s2657_s20 = sld [smem:[%s2928_s0 + %s2555_s15]]   ;;  %s2558_s7 = smov 18  }
  0x11   :  { %s2662_s27 = sld [smem:[%s2928_s0 + %s2556_s22]]   ;;  %s2559_s15 = smov 19  }
  0x12   :  { %s2667_s4 = sld [smem:[%s2928_s0 + %s2557_s28]]   ;;  %s2560_s22 = smov 20  }
  0x13   :  { %s2561_s28 = smov 21  }
  0x15   :  { %2934 = sst [smem:[#allocation2_spill]] %s2652_s12 }
  0x16   :  { %2935 = sst [smem:[#allocation3_spill]] %s2657_s20 }
  0x17   :  { %2936 = sst [smem:[#allocation4_spill]] %s2662_s27 }
  0x18   :  { %2937 = sst [smem:[#allocation5_spill]] %s2667_s4 }
  0x19   :  { %s2672_s12 = sld [smem:[%s2928_s0 + %s2558_s7]]   ;;  %s2562_s7 = smov 22  }
  0x1a   :  { %s2677_s20 = sld [smem:[%s2928_s0 + %s2559_s15]]   ;;  %s2563_s15 = smov 23  }
  0x1b   :  { %s2682_s27 = sld [smem:[%s2928_s0 + %s2560_s22]]   ;;  %s2564_s22 = smov 24  }
  0x1c   :  { %s2687_s4 = sld [smem:[%s2928_s0 + %s2561_s28]]   ;;  %s2565_s28 = smov 25  }
  0x1f   :  { %2938 = sst [smem:[#allocation6_spill]] %s2672_s12 }
  0x20   :  { %2939 = sst [smem:[#allocation7_spill]] %s2677_s20 }
  0x21   :  { %2940 = sst [smem:[#allocation8_spill]] %s2682_s27 }
  0x22   :  { %2941 = sst [smem:[#allocation9_spill]] %s2687_s4 }
  0x23   :  { %s2692_s12 = sld [smem:[%s2928_s0 + %s2562_s7]]   ;;  %s2566_s7 = smov 26  }
  0x24   :  { %s2697_s20 = sld [smem:[%s2928_s0 + %s2563_s15]]   ;;  %s2567_s15 = smov 27  }
  0x25   :  { %s2702_s27 = sld [smem:[%s2928_s0 + %s2564_s22]]   ;;  %s2568_s22 = smov 28  }
  0x26   :  { %s2707_s4 = sld [smem:[%s2928_s0 + %s2565_s28]]   ;;  %s2569_s28 = smov 29  }
  0x29   :  { %2942 = sst [smem:[#allocation10_spill]] %s2692_s12 }
  0x2a   :  { %2943 = sst [smem:[#allocation11_spill]] %s2697_s20 }
  0x2b   :  { %2944 = sst [smem:[#allocation12_spill]] %s2702_s27 }
  0x2c   :  { %2945 = sst [smem:[#allocation13_spill]] %s2707_s4 }
  0x2d   :  { %s2712_s12 = sld [smem:[%s2928_s0 + %s2566_s7]]   ;;  %s2729_s7 = smov 0  }
  0x2e   :  { %s2717_s20 = sld [smem:[%s2928_s0 + %s2567_s15]]  }
  0x2f   :  { %s2722_s27 = sld [smem:[%s2928_s0 + %s2568_s22]]  }
  0x30   :  { %s2727_s4 = sld [smem:[%s2928_s0 + %s2569_s28]]  }
  0x31 LB: > { %s2221_s10 = sadd.s32 4294967295, %s2539_s7   ;;  %p2225_p0 = scmp.ge.s32.totalorder %s2539_s7, 1  ;;  %s2539_s7 = sphi %s2729_s7, %s70_s7  }
  0x32   : > { %p838_p1 = scmp.lt.s32.totalorder %s2539_s7, 3 }
  0x34   : > { %p839_p2 = pnand %p2225_p0, %p838_p1 }
  0x35   : > { %p926_p3 = scmp.lt.s32.totalorder (!%p839_p2), %s2221_s10, 1  ;;  %s2570_s15 = smov (!%p839_p2), 112  }
  0x36   : > { %842 = sbr.rel (%p839_p2) target bundleno = 4154 (0x103a), region = 132  ;;  %s2573_s22 = smov (!%p839_p2), 120  }
  0x37   : > { %s2946_s26 = sld [smem:[#allocation4_spill]] (!%p839_p2) }
  0x38   : > { %s2947_s28 = sld [smem:[#allocation6_spill]] (!%p839_p2) }
  0x39   : > { %s2948_s1 = sld [smem:[#allocation2_spill]] (!%p839_p2) }
  0x3a   : > { %s2949_s2 = sld [smem:[#allocation3_spill]] (!%p839_p2) }
  0x3b   : > { %v2401_v0 = vld [vmem:[%s2602_s21 + $0x8] sm:$0xff]  ;;  %v2403_v1 = vld [vmem:[%s2602_s21 + $0x18] sm:$0xff]  ;;  %v2400_v2 = vld [vmem:[%s2602_s21] sm:$0xff]  ;;  %s2959_s10 = smov (!%p926_p3, %s2221_s10), 1  ;;  %vm976_vm0 = vcmask 261120   ;;  %vm1069_vm1 = vcmask 130048  }
  0x3c   : > { %986 = vmatpush.bf16.msra.mxu0 %v2401_v0  ;;  %1021 = vmatpush.bf16.msra.mxu1 %v2403_v1  ;;  %v2402_v3 = vld [vmem:[%s2602_s21 + $0x10] sm:$0xff]  ;;  %s2744_s0 = sshll.u32 %s2959_s10, 3  ;;  %v2468_v6 = vld [vmem:[%s2607_s25 + $0x1] ss:$0 sm:$0xff]  ;;  %v2467_v9 = vld [vmem:[%s2607_s25] ss:$0 sm:$0xff] }
  0x3d   : > { %s929_s11 = scalar_lea.vmem %s2582_s5, %s2744_s0  ;;  %v2405_v22 = vld [vmem:[%s2602_s21 + $0x28] sm:$0xff]  ;;  %v2404_v23 = vld [vmem:[%s2602_s21 + $0x20] sm:$0xff]  ;;  %vm1090_vm2 = vcmask 36864   ;;  %vm1108_vm3 = vcmask 1041408   ;;  %vm1109_vm4 = vcmask 1042432   ;;  %v2571_v37 = vmov 65535   ;;  %s938_s23 = scalar_lea.vmem %s2592_s13, %s2744_s0 }
  0x3e   : > { %v949_v4 = vld [vmem:[%s929_s11] sm:$0x1f]  ;;  %1056 = vmatpush.bf16.msra.mxu2 %v2405_v22  ;;  %v1110_v38 = vsel %vm1108_vm3, 4294967295, %v2571_v37  ;;  %vm1104_vm5 = vcmask 39936   ;;  %v2407_v59 = vld [vmem:[%s2612_s29 + $0x8] sm:$0xff]  ;;  %vm1241_vm6 = vcmask 258048  }
  0x3f   : > { %v959_v5 = vpack.c.bf16 %v949_v4, %v949_v4  ;;  %v2469_v30 = vld [vmem:[%s2607_s25 + $0x2] ss:$0 sm:$0xff]  ;;  %v2764_v39 = vsel %vm1109_vm4, %v1110_v38, 0  ;;  %v2470_v4 = vld [vmem:[%s2617_s3] ss:$0 sm:$0xff]  ;;  %s2398_s16 = sshll.u32 %s2959_s10, 4 }
  0x40   : > { %987 = vmatpush.bf16.msra.mxu0 %v2400_v2  ;;  %1022 = vmatpush.bf16.msra.mxu1 %v2402_v3  ;;  %v2406_v60 = vld [vmem:[%s2612_s29] sm:$0xff]  ;;  %s934_s18 = scalar_lea.vmem %s2587_s9, %s2398_s16  ;;  %vm1403_vm8 = vcmask 64512   ;;  %vm1424_vm12 = vcmask 126976   ;;  %vm1517_vm13 = vcmask 1043456   ;;  %s2950_s11 = sld [smem:[#allocation5_spill]] }
  0x41   : > { %v2473_v38 = vld [vmem:[%s2637_s24 + $0x1] ss:$0 sm:$0xff] }
  0x42   : > { %1057 = vmatpush.bf16.msra.mxu2 %v2404_v23 }
  0x43   : > { %2241 = vmatmul.msk.bf16.vlgmr.msra.gmra.mxu0 %vm976_vm0, %v959_v5  ;;  %2255 = vmatmul.msk.bf16.vlgmr.msra.gmra.mxu1 %vm976_vm0, %v959_v5 }
  0x45   : > { %2269 = vmatmul.msk.bf16.vlgmr.msra.gmra.mxu2 %vm976_vm0, %v959_v5 }
  0xc0   : > { %v989_v7 = vpop.f32.mrf.mxu0  ;;  %v1024_v8 = vpop.f32.mrf.mxu1 }
  0xc1   : > { %v1025_v10 = vadd.f32 %v2468_v6, %v1024_v8  ;;  %v990_v12 = vadd.f32 %v2467_v9, %v989_v7 }
  0xc3   : > { %v1068_v11 = vpack.c.bf16 %v1025_v10, %v1025_v10  ;;  %v1067_v16 = vpack.c.bf16 %v990_v12, %v990_v12  ;;  %v2783_v12 = vld [vmem:[%s934_s18] sm:$0xff] }
  0xc5   : > { %1133 = vrot.lane.b32.xlu0 %v1068_v11, %s2570_s15  ;;  %v1074_v13 = vsel %vm1069_vm1, %v1068_v11, 0  ;;  %v2572_v11 = vmov 32.0  }
  0xc6   : > { %1083 = vmatpush.bf16.xpose.msra.mxu3 %v1074_v13  ;;  %v2785_v13 = vld [vmem:[%s934_s18 + $0x8] sm:$0xff]  ;;  %s2952_s18 = sld [smem:[#allocation10_spill]] }
  0xc8   : > { %v991_v14 = vpop.f32.mrf.mxu0  ;;  %v1026_v15 = vpop.f32.mrf.mxu1 }
  0xc9   : > { %v1059_v33 = vpop.f32.mrf.mxu2  ;;  %v2411_v14 = vld [vmem:[%s2632_s19 + $0x18] sm:$0xff]  ;;  %v953_v15 = vld [vmem:[%s2597_s17] sm:$0xff] }
  0xca   : > { %v1060_v34 = vadd.f32 %v2469_v30, %v1059_v33  ;;  %v2408_v33 = vld [vmem:[%s2632_s19] sm:$0xff] }
  0xcc   : > { %v1103_v36 = vpack.c.bf16 %v1060_v34, %v1060_v34 }
  0xcd   : > { %1130 = vrot.lane.b32.xlu0 %v1067_v16, %s2570_s15  ;;  %2270 = vmatmul.msk.bf16.vlgmr.msra.gmra.mxu3 %vm1069_vm1, %v1067_v16  ;;  %v954_v16 = vld [vmem:[%s2597_s17 + $0x8] sm:$0xff] }
  0xce   : > { %v1113_v41 = vand.u32 %v2764_v39, %v1103_v36  ;;  %1206 = vmatpush.bf16.msrb.mxu3 %v2407_v59 }
  0xd0   : > { %1122 = vmatpush.bf16.msrb.mxu0 %v1113_v41 }
  0xd1   : > { %v1061_v43 = vpop.f32.mrf.mxu2 }
  0xd4   : > { %1228 = vmatpush.bf16.msra.mxu0 %v2406_v60 }
 0x137   : > { %v1134_v17 = vpop.permute.xlu0 %1133 }
 0x138   : > { %v1139_v18 = vsel %vm1069_vm1, %v1134_v17, 0  ;;  %v1280_v17 = vadd.f32 %v953_v15, %v2783_v12 }
 0x139   : > { %1148 = vmatpush.bf16.xpose.msrb.mxu1 %v1139_v18  ;;  %v2410_v18 = vld [vmem:[%s2632_s19 + $0x10] sm:$0xff] }
 0x13f   : > { %v1131_v19 = vpop.permute.xlu0 %1130 }
 0x140   : > { %2272 = vmatmul.msk.bf16.vlgmr.msrb.gmra.mxu1 %vm1069_vm1, %v1131_v19  ;;  %v1281_v19 = vadd.f32 %v954_v16, %v2785_v13 }
 0x150   : > { %v1085_v20 = vpop.f32.mrf.mxu3 }
 0x151   : > { %v1089_v27 = vmul.f32 0.25, %v1085_v20 }
 0x153   : > { %v1091_v29 = vsel %vm1090_vm2, %v1089_v27, -inf }
 0x158   : > { %v1087_v21 = vpop.f32.mrf.mxu3 }
 0x159   : > { %v2793_v21 = vpack.c.bf16 %v1281_v19, %v1280_v17 }
 0x1bd   : > { %v1150_v24 = vpop.f32.mrf.mxu1 }
 0x1be   : > { %v1154_v25 = vmul.f32 0.25, %v1150_v24 }
 0x1c0   : > { %v1155_v26 = vsel %vm1090_vm2, %v1154_v25, -inf }
 0x1c1   : > { %1156 = vmax.xlane.f32.xlu1 %v1155_v26 }
 0x1c5   : > { %v1152_v28 = vpop.f32.mrf.mxu1 }
 0x1c9   : > { %1092 = vmax.xlane.f32.xlu1 %v1091_v29 }
 0x234   : > { %v1157_v31 = vpop.xlane.xlu1 %1156 }
 0x235   : > { %v1158_v32 = vsub.f32 %v1154_v25, %v1157_v31 }
 0x237   : > { %v1159_v35 = vmul.f32 1.442695, %v1158_v32  ;;  %v2409_v32 = vld [vmem:[%s2632_s19 + $0x8] sm:$0xff] }
 0x238   : > { %1312 = vmatpush.bf16.msra.mxu1 %v2409_v32 }
 0x239   : > { %2489 = vpow2.f32 %v1159_v35 }
 0x23c   : > { %v1093_v40 = vpop.xlane.xlu1 %1092  ;;  %1313 = vmatpush.bf16.msra.mxu1 %v2408_v33 }
 0x23d   : > { %v1094_v42 = vsub.f32 %v1089_v27, %v1093_v40 }
 0x23f   : > { %v2490_v44 = vpop.eup %2489  ;;  %v1095_v45 = vmul.f32 1.442695, %v1094_v42 }
 0x240   : > { %v1161_v46 = vsel %vm1090_vm2, %v2490_v44, 0.0 }
 0x241   : > { %2491 = vpow2.f32 %v1095_v45  ;;  %1162 = vadd.xlane.f32.xlu2 %v1161_v46 }
 0x247   : > { %v2492_v47 = vpop.eup %2491 }
 0x248   : > { %v1097_v48 = vsel %vm1090_vm2, %v2492_v47, 0.0  ;;  %vm1666_vm2 = vcmask 523264  }
 0x249   : > { %1098 = vadd.xlane.f32.xlu0 %v1097_v48 }
 0x259   : > { %1168 = vrot.lane.b32.xlu2 %v1103_v36, %s2570_s15  ;;  %s2951_s15 = sld [smem:[#allocation7_spill]] }
 0x2b4   : > { %v1163_v49 = vpop.xlane.xlu2 %1162 }
 0x2b5   : > { %2493 = vrcp.f32 %v1163_v49 }
 0x2bb   : > { %v2494_v50 = vpop.eup %2493 }
 0x2bc   : > { %v1165_v51 = vmul.f32 %v2494_v50, %v2490_v44  ;;  %v1169_v52 = vpop.permute.xlu2 %1168  ;;  %v1099_v53 = vpop.xlane.xlu0 %1098 }
 0x2bd   : > { %v1174_v54 = vand.u32 %v1169_v52, %v2764_v39  ;;  %2495 = vrcp.f32 %v1099_v53  ;;  %v2472_v53 = vld [vmem:[%s2627_s14] ss:$0 sm:$0xff] }
 0x2be   : > { %v1166_v55 = vpack.c.bf16 %v1165_v51, %v1165_v51  ;;  %2497 = vrcp.f32 %v2572_v11  ;;  %v2471_v51 = vld [vmem:[%s2622_s8] ss:$0 sm:$0xff] }
 0x2bf   : > { %1183 = vmatpush.bf16.msrb.mxu2 %v1174_v54 }
 0x2c2   : > { %2273 = vmatmul.msk.bf16.vlgmr.msrb.gmra.mxu2 %vm1104_vm5, %v1166_v55 }
 0x2c3   : > { %v2496_v56 = vpop.eup %2495  ;;  %1351 = vmatpush.bf16.msra.mxu2 %v2411_v14 }
 0x2c4   : > { %v1101_v57 = vmul.f32 %v2496_v56, %v2492_v47  ;;  %v2498_v20 = vpop.eup %2497  ;;  %v2811_v56 = vld [vmem:[%s938_s23] sm:$0x1f]  ;;  %s2953_s23 = sld [smem:[#allocation8_spill]] }
 0x2c5   : > { %v1246_v22 = vmul.f32 32.0, %v2498_v20  ;;  %vm1250_vm7 = vweird.f32 %v2498_v20 }
 0x2c6   : > { %v1102_v58 = vpack.c.bf16 %v1101_v57, %v1101_v57 }
 0x2c7   : > { %1352 = vmatpush.bf16.msra.mxu2 %v2410_v18  ;;  %v1247_v23 = vsub.f32 1.0, %v1246_v22 }
 0x2c8   : > { %2271 = vmatmul.msk.bf16.vlgmr.msrb.gmra.mxu0 %vm1104_vm5, %v1102_v58 }
 0x2c9   : > { %v1248_v24 = vmul.f32 %v2498_v20, %v1247_v23 }
 0x2cb   : > { %v1249_v25 = vadd.f32 %v2498_v20, %v1248_v24  ;;  %v2475_v24 = vld [vmem:[%s2637_s24 + $0x2] ss:$0 sm:$0xff] }
 0x2cd   : > { %v2797_v26 = vsel %vm1250_vm7, %v2498_v20, %v1249_v25 }
 0x2d2   : > { %2306 = vmatmul.msk.bf16.vlgmr.msra.gmra.mxu2 %vm976_vm0, %v2793_v21 }
 0x345   : > { %v1124_v61 = vpop.f32.mrf.mxu0  ;;  %v1185_v62 = vpop.f32.mrf.mxu2 }
 0x346   : > { %v1128_v63 = vpack.c.bf16 %v1124_v61, %v1124_v61  ;;  %v1189_v0 = vpack.c.bf16 %v1185_v62, %v1185_v62  ;;  %v2474_v62 = vld [vmem:[%s2637_s24] ss:$0 sm:$0xff] }
 0x348   : > { %2278 = vmatmul.msk.bf16.vlgmr.msrb.gmra.mxu3 %vm1069_vm1, %v1189_v0  ;;  %2283 = vmatmul.msk.bf16.vlgmr.msra.gmra.mxu0 %vm1069_vm1, %v1128_v63 }
 0x34d   : > { %v1126_v1 = vpop.f32.mrf.mxu0  ;;  %v1187_v2 = vpop.f32.mrf.mxu2 }
 0x355   : > { %v1354_v36 = vpop.f32.mrf.mxu2 }
 0x356   : > { %v1355_v40 = vadd.f32 %v2473_v38, %v1354_v36 }
 0x35d   : > { %v1356_v41 = vpop.f32.mrf.mxu2 }
 0x35e   : > { %v1357_v42 = vadd.f32 %v2473_v38, %v1356_v41  ;;  %v1399_v41 = vld [vmem:[%s2642_s30] sm:$0xf] }
 0x360   : > { %v1402_v45 = vpack.c.bf16 %v1357_v42, %v1355_v40  ;;  %v1538_v42 = vsel %vm1517_vm13, %v1399_v41, 0 }
 0x362   : > { %v1408_v47 = vsel %vm1403_vm8, %v1402_v45, 0 }
 0x363   : > { %1417 = vmatpush.bf16.xpose.msrb.mxu0 %v1408_v47 }
 0x3c5   : > { %v1230_v3 = vpop.f32.mrf.mxu0 }
 0x3cb   : > { %v1208_v5 = vpop.f32.mrf.mxu3 }
 0x3cc   : > { %v1231_v6 = vadd.f32 %v1230_v3, %v1208_v5  ;;  %v2412_v5 = vld [vmem:[%s2632_s19 + $0x20] sm:$0xff] }
 0x3cd   : > { %v1232_v7 = vpop.f32.mrf.mxu0 }
 0x3ce   : > { %v1238_v8 = vadd.f32 %v2470_v4, %v1231_v6  ;;  %v2413_v4 = vld [vmem:[%s2632_s19 + $0x28] sm:$0xff]  ;;  %v1364_v6 = vpack.c.bf16 %v2785_v13, %v2783_v12 }
 0x3cf   : > { %1391 = vmatpush.bf16.msra.mxu3 %v2413_v4 }
 0x3d0   : > { %v1242_v9 = vsel %vm1241_vm6, %v1238_v8, 0.0 }
 0x3d1   : > { %1243 = vadd.xlane.f32.xlu1 %v1242_v9 }
 0x3d3   : > { %v1210_v10 = vpop.f32.mrf.mxu3  ;;  %1392 = vmatpush.bf16.msra.mxu3 %v2412_v5 }
 0x3d6   : > { %2320 = vmatmul.msk.bf16.vlgmr.msra.gmra.mxu3 %vm976_vm0, %v1364_v6 }
 0x444   : > { %v1244_v27 = vpop.xlane.xlu1 %1243 }
 0x445   : > { %v1252_v28 = vmul.f32 %v2797_v26, %v1244_v27 }
 0x447   : > { %v1253_v29 = vsub.f32 %v1238_v8, %v1252_v28 }
 0x449   : > { %v1254_v30 = vmul.f32 %v1253_v29, %v1253_v29 }
 0x44b   : > { %v1255_v31 = vsel %vm1241_vm6, %v1254_v30, 0.0 }
 0x44c   : > { %1256 = vadd.xlane.f32.xlu1 %v1255_v31 }
 0x459   : > { %v1394_v23 = vpop.f32.mrf.mxu3 }
 0x45a   : > { %v1395_v25 = vadd.f32 %v2475_v24, %v1394_v23 }
 0x461   : > { %v1396_v27 = vpop.f32.mrf.mxu3 }
 0x462   : > { %v1397_v28 = vadd.f32 %v2475_v24, %v1396_v27  ;;  %v2478_v24 = vld [vmem:[%s2949_s2] ss:$0 sm:$0xff]  ;;  %s2955_s2 = sld [smem:[#allocation11_spill]] }
 0x465   : > { %1459 = vrot.lane.b32.xlu1 %v1402_v45, %s2573_s22 }
 0x4bf   : > { %v1257_v34 = vpop.xlane.xlu1 %1256 }
 0x4c0   : > { %v1258_v35 = vmul.f32 %v1257_v34, %v2797_v26 }
 0x4c2   : > { %v1259_v37 = vadd.f32 1e-05, %v1258_v35 }
 0x4c4   : > { %2499 = vrsqrt.f32 %v1259_v37  ;;  %vm1266_vm10 = vweird.f32 %v1259_v37 }
 0x4ca   : > { %v2500_v43 = vpop.eup %2499 }
 0x4cb   : > { %v1261_v44 = vmul.f32 %v2500_v43, %v1259_v37  ;;  %vm1267_vm9 = vweird.f32 %v2500_v43 }
 0x4cc   : > { %vm1268_vm11 = vmor %vm1266_vm10, %vm1267_vm9 }
 0x4cd   : > { %v1262_v46 = vmul.f32 %v2500_v43, %v1261_v44 }
 0x4cf   : > { %v1263_v48 = vmul.f32 0.5, %v1262_v46 }
 0x4d1   : > { %v1264_v49 = vsub.f32 1.5, %v1263_v48 }
 0x4d3   : > { %v1265_v50 = vmul.f32 %v2500_v43, %v1264_v49 }
 0x4d5   : > { %v1269_v52 = vsel %vm1268_vm11, %v2500_v43, %v1265_v50  ;;  %v1400_v50 = vld [vmem:[%s2642_s30 + $0x4] sm:$0xf] }
 0x4d6   : > { %v1270_v54 = vmul.f32 %v1269_v52, %v1253_v29  ;;  %v1437_v29 = vpack.c.bf16 %v1397_v28, %v1395_v25 }
 0x4d7   : > { %v1460_v60 = vpop.permute.xlu1 %1459 }
 0x4d8   : > { %v1274_v55 = vmul.f32 %v2471_v51, %v1270_v54  ;;  %v1465_v61 = vsel %vm1403_vm8, %v1460_v60, 0  ;;  %1448 = vmatpush.bf16.msrb.mxu1 %v1437_v29  ;;  %v1519_v51 = vsel %vm1517_vm13, %v1400_v50, 0  ;;  %v2425_v50 = vld [vmem:[%s2952_s18 + $0x28] sm:$0xff] }
 0x4d9   : > { %1474 = vmatpush.bf16.xpose.msrb.mxu2 %v1465_v61  ;;  %1528 = vmatpush.bf16.msra.mxu0 %v1519_v51  ;;  %v2421_v51 = vld [vmem:[%s2952_s18 + $0x8] sm:$0xff] }
 0x4da   : > { %v2813_v57 = vadd.f32 %v2472_v53, %v1274_v55 }
 0x4dc   : > { %v1279_v58 = vadd.f32 %v2813_v57, %v2811_v56 }
 0x4de   : > { %v1286_v59 = vpack.c.bf16 %v1279_v58, %v1279_v58 }
 0x4e0   : > { %2292 = vmatmul.msk.bf16.vlgmr.msra.gmra.mxu1 %vm976_vm0, %v1286_v59  ;;  %v2476_v59 = vld [vmem:[%s2647_s6] ss:$0 sm:$0xff] }
 0x4e1   : > { %1547 = vmatpush.bf16.msra.mxu1 %v1538_v42 }
 0x55d   : > { %v1315_v63 = vpop.f32.mrf.mxu1 }
 0x55e   : > { %v1316_v0 = vadd.f32 %v2474_v62, %v1315_v63 }
 0x560   : > { %v1401_v1 = vpack.c.bf16 %v1316_v0, %v1316_v0 }
 0x562   : > { %1456 = vrot.lane.b32.xlu2 %v1401_v1, %s2573_s22  ;;  %2321 = vmatmul.msk.bf16.vlgmr.msrb.gmra.mxu0 %vm1403_vm8, %v1401_v1 }
 0x563   : > { %1743 = vmatpush.bf16.msrb.mxu0 %v2421_v51 }
 0x565   : > { %v1317_v2 = vpop.f32.mrf.mxu1 }
 0x5bc   : > { %v1457_v3 = vpop.permute.xlu2 %1456 }
 0x5bd   : > { %2323 = vmatmul.msk.bf16.vlgmr.msrb.gmra.mxu2 %vm1403_vm8, %v1457_v3 }
 0x5df   : > { %v1419_v7 = vpop.f32.mrf.mxu0 }
 0x5e0   : > { %v1423_v8 = vmul.f32 0.35355338, %v1419_v7  ;;  %v2415_v7 = vld [vmem:[%s2946_s26 + $0x8] sm:$0xff] }
 0x5e1   : > { %1621 = vmatpush.bf16.msra.mxu2 %v2415_v7 }
 0x5e2   : > { %v1425_v9 = vsel %vm1424_vm12, %v1423_v8, -inf }
 0x5e3   : > { %1426 = vmax.xlane.f32.xlu1 %v1425_v9  ;;  %v2419_v9 = vld [vmem:[%s2947_s28 + $0x18] sm:$0xff] }
 0x5e7   : > { %v1421_v10 = vpop.f32.mrf.mxu0 }
 0x640   : > { %v1476_v11 = vpop.f32.mrf.mxu2 }
 0x641   : > { %v1480_v14 = vmul.f32 0.35355338, %v1476_v11  ;;  %v2418_v11 = vld [vmem:[%s2947_s28 + $0x10] sm:$0xff] }
 0x643   : > { %v1481_v15 = vsel %vm1424_vm12, %v1480_v14, -inf }
 0x644   : > { %1482 = vmax.xlane.f32.xlu2 %v1481_v15 }
 0x648   : > { %v1478_v16 = vpop.f32.mrf.mxu2 }
 0x656   : > { %v1427_v17 = vpop.xlane.xlu1 %1426 }
 0x657   : > { %v1428_v18 = vsub.f32 %v1423_v8, %v1427_v17  ;;  %v2414_v8 = vld [vmem:[%s2946_s26] sm:$0xff] }
 0x658   : > { %1622 = vmatpush.bf16.msra.mxu2 %v2414_v8 }
 0x659   : > { %v1429_v19 = vmul.f32 1.442695, %v1428_v18 }
 0x65b   : > { %2501 = vpow2.f32 %v1429_v19 }
 0x65c   : > { %1822 = vmatpush.bf16.msrb.mxu2 %v2425_v50 }
 0x661   : > { %v2502_v20 = vpop.eup %2501 }
 0x662   : > { %v1431_v22 = vsel %vm1424_vm12, %v2502_v20, 0.0 }
 0x663   : > { %1432 = vadd.xlane.f32.xlu0 %v1431_v22  ;;  %v2477_v22 = vld [vmem:[%s2948_s1] ss:$0 sm:$0xff]  ;;  %s2954_s1 = sld [smem:[#allocation9_spill]] }
 0x6b7   : > { %v1483_v30 = vpop.xlane.xlu2 %1482 }
 0x6b8   : > { %v1484_v31 = vsub.f32 %v1480_v14, %v1483_v30  ;;  %v2417_v30 = vld [vmem:[%s2947_s28 + $0x8] sm:$0xff] }
 0x6ba   : > { %v1485_v32 = vmul.f32 1.442695, %v1484_v31  ;;  %v2416_v31 = vld [vmem:[%s2947_s28] sm:$0xff] }
 0x6bc   : > { %2503 = vpow2.f32 %v1485_v32  ;;  %v2479_v32 = vld [vmem:[%s2950_s11] ss:$0 sm:$0xff]  ;;  %s942_s11 = scalar_lea.vmem %s2722_s27, %s2744_s0  ;;  %s2956_s0 = sld [smem:[#allocation12_spill]] }
 0x6c2   : > { %v2504_v33 = vpop.eup %2503 }
 0x6c3   : > { %v1487_v34 = vsel %vm1424_vm12, %v2504_v33, 0.0 }
 0x6c4   : > { %1488 = vadd.xlane.f32.xlu0 %v1487_v34 }
 0x6d6   : > { %v1433_v35 = vpop.xlane.xlu0 %1432 }
 0x6d7   : > { %2505 = vrcp.f32 %v1433_v35 }
 0x6d8   : > { %1494 = vrot.lane.b32.xlu0 %v1437_v29, %s2573_s22 }
 0x6dd   : > { %v2506_v36 = vpop.eup %2505 }
 0x6de   : > { %v1435_v37 = vmul.f32 %v2506_v36, %v2502_v20 }
 0x6e0   : > { %v1436_v38 = vpack.c.bf16 %v1435_v37, %v1435_v37 }
 0x6e2   : > { %2322 = vmatmul.msk.bf16.vlgmr.msrb.gmra.mxu1 %vm1069_vm1, %v1436_v38  ;;  %v2480_v38 = vld [vmem:[%s2951_s15] ss:$0 sm:$0xff]  ;;  %s947_s15 = scalar_lea.vmem %s2727_s4, %s2398_s16 }
 0x737   : > { %v1489_v40 = vpop.xlane.xlu0 %1488 }
 0x738   : > { %2507 = vrcp.f32 %v1489_v40 }
 0x73e   : > { %v2508_v43 = vpop.eup %2507 }
 0x73f   : > { %v1491_v44 = vmul.f32 %v2508_v43, %v2504_v33 }
 0x741   : > { %v1492_v46 = vpack.c.bf16 %v1491_v44, %v1491_v44 }
 0x74a   : > { %v1495_v45 = vpop.permute.xlu0 %1494 }
 0x74b   : > { %1507 = vmatpush.bf16.msrb.mxu3 %v1495_v45 }
 0x74e   : > { %2324 = vmatmul.msk.bf16.vlgmr.msrb.gmra.mxu3 %vm1069_vm1, %v1492_v46 }
 0x74f   : > { %1674 = vmatpush.bf16.msra.mxu3 %v2419_v9 }
 0x753   : > { %1675 = vmatpush.bf16.msra.mxu3 %v2418_v11  ;;  %v2483_v11 = vld [vmem:[%s2955_s2] ss:$0 sm:$0xff] }
 0x757   : > { %1676 = vmatpush.bf16.msra.mxu3 %v2417_v30 }
 0x75b   : > { %1677 = vmatpush.bf16.msra.mxu3 %v2416_v31 }
 0x75f   : > { %v1450_v47 = vpop.f32.mrf.mxu1 }
 0x760   : > { %v1454_v48 = vpack.c.bf16 %v1450_v47, %v1450_v47 }
 0x762   : > { %2326 = vmatmul.msk.bf16.vlgmr.msra.gmra.mxu1 %vm1403_vm8, %v1454_v48 }
 0x767   : > { %v1452_v49 = vpop.f32.mrf.mxu1 }
 0x7d1   : > { %v1509_v52 = vpop.f32.mrf.mxu3 }
 0x7d2   : > { %v1513_v53 = vpack.c.bf16 %v1509_v52, %v1509_v52  ;;  %v2423_v52 = vld [vmem:[%s2952_s18 + $0x18] sm:$0xff] }
 0x7d3   : > { %1783 = vmatpush.bf16.msrb.mxu1 %v2423_v52 }
 0x7d4   : > { %2325 = vmatmul.msk.bf16.vlgmr.msra.gmra.mxu0 %vm1403_vm8, %v1513_v53  ;;  %v2424_v53 = vld [vmem:[%s2952_s18 + $0x20] sm:$0xff] }
 0x7d5   : > { %1823 = vmatpush.bf16.msrb.mxu2 %v2424_v53 }
 0x7d9   : > { %v1511_v54 = vpop.f32.mrf.mxu3 }
 0x7da   : > { %v2420_v54 = vld [vmem:[%s2952_s18] sm:$0xff] }
 0x7db   : > { %1744 = vmatpush.bf16.msrb.mxu0 %v2420_v54 }
 0x7df   : > { %v1549_v55 = vpop.f32.mrf.mxu1 }
 0x7e4   : > { %2361 = vmatmul.msk.bf16.vlgmr.msrb.gmra.mxu0 %vm976_vm0, %v2793_v21 }
 0x7e7   : > { %v1551_v58 = vpop.f32.mrf.mxu1 }
 0x851   : > { %v1530_v60 = vpop.f32.mrf.mxu0 }
 0x852   : > { %v1550_v61 = vadd.f32 %v1549_v55, %v1530_v60  ;;  %v2422_v55 = vld [vmem:[%s2952_s18 + $0x10] sm:$0xff] }
 0x853   : > { %1784 = vmatpush.bf16.msrb.mxu1 %v2422_v55 }
 0x854   : > { %v1557_v62 = vadd.f32 %v2476_v59, %v1550_v61 }
 0x856   : > { %v1558_v63 = vadd.f32 %v1557_v62, %v2813_v57 }
 0x858   : > { %v1561_v0 = vsel %vm1241_vm6, %v1558_v63, 0.0 }
 0x859   : > { %v1532_v1 = vpop.f32.mrf.mxu0  ;;  %1562 = vadd.xlane.f32.xlu2 %v1561_v0 }
 0x8cc   : > { %v1563_v2 = vpop.xlane.xlu2 %1562 }
 0x8cd   : > { %v1564_v3 = vmul.f32 %v1563_v2, %v2797_v26 }
 0x8cf   : > { %v1565_v4 = vsub.f32 %v1558_v63, %v1564_v3  ;;  %v2481_v3 = vld [vmem:[%s2953_s23] ss:$0 sm:$0xff] }
 0x8d1   : > { %v1566_v5 = vmul.f32 %v1565_v4, %v1565_v4 }
 0x8d3   : > { %v1567_v6 = vsel %vm1241_vm6, %v1566_v5, 0.0  ;;  %v2482_v5 = vld [vmem:[%s2954_s1] ss:$0 sm:$0xff] }
 0x8d4   : > { %1568 = vadd.xlane.f32.xlu2 %v1567_v6 }
 0x947   : > { %v1569_v57 = vpop.xlane.xlu2 %1568 }
 0x948   : > { %v1570_v10 = vmul.f32 %v1569_v57, %v2797_v26 }
 0x94a   : > { %v1571_v14 = vadd.f32 1e-05, %v1570_v10  ;;  %v1746_v10 = vpop.f32.mrf.mxu0 }
 0x94c   : > { %2509 = vrsqrt.f32 %v1571_v14  ;;  %vm1578_vm15 = vweird.f32 %v1571_v14 }
 0x952   : > { %v2510_v15 = vpop.eup %2509 }
 0x953   : > { %v1573_v16 = vmul.f32 %v2510_v15, %v1571_v14  ;;  %vm1579_vm14 = vweird.f32 %v2510_v15  ;;  %v1747_v14 = vadd.f32 %v2483_v11, %v1746_v10 }
 0x954   : > { %vm1580_vm1 = vmor %vm1578_vm15, %vm1579_vm14 }
 0x955   : > { %v1574_v17 = vmul.f32 %v2510_v15, %v1573_v16 }
 0x957   : > { %v1575_v18 = vmul.f32 0.5, %v1574_v17 }
 0x959   : > { %v1576_v19 = vsub.f32 1.5, %v1575_v18  ;;  %v2484_v18 = vld [vmem:[%s2955_s2 + $0x1] ss:$0 sm:$0xff] }
 0x95b   : > { %v1577_v20 = vmul.f32 %v2510_v15, %v1576_v19 }
 0x95d   : > { %v1581_v23 = vsel %vm1580_vm1, %v2510_v15, %v1577_v20  ;;  %v1748_v15 = vpop.f32.mrf.mxu0 }
 0x95e   : > { %v1582_v25 = vmul.f32 %v1581_v23, %v1565_v4  ;;  %v1749_v16 = vadd.f32 %v2483_v11, %v1748_v15 }
 0x960   : > { %v1586_v27 = vmul.f32 %v2477_v22, %v1582_v25  ;;  %v1831_v17 = vpack.c.bf16 %v1749_v16, %v1747_v14  ;;  %v2485_v22 = vld [vmem:[%s2955_s2 + $0x2] ss:$0 sm:$0xff] }
 0x962   : > { %v1590_v28 = vadd.f32 %v2478_v24, %v1586_v27 }
 0x964   : > { %v1595_v29 = vpack.c.bf16 %v1590_v28, %v1590_v28 }
 0x966   : > { %2335 = vmatmul.msk.bf16.vlgmr.msra.gmra.mxu2 %vm976_vm0, %v1595_v29 }
 0x9e9   : > { %v1624_v33 = vpop.f32.mrf.mxu2 }
 0x9ea   : > { %v1625_v34 = vadd.f32 %v2479_v32, %v1624_v33 }
 0x9ec   : > { %v1628_v35 = vmax.f32 %v1625_v34, 0.0 }
 0x9ee   : > { %v1637_v36 = vpack.c.bf16 %v1628_v35, %v1628_v35 }
 0x9f0   : > { %2352 = vmatmul.msk.bf16.vlgmr.msra.gmra.mxu3 %vm1666_vm2, %v1637_v36 }
 0x9f1   : > { %v1626_v37 = vpop.f32.mrf.mxu2 }
 0xa73   : > { %v1679_v40 = vpop.f32.mrf.mxu3 }
 0xa74   : > { %v1680_v41 = vadd.f32 %v2480_v38, %v1679_v40 }
 0xa76   : > { %v1683_v42 = vadd.f32 %v1680_v41, %v1590_v28 }
 0xa78   : > { %v1686_v43 = vsel %vm1241_vm6, %v1683_v42, 0.0 }
 0xa79   : > { %1687 = vadd.xlane.f32.xlu0 %v1686_v43 }
 0xa7b   : > { %v1681_v44 = vpop.f32.mrf.mxu3 }
 0xaec   : > { %v1688_v45 = vpop.xlane.xlu0 %1687 }
 0xaed   : > { %v1689_v46 = vmul.f32 %v1688_v45, %v2797_v26 }
 0xaef   : > { %v1690_v47 = vsub.f32 %v1683_v42, %v1689_v46 }
 0xaf1   : > { %v1691_v48 = vmul.f32 %v1690_v47, %v1690_v47 }
 0xaf3   : > { %v1692_v49 = vsel %vm1241_vm6, %v1691_v48, 0.0 }
 0xaf4   : > { %1693 = vadd.xlane.f32.xlu2 %v1692_v49 }
 0xb0c   : > { %1901 = vrot.lane.b32.xlu2 %v1831_v17, %s2573_s22 }
 0xb67   : > { %v1694_v58 = vpop.xlane.xlu2 %1693 }
 0xb68   : > { %v1695_v59 = vmul.f32 %v1694_v58, %v2797_v26 }
 0xb6a   : > { %v1696_v60 = vadd.f32 1e-05, %v1695_v59 }
 0xb6c   : > { %2511 = vrsqrt.f32 %v1696_v60  ;;  %vm1703_vm4 = vweird.f32 %v1696_v60 }
 0xb6f   : > { %v1902_v33 = vpop.permute.xlu2 %1901 }
 0xb72   : > { %v2512_v61 = vpop.eup %2511 }
 0xb73   : > { %v1698_v62 = vmul.f32 %v2512_v61, %v1696_v60  ;;  %vm1704_vm3 = vweird.f32 %v2512_v61 }
 0xb74   : > { %vm1705_vm7 = vmor %vm1703_vm4, %vm1704_vm3 }
 0xb75   : > { %v1699_v63 = vmul.f32 %v2512_v61, %v1698_v62 }
 0xb77   : > { %v1700_v0 = vmul.f32 0.5, %v1699_v63 }
 0xb79   : > { %v1701_v1 = vsub.f32 1.5, %v1700_v0 }
 0xb7b   : > { %v1702_v2 = vmul.f32 %v2512_v61, %v1701_v1 }
 0xb7d   : > { %v1706_v4 = vsel %vm1705_vm7, %v2512_v61, %v1702_v2 }
 0xb7e   : > { %v1707_v6 = vmul.f32 %v1706_v4, %v1690_v47 }
 0xb80   : > { %v1711_v7 = vmul.f32 %v2481_v3, %v1707_v6 }
 0xb82   : > { %v1715_v21 = vadd.f32 %v2482_v5, %v1711_v7 }
 0xb84   : > { %2079 = vst.msk [vmem:[%s942_s11] sm:$0x1f] %vm1241_vm6, %v1715_v21  ;;  %v1795_v8 = vpack.c.bf16 %v1715_v21, %v1715_v21  ;;  %v1716_v9 = vadd.f32 %v1715_v21, %v2811_v56 }
 0xb86   : > { %2389 = vmatmul.msk.bf16.vlgmr.msrb.gmra.mxu2 %vm976_vm0, %v1795_v8  ;;  %v1756_v57 = vpack.c.bf16 %v1716_v9, %v1716_v9 }
 0xb88   : > { %2375 = vmatmul.msk.bf16.vlgmr.msrb.gmra.mxu1 %vm976_vm0, %v1756_v57 }
 0xc05   : > { %v1786_v19 = vpop.f32.mrf.mxu1 }
 0xc06   : > { %v1787_v20 = vadd.f32 %v2484_v18, %v1786_v19 }
 0xc08   : > { %v1832_v23 = vpack.c.bf16 %v1787_v20, %v1787_v20  ;;  %v1830_v20 = vld [vmem:[%s2956_s0 + $0x4] sm:$0xf] }
 0xc09   : > { %v1825_v24 = vpop.f32.mrf.mxu2 }
 0xc0a   : > { %v1837_v56 = vsel %vm1403_vm8, %v1832_v23, 0  ;;  %v1826_v25 = vadd.f32 %v2485_v22, %v1825_v24  ;;  %1904 = vrot.lane.b32.xlu1 %v1832_v23, %s2573_s22  ;;  %v1979_v22 = vsel %vm1517_vm13, %v1830_v20, 0  ;;  %v1829_v23 = vld [vmem:[%s2956_s0] sm:$0xf] }
 0xc0b   : > { %1846 = vmatpush.bf16.xpose.msrb.mxu3 %v1837_v56  ;;  %v1999_v24 = vsel %vm1517_vm13, %v1829_v23, 0 }
 0xc0c   : > { %v1878_v27 = vpack.c.bf16 %v1826_v25, %v1826_v25 }
 0xc0d   : > { %v1788_v28 = vpop.f32.mrf.mxu1 }
 0xc0e   : > { %v1883_v29 = vand.u32 %v1878_v27, %v2764_v39 }
 0xc10   : > { %1892 = vmatpush.bf16.msra.mxu0 %v1883_v29 }
 0xc11   : > { %v1827_v30 = vpop.f32.mrf.mxu2 }
 0xc12   : > { %2390 = vmatmul.msk.bf16.vlgmr.msrb.gmra.mxu3 %vm1403_vm8, %v1831_v17 }
 0xc13   : > { %1988 = vmatpush.bf16.msra.mxu3 %v1979_v22 }
 0xc14   : > { %2008 = vmatpush.bf16.msrb.mxu0 %v1999_v24 }
 0xc7c   : > { %v1905_v31 = vpop.permute.xlu1 %1904 }
 0xc7d   : > { %v1910_v32 = vsel %vm1403_vm8, %v1905_v31, 0 }
 0xc7e   : > { %1919 = vmatpush.bf16.xpose.msra.mxu1 %v1910_v32 }
 0xc85   : > { %2392 = vmatmul.msk.bf16.vlgmr.msra.gmra.mxu1 %vm1403_vm8, %v1902_v33 }
 0xc95   : > { %v1848_v34 = vpop.f32.mrf.mxu3 }
 0xc96   : > { %v1853_v35 = vmul.f32 0.35355338, %v1848_v34 }
 0xc98   : > { %v1855_v36 = vsel %vm1104_vm5, %v1853_v35, -inf }
 0xc99   : > { %1856 = vmax.xlane.f32.xlu0 %v1855_v36 }
 0xc9d   : > { %v1850_v37 = vpop.f32.mrf.mxu3 }
 0xc9e   : > { %v1854_v38 = vmul.f32 0.35355338, %v1850_v37 }
 0xca0   : > { %v1858_v40 = vsel %vm1104_vm5, %v1854_v38, -inf }
 0xca1   : > { %1859 = vmax.xlane.f32.xlu0 %v1858_v40 }
 0xd02   : > { %v1921_v41 = vpop.f32.mrf.mxu1 }
 0xd03   : > { %v1926_v42 = vmul.f32 0.35355338, %v1921_v41 }
 0xd05   : > { %v1928_v43 = vsel %vm1104_vm5, %v1926_v42, -inf }
 0xd06   : > { %1929 = vmax.xlane.f32.xlu1 %v1928_v43 }
 0xd0a   : > { %v1923_v44 = vpop.f32.mrf.mxu1 }
 0xd0b   : > { %v1927_v45 = vmul.f32 0.35355338, %v1923_v44 }
 0xd0c   : > { %v1857_v46 = vpop.xlane.xlu0 %1856 }
 0xd0d   : > { %v1931_v47 = vsel %vm1104_vm5, %v1927_v45, -inf  ;;  %v1861_v61 = vsub.f32 %v1853_v35, %v1857_v46 }
 0xd0e   : > { %1932 = vmax.xlane.f32.xlu2 %v1931_v47 }
 0xd0f   : > { %v1863_v0 = vmul.f32 1.442695, %v1861_v61 }
 0xd14   : > { %v1860_v48 = vpop.xlane.xlu0 %1859 }
 0xd15   : > { %v1862_v49 = vsub.f32 %v1854_v38, %v1860_v48 }
 0xd17   : > { %v1865_v50 = vmul.f32 1.442695, %v1862_v49 }
 0xd19   : > { %2513 = vpow2.f32 %v1865_v50 }
 0xd1f   : > { %v2514_v51 = vpop.eup %2513  ;;  %1952 = vrot.lane.b32.xlu1 %v1878_v27, %s2573_s22  ;;  %s2957_s22 = sld [smem:[#allocation13_spill]] }
 0xd20   : > { %v1870_v52 = vsel %vm1104_vm5, %v2514_v51, 0.0 }
 0xd21   : > { %1871 = vadd.xlane.f32.xlu2 %v1870_v52 }
 0xd25   : > { %v2486_v32 = vld [vmem:[%s2957_s22] ss:$0 sm:$0xff] }
 0xd79   : > { %v1930_v53 = vpop.xlane.xlu1 %1929 }
 0xd7a   : > { %v1934_v54 = vsub.f32 %v1926_v42, %v1930_v53 }
 0xd7c   : > { %v1936_v55 = vmul.f32 1.442695, %v1934_v54 }
 0xd7e   : > { %2515 = vpow2.f32 %v1936_v55 }
 0xd81   : > { %v1933_v58 = vpop.xlane.xlu2 %1932 }
 0xd82   : > { %v1935_v59 = vsub.f32 %v1927_v45, %v1933_v58 }
 0xd84   : > { %v2516_v60 = vpop.eup %2515  ;;  %v1938_v62 = vmul.f32 1.442695, %v1935_v59 }
 0xd85   : > { %v1940_v63 = vsel %vm1104_vm5, %v2516_v60, 0.0 }
 0xd86   : > { %2517 = vpow2.f32 %v1938_v62  ;;  %1941 = vadd.xlane.f32.xlu0 %v1940_v63 }
 0xd87   : > { %2519 = vpow2.f32 %v1863_v0 }
 0xd8c   : > { %v2518_v1 = vpop.eup %2517 }
 0xd8d   : > { %v1943_v2 = vsel %vm1104_vm5, %v2518_v1, 0.0  ;;  %v2520_v4 = vpop.eup %2519 }
 0xd8e   : > { %1944 = vadd.xlane.f32.xlu0 %v1943_v2  ;;  %v1867_v6 = vsel %vm1104_vm5, %v2520_v4, 0.0 }
 0xd91   : > { %v1953_v3 = vpop.permute.xlu1 %1952 }
 0xd92   : > { %v1958_v5 = vand.u32 %v1953_v3, %v2764_v39 }
 0xd94   : > { %1967 = vmatpush.bf16.msra.mxu2 %v1958_v5  ;;  %v1872_v8 = vpop.xlane.xlu2 %1871  ;;  %v2487_v5 = vld [vmem:[%s2712_s12] ss:$0 sm:$0xff] }
 0xd96   : > { %1868 = vadd.xlane.f32.xlu0 %v1867_v6 }
 0xdf9   : > { %v1942_v7 = vpop.xlane.xlu0 %1941 }
 0xdfa   : > { %2521 = vrcp.f32 %v1942_v7 }
 0xe00   : > { %v2522_v9 = vpop.eup %2521 }
 0xe01   : > { %v1945_v21 = vpop.xlane.xlu0 %1944  ;;  %v1948_v10 = vmul.f32 %v2522_v9, %v2516_v60 }
 0xe02   : > { %2523 = vrcp.f32 %v1945_v21 }
 0xe03   : > { %2525 = vrcp.f32 %v1872_v8 }
 0xe08   : > { %v2524_v57 = vpop.eup %2523 }
 0xe09   : > { %v1949_v11 = vmul.f32 %v2524_v57, %v2518_v1  ;;  %v1869_v14 = vpop.xlane.xlu0 %1868  ;;  %v2526_v39 = vpop.eup %2525 }
 0xe0a   : > { %2527 = vrcp.f32 %v1869_v14  ;;  %v1876_v17 = vmul.f32 %v2526_v39, %v2514_v51 }
 0xe0b   : > { %v1950_v15 = vpack.c.bf16 %v1949_v11, %v1948_v10 }
 0xe0d   : > { %2393 = vmatmul.msk.bf16.vlgmr.msra.gmra.mxu2 %vm1104_vm5, %v1950_v15 }
 0xe10   : > { %v2528_v16 = vpop.eup %2527 }
 0xe11   : > { %v1875_v18 = vmul.f32 %v2528_v16, %v2520_v4 }
 0xe13   : > { %v1877_v19 = vpack.c.bf16 %v1876_v17, %v1875_v18 }
 0xe15   : > { %2391 = vmatmul.msk.bf16.vlgmr.msra.gmra.mxu0 %vm1104_vm5, %v1877_v19 }
 0xe90   : > { %v1969_v56 = vpop.f32.mrf.mxu2 }
 0xe92   : > { %v1894_v25 = vpop.f32.mrf.mxu0 }
 0xe98   : > { %v1971_v27 = vpop.f32.mrf.mxu2 }
 0xe99   : > { %v1974_v28 = vpack.c.bf16 %v1971_v27, %v1969_v56 }
 0xe9a   : > { %v1896_v29 = vpop.f32.mrf.mxu0 }
 0xe9b   : > { %v1899_v30 = vpack.c.bf16 %v1896_v29, %v1894_v25  ;;  %2394 = vmatmul.msk.bf16.vlgmr.msra.gmra.mxu3 %vm1403_vm8, %v1974_v28 }
 0xe9d   : > { %2395 = vmatmul.msk.bf16.vlgmr.msrb.gmra.mxu0 %vm1403_vm8, %v1899_v30 }
 0xf1a   : > { %v2010_v31 = vpop.f32.mrf.mxu0 }
 0xf1e   : > { %v1990_v33 = vpop.f32.mrf.mxu3 }
 0xf1f   : > { %v2011_v34 = vadd.f32 %v2010_v31, %v1990_v33 }
 0xf21   : > { %v2019_v35 = vadd.f32 %v2486_v32, %v2011_v34 }
 0xf22   : > { %v2012_v38 = vpop.f32.mrf.mxu0 }
 0xf23   : > { %v2021_v36 = vadd.f32 %v2019_v35, %v2783_v12 }
 0xf25   : > { %v2025_v37 = vsel %vm976_vm0, %v2021_v36, 0.0 }
 0xf26   : > { %v1992_v40 = vpop.f32.mrf.mxu3  ;;  %2026 = vadd.xlane.f32.xlu0 %v2025_v37 }
 0xf27   : > { %v2013_v41 = vadd.f32 %v2012_v38, %v1992_v40 }
 0xf29   : > { %v2020_v42 = vadd.f32 %v2486_v32, %v2013_v41 }
 0xf2b   : > { %v2022_v43 = vadd.f32 %v2020_v42, %v2785_v13 }
 0xf2d   : > { %v2028_v44 = vsel %vm976_vm0, %v2022_v43, 0.0 }
 0xf2e   : > { %2029 = vadd.xlane.f32.xlu2 %v2028_v44 }
 0xf99   : > { %v2027_v45 = vpop.xlane.xlu0 %2026 }
 0xf9a   : > { %v2031_v46 = vmul.f32 %v2027_v45, %v2797_v26 }
 0xf9c   : > { %v2033_v47 = vsub.f32 %v2021_v36, %v2031_v46 }
 0xf9e   : > { %v2035_v48 = vmul.f32 %v2033_v47, %v2033_v47 }
 0xfa0   : > { %v2037_v49 = vsel %vm976_vm0, %v2035_v48, 0.0 }
 0xfa1   : > { %v2030_v12 = vpop.xlane.xlu2 %2029  ;;  %2038 = vadd.xlane.f32.xlu0 %v2037_v49 }
 0xfa2   : > { %v2032_v50 = vmul.f32 %v2030_v12, %v2797_v26 }
 0xfa4   : > { %v2034_v51 = vsub.f32 %v2022_v43, %v2032_v50 }
 0xfa6   : > { %v2036_v52 = vmul.f32 %v2034_v51, %v2034_v51 }
 0xfa8   : > { %v2040_v53 = vsel %vm976_vm0, %v2036_v52, 0.0 }
 0xfa9   : > { %2041 = vadd.xlane.f32.xlu2 %v2040_v53 }
0x1014   : > { %v2039_v13 = vpop.xlane.xlu0 %2038 }
0x1015   : > { %v2043_v54 = vmul.f32 %v2039_v13, %v2797_v26 }
0x1017   : > { %v2045_v55 = vadd.f32 1e-05, %v2043_v54 }
0x1019   : > { %2529 = vrsqrt.f32 %v2045_v55  ;;  %vm2053_vm6 = vweird.f32 %v2045_v55 }
0x101c   : > { %v2042_v58 = vpop.xlane.xlu2 %2041 }
0x101d   : > { %v2044_v59 = vmul.f32 %v2042_v58, %v2797_v26  ;;  %v2488_v26 = vld [vmem:[%s2717_s20] ss:$0 sm:$0xff] }
0x101f   : > { %v2530_v60 = vpop.eup %2529  ;;  %v2046_v61 = vadd.f32 1e-05, %v2044_v59 }
0x1020   : > { %v2048_v62 = vmul.f32 %v2530_v60, %v2045_v55  ;;  %vm2054_vm5 = vweird.f32 %v2530_v60 }
0x1021   : > { %2531 = vrsqrt.f32 %v2046_v61  ;;  %vm2055_vm8 = vmor %vm2053_vm6, %vm2054_vm5  ;;  %vm2063_vm10 = vweird.f32 %v2046_v61 }
0x1022   : > { %v2049_v63 = vmul.f32 %v2530_v60, %v2048_v62 }
0x1024   : > { %v2050_v0 = vmul.f32 0.5, %v2049_v63 }
0x1026   : > { %v2051_v1 = vsub.f32 1.5, %v2050_v0 }
0x1027   : > { %v2532_v2 = vpop.eup %2531 }
0x1028   : > { %v2052_v3 = vmul.f32 %v2530_v60, %v2051_v1  ;;  %v2058_v4 = vmul.f32 %v2532_v2, %v2046_v61  ;;  %vm2064_vm9 = vweird.f32 %v2532_v2 }
0x1029   : > { %vm2065_vm11 = vmor %vm2063_vm10, %vm2064_vm9 }
0x102a   : > { %v2056_v6 = vsel %vm2055_vm8, %v2530_v60, %v2052_v3  ;;  %v2059_v7 = vmul.f32 %v2532_v2, %v2058_v4 }
0x102b   : > { %v2067_v21 = vmul.f32 %v2056_v6, %v2033_v47 }
0x102c   : > { %v2060_v8 = vmul.f32 0.5, %v2059_v7 }
0x102d   : > { %v2072_v9 = vmul.f32 %v2487_v5, %v2067_v21 }
0x102e   : > { %v2061_v57 = vsub.f32 1.5, %v2060_v8 }
0x102f   : > { %v2077_v10 = vadd.f32 %v2488_v26, %v2072_v9 }
0x1030   : > { %v2062_v11 = vmul.f32 %v2532_v2, %v2061_v57 }
0x1031   : > { %2080 = vst.msk [vmem:[%s947_s15] sm:$0xff] %vm976_vm0, %v2077_v10 }
0x1032   : > { %v2066_v14 = vsel %vm2065_vm11, %v2532_v2, %v2062_v11 }
0x1033   : > { %v2068_v15 = vmul.f32 %v2066_v14, %v2034_v51 }
0x1035   : > { %v2073_v39 = vmul.f32 %v2487_v5, %v2068_v15 }
0x1037   : > { %v2078_v16 = vadd.f32 %v2488_v26, %v2073_v39 }
0x1039   : > { %2081 = vst.msk [vmem:[%s947_s15 + $0x8] sm:$0xff] %vm976_vm0, %v2078_v16 }
0x103a PF: > { %s70_s7 = sadd.s32 1, %s2539_s7  }
0x103b   : > { %p67_p4 = scmp.ge.s32.totalorder %s70_s7, 4  }
0x103d   :  { %69 = sbr.rel (!%p67_p4) target bundleno = 49 (0x31), region = 221 }

// kernel: bk_medsam_forward.16
= control target key start
LH: loop header
LB: loop body
LE: loop exit
PB: predicated region body
PF: predicated region fallthrough
CT: control target
= control target key end

     0   :  { %s2547_s6 = smov 1   ;;  %s2548_s10 = smov 2   ;;  %s2941_s0 = inlined_call_operand.smem [shape: u32[30], index: -1, kind: input, shape index: {}] }
   0x1   :  { %s2588_s5 = sld [smem:[%s2941_s0]]   ;;  %s2549_s14 = smov 3  }
   0x2   :  { %s2593_s9 = sld [smem:[%s2941_s0 + %s2547_s6]]   ;;  %s2550_s18 = smov 4  }
   0x3   :  { %s2598_s13 = sld [smem:[%s2941_s0 + %s2548_s10]]   ;;  %s2551_s22 = smov 5  }
   0x4   :  { %s2603_s17 = sld [smem:[%s2941_s0 + %s2549_s14]]   ;;  %s2552_s26 = smov 6  }
   0x5   :  { %s2608_s21 = sld [smem:[%s2941_s0 + %s2550_s18]]   ;;  %s2553_s30 = smov 7  }
   0x6   :  { %s2613_s25 = sld [smem:[%s2941_s0 + %s2551_s22]]   ;;  %s2554_s4 = smov 8  }
   0x7   :  { %s2618_s29 = sld [smem:[%s2941_s0 + %s2552_s26]]   ;;  %s2555_s10 = smov 9  }
   0x8   :  { %s2623_s3 = sld [smem:[%s2941_s0 + %s2553_s30]]   ;;  %s2556_s15 = smov 10  }
   0x9   :  { %s2628_s8 = sld [smem:[%s2941_s0 + %s2554_s4]]   ;;  %s2557_s20 = smov 11  }
   0xa   :  { %s2633_s14 = sld [smem:[%s2941_s0 + %s2555_s10]]   ;;  %s2558_s26 = smov 12  }
   0xb   :  { %s2638_s19 = sld [smem:[%s2941_s0 + %s2556_s15]]   ;;  %s2559_s1 = smov 13  }
   0xc   :  { %s2643_s24 = sld [smem:[%s2941_s0 + %s2557_s20]]   ;;  %s2560_s7 = smov 14  }
   0xd   :  { %s2648_s30 = sld [smem:[%s2941_s0 + %s2558_s26]]   ;;  %s2561_s15 = smov 15  }
   0xe   :  { %s2653_s6 = sld [smem:[%s2941_s0 + %s2559_s1]]   ;;  %s2562_s22 = smov 16  }
   0xf   :  { %s2658_s12 = sld [smem:[%s2941_s0 + %s2560_s7]]   ;;  %s2563_s28 = smov 17  }
  0x10   :  { %s2663_s20 = sld [smem:[%s2941_s0 + %s2561_s15]]   ;;  %s2564_s7 = smov 18  }
  0x11   :  { %s2668_s27 = sld [smem:[%s2941_s0 + %s2562_s22]]   ;;  %s2565_s15 = smov 19  }
  0x12   :  { %s2673_s4 = sld [smem:[%s2941_s0 + %s2563_s28]]   ;;  %s2566_s22 = smov 20  }
  0x13   :  { %s2567_s28 = smov 21  }
  0x15   :  { %2947 = sst [smem:[#allocation2_spill]] %s2658_s12 }
  0x16   :  { %2948 = sst [smem:[#allocation3_spill]] %s2663_s20 }
  0x17   :  { %2949 = sst [smem:[#allocation4_spill]] %s2668_s27 }
  0x18   :  { %2950 = sst [smem:[#allocation5_spill]] %s2673_s4 }
  0x19   :  { %s2678_s12 = sld [smem:[%s2941_s0 + %s2564_s7]]   ;;  %s2568_s7 = smov 22  }
  0x1a   :  { %s2683_s20 = sld [smem:[%s2941_s0 + %s2565_s15]]   ;;  %s2569_s15 = smov 23  }
  0x1b   :  { %s2688_s27 = sld [smem:[%s2941_s0 + %s2566_s22]]   ;;  %s2570_s22 = smov 24  }
  0x1c   :  { %s2693_s4 = sld [smem:[%s2941_s0 + %s2567_s28]]   ;;  %s2571_s28 = smov 25  }
  0x1f   :  { %2951 = sst [smem:[#allocation6_spill]] %s2678_s12 }
  0x20   :  { %2952 = sst [smem:[#allocation7_spill]] %s2683_s20 }
  0x21   :  { %2953 = sst [smem:[#allocation8_spill]] %s2688_s27 }
  0x22   :  { %2954 = sst [smem:[#allocation9_spill]] %s2693_s4 }
  0x23   :  { %s2698_s12 = sld [smem:[%s2941_s0 + %s2568_s7]]   ;;  %s2572_s7 = smov 26  }
  0x24   :  { %s2703_s20 = sld [smem:[%s2941_s0 + %s2569_s15]]   ;;  %s2573_s15 = smov 27  }
  0x25   :  { %s2708_s27 = sld [smem:[%s2941_s0 + %s2570_s22]]   ;;  %s2574_s22 = smov 28  }
  0x26   :  { %s2713_s4 = sld [smem:[%s2941_s0 + %s2571_s28]]   ;;  %s2575_s28 = smov 29  }
  0x29   :  { %2955 = sst [smem:[#allocation10_spill]] %s2698_s12 }
  0x2a   :  { %2956 = sst [smem:[#allocation11_spill]] %s2703_s20 }
  0x2b   :  { %2957 = sst [smem:[#allocation12_spill]] %s2708_s27 }
  0x2c   :  { %2958 = sst [smem:[#allocation13_spill]] %s2713_s4 }
  0x2d   :  { %s2718_s12 = sld [smem:[%s2941_s0 + %s2572_s7]]   ;;  %s2735_s7 = smov 0  }
  0x2e   :  { %s2723_s20 = sld [smem:[%s2941_s0 + %s2573_s15]]  }
  0x2f   :  { %s2728_s27 = sld [smem:[%s2941_s0 + %s2574_s22]]  }
  0x30   :  { %s2733_s4 = sld [smem:[%s2941_s0 + %s2575_s28]]  }
  0x31 LB: > { %s2227_s10 = sadd.s32 4294967295, %s2545_s7   ;;  %p2231_p0 = scmp.ge.s32.totalorder %s2545_s7, 1  ;;  %s2545_s7 = sphi %s2735_s7, %s70_s7  }
  0x32   : > { %p838_p1 = scmp.lt.s32.totalorder %s2545_s7, 3 }
  0x34   : > { %p839_p2 = pnand %p2231_p0, %p838_p1 }
  0x35   : > { %p926_p3 = scmp.lt.s32.totalorder (!%p839_p2), %s2227_s10, 1  ;;  %s2576_s16 = smov (!%p839_p2), 112  }
  0x36   : > { %842 = sbr.rel (%p839_p2) target bundleno = 4157 (0x103d), region = 132  ;;  %s2579_s23 = smov (!%p839_p2), 120  }
  0x37   : > { %s2959_s26 = sld [smem:[#allocation4_spill]] (!%p839_p2) }
  0x38   : > { %s2960_s28 = sld [smem:[#allocation6_spill]] (!%p839_p2) }
  0x39   : > { %s2961_s1 = sld [smem:[#allocation2_spill]] (!%p839_p2) }
  0x3a   : > { %s2962_s2 = sld [smem:[#allocation3_spill]] (!%p839_p2) }
  0x3b   : > { %v2407_v0 = vld [vmem:[%s2608_s21 + $0x8] sm:$0xff]  ;;  %v2409_v1 = vld [vmem:[%s2608_s21 + $0x18] sm:$0xff]  ;;  %v2406_v2 = vld [vmem:[%s2608_s21] sm:$0xff]  ;;  %s2972_s10 = smov (!%p926_p3, %s2227_s10), 1  ;;  %vm977_vm0 = vcmask 261120   ;;  %vm1074_vm1 = vcmask 130048  }
  0x3c   : > { %987 = vmatpush.bf16.msra.mxu0 %v2407_v0  ;;  %1022 = vmatpush.bf16.msra.mxu1 %v2409_v1  ;;  %v2408_v3 = vld [vmem:[%s2608_s21 + $0x10] sm:$0xff]  ;;  %s2750_s0 = sshll.u32 %s2972_s10, 3  ;;  %v2474_v8 = vld [vmem:[%s2613_s25 + $0x1] ss:$0 sm:$0xff]  ;;  %v2473_v11 = vld [vmem:[%s2613_s25] ss:$0 sm:$0xff] }
  0x3d   : > { %s929_s11 = scalar_lea.vmem %s2588_s5, %s2750_s0  ;;  %s938_s15 = scalar_lea.vmem %s2598_s13, %s2750_s0  ;;  %v2411_v24 = vld [vmem:[%s2608_s21 + $0x28] sm:$0xff]  ;;  %v2410_v25 = vld [vmem:[%s2608_s21 + $0x20] sm:$0xff]  ;;  %vm1095_vm2 = vcmask 36864   ;;  %vm1113_vm3 = vcmask 1041408   ;;  %vm1114_vm4 = vcmask 1042432   ;;  %v2577_v40 = vmov 65535  }
  0x3e   : > { %v2756_v4 = vld [vmem:[%s929_s11] sm:$0x1f]  ;;  %1061 = vmatpush.bf16.msra.mxu2 %v2411_v24  ;;  %v1115_v41 = vsel %vm1113_vm3, 4294967295, %v2577_v40  ;;  %vm1109_vm5 = vcmask 39936   ;;  %v2413_v62 = vld [vmem:[%s2618_s29 + $0x8] sm:$0xff]  ;;  %vm1247_vm6 = vcmask 258048  }
  0x3f   : > { %v2758_v5 = vld [vmem:[%s938_s15] sm:$0x1f]  ;;  %v1034_v26 = vpack.c.bf16 %v2756_v4, %v2756_v4  ;;  %v2780_v42 = vsel %vm1114_vm4, %v1115_v41, 0  ;;  %s2404_s18 = sshll.u32 %s2972_s10, 4  ;;  %vm1409_vm8 = vcmask 64512   ;;  %vm1430_vm12 = vcmask 126976  }
  0x40   : > { %988 = vmatpush.bf16.msra.mxu0 %v2406_v2  ;;  %1023 = vmatpush.bf16.msra.mxu1 %v2408_v3  ;;  %v955_v6 = vadd.f32 %v2758_v5, %v2756_v4  ;;  %v2475_v33 = vld [vmem:[%s2613_s25 + $0x2] ss:$0 sm:$0xff]  ;;  %s934_s22 = scalar_lea.vmem %s2593_s9, %s2404_s18  ;;  %vm1523_vm13 = vcmask 1043456   ;;  %s2963_s11 = sld [smem:[#allocation5_spill]] }
  0x41   : > { %v2412_v63 = vld [vmem:[%s2618_s29] sm:$0xff]  ;;  %s2964_s15 = sld [smem:[#allocation7_spill]] }
  0x42   : > { %v960_v7 = vpack.c.bf16 %v955_v6, %v955_v6  ;;  %1062 = vmatpush.bf16.msra.mxu2 %v2410_v25 }
  0x44   : > { %2247 = vmatmul.msk.bf16.vlgmr.msra.gmra.mxu0 %vm977_vm0, %v960_v7  ;;  %2261 = vmatmul.msk.bf16.vlgmr.msra.gmra.mxu1 %vm977_vm0, %v960_v7 }
  0x45   : > { %2275 = vmatmul.msk.bf16.vlgmr.msra.gmra.mxu2 %vm977_vm0, %v1034_v26 }
  0xc1   : > { %v990_v9 = vpop.f32.mrf.mxu0  ;;  %v1025_v10 = vpop.f32.mrf.mxu1 }
  0xc2   : > { %v1026_v12 = vadd.f32 %v2474_v8, %v1025_v10  ;;  %v991_v14 = vadd.f32 %v2473_v11, %v990_v9  ;;  %v2476_v9 = vld [vmem:[%s2623_s3] ss:$0 sm:$0xff] }
  0xc4   : > { %v1073_v13 = vpack.c.bf16 %v1026_v12, %v1026_v12  ;;  %v1072_v18 = vpack.c.bf16 %v991_v14, %v991_v14 }
  0xc6   : > { %1138 = vrot.lane.b32.xlu0 %v1073_v13, %s2576_s16  ;;  %v1079_v15 = vsel %vm1074_vm1, %v1073_v13, 0 }
  0xc7   : > { %1088 = vmatpush.bf16.xpose.msra.mxu3 %v1079_v15 }
  0xc8   : > { %v1064_v36 = vpop.f32.mrf.mxu2 }
  0xc9   : > { %v992_v16 = vpop.f32.mrf.mxu0  ;;  %v1027_v17 = vpop.f32.mrf.mxu1  ;;  %v1065_v37 = vadd.f32 %v2475_v33, %v1064_v36 }
  0xca   : > { %v2578_v17 = vmov 32.0  }
  0xcb   : > { %v1108_v39 = vpack.c.bf16 %v1065_v37, %v1065_v37  ;;  %v2415_v37 = vld [vmem:[%s2638_s19 + $0x8] sm:$0xff] }
  0xcd   : > { %v1118_v44 = vand.u32 %v2780_v42, %v1108_v39 }
  0xce   : > { %1135 = vrot.lane.b32.xlu0 %v1072_v18, %s2576_s16  ;;  %2276 = vmatmul.msk.bf16.vlgmr.msra.gmra.mxu3 %vm1074_vm1, %v1072_v18  ;;  %v2800_v18 = vld [vmem:[%s934_s22] sm:$0xff] }
  0xcf   : > { %1127 = vmatpush.bf16.msrb.mxu0 %v1118_v44  ;;  %1211 = vmatpush.bf16.msrb.mxu3 %v2413_v62  ;;  %v2479_v44 = vld [vmem:[%s2643_s24 + $0x1] ss:$0 sm:$0xff] }
  0xd0   : > { %v1066_v46 = vpop.f32.mrf.mxu2 }
  0xd3   : > { %1233 = vmatpush.bf16.msra.mxu0 %v2412_v63 }
 0x138   : > { %v1139_v19 = vpop.permute.xlu0 %1138 }
 0x139   : > { %v1144_v20 = vsel %vm1074_vm1, %v1139_v19, 0  ;;  %v2802_v19 = vld [vmem:[%s934_s22 + $0x8] sm:$0xff]  ;;  %s2966_s22 = sld [smem:[#allocation8_spill]] }
 0x13a   : > { %1153 = vmatpush.bf16.xpose.msrb.mxu1 %v1144_v20  ;;  %v2417_v20 = vld [vmem:[%s2638_s19 + $0x18] sm:$0xff] }
 0x140   : > { %v1136_v21 = vpop.permute.xlu0 %1135 }
 0x141   : > { %2278 = vmatmul.msk.bf16.vlgmr.msrb.gmra.mxu1 %vm1074_vm1, %v1136_v21  ;;  %v953_v21 = vld [vmem:[%s2603_s17] sm:$0xff] }
 0x142   : > { %1318 = vmatpush.bf16.msra.mxu1 %v2415_v37 }
 0x151   : > { %v1090_v22 = vpop.f32.mrf.mxu3 }
 0x152   : > { %v1094_v30 = vmul.f32 0.25, %v1090_v22  ;;  %v954_v22 = vld [vmem:[%s2603_s17 + $0x8] sm:$0xff] }
 0x153   : > { %v1287_v24 = vadd.f32 %v954_v22, %v2802_v19 }
 0x154   : > { %v1096_v32 = vsel %vm1095_vm2, %v1094_v30, -inf }
 0x159   : > { %v1092_v23 = vpop.f32.mrf.mxu3 }
 0x15a   : > { %v1286_v23 = vadd.f32 %v953_v21, %v2800_v18 }
 0x15c   : > { %v2810_v26 = vpack.c.bf16 %v1287_v24, %v1286_v23 }
 0x1be   : > { %v1155_v27 = vpop.f32.mrf.mxu1 }
 0x1bf   : > { %v1159_v28 = vmul.f32 0.25, %v1155_v27 }
 0x1c1   : > { %v1160_v29 = vsel %vm1095_vm2, %v1159_v28, -inf }
 0x1c2   : > { %1161 = vmax.xlane.f32.xlu1 %v1160_v29 }
 0x1c6   : > { %v1157_v31 = vpop.f32.mrf.mxu1 }
 0x1ca   : > { %1097 = vmax.xlane.f32.xlu1 %v1096_v32 }
 0x235   : > { %v1162_v34 = vpop.xlane.xlu1 %1161 }
 0x236   : > { %v1163_v35 = vsub.f32 %v1159_v28, %v1162_v34 }
 0x238   : > { %v1164_v38 = vmul.f32 1.442695, %v1163_v35 }
 0x23a   : > { %2495 = vpow2.f32 %v1164_v38  ;;  %v2414_v38 = vld [vmem:[%s2638_s19] sm:$0xff] }
 0x23b   : > { %1319 = vmatpush.bf16.msra.mxu1 %v2414_v38 }
 0x23d   : > { %v1098_v43 = vpop.xlane.xlu1 %1097 }
 0x23e   : > { %v1099_v45 = vsub.f32 %v1094_v30, %v1098_v43 }
 0x240   : > { %v2496_v47 = vpop.eup %2495  ;;  %v1100_v48 = vmul.f32 1.442695, %v1099_v45 }
 0x241   : > { %v1166_v49 = vsel %vm1095_vm2, %v2496_v47, 0.0 }
 0x242   : > { %2497 = vpow2.f32 %v1100_v48  ;;  %1167 = vadd.xlane.f32.xlu2 %v1166_v49 }
 0x248   : > { %v2498_v50 = vpop.eup %2497 }
 0x249   : > { %v1102_v51 = vsel %vm1095_vm2, %v2498_v50, 0.0  ;;  %vm1672_vm2 = vcmask 523264  }
 0x24a   : > { %1103 = vadd.xlane.f32.xlu0 %v1102_v51 }
 0x25a   : > { %1173 = vrot.lane.b32.xlu2 %v1108_v39, %s2576_s16  ;;  %s2965_s16 = sld [smem:[#allocation10_spill]] }
 0x2b5   : > { %v1168_v52 = vpop.xlane.xlu2 %1167 }
 0x2b6   : > { %2499 = vrcp.f32 %v1168_v52 }
 0x2bc   : > { %v2500_v53 = vpop.eup %2499 }
 0x2bd   : > { %v1170_v54 = vmul.f32 %v2500_v53, %v2496_v47  ;;  %v1174_v55 = vpop.permute.xlu2 %1173  ;;  %v1104_v56 = vpop.xlane.xlu0 %1103 }
 0x2be   : > { %v1179_v57 = vand.u32 %v1174_v55, %v2780_v42  ;;  %2501 = vrcp.f32 %v1104_v56  ;;  %v2477_v56 = vld [vmem:[%s2628_s8] ss:$0 sm:$0xff] }
 0x2bf   : > { %v1171_v58 = vpack.c.bf16 %v1170_v54, %v1170_v54  ;;  %2503 = vrcp.f32 %v2578_v17 }
 0x2c0   : > { %1188 = vmatpush.bf16.msrb.mxu2 %v1179_v57 }
 0x2c3   : > { %2279 = vmatmul.msk.bf16.vlgmr.msrb.gmra.mxu2 %vm1109_vm5, %v1171_v58  ;;  %v2478_v58 = vld [vmem:[%s2633_s14] ss:$0 sm:$0xff] }
 0x2c4   : > { %v2502_v59 = vpop.eup %2501  ;;  %1357 = vmatpush.bf16.msra.mxu2 %v2417_v20 }
 0x2c5   : > { %v1106_v60 = vmul.f32 %v2502_v59, %v2498_v50  ;;  %v2504_v25 = vpop.eup %2503 }
 0x2c6   : > { %v1252_v27 = vmul.f32 32.0, %v2504_v25  ;;  %vm1256_vm7 = vweird.f32 %v2504_v25 }
 0x2c7   : > { %v1107_v61 = vpack.c.bf16 %v1106_v60, %v1106_v60 }
 0x2c8   : > { %v1253_v28 = vsub.f32 1.0, %v1252_v27 }
 0x2c9   : > { %2277 = vmatmul.msk.bf16.vlgmr.msrb.gmra.mxu0 %vm1109_vm5, %v1107_v61 }
 0x2ca   : > { %v1254_v29 = vmul.f32 %v2504_v25, %v1253_v28 }
 0x2cc   : > { %v1255_v30 = vadd.f32 %v2504_v25, %v1254_v29  ;;  %v2481_v29 = vld [vmem:[%s2643_s24 + $0x2] ss:$0 sm:$0xff] }
 0x2ce   : > { %v2814_v31 = vsel %vm1256_vm7, %v2504_v25, %v1255_v30 }
 0x346   : > { %v1129_v0 = vpop.f32.mrf.mxu0  ;;  %v1190_v1 = vpop.f32.mrf.mxu2 }
 0x347   : > { %v1133_v2 = vpack.c.bf16 %v1129_v0, %v1129_v0  ;;  %v1194_v3 = vpack.c.bf16 %v1190_v1, %v1190_v1 }
 0x349   : > { %2284 = vmatmul.msk.bf16.vlgmr.msrb.gmra.mxu3 %vm1074_vm1, %v1194_v3  ;;  %2289 = vmatmul.msk.bf16.vlgmr.msra.gmra.mxu0 %vm1074_vm1, %v1133_v2  ;;  %v2480_v2 = vld [vmem:[%s2643_s24] ss:$0 sm:$0xff] }
 0x34e   : > { %v1131_v6 = vpop.f32.mrf.mxu0  ;;  %v1192_v7 = vpop.f32.mrf.mxu2 }
 0x3c6   : > { %v1235_v8 = vpop.f32.mrf.mxu0 }
 0x3cc   : > { %v1213_v10 = vpop.f32.mrf.mxu3 }
 0x3cd   : > { %v1236_v11 = vadd.f32 %v1235_v8, %v1213_v10  ;;  %v2419_v10 = vld [vmem:[%s2638_s19 + $0x28] sm:$0xff] }
 0x3ce   : > { %v1237_v12 = vpop.f32.mrf.mxu0  ;;  %1397 = vmatpush.bf16.msra.mxu3 %v2419_v10 }
 0x3cf   : > { %v1243_v13 = vadd.f32 %v2476_v9, %v1236_v11  ;;  %v2418_v11 = vld [vmem:[%s2638_s19 + $0x20] sm:$0xff]  ;;  %v1370_v12 = vpack.c.bf16 %v2802_v19, %v2800_v18 }
 0x3d1   : > { %v1244_v14 = vadd.f32 %v1243_v13, %v2756_v4  ;;  %v2416_v4 = vld [vmem:[%s2638_s19 + $0x10] sm:$0xff] }
 0x3d2   : > { %1358 = vmatpush.bf16.msra.mxu2 %v2416_v4  ;;  %1398 = vmatpush.bf16.msra.mxu3 %v2418_v11 }
 0x3d3   : > { %v1248_v15 = vsel %vm1247_vm6, %v1244_v14, 0.0 }
 0x3d4   : > { %1249 = vadd.xlane.f32.xlu1 %v1248_v15  ;;  %v1215_v16 = vpop.f32.mrf.mxu3 }
 0x3d5   : > { %2312 = vmatmul.msk.bf16.vlgmr.msra.gmra.mxu2 %vm977_vm0, %v2810_v26  ;;  %2326 = vmatmul.msk.bf16.vlgmr.msra.gmra.mxu3 %vm977_vm0, %v1370_v12 }
 0x447   : > { %v1250_v32 = vpop.xlane.xlu1 %1249 }
 0x448   : > { %v1258_v33 = vmul.f32 %v2814_v31, %v1250_v32 }
 0x44a   : > { %v1259_v34 = vsub.f32 %v1244_v14, %v1258_v33 }
 0x44c   : > { %v1260_v35 = vmul.f32 %v1259_v34, %v1259_v34 }
 0x44e   : > { %v1261_v36 = vsel %vm1247_vm6, %v1260_v35, 0.0 }
 0x44f   : > { %1262 = vadd.xlane.f32.xlu1 %v1261_v36 }
 0x458   : > { %v1360_v41 = vpop.f32.mrf.mxu2  ;;  %v1400_v28 = vpop.f32.mrf.mxu3 }
 0x459   : > { %v1361_v45 = vadd.f32 %v2479_v44, %v1360_v41  ;;  %v1401_v30 = vadd.f32 %v2481_v29, %v1400_v28 }
 0x460   : > { %v1362_v46 = vpop.f32.mrf.mxu2  ;;  %v1402_v32 = vpop.f32.mrf.mxu3 }
 0x461   : > { %v1363_v47 = vadd.f32 %v2479_v44, %v1362_v46  ;;  %v1403_v33 = vadd.f32 %v2481_v29, %v1402_v32  ;;  %v1405_v46 = vld [vmem:[%s2648_s30] sm:$0xf] }
 0x462   : > { %v2484_v29 = vld [vmem:[%s2962_s2] ss:$0 sm:$0xff]  ;;  %s2968_s2 = sld [smem:[#allocation11_spill]] }
 0x463   : > { %v1408_v50 = vpack.c.bf16 %v1363_v47, %v1361_v45  ;;  %v1544_v47 = vsel %vm1523_vm13, %v1405_v46, 0 }
 0x465   : > { %v1414_v52 = vsel %vm1409_vm8, %v1408_v50, 0 }
 0x466   : > { %1423 = vmatpush.bf16.xpose.msrb.mxu0 %v1414_v52 }
 0x468   : > { %1465 = vrot.lane.b32.xlu1 %v1408_v50, %s2579_s23 }
 0x4c2   : > { %v1263_v39 = vpop.xlane.xlu1 %1262 }
 0x4c3   : > { %v1264_v40 = vmul.f32 %v1263_v39, %v2814_v31 }
 0x4c5   : > { %v1265_v43 = vadd.f32 1e-05, %v1264_v40 }
 0x4c7   : > { %2505 = vrsqrt.f32 %v1265_v43  ;;  %vm1272_vm10 = vweird.f32 %v1265_v43 }
 0x4cd   : > { %v2506_v48 = vpop.eup %2505 }
 0x4ce   : > { %v1267_v49 = vmul.f32 %v2506_v48, %v1265_v43  ;;  %vm1273_vm9 = vweird.f32 %v2506_v48 }
 0x4cf   : > { %vm1274_vm11 = vmor %vm1272_vm10, %vm1273_vm9 }
 0x4d0   : > { %v1268_v51 = vmul.f32 %v2506_v48, %v1267_v49 }
 0x4d2   : > { %v1269_v53 = vmul.f32 0.5, %v1268_v51 }
 0x4d4   : > { %v1270_v54 = vsub.f32 1.5, %v1269_v53 }
 0x4d6   : > { %v1271_v55 = vmul.f32 %v2506_v48, %v1270_v54 }
 0x4d8   : > { %v1275_v57 = vsel %vm1274_vm11, %v2506_v48, %v1271_v55  ;;  %v1406_v55 = vld [vmem:[%s2648_s30 + $0x4] sm:$0xf] }
 0x4d9   : > { %v1276_v59 = vmul.f32 %v1275_v57, %v1259_v34  ;;  %v1443_v34 = vpack.c.bf16 %v1403_v33, %v1401_v30 }
 0x4da   : > { %v1466_v0 = vpop.permute.xlu1 %1465 }
 0x4db   : > { %v1280_v60 = vmul.f32 %v2477_v56, %v1276_v59  ;;  %v1471_v1 = vsel %vm1409_vm8, %v1466_v0, 0  ;;  %1454 = vmatpush.bf16.msrb.mxu1 %v1443_v34  ;;  %v1525_v56 = vsel %vm1523_vm13, %v1406_v55, 0  ;;  %v2431_v55 = vld [vmem:[%s2965_s16 + $0x28] sm:$0xff] }
 0x4dc   : > { %1480 = vmatpush.bf16.xpose.msrb.mxu2 %v1471_v1  ;;  %1534 = vmatpush.bf16.msra.mxu0 %v1525_v56  ;;  %v2427_v56 = vld [vmem:[%s2965_s16 + $0x8] sm:$0xff] }
 0x4dd   : > { %v2826_v61 = vadd.f32 %v2478_v58, %v1280_v60 }
 0x4df   : > { %v1285_v62 = vadd.f32 %v2826_v61, %v2758_v5 }
 0x4e1   : > { %v1292_v63 = vpack.c.bf16 %v1285_v62, %v1285_v62 }
 0x4e3   : > { %2298 = vmatmul.msk.bf16.vlgmr.msra.gmra.mxu1 %vm977_vm0, %v1292_v63  ;;  %v2482_v63 = vld [vmem:[%s2653_s6] ss:$0 sm:$0xff] }
 0x4e4   : > { %1553 = vmatpush.bf16.msra.mxu1 %v1544_v47 }
 0x560   : > { %v1321_v3 = vpop.f32.mrf.mxu1 }
 0x561   : > { %v1322_v6 = vadd.f32 %v2480_v2, %v1321_v3 }
 0x563   : > { %v1407_v7 = vpack.c.bf16 %v1322_v6, %v1322_v6 }
 0x565   : > { %1462 = vrot.lane.b32.xlu2 %v1407_v7, %s2579_s23  ;;  %2327 = vmatmul.msk.bf16.vlgmr.msrb.gmra.mxu0 %vm1409_vm8, %v1407_v7 }
 0x566   : > { %1749 = vmatpush.bf16.msrb.mxu0 %v2427_v56 }
 0x568   : > { %v1323_v8 = vpop.f32.mrf.mxu1 }
 0x5bf   : > { %v1463_v9 = vpop.permute.xlu2 %1462 }
 0x5c0   : > { %2329 = vmatmul.msk.bf16.vlgmr.msrb.gmra.mxu2 %vm1409_vm8, %v1463_v9 }
 0x5e2   : > { %v1425_v13 = vpop.f32.mrf.mxu0 }
 0x5e3   : > { %v1429_v14 = vmul.f32 0.35355338, %v1425_v13  ;;  %v2421_v13 = vld [vmem:[%s2959_s26 + $0x8] sm:$0xff] }
 0x5e4   : > { %1627 = vmatpush.bf16.msra.mxu2 %v2421_v13 }
 0x5e5   : > { %v1431_v15 = vsel %vm1430_vm12, %v1429_v14, -inf }
 0x5e6   : > { %1432 = vmax.xlane.f32.xlu1 %v1431_v15  ;;  %v2425_v15 = vld [vmem:[%s2960_s28 + $0x18] sm:$0xff] }
 0x5ea   : > { %v1427_v16 = vpop.f32.mrf.mxu0 }
 0x643   : > { %v1482_v17 = vpop.f32.mrf.mxu2 }
 0x644   : > { %v1486_v20 = vmul.f32 0.35355338, %v1482_v17  ;;  %v2424_v17 = vld [vmem:[%s2960_s28 + $0x10] sm:$0xff] }
 0x646   : > { %v1487_v21 = vsel %vm1430_vm12, %v1486_v20, -inf }
 0x647   : > { %1488 = vmax.xlane.f32.xlu2 %v1487_v21 }
 0x64b   : > { %v1484_v22 = vpop.f32.mrf.mxu2 }
 0x659   : > { %v1433_v23 = vpop.xlane.xlu1 %1432 }
 0x65a   : > { %v1434_v4 = vsub.f32 %v1429_v14, %v1433_v23  ;;  %v2420_v14 = vld [vmem:[%s2959_s26] sm:$0xff] }
 0x65b   : > { %1628 = vmatpush.bf16.msra.mxu2 %v2420_v14 }
 0x65c   : > { %v1435_v24 = vmul.f32 1.442695, %v1434_v4 }
 0x65e   : > { %2507 = vpow2.f32 %v1435_v24 }
 0x65f   : > { %1828 = vmatpush.bf16.msrb.mxu2 %v2431_v55 }
 0x664   : > { %v2508_v25 = vpop.eup %2507 }
 0x665   : > { %v1437_v27 = vsel %vm1430_vm12, %v2508_v25, 0.0 }
 0x666   : > { %1438 = vadd.xlane.f32.xlu0 %v1437_v27  ;;  %v2483_v27 = vld [vmem:[%s2961_s1] ss:$0 sm:$0xff]  ;;  %s2967_s1 = sld [smem:[#allocation9_spill]] }
 0x6ba   : > { %v1489_v35 = vpop.xlane.xlu2 %1488 }
 0x6bb   : > { %v1490_v36 = vsub.f32 %v1486_v20, %v1489_v35  ;;  %v2423_v35 = vld [vmem:[%s2960_s28 + $0x8] sm:$0xff] }
 0x6bd   : > { %v1491_v37 = vmul.f32 1.442695, %v1490_v36  ;;  %v2422_v36 = vld [vmem:[%s2960_s28] sm:$0xff] }
 0x6bf   : > { %2509 = vpow2.f32 %v1491_v37  ;;  %v2485_v37 = vld [vmem:[%s2963_s11] ss:$0 sm:$0xff]  ;;  %s942_s11 = scalar_lea.vmem %s2728_s27, %s2750_s0  ;;  %s2969_s0 = sld [smem:[#allocation12_spill]] }
 0x6c5   : > { %v2510_v38 = vpop.eup %2509 }
 0x6c6   : > { %v1493_v39 = vsel %vm1430_vm12, %v2510_v38, 0.0 }
 0x6c7   : > { %1494 = vadd.xlane.f32.xlu0 %v1493_v39 }
 0x6d9   : > { %v1439_v40 = vpop.xlane.xlu0 %1438 }
 0x6da   : > { %2511 = vrcp.f32 %v1439_v40 }
 0x6db   : > { %1500 = vrot.lane.b32.xlu0 %v1443_v34, %s2579_s23 }
 0x6e0   : > { %v2512_v41 = vpop.eup %2511 }
 0x6e1   : > { %v1441_v43 = vmul.f32 %v2512_v41, %v2508_v25 }
 0x6e3   : > { %v1442_v44 = vpack.c.bf16 %v1441_v43, %v1441_v43 }
 0x6e5   : > { %2328 = vmatmul.msk.bf16.vlgmr.msrb.gmra.mxu1 %vm1074_vm1, %v1442_v44  ;;  %v2486_v44 = vld [vmem:[%s2964_s15] ss:$0 sm:$0xff]  ;;  %s947_s15 = scalar_lea.vmem %s2733_s4, %s2404_s18 }
 0x73a   : > { %v1495_v45 = vpop.xlane.xlu0 %1494 }
 0x73b   : > { %2513 = vrcp.f32 %v1495_v45 }
 0x741   : > { %v2514_v48 = vpop.eup %2513 }
 0x742   : > { %v1497_v49 = vmul.f32 %v2514_v48, %v2510_v38 }
 0x744   : > { %v1498_v51 = vpack.c.bf16 %v1497_v49, %v1497_v49 }
 0x74d   : > { %v1501_v50 = vpop.permute.xlu0 %1500 }
 0x74e   : > { %1513 = vmatpush.bf16.msrb.mxu3 %v1501_v50 }
 0x751   : > { %2330 = vmatmul.msk.bf16.vlgmr.msrb.gmra.mxu3 %vm1074_vm1, %v1498_v51 }
 0x752   : > { %1680 = vmatpush.bf16.msra.mxu3 %v2425_v15 }
 0x756   : > { %1681 = vmatpush.bf16.msra.mxu3 %v2424_v17  ;;  %v2489_v17 = vld [vmem:[%s2968_s2] ss:$0 sm:$0xff] }
 0x75a   : > { %1682 = vmatpush.bf16.msra.mxu3 %v2423_v35 }
 0x75e   : > { %1683 = vmatpush.bf16.msra.mxu3 %v2422_v36 }
 0x762   : > { %v1456_v52 = vpop.f32.mrf.mxu1 }
 0x763   : > { %v1460_v53 = vpack.c.bf16 %v1456_v52, %v1456_v52 }
 0x765   : > { %2332 = vmatmul.msk.bf16.vlgmr.msra.gmra.mxu1 %vm1409_vm8, %v1460_v53 }
 0x76a   : > { %v1458_v54 = vpop.f32.mrf.mxu1 }
 0x7d4   : > { %v1515_v57 = vpop.f32.mrf.mxu3 }
 0x7d5   : > { %v1519_v58 = vpack.c.bf16 %v1515_v57, %v1515_v57  ;;  %v2429_v57 = vld [vmem:[%s2965_s16 + $0x18] sm:$0xff] }
 0x7d6   : > { %1789 = vmatpush.bf16.msrb.mxu1 %v2429_v57 }
 0x7d7   : > { %2331 = vmatmul.msk.bf16.vlgmr.msra.gmra.mxu0 %vm1409_vm8, %v1519_v58  ;;  %v2430_v58 = vld [vmem:[%s2965_s16 + $0x20] sm:$0xff] }
 0x7d8   : > { %1829 = vmatpush.bf16.msrb.mxu2 %v2430_v58 }
 0x7dc   : > { %v1517_v59 = vpop.f32.mrf.mxu3 }
 0x7dd   : > { %v2426_v59 = vld [vmem:[%s2965_s16] sm:$0xff] }
 0x7de   : > { %1750 = vmatpush.bf16.msrb.mxu0 %v2426_v59 }
 0x7e2   : > { %v1555_v60 = vpop.f32.mrf.mxu1 }
 0x7e7   : > { %2367 = vmatmul.msk.bf16.vlgmr.msrb.gmra.mxu0 %vm977_vm0, %v2810_v26 }
 0x7ea   : > { %v1557_v62 = vpop.f32.mrf.mxu1 }
 0x854   : > { %v1536_v0 = vpop.f32.mrf.mxu0 }
 0x855   : > { %v1556_v1 = vadd.f32 %v1555_v60, %v1536_v0  ;;  %v2428_v60 = vld [vmem:[%s2965_s16 + $0x10] sm:$0xff] }
 0x856   : > { %1790 = vmatpush.bf16.msrb.mxu1 %v2428_v60 }
 0x857   : > { %v1563_v2 = vadd.f32 %v2482_v63, %v1556_v1 }
 0x859   : > { %v1564_v3 = vadd.f32 %v1563_v2, %v2826_v61 }
 0x85b   : > { %v1567_v6 = vsel %vm1247_vm6, %v1564_v3, 0.0 }
 0x85c   : > { %v1538_v7 = vpop.f32.mrf.mxu0  ;;  %1568 = vadd.xlane.f32.xlu2 %v1567_v6 }
 0x8cf   : > { %v1569_v8 = vpop.xlane.xlu2 %1568 }
 0x8d0   : > { %v1570_v9 = vmul.f32 %v1569_v8, %v2814_v31 }
 0x8d2   : > { %v1571_v10 = vsub.f32 %v1564_v3, %v1570_v9  ;;  %v2487_v9 = vld [vmem:[%s2966_s22] ss:$0 sm:$0xff] }
 0x8d4   : > { %v1572_v11 = vmul.f32 %v1571_v10, %v1571_v10 }
 0x8d6   : > { %v1573_v12 = vsel %vm1247_vm6, %v1572_v11, 0.0  ;;  %v2488_v11 = vld [vmem:[%s2967_s1] ss:$0 sm:$0xff] }
 0x8d7   : > { %1574 = vadd.xlane.f32.xlu2 %v1573_v12 }
 0x94a   : > { %v1575_v61 = vpop.xlane.xlu2 %1574 }
 0x94b   : > { %v1576_v16 = vmul.f32 %v1575_v61, %v2814_v31 }
 0x94d   : > { %v1577_v20 = vadd.f32 1e-05, %v1576_v16  ;;  %v1752_v16 = vpop.f32.mrf.mxu0 }
 0x94f   : > { %2515 = vrsqrt.f32 %v1577_v20  ;;  %vm1584_vm15 = vweird.f32 %v1577_v20 }
 0x955   : > { %v2516_v21 = vpop.eup %2515 }
 0x956   : > { %v1579_v22 = vmul.f32 %v2516_v21, %v1577_v20  ;;  %vm1585_vm14 = vweird.f32 %v2516_v21  ;;  %v1753_v20 = vadd.f32 %v2489_v17, %v1752_v16 }
 0x957   : > { %vm1586_vm1 = vmor %vm1584_vm15, %vm1585_vm14 }
 0x958   : > { %v1580_v23 = vmul.f32 %v2516_v21, %v1579_v22 }
 0x95a   : > { %v1581_v4 = vmul.f32 0.5, %v1580_v23 }
 0x95c   : > { %v1582_v24 = vsub.f32 1.5, %v1581_v4  ;;  %v2490_v4 = vld [vmem:[%s2968_s2 + $0x1] ss:$0 sm:$0xff] }
 0x95e   : > { %v1583_v25 = vmul.f32 %v2516_v21, %v1582_v24 }
 0x960   : > { %v1587_v28 = vsel %vm1586_vm1, %v2516_v21, %v1583_v25  ;;  %v1754_v21 = vpop.f32.mrf.mxu0 }
 0x961   : > { %v1588_v30 = vmul.f32 %v1587_v28, %v1571_v10  ;;  %v1755_v22 = vadd.f32 %v2489_v17, %v1754_v21 }
 0x963   : > { %v1592_v32 = vmul.f32 %v2483_v27, %v1588_v30  ;;  %v1837_v23 = vpack.c.bf16 %v1755_v22, %v1753_v20  ;;  %v2491_v27 = vld [vmem:[%s2968_s2 + $0x2] ss:$0 sm:$0xff] }
 0x965   : > { %v1596_v33 = vadd.f32 %v2484_v29, %v1592_v32 }
 0x967   : > { %v1601_v34 = vpack.c.bf16 %v1596_v33, %v1596_v33 }
 0x969   : > { %2341 = vmatmul.msk.bf16.vlgmr.msra.gmra.mxu2 %vm977_vm0, %v1601_v34 }
 0x9ec   : > { %v1630_v38 = vpop.f32.mrf.mxu2 }
 0x9ed   : > { %v1631_v39 = vadd.f32 %v2485_v37, %v1630_v38 }
 0x9ef   : > { %v1634_v40 = vmax.f32 %v1631_v39, 0.0 }
 0x9f1   : > { %v1643_v41 = vpack.c.bf16 %v1634_v40, %v1634_v40 }
 0x9f3   : > { %2358 = vmatmul.msk.bf16.vlgmr.msra.gmra.mxu3 %vm1672_vm2, %v1643_v41 }
 0x9f4   : > { %v1632_v43 = vpop.f32.mrf.mxu2 }
 0xa76   : > { %v1685_v45 = vpop.f32.mrf.mxu3 }
 0xa77   : > { %v1686_v46 = vadd.f32 %v2486_v44, %v1685_v45 }
 0xa79   : > { %v1689_v47 = vadd.f32 %v1686_v46, %v1596_v33 }
 0xa7b   : > { %v1692_v48 = vsel %vm1247_vm6, %v1689_v47, 0.0 }
 0xa7c   : > { %1693 = vadd.xlane.f32.xlu0 %v1692_v48 }
 0xa7e   : > { %v1687_v49 = vpop.f32.mrf.mxu3 }
 0xaef   : > { %v1694_v50 = vpop.xlane.xlu0 %1693 }
 0xaf0   : > { %v1695_v51 = vmul.f32 %v1694_v50, %v2814_v31 }
 0xaf2   : > { %v1696_v52 = vsub.f32 %v1689_v47, %v1695_v51 }
 0xaf4   : > { %v1697_v53 = vmul.f32 %v1696_v52, %v1696_v52 }
 0xaf6   : > { %v1698_v54 = vsel %vm1247_vm6, %v1697_v53, 0.0 }
 0xaf7   : > { %1699 = vadd.xlane.f32.xlu2 %v1698_v54 }
 0xb0f   : > { %1907 = vrot.lane.b32.xlu2 %v1837_v23, %s2579_s23 }
 0xb6a   : > { %v1700_v62 = vpop.xlane.xlu2 %1699 }
 0xb6b   : > { %v1701_v63 = vmul.f32 %v1700_v62, %v2814_v31 }
 0xb6d   : > { %v1702_v0 = vadd.f32 1e-05, %v1701_v63 }
 0xb6f   : > { %2517 = vrsqrt.f32 %v1702_v0  ;;  %vm1709_vm4 = vweird.f32 %v1702_v0 }
 0xb72   : > { %v1908_v38 = vpop.permute.xlu2 %1907 }
 0xb75   : > { %v2518_v1 = vpop.eup %2517 }
 0xb76   : > { %v1704_v2 = vmul.f32 %v2518_v1, %v1702_v0  ;;  %vm1710_vm3 = vweird.f32 %v2518_v1 }
 0xb77   : > { %vm1711_vm7 = vmor %vm1709_vm4, %vm1710_vm3 }
 0xb78   : > { %v1705_v3 = vmul.f32 %v2518_v1, %v1704_v2 }
 0xb7a   : > { %v1706_v6 = vmul.f32 0.5, %v1705_v3 }
 0xb7c   : > { %v1707_v7 = vsub.f32 1.5, %v1706_v6 }
 0xb7e   : > { %v1708_v8 = vmul.f32 %v2518_v1, %v1707_v7 }
 0xb80   : > { %v1712_v10 = vsel %vm1711_vm7, %v2518_v1, %v1708_v8 }
 0xb81   : > { %v1713_v12 = vmul.f32 %v1712_v10, %v1696_v52 }
 0xb83   : > { %v1717_v13 = vmul.f32 %v2487_v9, %v1713_v12 }
 0xb85   : > { %v1721_v26 = vadd.f32 %v2488_v11, %v1717_v13 }
 0xb87   : > { %2085 = vst.msk [vmem:[%s942_s11] sm:$0x1f] %vm1247_vm6, %v1721_v26  ;;  %v1801_v14 = vpack.c.bf16 %v1721_v26, %v1721_v26  ;;  %v1722_v15 = vadd.f32 %v1721_v26, %v2758_v5 }
 0xb89   : > { %2395 = vmatmul.msk.bf16.vlgmr.msrb.gmra.mxu2 %vm977_vm0, %v1801_v14  ;;  %v1762_v61 = vpack.c.bf16 %v1722_v15, %v1722_v15 }
 0xb8b   : > { %2381 = vmatmul.msk.bf16.vlgmr.msrb.gmra.mxu1 %vm977_vm0, %v1762_v61 }
 0xc08   : > { %v1792_v24 = vpop.f32.mrf.mxu1 }
 0xc09   : > { %v1793_v25 = vadd.f32 %v2490_v4, %v1792_v24 }
 0xc0b   : > { %v1838_v28 = vpack.c.bf16 %v1793_v25, %v1793_v25  ;;  %v1836_v25 = vld [vmem:[%s2969_s0 + $0x4] sm:$0xf] }
 0xc0c   : > { %v1831_v29 = vpop.f32.mrf.mxu2 }
 0xc0d   : > { %v1843_v5 = vsel %vm1409_vm8, %v1838_v28, 0  ;;  %v1832_v30 = vadd.f32 %v2491_v27, %v1831_v29  ;;  %1910 = vrot.lane.b32.xlu1 %v1838_v28, %s2579_s23  ;;  %v1985_v27 = vsel %vm1523_vm13, %v1836_v25, 0  ;;  %v1835_v28 = vld [vmem:[%s2969_s0] sm:$0xf] }
 0xc0e   : > { %1852 = vmatpush.bf16.xpose.msrb.mxu3 %v1843_v5  ;;  %v2005_v29 = vsel %vm1523_vm13, %v1835_v28, 0 }
 0xc0f   : > { %v1884_v32 = vpack.c.bf16 %v1832_v30, %v1832_v30 }
 0xc10   : > { %v1794_v33 = vpop.f32.mrf.mxu1 }
 0xc11   : > { %v1889_v34 = vand.u32 %v1884_v32, %v2780_v42 }
 0xc13   : > { %1898 = vmatpush.bf16.msra.mxu0 %v1889_v34 }
 0xc14   : > { %v1833_v35 = vpop.f32.mrf.mxu2 }
 0xc15   : > { %2396 = vmatmul.msk.bf16.vlgmr.msrb.gmra.mxu3 %vm1409_vm8, %v1837_v23 }
 0xc16   : > { %1994 = vmatpush.bf16.msra.mxu3 %v1985_v27 }
 0xc17   : > { %2014 = vmatpush.bf16.msrb.mxu0 %v2005_v29 }
 0xc7f   : > { %v1911_v36 = vpop.permute.xlu1 %1910 }
 0xc80   : > { %v1916_v37 = vsel %vm1409_vm8, %v1911_v36, 0 }
 0xc81   : > { %1925 = vmatpush.bf16.xpose.msra.mxu1 %v1916_v37 }
 0xc88   : > { %2398 = vmatmul.msk.bf16.vlgmr.msra.gmra.mxu1 %vm1409_vm8, %v1908_v38 }
 0xc98   : > { %v1854_v39 = vpop.f32.mrf.mxu3 }
 0xc99   : > { %v1859_v40 = vmul.f32 0.35355338, %v1854_v39 }
 0xc9b   : > { %v1861_v41 = vsel %vm1109_vm5, %v1859_v40, -inf }
 0xc9c   : > { %1862 = vmax.xlane.f32.xlu0 %v1861_v41 }
 0xca0   : > { %v1856_v43 = vpop.f32.mrf.mxu3 }
 0xca1   : > { %v1860_v44 = vmul.f32 0.35355338, %v1856_v43 }
 0xca3   : > { %v1864_v45 = vsel %vm1109_vm5, %v1860_v44, -inf }
 0xca4   : > { %1865 = vmax.xlane.f32.xlu0 %v1864_v45 }
 0xd05   : > { %v1927_v46 = vpop.f32.mrf.mxu1 }
 0xd06   : > { %v1932_v47 = vmul.f32 0.35355338, %v1927_v46 }
 0xd08   : > { %v1934_v48 = vsel %vm1109_vm5, %v1932_v47, -inf }
 0xd09   : > { %1935 = vmax.xlane.f32.xlu1 %v1934_v48 }
 0xd0d   : > { %v1929_v49 = vpop.f32.mrf.mxu1 }
 0xd0e   : > { %v1933_v50 = vmul.f32 0.35355338, %v1929_v49 }
 0xd0f   : > { %v1863_v51 = vpop.xlane.xlu0 %1862 }
 0xd10   : > { %v1937_v52 = vsel %vm1109_vm5, %v1933_v50, -inf  ;;  %v1867_v1 = vsub.f32 %v1859_v40, %v1863_v51 }
 0xd11   : > { %1938 = vmax.xlane.f32.xlu2 %v1937_v52 }
 0xd12   : > { %v1869_v6 = vmul.f32 1.442695, %v1867_v1 }
 0xd17   : > { %v1866_v53 = vpop.xlane.xlu0 %1865 }
 0xd18   : > { %v1868_v54 = vsub.f32 %v1860_v44, %v1866_v53 }
 0xd1a   : > { %v1871_v55 = vmul.f32 1.442695, %v1868_v54 }
 0xd1c   : > { %2519 = vpow2.f32 %v1871_v55 }
 0xd22   : > { %v2520_v56 = vpop.eup %2519  ;;  %1958 = vrot.lane.b32.xlu1 %v1884_v32, %s2579_s23  ;;  %s2970_s23 = sld [smem:[#allocation13_spill]] }
 0xd23   : > { %v1876_v57 = vsel %vm1109_vm5, %v2520_v56, 0.0 }
 0xd24   : > { %1877 = vadd.xlane.f32.xlu2 %v1876_v57 }
 0xd28   : > { %v2492_v37 = vld [vmem:[%s2970_s23] ss:$0 sm:$0xff] }
 0xd7c   : > { %v1936_v58 = vpop.xlane.xlu1 %1935 }
 0xd7d   : > { %v1940_v59 = vsub.f32 %v1932_v47, %v1936_v58 }
 0xd7f   : > { %v1942_v60 = vmul.f32 1.442695, %v1940_v59 }
 0xd81   : > { %2521 = vpow2.f32 %v1942_v60 }
 0xd84   : > { %v1939_v62 = vpop.xlane.xlu2 %1938 }
 0xd85   : > { %v1941_v63 = vsub.f32 %v1933_v50, %v1939_v62 }
 0xd87   : > { %v2522_v0 = vpop.eup %2521  ;;  %v1944_v2 = vmul.f32 1.442695, %v1941_v63 }
 0xd88   : > { %v1946_v3 = vsel %vm1109_vm5, %v2522_v0, 0.0 }
 0xd89   : > { %2523 = vpow2.f32 %v1944_v2  ;;  %1947 = vadd.xlane.f32.xlu0 %v1946_v3 }
 0xd8a   : > { %2525 = vpow2.f32 %v1869_v6 }
 0xd8f   : > { %v2524_v7 = vpop.eup %2523 }
 0xd90   : > { %v1949_v8 = vsel %vm1109_vm5, %v2524_v7, 0.0  ;;  %v2526_v10 = vpop.eup %2525 }
 0xd91   : > { %1950 = vadd.xlane.f32.xlu0 %v1949_v8  ;;  %v1873_v12 = vsel %vm1109_vm5, %v2526_v10, 0.0 }
 0xd94   : > { %v1959_v9 = vpop.permute.xlu1 %1958 }
 0xd95   : > { %v1964_v11 = vand.u32 %v1959_v9, %v2780_v42 }
 0xd97   : > { %1973 = vmatpush.bf16.msra.mxu2 %v1964_v11  ;;  %v1878_v14 = vpop.xlane.xlu2 %1877  ;;  %v2493_v11 = vld [vmem:[%s2718_s12] ss:$0 sm:$0xff] }
 0xd99   : > { %1874 = vadd.xlane.f32.xlu0 %v1873_v12 }
 0xdfc   : > { %v1948_v13 = vpop.xlane.xlu0 %1947 }
 0xdfd   : > { %2527 = vrcp.f32 %v1948_v13 }
 0xe03   : > { %v2528_v15 = vpop.eup %2527 }
 0xe04   : > { %v1951_v26 = vpop.xlane.xlu0 %1950  ;;  %v1954_v16 = vmul.f32 %v2528_v15, %v2522_v0 }
 0xe05   : > { %2529 = vrcp.f32 %v1951_v26 }
 0xe06   : > { %2531 = vrcp.f32 %v1878_v14 }
 0xe0b   : > { %v2530_v61 = vpop.eup %2529 }
 0xe0c   : > { %v1955_v17 = vmul.f32 %v2530_v61, %v2524_v7  ;;  %v1875_v20 = vpop.xlane.xlu0 %1874  ;;  %v2532_v42 = vpop.eup %2531 }
 0xe0d   : > { %2533 = vrcp.f32 %v1875_v20  ;;  %v1882_v23 = vmul.f32 %v2532_v42, %v2520_v56 }
 0xe0e   : > { %v1956_v21 = vpack.c.bf16 %v1955_v17, %v1954_v16 }
 0xe10   : > { %2399 = vmatmul.msk.bf16.vlgmr.msra.gmra.mxu2 %vm1109_vm5, %v1956_v21 }
 0xe13   : > { %v2534_v22 = vpop.eup %2533 }
 0xe14   : > { %v1881_v4 = vmul.f32 %v2534_v22, %v2526_v10 }
 0xe16   : > { %v1883_v24 = vpack.c.bf16 %v1882_v23, %v1881_v4 }
 0xe18   : > { %2397 = vmatmul.msk.bf16.vlgmr.msra.gmra.mxu0 %vm1109_vm5, %v1883_v24 }
 0xe93   : > { %v1975_v5 = vpop.f32.mrf.mxu2 }
 0xe95   : > { %v1900_v30 = vpop.f32.mrf.mxu0 }
 0xe9b   : > { %v1977_v32 = vpop.f32.mrf.mxu2 }
 0xe9c   : > { %v1980_v33 = vpack.c.bf16 %v1977_v32, %v1975_v5 }
 0xe9d   : > { %v1902_v34 = vpop.f32.mrf.mxu0 }
 0xe9e   : > { %v1905_v35 = vpack.c.bf16 %v1902_v34, %v1900_v30  ;;  %2400 = vmatmul.msk.bf16.vlgmr.msra.gmra.mxu3 %vm1409_vm8, %v1980_v33 }
 0xea0   : > { %2401 = vmatmul.msk.bf16.vlgmr.msrb.gmra.mxu0 %vm1409_vm8, %v1905_v35 }
 0xf1d   : > { %v2016_v36 = vpop.f32.mrf.mxu0 }
 0xf21   : > { %v1996_v38 = vpop.f32.mrf.mxu3 }
 0xf22   : > { %v2017_v39 = vadd.f32 %v2016_v36, %v1996_v38 }
 0xf24   : > { %v2025_v40 = vadd.f32 %v2492_v37, %v2017_v39 }
 0xf25   : > { %v2018_v44 = vpop.f32.mrf.mxu0 }
 0xf26   : > { %v2027_v41 = vadd.f32 %v2025_v40, %v2800_v18 }
 0xf28   : > { %v2031_v43 = vsel %vm977_vm0, %v2027_v41, 0.0 }
 0xf29   : > { %v1998_v45 = vpop.f32.mrf.mxu3  ;;  %2032 = vadd.xlane.f32.xlu0 %v2031_v43 }
 0xf2a   : > { %v2019_v46 = vadd.f32 %v2018_v44, %v1998_v45 }
 0xf2c   : > { %v2026_v47 = vadd.f32 %v2492_v37, %v2019_v46 }
 0xf2e   : > { %v2028_v48 = vadd.f32 %v2026_v47, %v2802_v19 }
 0xf30   : > { %v2034_v49 = vsel %vm977_vm0, %v2028_v48, 0.0 }
 0xf31   : > { %2035 = vadd.xlane.f32.xlu2 %v2034_v49 }
 0xf9c   : > { %v2033_v50 = vpop.xlane.xlu0 %2032 }
 0xf9d   : > { %v2037_v51 = vmul.f32 %v2033_v50, %v2814_v31 }
 0xf9f   : > { %v2039_v52 = vsub.f32 %v2027_v41, %v2037_v51 }
 0xfa1   : > { %v2041_v53 = vmul.f32 %v2039_v52, %v2039_v52 }
 0xfa3   : > { %v2043_v54 = vsel %vm977_vm0, %v2041_v53, 0.0 }
 0xfa4   : > { %v2036_v18 = vpop.xlane.xlu2 %2035  ;;  %2044 = vadd.xlane.f32.xlu0 %v2043_v54 }
 0xfa5   : > { %v2038_v55 = vmul.f32 %v2036_v18, %v2814_v31 }
 0xfa7   : > { %v2040_v56 = vsub.f32 %v2028_v48, %v2038_v55 }
 0xfa9   : > { %v2042_v57 = vmul.f32 %v2040_v56, %v2040_v56 }
 0xfab   : > { %v2046_v58 = vsel %vm977_vm0, %v2042_v57, 0.0 }
 0xfac   : > { %2047 = vadd.xlane.f32.xlu2 %v2046_v58 }
0x1017   : > { %v2045_v19 = vpop.xlane.xlu0 %2044 }
0x1018   : > { %v2049_v59 = vmul.f32 %v2045_v19, %v2814_v31 }
0x101a   : > { %v2051_v60 = vadd.f32 1e-05, %v2049_v59 }
0x101c   : > { %2535 = vrsqrt.f32 %v2051_v60  ;;  %vm2059_vm6 = vweird.f32 %v2051_v60 }
0x101f   : > { %v2048_v62 = vpop.xlane.xlu2 %2047 }
0x1020   : > { %v2050_v63 = vmul.f32 %v2048_v62, %v2814_v31  ;;  %v2494_v31 = vld [vmem:[%s2723_s20] ss:$0 sm:$0xff] }
0x1022   : > { %v2536_v0 = vpop.eup %2535  ;;  %v2052_v1 = vadd.f32 1e-05, %v2050_v63 }
0x1023   : > { %v2054_v2 = vmul.f32 %v2536_v0, %v2051_v60  ;;  %vm2060_vm5 = vweird.f32 %v2536_v0 }
0x1024   : > { %2537 = vrsqrt.f32 %v2052_v1  ;;  %vm2061_vm8 = vmor %vm2059_vm6, %vm2060_vm5  ;;  %vm2069_vm10 = vweird.f32 %v2052_v1 }
0x1025   : > { %v2055_v3 = vmul.f32 %v2536_v0, %v2054_v2 }
0x1027   : > { %v2056_v6 = vmul.f32 0.5, %v2055_v3 }
0x1029   : > { %v2057_v7 = vsub.f32 1.5, %v2056_v6 }
0x102a   : > { %v2538_v8 = vpop.eup %2537 }
0x102b   : > { %v2058_v9 = vmul.f32 %v2536_v0, %v2057_v7  ;;  %v2064_v10 = vmul.f32 %v2538_v8, %v2052_v1  ;;  %vm2070_vm9 = vweird.f32 %v2538_v8 }
0x102c   : > { %vm2071_vm11 = vmor %vm2069_vm10, %vm2070_vm9 }
0x102d   : > { %v2062_v12 = vsel %vm2061_vm8, %v2536_v0, %v2058_v9  ;;  %v2065_v13 = vmul.f32 %v2538_v8, %v2064_v10 }
0x102e   : > { %v2073_v26 = vmul.f32 %v2062_v12, %v2039_v52 }
0x102f   : > { %v2066_v14 = vmul.f32 0.5, %v2065_v13 }
0x1030   : > { %v2078_v15 = vmul.f32 %v2493_v11, %v2073_v26 }
0x1031   : > { %v2067_v61 = vsub.f32 1.5, %v2066_v14 }
0x1032   : > { %v2083_v16 = vadd.f32 %v2494_v31, %v2078_v15 }
0x1033   : > { %v2068_v17 = vmul.f32 %v2538_v8, %v2067_v61 }
0x1034   : > { %2086 = vst.msk [vmem:[%s947_s15] sm:$0xff] %vm977_vm0, %v2083_v16 }
0x1035   : > { %v2072_v20 = vsel %vm2071_vm11, %v2538_v8, %v2068_v17 }
0x1036   : > { %v2074_v21 = vmul.f32 %v2072_v20, %v2040_v56 }
0x1038   : > { %v2079_v42 = vmul.f32 %v2493_v11, %v2074_v21 }
0x103a   : > { %v2084_v22 = vadd.f32 %v2494_v31, %v2079_v42 }
0x103c   : > { %2087 = vst.msk [vmem:[%s947_s15 + $0x8] sm:$0xff] %vm977_vm0, %v2084_v22 }
0x103d PF: > { %s70_s7 = sadd.s32 1, %s2545_s7  }
0x103e   : > { %p67_p4 = scmp.ge.s32.totalorder %s70_s7, 4  }
0x1040   :  { %69 = sbr.rel (!%p67_p4) target bundleno = 49 (0x31), region = 221 }

// kernel: bk_medsam_forward.19
= control target key start
LH: loop header
LB: loop body
LE: loop exit
PB: predicated region body
PF: predicated region fallthrough
CT: control target
= control target key end

     0   :  { %s1151_s27 = smov 0   ;;  %s1302_s0 = inlined_call_operand.vmem [shape: f32[2,4,32], index: 0, kind: input, shape index: {}]   ;;  %s1303_s1 = inlined_call_operand.vmem [shape: bf16[4,32,32], index: 1, kind: input, shape index: {}]   ;;  %s1304_s2 = inlined_call_operand.vmem [shape: f32[4,1,32], index: 2, kind: input, shape index: {}]   ;;  %s1305_s3 = inlined_call_operand.vmem [shape: bf16[4,32,32], index: 3, kind: input, shape index: {}]   ;;  %s1306_s4 = inlined_call_operand.vmem [shape: f32[4,1,32], index: 4, kind: input, shape index: {}]   ;;  %s1307_s5 = inlined_call_operand.vmem [shape: bf16[4,32,4], index: 5, kind: input, shape index: {}]   ;;  %s1308_s6 = inlined_call_operand.vmem [shape: f32[4,1,4], index: 6, kind: input, shape index: {}]   ;;  %s1309_s7 = inlined_call_operand.vmem [shape: f32[2,4,256], index: 7, kind: input, shape index: {}]   ;;  %s1310_s8 = inlined_call_operand.vmem [shape: f32[2,4,256], index: 8, kind: output, shape index: {}]  }
   0x1 LB: > { %s897_s28 = sadd.s32 4294967295, %s1104_s27   ;;  %p901_p0 = scmp.ge.s32.totalorder %s1104_s27, 1  ;;  %s1104_s27 = sphi %s1151_s27, %s18_s27  }
   0x2   : > { %p271_p1 = scmp.lt.s32.totalorder %s1104_s27, 3 }
   0x4   : > { %p272_p2 = pnand %p901_p0, %p271_p1 }
   0x5   : > { %p309_p3 = scmp.lt.s32.totalorder (!%p272_p2), %s897_s28, 1 }
   0x6   : > { %275 = sbr.rel (%p272_p2) target bundleno = 848 (0x350), region = 52 }
   0xb   : > { %v1067_v0 = vld [vmem:[%s1303_s1 + $0x8] sm:$0xff]  ;;  %v1073_v1 = vld [vmem:[%s1303_s1 + $0x18] sm:$0xff]  ;;  %v1066_v2 = vld [vmem:[%s1303_s1] sm:$0xff]  ;;  %s1312_s28 = smov (!%p309_p3, %s897_s28), 1  ;;  %vm343_vm0 = vcmask 261120   ;;  %vm771_vm1 = vcmask 1040384  }
   0xc   : > { %353 = vmatpush.bf16.msra.mxu0 %v1067_v0  ;;  %460 = vmatpush.bf16.msra.mxu3 %v1073_v1  ;;  %v1072_v3 = vld [vmem:[%s1303_s1 + $0x10] sm:$0xff]  ;;  %v1075_v4 = vld [vmem:[%s1305_s3 + $0x18] sm:$0xff]  ;;  %s902_s17 = sshll.u32 %s1312_s28, 2  ;;  %s1064_s18 = sshll.u32 %s1312_s28, 3  ;;  %v1069_v9 = vld [vmem:[%s1305_s3 + $0x8] sm:$0xff]  ;;  %vm773_vm2 = vcmask 1041408  }
   0xd   : > { %s312_s21 = scalar_lea.vmem %s1302_s0, %s902_s17  ;;  %s317_s24 = scalar_lea.vmem %s1309_s7, %s1064_s18  ;;  %388 = vmatpush.bf16.msra.mxu1 %v1069_v9  ;;  %v1068_v10 = vld [vmem:[%s1305_s3] sm:$0xff]  ;;  %v1074_v11 = vld [vmem:[%s1305_s3 + $0x10] sm:$0xff]  ;;  %v1077_v12 = vld [vmem:[%s1307_s5 + $0x18] sm:$0xff]  ;;  %vm775_vm3 = vcmask 1042432   ;;  %vm787_vm4 = vcmask 31744   ;;  %vm826_vm5 = vcmask 1043456  }
   0xe   : > { %v324_v5 = vld [vmem:[%s312_s21] sm:$0xf]  ;;  %v1071_v25 = vld [vmem:[%s1307_s5 + $0x8] sm:$0xff]  ;;  %v1076_v27 = vld [vmem:[%s1307_s5 + $0x10] sm:$0xff]  ;;  %s322_s12 = scalar_lea.vmem %s1310_s8, %s1064_s18 }
   0xf   : > { %v777_v6 = vld [vmem:[%s317_s24] sm:$0xff]  ;;  %v329_v7 = vpack.c.bf16 %v324_v5, %v324_v5  ;;  %423 = vmatpush.bf16.msra.mxu2 %v1071_v25  ;;  %v1079_v28 = vld [vmem:[%s1303_s1 + $0x28] sm:$0xff]  ;;  %v1085_v29 = vld [vmem:[%s1303_s1 + $0x38] sm:$0xff] }
  0x10   : > { %354 = vmatpush.bf16.msra.mxu0 %v1066_v2  ;;  %461 = vmatpush.bf16.msra.mxu3 %v1072_v3  ;;  %780 = vst [vmem:[#allocation1] ss:$2 sm:$0xff] %v777_v6  ;;  %v330_v13 = vld [vmem:[%s1304_s2] sm:$0x1]  ;;  %v938_v18 = vld [vmem:[%s1304_s2 + $0x1] sm:$0x1] }
  0x11   : > { %v437_v8 = vshrl.u32 %v329_v7, 16  ;;  %389 = vmatpush.bf16.msra.mxu1 %v1068_v10  ;;  %v1070_v26 = vld [vmem:[%s1307_s5] sm:$0xff]  ;;  %v1084_v31 = vld [vmem:[%s1303_s1 + $0x30] sm:$0xff]  ;;  %v549_v44 = vrot.slane %v329_v7, 1  ;;  %v1087_v46 = vld [vmem:[%s1305_s3 + $0x38] sm:$0xff] }
  0x12   : > { %v1078_v30 = vld [vmem:[%s1303_s1 + $0x20] sm:$0xff]  ;;  %v1081_v47 = vld [vmem:[%s1305_s3 + $0x28] sm:$0xff]  ;;  %v1086_v49 = vld [vmem:[%s1305_s3 + $0x30] sm:$0xff] }
  0x13   : > { %915 = vmatmul.msk.bf16.vlgmr.msra.gmra.mxu0 %vm343_vm0, %v329_v7  ;;  %947 = vmatmul.msk.bf16.vlgmr.msra.gmra.mxu3 %vm343_vm0, %v437_v8  ;;  %v366_v32 = vld [vmem:[%s1306_s4] sm:$0x1]  ;;  %v952_v37 = vld [vmem:[%s1306_s4 + $0x1] sm:$0x1]  ;;  %v659_v45 = vrot.slane %v437_v8, 1  ;;  %v1089_v50 = vld [vmem:[%s1307_s5 + $0x38] sm:$0xff] }
  0x14   : > { %497 = vmatpush.bf16.msrb.mxu0 %v1075_v4  ;;  %424 = vmatpush.bf16.msra.mxu2 %v1070_v26  ;;  %v1080_v48 = vld [vmem:[%s1305_s3 + $0x20] sm:$0xff]  ;;  %v1083_v51 = vld [vmem:[%s1307_s5 + $0x28] sm:$0xff] }
  0x15   : > { %534 = vmatpush.bf16.msrb.mxu1 %v1077_v12  ;;  %608 = vmatpush.bf16.msrb.mxu3 %v1081_v47  ;;  %v401_v52 = vld [vmem:[%s1308_s6] sm:$0x1]  ;;  %v966_v54 = vld [vmem:[%s1308_s6 + $0x1] sm:$0x1]  ;;  %v980_v62 = vld [vmem:[%s1304_s2 + $0x2] sm:$0x1] }
  0x16   : > { %v1022_v0 = vld [vmem:[%s1304_s2 + $0x3] sm:$0x1] }
  0x17   : > { %v1082_v10 = vld [vmem:[%s1307_s5 + $0x20] sm:$0xff] }
  0x18   : > { %498 = vmatpush.bf16.msrb.mxu0 %v1074_v11  ;;  %571 = vmatpush.bf16.msrb.mxu2 %v1079_v28  ;;  %v1088_v11 = vld [vmem:[%s1307_s5 + $0x30] sm:$0xff]  ;;  %v781_v12 = vld.sshfl [vmem:[#allocation1] sm:$0xff pattern:$0x75316420] }
  0x19   : > { %535 = vmatpush.bf16.msrb.mxu1 %v1076_v27  ;;  %609 = vmatpush.bf16.msrb.mxu3 %v1080_v48 }
  0x1c   : > { %572 = vmatpush.bf16.msrb.mxu2 %v1078_v30  ;;  %645 = vmatpush.bf16.msra.mxu0 %v1083_v51 }
  0x1d   : > { %755 = vmatpush.bf16.msra.mxu3 %v1089_v50 }
  0x20   : > { %646 = vmatpush.bf16.msra.mxu0 %v1082_v10 }
  0x21   : > { %756 = vmatpush.bf16.msra.mxu3 %v1088_v11 }
  0x90   : > { %v356_v14 = vpop.f32.mrf.mxu0 }
  0x91   : > { %v357_v15 = vadd.f32 %v356_v14, %v330_v13  ;;  %v785_v13 = vpack.c.bf16 %v781_v12, %v781_v12  ;;  %v782_v14 = vld.sshfl [vmem:[#allocation1 + $0x8] sm:$0xff pattern:$0x75316420] }
  0x93   : > { %v360_v16 = vmax.f32 %v357_v15, 0.0  ;;  %v786_v15 = vpack.c.bf16 %v782_v14, %v782_v14 }
  0x95   : > { %v365_v17 = vpack.c.bf16 %v360_v16, %v360_v16  ;;  %v792_v16 = vsel %vm773_vm2, %v785_v13, 0 }
  0x96   : > { %v463_v19 = vpop.f32.mrf.mxu3 }
  0x97   : > { %924 = vmatmul.msk.bf16.vlgmr.msra.gmra.mxu1 %vm343_vm0, %v365_v17  ;;  %v464_v21 = vadd.f32 %v938_v18, %v463_v19  ;;  %v795_v17 = vsel %vm773_vm2, %v786_v15, 0  ;;  %v994_v18 = vld [vmem:[%s1306_s4 + $0x2] sm:$0x1] }
  0x98   : > { %v358_v20 = vpop.f32.mrf.mxu0  ;;  %681 = vmatpush.bf16.msra.mxu1 %v1085_v29 }
  0x99   : > { %v467_v22 = vmax.f32 %v464_v21, 0.0  ;;  %v1036_v20 = vld [vmem:[%s1306_s4 + $0x3] sm:$0x1] }
  0x9b   : > { %v473_v23 = vpack.c.bf16 %v467_v22, %v467_v22 }
  0x9c   : > { %682 = vmatpush.bf16.msra.mxu1 %v1084_v31  ;;  %v1008_v31 = vld [vmem:[%s1308_s6 + $0x2] sm:$0x1] }
  0x9d   : > { %961 = vmatmul.msk.bf16.vlgmr.msrb.gmra.mxu0 %vm343_vm0, %v473_v23 }
  0x9e   : > { %v465_v24 = vpop.f32.mrf.mxu3  ;;  %804 = vmatpush.bf16.msrb.mxu0 %v792_v16 }
 0x114   : > { %v391_v33 = vpop.f32.mrf.mxu1 }
 0x115   : > { %v392_v34 = vadd.f32 %v391_v33, %v366_v32  ;;  %v1050_v33 = vld [vmem:[%s1308_s6 + $0x3] sm:$0x1] }
 0x117   : > { %v395_v35 = vmax.f32 %v392_v34, 0.0 }
 0x119   : > { %v400_v36 = vpack.c.bf16 %v395_v35, %v395_v35 }
 0x11a   : > { %v500_v38 = vpop.f32.mrf.mxu0 }
 0x11b   : > { %933 = vmatmul.msk.bf16.vlgmr.msra.gmra.mxu2 %vm343_vm0, %v400_v36  ;;  %v501_v40 = vadd.f32 %v952_v37, %v500_v38 }
 0x11c   : > { %v393_v39 = vpop.f32.mrf.mxu1  ;;  %718 = vmatpush.bf16.msra.mxu2 %v1087_v46 }
 0x11d   : > { %v504_v41 = vmax.f32 %v501_v40, 0.0 }
 0x11f   : > { %v510_v42 = vpack.c.bf16 %v504_v41, %v504_v41 }
 0x120   : > { %719 = vmatpush.bf16.msra.mxu2 %v1086_v49 }
 0x121   : > { %975 = vmatmul.msk.bf16.vlgmr.msrb.gmra.mxu1 %vm343_vm0, %v510_v42 }
 0x122   : > { %v502_v43 = vpop.f32.mrf.mxu0  ;;  %817 = vmatpush.bf16.msrb.mxu1 %v795_v17 }
 0x12b   : > { %989 = vmatmul.msk.bf16.vlgmr.msrb.gmra.mxu2 %vm343_vm0, %v549_v44 }
 0x131   : > { %1031 = vmatmul.msk.bf16.vlgmr.msra.gmra.mxu1 %vm343_vm0, %v659_v45 }
 0x19e   : > { %v426_v53 = vpop.f32.mrf.mxu2  ;;  %v537_v55 = vpop.f32.mrf.mxu1 }
 0x19f   : > { %v427_v56 = vadd.f32 %v426_v53, %v401_v52  ;;  %v538_v57 = vadd.f32 %v966_v54, %v537_v55 }
 0x1a1   : > { %v763_v58 = vrot.slane %v538_v57, 7 }
 0x1a3   : > { %v772_v59 = vsel %vm771_vm1, %v427_v56, %v763_v58 }
 0x1a6   : > { %v428_v60 = vpop.f32.mrf.mxu2  ;;  %v539_v61 = vpop.f32.mrf.mxu1 }
 0x1ae   : > { %v574_v63 = vpop.f32.mrf.mxu2  ;;  %v684_v2 = vpop.f32.mrf.mxu1 }
 0x1af   : > { %v575_v1 = vadd.f32 %v980_v62, %v574_v63  ;;  %v685_v4 = vadd.f32 %v1022_v0, %v684_v2 }
 0x1b1   : > { %v578_v3 = vmax.f32 %v575_v1, 0.0  ;;  %v688_v6 = vmax.f32 %v685_v4, 0.0 }
 0x1b3   : > { %v584_v5 = vpack.c.bf16 %v578_v3, %v578_v3  ;;  %v694_v7 = vpack.c.bf16 %v688_v6, %v688_v6 }
 0x1b5   : > { %1003 = vmatmul.msk.bf16.vlgmr.msrb.gmra.mxu3 %vm343_vm0, %v584_v5  ;;  %1045 = vmatmul.msk.bf16.vlgmr.msra.gmra.mxu2 %vm343_vm0, %v694_v7 }
 0x1b6   : > { %v576_v8 = vpop.f32.mrf.mxu2  ;;  %v686_v9 = vpop.f32.mrf.mxu1 }
 0x238   : > { %v611_v19 = vpop.f32.mrf.mxu3  ;;  %v721_v22 = vpop.f32.mrf.mxu2 }
 0x239   : > { %v612_v21 = vadd.f32 %v994_v18, %v611_v19  ;;  %v722_v24 = vadd.f32 %v1036_v20, %v721_v22 }
 0x23b   : > { %v615_v23 = vmax.f32 %v612_v21, 0.0  ;;  %v725_v26 = vmax.f32 %v722_v24, 0.0 }
 0x23d   : > { %v621_v25 = vpack.c.bf16 %v615_v23, %v615_v23  ;;  %v731_v27 = vpack.c.bf16 %v725_v26, %v725_v26 }
 0x23f   : > { %1017 = vmatmul.msk.bf16.vlgmr.msra.gmra.mxu0 %vm343_vm0, %v621_v25  ;;  %1059 = vmatmul.msk.bf16.vlgmr.msra.gmra.mxu3 %vm343_vm0, %v731_v27 }
 0x240   : > { %v613_v28 = vpop.f32.mrf.mxu3  ;;  %v723_v29 = vpop.f32.mrf.mxu2 }
 0x2bc   : > { %v648_v30 = vpop.f32.mrf.mxu0 }
 0x2bd   : > { %v649_v32 = vadd.f32 %v1008_v31, %v648_v30 }
 0x2bf   : > { %v766_v34 = vrot.slane %v649_v32, 6 }
 0x2c1   : > { %v774_v39 = vsel %vm773_vm2, %v772_v59, %v766_v34 }
 0x2c2   : > { %v758_v35 = vpop.f32.mrf.mxu3 }
 0x2c3   : > { %v759_v37 = vadd.f32 %v1050_v33, %v758_v35 }
 0x2c4   : > { %v650_v36 = vpop.f32.mrf.mxu0 }
 0x2c5   : > { %v769_v38 = vrot.slane %v759_v37, 5 }
 0x2c7   : > { %v776_v40 = vsel %vm775_vm3, %v774_v39, %v769_v38 }
 0x2c8   : > { %v778_v41 = vpack.c.bf16 %v776_v40, %v776_v40 }
 0x2ca   : > { %v760_v42 = vpop.f32.mrf.mxu3  ;;  %1060 = vmatmul.msk.bf16.vlgmr.msrb.gmra.mxu0 %vm787_vm4, %v778_v41  ;;  %1061 = vmatmul.msk.bf16.vlgmr.msrb.gmra.mxu1 %vm787_vm4, %v778_v41 }
 0x347   : > { %v806_v43 = vpop.f32.mrf.mxu0  ;;  %v819_v44 = vpop.f32.mrf.mxu1 }
 0x348   : > { %v825_v45 = vrot.slane %v819_v44, 4 }
 0x34a   : > { %v827_v46 = vsel %vm826_vm5, %v806_v43, %v825_v45 }
 0x34b   : > { %829 = vst [vmem:[%s322_s12] sm:$0xff] %v827_v46 }
 0x34f   : > { %v808_v47 = vpop.f32.mrf.mxu0  ;;  %v821_v48 = vpop.f32.mrf.mxu1 }
 0x350 PF: > { %s18_s27 = sadd.s32 1, %s1104_s27  }
 0x351   : > { %p15_p4 = scmp.ge.s32.totalorder %s18_s27, 4  }
 0x353   :  { %17 = sbr.rel (!%p15_p4) target bundleno = 1 (0x1), region = 103 }

</bundles_post_ra>
